<compile_context>
chip_gen: v6e
topology: v6e:2x2x1
jax: 0.10.0
libtpu: 0.0.40
codegen_flags: <defaults>
</compile_context>

<pallas_src>
import functools

import numpy as np

import jax
import jax.numpy as jnp
from jax.experimental import pallas as pl
from jax.experimental.pallas import tpu as pltpu


# ----------------------------------------------------------------------------
# Hardware-gated budgets
# ----------------------------------------------------------------------------
def _detect_vmem_bytes():
    try:
        info = pltpu.get_tpu_info()
        v = getattr(info, "vmem_capacity_bytes", None)
        if v:
            return int(v)
    except Exception:
        pass
    return 64 * 1024 * 1024


_VMEM_CAP = _detect_vmem_bytes()
_BIG_VMEM = _VMEM_CAP >= 100 * 1024 * 1024          # v5e/v6e: 128 MiB, v7x: 64 MiB
_VMEM_LIMIT = (64 if _BIG_VMEM else 32) * 1024 * 1024
_TILE_M_CAP = 1024 if _BIG_VMEM else 512             # lane-tile cap for the GEMM fallback
_TILE_K = 512                                        # K reduction tile (v7x VMEM-friendly)
_SINGLE_M = 512                                      # single-block (no grid) thresholds
_SINGLE_K = 2048
_FUSED_MAX_M = 4096                                  # fused-block path VMEM guard


def _round_up(v: int, m: int) -> int:
    return ((v + m - 1) // m) * m


# ----------------------------------------------------------------------------
# GEMM conv kernels (used by stem / stride-2 convs and as a large-M fallback)
# ----------------------------------------------------------------------------
def _make_gemm_simple(relu):
    def kernel(w_ref, a_ref, b_ref, o_ref):
        acc = jnp.dot(w_ref[...], a_ref[...],
                      preferred_element_type=jnp.float32) + b_ref[...]
        if relu:
            acc = jnp.maximum(acc, 0.0)
        o_ref[...] = acc.astype(o_ref.dtype)
    return kernel


def _make_gemm_tiled(relu):
    def kernel(w_ref, a_ref, b_ref, o_ref, acc_ref):
        @pl.when(pl.program_id(1) == 0)
        def _():
            acc_ref[...] = jnp.zeros_like(acc_ref)

        acc_ref[...] += jnp.dot(w_ref[...], a_ref[...],
                                preferred_element_type=jnp.float32)

        @pl.when(pl.program_id(1) == pl.num_programs(1) - 1)
        def _():
            r = acc_ref[...] + b_ref[...]
            if relu:
                r = jnp.maximum(r, 0.0)
            o_ref[...] = r.astype(o_ref.dtype)
    return kernel


def conv_gemm(w, a, bias, *, relu):
    """out = act(W @ A + bias), lane-dense on M.  W:(Cout,K) bf16, A:(K,M) bf16,
    bias:(Cout,1) f32 -> (Cout,M) bf16."""
    cout, kdim = w.shape
    k2, m = a.shape
    assert kdim == k2

    # Single-block path: full-extent blocks, no padding, no grid (small layers).
    if m <= _SINGLE_M and kdim <= _SINGLE_K:
        return pl.pallas_call(
            _make_gemm_simple(relu),
            out_shape=jax.ShapeDtypeStruct((cout, m), jnp.bfloat16),
            compiler_params=pltpu.CompilerParams(vmem_limit_bytes=_VMEM_LIMIT),
        )(w, a, bias)

    # Tiled path: keep tm at the cap (pad M up to a multiple of tm instead of
    # collapsing the tile), tile K as an "arbitrary" reduction axis, and prefer
    # >=2 grid steps along M for v7x megacore.
    mp128 = _round_up(m, 128)
    tm = min(_TILE_M_CAP, mp128)
    if mp128 // tm < 2 and mp128 >= 256:
        tm = max(128, _round_up(mp128 // 2, 128))
    mp = _round_up(m, tm)
    tk = min(_TILE_K, _round_up(kdim, 128))
    kp = _round_up(kdim, tk)

    wp = jnp.pad(w, ((0, 0), (0, kp - kdim))) if kp != kdim else w
    ap = a
    if kp != kdim or mp != m:
        ap = jnp.pad(a, ((0, kp - kdim), (0, mp - m)))

    out = pl.pallas_call(
        _make_gemm_tiled(relu),
        out_shape=jax.ShapeDtypeStruct((cout, mp), jnp.bfloat16),
        grid=(mp // tm, kp // tk),
        in_specs=[
            pl.BlockSpec((cout, tk), lambda i, k: (0, k)),
            pl.BlockSpec((tk, tm), lambda i, k: (k, i)),
            pl.BlockSpec((cout, 1), lambda i, k: (0, 0)),
        ],
        out_specs=pl.BlockSpec((cout, tm), lambda i, k: (0, i)),
        scratch_shapes=[pltpu.VMEM((cout, tm), jnp.float32)],
        compiler_params=pltpu.CompilerParams(
            dimension_semantics=("parallel", "arbitrary"),
            vmem_limit_bytes=_VMEM_LIMIT),
    )(wp, ap, bias)
    return out[:, :m] if mp != m else out


def _im2col_t(x_cnhw, kh, kw, stride, pad):
    """Transposed im2col (XLA, bf16): returns (K, M)=(kh*kw*C, N*Ho*Wo)."""
    c, n, h, w = x_cnhw.shape
    xp = jnp.pad(x_cnhw, ((0, 0), (0, 0), (pad, pad), (pad, pad)))
    ho = (h + 2 * pad - kh) // stride + 1
    wo = (w + 2 * pad - kw) // stride + 1
    cols = []
    for i in range(kh):
        for j in range(kw):
            cols.append(xp[:, :, i:i + stride * (ho - 1) + 1:stride,
                           j:j + stride * (wo - 1) + 1:stride])
    patches = jnp.stack(cols, axis=0)                 # (kh*kw, c, n, ho, wo)
    return patches.reshape(kh * kw * c, n * ho * wo), (n, ho, wo)


def conv_bn_act(x_cnhw, p, kh, kw, stride, pad, relu=True):
    """Standalone conv + folded BN + optional ReLU (stem / stride-2 convs)."""
    patches, (n, ho, wo) = _im2col_t(x_cnhw, kh, kw, stride, pad)
    cout = p["w"].shape[0]
    y = conv_gemm(p["w"], patches, p["b"], relu=relu)
    return y.reshape(cout, n, ho, wo)


# ----------------------------------------------------------------------------
# Fused BasicBlock kernels with implicit (in-kernel) im2col for stride-1 3x3s
# ----------------------------------------------------------------------------
@functools.lru_cache(maxsize=None)
def _shift_ops_np(n, h, w, mq, use_roll):
    """Per-tap border masks (roll path, (9, mq)) or shift-mask matrices
    (S path, (9, m, m)).  Tap t = (di+1)*3 + (dj+1), flat shift d = di*w + dj."""
    m = n * h * w
    taps = []
    if use_roll:
        sh = np.zeros((9, mq), np.float32)
    else:
        sh = np.zeros((9, m, m), np.float32)
    hh = np.arange(h)[:, None]
    ww = np.arange(w)[None, :]
    t = 0
    for di in (-1, 0, 1):
        for dj in (-1, 0, 1):
            ok = ((hh + di >= 0) & (hh + di < h) & (ww + dj >= 0) & (ww + dj < w))
            okf = np.broadcast_to(ok[None], (n, h, w)).reshape(m).astype(np.float32)
            d = di * w + dj
            if okf.any():
                taps.append((t, d))
                if use_roll:
                    sh[t, :m] = okf
                else:
                    dst = np.arange(m)
                    src = dst + d
                    valid = okf > 0
                    sh[t, src[valid], dst[valid]] = 1.0
            t += 1
    return tuple(taps), sh


def _make_block_kernel(*, taps, use_roll, mode):
    taps = tuple((int(t), int(d)) for t, d in taps)

    def conv3x3(x_b16, w_val, sh_val):
        # x_b16: (Cin, Mq) bf16;  w_val: (9, Cout, Cin) bf16
        # sh_val: (9, Mq) f32 masks (roll path) or (9, M, M) bf16 S (small-M path)
        cout = w_val.shape[1]
        mq = x_b16.shape[1]
        acc = jnp.zeros((cout, mq), jnp.float32)
        if use_roll:
            xf = x_b16.astype(jnp.float32)
            for t, d in taps:
                xs = xf if d == 0 else pltpu.roll(xf, (-d) % mq, axis=1)
                xs = (xs * sh_val[t:t + 1, :]).astype(jnp.bfloat16)
                acc = acc + jnp.dot(w_val[t], xs,
                                    preferred_element_type=jnp.float32)
        else:
            for t, d in taps:
                xs = jnp.dot(x_b16, sh_val[t],
                             preferred_element_type=jnp.float32).astype(jnp.bfloat16)
                acc = acc + jnp.dot(w_val[t], xs,
                                    preferred_element_type=jnp.float32)
        return acc

    if mode == "block":
        # Full stride-1 BasicBlock: relu(conv2(relu(conv1(x))) + x)
        def kernel(x_ref, w1_ref, b1_ref, w2_ref, b2_ref, sh_ref, o_ref):
            x = x_ref[...]
            sh_val = sh_ref[...]
            y = conv3x3(x, w1_ref[...], sh_val) + b1_ref[...]
            y = jnp.maximum(y, 0.0).astype(jnp.bfloat16)
            z = conv3x3(y, w2_ref[...], sh_val) + b2_ref[...] + x.astype(jnp.float32)
            o_ref[...] = jnp.maximum(z, 0.0).astype(o_ref.dtype)
    elif mode == "conv2_down":
        # Second half of a downsampling block: relu(conv2(y) + Wd @ x_sub + b)
        def kernel(y_ref, w2_ref, b_ref, wd_ref, xd_ref, sh_ref, o_ref):
            y = y_ref[...]
            z = conv3x3(y, w2_ref[...], sh_ref[...]) + b_ref[...]
            z = z + jnp.dot(wd_ref[...], xd_ref[...],
                            preferred_element_type=jnp.float32)
            o_ref[...] = jnp.maximum(z, 0.0).astype(o_ref.dtype)
    else:
        raise ValueError(mode)
    return kernel


def _shift_inputs(n, h, w):
    m = n * h * w
    use_roll = m >= 128
    mq = _round_up(m, 128) if use_roll else m
    taps, sh_np = _shift_ops_np(n, h, w, mq, use_roll)
    sh = jnp.asarray(sh_np, jnp.float32 if use_roll else jnp.bfloat16)
    return m, mq, use_roll, taps, sh


def fused_block(x_cnhw, blk):
    """One pallas_call for a full stride-1 BasicBlock (identity residual)."""
    c, n, h, w = x_cnhw.shape
    cout = blk["conv1"]["w"].shape[1]
    assert c == cout
    m, mq, use_roll, taps, sh = _shift_inputs(n, h, w)
    xf = x_cnhw.reshape(c, m)
    if mq != m:
        xf = jnp.pad(xf, ((0, 0), (0, mq - m)))
    out = pl.pallas_call(
        _make_block_kernel(taps=taps, use_roll=use_roll, mode="block"),
        out_shape=jax.ShapeDtypeStruct((cout, mq), jnp.bfloat16),
        compiler_params=pltpu.CompilerParams(vmem_limit_bytes=_VMEM_LIMIT),
    )(xf, blk["conv1"]["w"], blk["conv1"]["b"],
      blk["conv2"]["w"], blk["conv2"]["b"], sh)
    if mq != m:
        out = out[:, :m]
    return out.reshape(cout, n, h, w)


def fused_conv2_down(y_cnhw, x_cnhw, blk, stride):
    """One pallas_call for conv2 + 1x1 downsample + bias + ReLU."""
    cout, n, ho, wo = y_cnhw.shape
    cin = x_cnhw.shape[0]
    m, mq, use_roll, taps, sh = _shift_inputs(n, ho, wo)
    yf = y_cnhw.reshape(cout, m)
    xd = x_cnhw[:, :, ::stride, ::stride].reshape(cin, m)
    if mq != m:
        yf = jnp.pad(yf, ((0, 0), (0, mq - m)))
        xd = jnp.pad(xd, ((0, 0), (0, mq - m)))
    bias = blk["conv2"]["b"] + blk["down"]["b"]
    out = pl.pallas_call(
        _make_block_kernel(taps=taps, use_roll=use_roll, mode="conv2_down"),
        out_shape=jax.ShapeDtypeStruct((cout, mq), jnp.bfloat16),
        compiler_params=pltpu.CompilerParams(vmem_limit_bytes=_VMEM_LIMIT),
    )(yf, blk["conv2"]["w"], bias, blk["down"]["w"], xd, sh)
    if mq != m:
        out = out[:, :m]
    return out.reshape(cout, n, ho, wo)


def _taps_to_gemm(w_taps):
    t, cout, cin = w_taps.shape
    return jnp.transpose(w_taps, (1, 0, 2)).reshape(cout, t * cin)


def _basic_block_fallback(x, blk, stride):
    # TODO(synk): halo-aware tiled implicit-im2col for very large M; this
    # fallback materializes bf16 im2col patches with XLA and does the residual
    # add / final ReLU as one fused XLA elementwise pass.
    cin = x.shape[0]
    w1 = blk["conv1"]["w"]
    if w1.ndim == 3:
        w1 = _taps_to_gemm(w1)
    patches, (n, ho, wo) = _im2col_t(x, 3, 3, stride, 1)
    cout = w1.shape[0]
    y = conv_gemm(w1, patches, blk["conv1"]["b"], relu=True).reshape(cout, n, ho, wo)
    patches2, _ = _im2col_t(y, 3, 3, 1, 1)
    z = conv_gemm(_taps_to_gemm(blk["conv2"]["w"]), patches2,
                  blk["conv2"]["b"], relu=False)
    m = n * ho * wo
    if "down" in blk:
        xd = x[:, :, ::stride, ::stride].reshape(cin, m)
        r = conv_gemm(blk["down"]["w"], xd, blk["down"]["b"], relu=False)
    else:
        r = x.reshape(cout, m)
    z = jnp.maximum(z.astype(jnp.float32) + r.astype(jnp.float32), 0.0)
    return z.astype(jnp.bfloat16).reshape(cout, n, ho, wo)


def basic_block(x, blk, stride):
    c, n, h, w = x.shape
    ho = (h + 2 - 3) // stride + 1
    wo = (w + 2 - 3) // stride + 1
    if n * ho * wo > _FUSED_MAX_M:
        return _basic_block_fallback(x, blk, stride)
    if stride == 1 and "down" not in blk:
        return fused_block(x, blk)
    y = conv_bn_act(x, blk["conv1"], 3, 3, stride, 1, relu=True)
    return fused_conv2_down(y, x, blk, stride)


# ----------------------------------------------------------------------------
# Maxpool 3x3/s2/p1: fused XLA shifted-slice max chain (reads x once).
# ----------------------------------------------------------------------------
def maxpool_3x3_s2(x):
    c, n, h, w = x.shape
    xp = jnp.pad(x, ((0, 0), (0, 0), (1, 1), (1, 1)), constant_values=-jnp.inf)
    ho = (h + 2 - 3) // 2 + 1
    wo = (w + 2 - 3) // 2 + 1
    out = None
    for i in range(3):
        for j in range(3):
            v = xp[:, :, i:i + 2 * (ho - 1) + 1:2, j:j + 2 * (wo - 1) + 1:2]
            out = v if out is None else jnp.maximum(out, v)
    return out


# ----------------------------------------------------------------------------
# Parameter construction (synthetic, deterministic; BN folded into weights)
# ----------------------------------------------------------------------------
def _fold_bn(key, cout):
    k1, k2, k3, k4 = jax.random.split(key, 4)
    gamma = 1.0 + 0.1 * jax.random.normal(k1, (cout,), jnp.float32)
    beta = 0.1 * jax.random.normal(k2, (cout,), jnp.float32)
    mean = 0.1 * jax.random.normal(k3, (cout,), jnp.float32)
    var = 1.0 + 0.1 * jnp.abs(jax.random.normal(k4, (cout,), jnp.float32))
    scale = gamma / jnp.sqrt(var + 1e-5)
    bias = beta - mean * scale
    return scale, bias


def _conv_bn_params(key, kh, kw, cin, cout, layout):
    kkey, bnkey = jax.random.split(key)
    fan_in = kh * kw * cin
    w4 = jax.random.normal(kkey, (kh, kw, cin, cout), jnp.float32) / np.sqrt(fan_in)
    scale, bias = _fold_bn(bnkey, cout)
    if layout == "gemm":
        wmat = (w4.reshape(fan_in, cout) * scale[None, :]).T       # (cout, K)
    else:  # "taps": (kh*kw, cout, cin)
        wmat = (jnp.transpose(w4, (0, 1, 3, 2)).reshape(kh * kw, cout, cin)
                * scale[None, :, None])
    return {"w": wmat.astype(jnp.bfloat16),
            "b": bias.reshape(cout, 1).astype(jnp.float32)}


def _stem_params(key, in_channel, cout):
    kkey, bnkey = jax.random.split(key)
    # PyTorch (cout, 3, 7, 7) layout so the in_channel != 3 averaging trick from
    # the original module's __init__ can be reproduced exactly.
    w_t = jax.random.normal(kkey, (cout, 3, 7, 7), jnp.float32) / np.sqrt(3 * 49)
    if in_channel != 3:
        conv1_filter = w_t / 2 + 0.5
        mean_t = jnp.mean(conv1_filter, axis=1, keepdims=True)
        w_t = jnp.repeat(mean_t, in_channel, axis=1) / 2 + 0.5
    cin = w_t.shape[1]
    scale, bias = _fold_bn(bnkey, cout)
    wmat = jnp.transpose(w_t, (0, 2, 3, 1)).reshape(cout, 7 * 7 * cin) * scale[:, None]
    return {"w": wmat.astype(jnp.bfloat16),
            "b": bias.reshape(cout, 1).astype(jnp.float32)}


def make_resnet_params(key, in_channel=3, widths=(8, 16, 32, 64), blocks=(2, 2, 2, 2)):
    keys = jax.random.split(key, 2)
    params = {"stem": _stem_params(keys[0], in_channel, widths[0]), "layers": []}
    lkey = keys[1]
    cin = widths[0]
    for li, (cout, nblk) in enumerate(zip(widths, blocks)):
        layer = []
        for bi in range(nblk):
            lkey, k1, k2, k3 = jax.random.split(lkey, 4)
            stride = 2 if (li > 0 and bi == 0) else 1
            need_down = (stride != 1) or (cin != cout)
            blk = {
                "conv1": _conv_bn_params(k1, 3, 3, cin, cout,
                                         layout="gemm" if need_down else "taps"),
                "conv2": _conv_bn_params(k2, 3, 3, cout, cout, layout="taps"),
            }
            if need_down:
                blk["down"] = _conv_bn_params(k3, 1, 1, cin, cout, layout="gemm")
            layer.append(blk)
            cin = cout
        params["layers"].append(layer)
    return params


# ----------------------------------------------------------------------------
# Forward pass (matches the PyTorch module's forward semantics)
# ----------------------------------------------------------------------------
def resnet_forward(x_nchw, params, out_keys):
    # NCHW -> (C, N, H, W), bf16 activations end-to-end.
    x = jnp.transpose(x_nchw, (1, 0, 2, 3)).astype(jnp.bfloat16)
    out = {}
    h = conv_bn_act(x, params["stem"], 7, 7, 2, 3, relu=True)   # out['0']
    out["0"] = h
    h = maxpool_3x3_s2(h)
    for li, layer in enumerate(params["layers"]):
        for bi, blk in enumerate(layer):
            stride = 2 if (li > 0 and bi == 0) else 1
            h = basic_block(h, blk, stride)
        out[str(li + 1)] = h
    return [jnp.transpose(out[k], (1, 0, 2, 3)).astype(jnp.float32)
            for k in out_keys]


# ----------------------------------------------------------------------------
# Demo
# ----------------------------------------------------------------------------
if __name__ == "__main__":
    key = jax.random.PRNGKey(0)
    kx, kp = jax.random.split(key)

    # Small synthetic config: batch=2, in_channel=3, spatial=32,
    # stage widths (8, 16, 32, 64), 2 BasicBlocks per stage (ResNet-18 topology).
    x = jax.random.normal(kx, (2, 3, 32, 32), jnp.float32)       # NCHW like PyTorch
    params = make_resnet_params(kp, in_channel=3, widths=(8, 16, 32, 64),
                                blocks=(2, 2, 2, 2))

    out_keys = ("0", "1", "2", "3", "4")
    fwd = jax.jit(resnet_forward, static_argnums=2)
    outs = fwd(x, params, out_keys)
    for o in outs:
        jax.block_until_ready(o)

    expected = [(2, 8, 16, 16), (2, 8, 8, 8), (2, 16, 4, 4),
                (2, 32, 2, 2), (2, 64, 1, 1)]
    assert [tuple(o.shape) for o in outs] == expected, \
        [tuple(o.shape) for o in outs]
    assert all(bool(jnp.all(jnp.isfinite(o))) for o in outs)

    print("KERNEL_OK")
</pallas_src>

<mosaic_0001>
module attributes {stable_mosaic.version = 11 : i64} {
  func.func @kernel(%arg0: memref<8x147xbf16, #tpu.memory_space<vmem>>, %arg1: memref<147x512xbf16, #tpu.memory_space<vmem>>, %arg2: memref<8x1xf32, #tpu.memory_space<vmem>>, %arg3: memref<8x512xbf16, #tpu.memory_space<vmem>>) attributes {dimension_semantics = [], scalar_prefetch = 0 : i64, scratch_operands = 0 : i64, tpu.core_type = #tpu.core_type<tc>} {
    %c0 = arith.constant 0 : index
    %c0_0 = arith.constant 0 : index
    %0 = vector.load %arg0[%c0, %c0_0] : memref<8x147xbf16, #tpu.memory_space<vmem>>, vector<8x147xbf16>
    %c0_1 = arith.constant 0 : index
    %c0_2 = arith.constant 0 : index
    %1 = vector.load %arg1[%c0_1, %c0_2] : memref<147x512xbf16, #tpu.memory_space<vmem>>, vector<147x512xbf16>
    %cst = arith.constant dense<0.000000e+00> : vector<8x512xf32>
    %2 = tpu.matmul %0, %1, %cst {dimension_numbers = #tpu.dot_dimension_numbers<[1], [0], [0], [1], [0, 0, 1, 1], [], []>} : vector<8x147xbf16>, vector<147x512xbf16>, vector<8x512xf32> -> vector<8x512xf32>
    %c0_3 = arith.constant 0 : index
    %c0_4 = arith.constant 0 : index
    %3 = vector.load %arg2[%c0_3, %c0_4] : memref<8x1xf32, #tpu.memory_space<vmem>>, vector<8x1xf32>
    %4 = vector.broadcast %3 : vector<8x1xf32> to vector<8x512xf32>
    %5 = arith.addf %2, %4 : vector<8x512xf32>
    %cst_5 = arith.constant 0.000000e+00 : f32
    %6 = vector.broadcast %cst_5 : f32 to vector<8x512xf32>
    %7 = arith.maximumf %5, %6 : vector<8x512xf32>
    %8 = arith.truncf %7 : vector<8x512xf32> to vector<8x512xbf16>
    %c0_6 = arith.constant 0 : index
    %c0_7 = arith.constant 0 : index
    %9 = vector.load %arg3[%c0_6, %c0_7] : memref<8x512xbf16, #tpu.memory_space<vmem>>, vector<8x512xbf16>
    tpu.vector_store %arg3[%c0_6, %c0_7], %8 {strides = array<i32>} : memref<8x512xbf16, #tpu.memory_space<vmem>>, vector<8x512xbf16>,
    return
  }
}

module attributes {stable_mosaic.version = 11 : i64} {
  func.func @kernel(%arg0: memref<8x128xbf16, #tpu.memory_space<vmem>>, %arg1: memref<9x8x8xbf16, #tpu.memory_space<vmem>>, %arg2: memref<8x1xf32, #tpu.memory_space<vmem>>, %arg3: memref<9x8x8xbf16, #tpu.memory_space<vmem>>, %arg4: memref<8x1xf32, #tpu.memory_space<vmem>>, %arg5: memref<9x128xf32, #tpu.memory_space<vmem>>, %arg6: memref<8x128xbf16, #tpu.memory_space<vmem>>) attributes {dimension_semantics = [], scalar_prefetch = 0 : i64, scratch_operands = 0 : i64, tpu.core_type = #tpu.core_type<tc>} {
    %c0 = arith.constant 0 : index
    %c0_0 = arith.constant 0 : index
    %0 = vector.load %arg0[%c0, %c0_0] : memref<8x128xbf16, #tpu.memory_space<vmem>>, vector<8x128xbf16>
    %c0_1 = arith.constant 0 : index
    %c0_2 = arith.constant 0 : index
    %1 = vector.load %arg5[%c0_1, %c0_2] : memref<9x128xf32, #tpu.memory_space<vmem>>, vector<9x128xf32>
    %c0_3 = arith.constant 0 : index
    %c0_4 = arith.constant 0 : index
    %c0_5 = arith.constant 0 : index
    %2 = vector.load %arg1[%c0_3, %c0_4, %c0_5] : memref<9x8x8xbf16, #tpu.memory_space<vmem>>, vector<9x8x8xbf16>
    %cst = arith.constant 0.000000e+00 : f32
    %3 = vector.broadcast %cst : f32 to vector<8x128xf32>
    %4 = arith.extf %0 : vector<8x128xbf16> to vector<8x128xf32>
    %c9_i32 = arith.constant 9 : i32
    %5 = tpu.dynamic_rotate %4 by %c9_i32 dim 1 : vector<8x128xf32>, i32 -> vector<8x128xf32>
    %6 = vector.extract_strided_slice %1 {offsets = [0, 0], sizes = [1, 128], strides = [1, 1]} : vector<9x128xf32> to vector<1x128xf32>
    %7 = vector.broadcast %6 : vector<1x128xf32> to vector<8x128xf32>
    %8 = arith.mulf %5, %7 : vector<8x128xf32>
    %9 = arith.truncf %8 : vector<8x128xf32> to vector<8x128xbf16>
    %10 = vector.extract_strided_slice %2 {offsets = [0, 0, 0], sizes = [1, 8, 8], strides = [1, 1, 1]} : vector<9x8x8xbf16> to vector<1x8x8xbf16>
    %11 = vector.shape_cast %10 : vector<1x8x8xbf16> to vector<8x8xbf16>
    %cst_6 = arith.constant dense<0.000000e+00> : vector<8x128xf32>
    %12 = tpu.matmul %11, %9, %cst_6 {dimension_numbers = #tpu.dot_dimension_numbers<[1], [0], [0], [1], [0, 0, 1, 1], [], []>} : vector<8x8xbf16>, vector<8x128xbf16>, vector<8x128xf32> -> vector<8x128xf32>
    %13 = arith.addf %3, %12 : vector<8x128xf32>
    %c8_i32 = arith.constant 8 : i32
    %14 = tpu.dynamic_rotate %4 by %c8_i32 dim 1 : vector<8x128xf32>, i32 -> vector<8x128xf32>
    %15 = vector.extract_strided_slice %1 {offsets = [1, 0], sizes = [1, 128], strides = [1, 1]} : vector<9x128xf32> to vector<1x128xf32>
    %16 = vector.broadcast %15 : vector<1x128xf32> to vector<8x128xf32>
    %17 = arith.mulf %14, %16 : vector<8x128xf32>
    %18 = arith.truncf %17 : vector<8x128xf32> to vector<8x128xbf16>
    %19 = vector.extract_strided_slice %2 {offsets = [1, 0, 0], sizes = [1, 8, 8], strides = [1, 1, 1]} : vector<9x8x8xbf16> to vector<1x8x8xbf16>
    %20 = vector.shape_cast %19 : vector<1x8x8xbf16> to vector<8x8xbf16>
    %cst_7 = arith.constant dense<0.000000e+00> : vector<8x128xf32>
    %21 = tpu.matmul %20, %18, %cst_7 {dimension_numbers = #tpu.dot_dimension_numbers<[1], [0], [0], [1], [0, 0, 1, 1], [], []>} : vector<8x8xbf16>, vector<8x128xbf16>, vector<8x128xf32> -> vector<8x128xf32>
    %22 = arith.addf %13, %21 : vector<8x128xf32>
    %c7_i32 = arith.constant 7 : i32
    %23 = tpu.dynamic_rotate %4 by %c7_i32 dim 1 : vector<8x128xf32>, i32 -> vector<8x128xf32>
    %24 = vector.extract_strided_slice %1 {offsets = [2, 0], sizes = [1, 128], strides = [1, 1]} : vector<9x128xf32> to vector<1x128xf32>
    %25 = vector.broadcast %24 : vector<1x128xf32> to vector<8x128xf32>
    %26 = arith.mulf %23, %25 : vector<8x128xf32>
    %27 = arith.truncf %26 : vector<8x128xf32> to vector<8x128xbf16>
    %28 = vector.extract_strided_slice %2 {offsets = [2, 0, 0], sizes = [1, 8, 8], strides = [1, 1, 1]} : vector<9x8x8xbf16> to vector<1x8x8xbf16>
    %29 = vector.shape_cast %28 : vector<1x8x8xbf16> to vector<8x8xbf16>
    %cst_8 = arith.constant dense<0.000000e+00> : vector<8x128xf32>
    %30 = tpu.matmul %29, %27, %cst_8 {dimension_numbers = #tpu.dot_dimension_numbers<[1], [0], [0], [1], [0, 0, 1, 1], [], []>} : vector<8x8xbf16>, vector<8x128xbf16>, vector<8x128xf32> -> vector<8x128xf32>
    %31 = arith.addf %22, %30 : vector<8x128xf32>
    %c1_i32 = arith.constant 1 : i32
    %32 = tpu.dynamic_rotate %4 by %c1_i32 dim 1 : vector<8x128xf32>, i32 -> vector<8x128xf32>
    %33 = vector.extract_strided_slice %1 {offsets = [3, 0], sizes = [1, 128], strides = [1, 1]} : vector<9x128xf32> to vector<1x128xf32>
    %34 = vector.broadcast %33 : vector<1x128xf32> to vector<8x128xf32>
    %35 = arith.mulf %32, %34 : vector<8x128xf32>
    %36 = arith.truncf %35 : vector<8x128xf32> to vector<8x128xbf16>
    %37 = vector.extract_strided_slice %2 {offsets = [3, 0, 0], sizes = [1, 8, 8], strides = [1, 1, 1]} : vector<9x8x8xbf16> to vector<1x8x8xbf16>
    %38 = vector.shape_cast %37 : vector<1x8x8xbf16> to vector<8x8xbf16>
    %cst_9 = arith.constant dense<0.000000e+00> : vector<8x128xf32>
    %39 = tpu.matmul %38, %36, %cst_9 {dimension_numbers = #tpu.dot_dimension_numbers<[1], [0], [0], [1], [0, 0, 1, 1], [], []>} : vector<8x8xbf16>, vector<8x128xbf16>, vector<8x128xf32> -> vector<8x128xf32>
    %40 = arith.addf %31, %39 : vector<8x128xf32>
    %41 = vector.extract_strided_slice %1 {offsets = [4, 0], sizes = [1, 128], strides = [1, 1]} : vector<9x128xf32> to vector<1x128xf32>
    %42 = vector.broadcast %41 : vector<1x128xf32> to vector<8x128xf32>
    %43 = arith.mulf %4, %42 : vector<8x128xf32>
    %44 = arith.truncf %43 : vector<8x128xf32> to vector<8x128xbf16>
    %45 = vector.extract_strided_slice %2 {offsets = [4, 0, 0], sizes = [1, 8, 8], strides = [1, 1, 1]} : vector<9x8x8xbf16> to vector<1x8x8xbf16>
    %46 = vector.shape_cast %45 : vector<1x8x8xbf16> to vector<8x8xbf16>
    %cst_10 = arith.constant dense<0.000000e+00> : vector<8x128xf32>
    %47 = tpu.matmul %46, %44, %cst_10 {dimension_numbers = #tpu.dot_dimension_numbers<[1], [0], [0], [1], [0, 0, 1, 1], [], []>} : vector<8x8xbf16>, vector<8x128xbf16>, vector<8x128xf32> -> vector<8x128xf32>
    %48 = arith.addf %40, %47 : vector<8x128xf32>
    %c127_i32 = arith.constant 127 : i32
    %49 = tpu.dynamic_rotate %4 by %c127_i32 dim 1 : vector<8x128xf32>, i32 -> vector<8x128xf32>
    %50 = vector.extract_strided_slice %1 {offsets = [5, 0], sizes = [1, 128], strides = [1, 1]} : vector<9x128xf32> to vector<1x128xf32>
    %51 = vector.broadcast %50 : vector<1x128xf32> to vector<8x128xf32>
    %52 = arith.mulf %49, %51 : vector<8x128xf32>
    %53 = arith.truncf %52 : vector<8x128xf32> to vector<8x128xbf16>
    %54 = vector.extract_strided_slice %2 {offsets = [5, 0, 0], sizes = [1, 8, 8], strides = [1, 1, 1]} : vector<9x8x8xbf16> to vector<1x8x8xbf16>
    %55 = vector.shape_cast %54 : vector<1x8x8xbf16> to vector<8x8xbf16>
    %cst_11 = arith.constant dense<0.000000e+00> : vector<8x128xf32>
    %56 = tpu.matmul %55, %53, %cst_11 {dimension_numbers = #tpu.dot_dimension_numbers<[1], [0], [0], [1], [0, 0, 1, 1], [], []>} : vector<8x8xbf16>, vector<8x128xbf16>, vector<8x128xf32> -> vector<8x128xf32>
    %57 = arith.addf %48, %56 : vector<8x128xf32>
    %c121_i32 = arith.constant 121 : i32
    %58 = tpu.dynamic_rotate %4 by %c121_i32 dim 1 : vector<8x128xf32>, i32 -> vector<8x128xf32>
    %59 = vector.extract_strided_slice %1 {offsets = [6, 0], sizes = [1, 128], strides = [1, 1]} : vector<9x128xf32> to vector<1x128xf32>
    %60 = vector.broadcast %59 : vector<1x128xf32> to vector<8x128xf32>
    %61 = arith.mulf %58, %60 : vector<8x128xf32>
    %62 = arith.truncf %61 : vector<8x128xf32> to vector<8x128xbf16>
    %63 = vector.extract_strided_slice %2 {offsets = [6, 0, 0], sizes = [1, 8, 8], strides = [1, 1, 1]} : vector<9x8x8xbf16> to vector<1x8x8xbf16>
    %64 = vector.shape_cast %63 : vector<1x8x8xbf16> to vector<8x8xbf16>
    %cst_12 = arith.constant dense<0.000000e+00> : vector<8x128xf32>
    %65 = tpu.matmul %64, %62, %cst_12 {dimension_numbers = #tpu.dot_dimension_numbers<[1], [0], [0], [1], [0, 0, 1, 1], [], []>} : vector<8x8xbf16>, vector<8x128xbf16>, vector<8x128xf32> -> vector<8x128xf32>
    %66 = arith.addf %57, %65 : vector<8x128xf32>
    %c120_i32 = arith.constant 120 : i32
    %67 = tpu.dynamic_rotate %4 by %c120_i32 dim 1 : vector<8x128xf32>, i32 -> vector<8x128xf32>
    %68 = vector.extract_strided_slice %1 {offsets = [7, 0], sizes = [1, 128], strides = [1, 1]} : vector<9x128xf32> to vector<1x128xf32>
    %69 = vector.broadcast %68 : vector<1x128xf32> to vector<8x128xf32>
    %70 = arith.mulf %67, %69 : vector<8x128xf32>
    %71 = arith.truncf %70 : vector<8x128xf32> to vector<8x128xbf16>
    %72 = vector.extract_strided_slice %2 {offsets = [7, 0, 0], sizes = [1, 8, 8], strides = [1, 1, 1]} : vector<9x8x8xbf16> to vector<1x8x8xbf16>
    %73 = vector.shape_cast %72 : vector<1x8x8xbf16> to vector<8x8xbf16>
    %cst_13 = arith.constant dense<0.000000e+00> : vector<8x128xf32>
    %74 = tpu.matmul %73, %71, %cst_13 {dimension_numbers = #tpu.dot_dimension_numbers<[1], [0], [0], [1], [0, 0, 1, 1], [], []>} : vector<8x8xbf16>, vector<8x128xbf16>, vector<8x128xf32> -> vector<8x128xf32>
    %75 = arith.addf %66, %74 : vector<8x128xf32>
    %c119_i32 = arith.constant 119 : i32
    %76 = tpu.dynamic_rotate %4 by %c119_i32 dim 1 : vector<8x128xf32>, i32 -> vector<8x128xf32>
    %77 = vector.extract_strided_slice %1 {offsets = [8, 0], sizes = [1, 128], strides = [1, 1]} : vector<9x128xf32> to vector<1x128xf32>
    %78 = vector.broadcast %77 : vector<1x128xf32> to vector<8x128xf32>
    %79 = arith.mulf %76, %78 : vector<8x128xf32>
    %80 = arith.truncf %79 : vector<8x128xf32> to vector<8x128xbf16>
    %81 = vector.extract_strided_slice %2 {offsets = [8, 0, 0], sizes = [1, 8, 8], strides = [1, 1, 1]} : vector<9x8x8xbf16> to vector<1x8x8xbf16>
    %82 = vector.shape_cast %81 : vector<1x8x8xbf16> to vector<8x8xbf16>
    %cst_14 = arith.constant dense<0.000000e+00> : vector<8x128xf32>
    %83 = tpu.matmul %82, %80, %cst_14 {dimension_numbers = #tpu.dot_dimension_numbers<[1], [0], [0], [1], [0, 0, 1, 1], [], []>} : vector<8x8xbf16>, vector<8x128xbf16>, vector<8x128xf32> -> vector<8x128xf32>
    %84 = arith.addf %75, %83 : vector<8x128xf32>
    %c0_15 = arith.constant 0 : index
    %c0_16 = arith.constant 0 : index
    %85 = vector.load %arg2[%c0_15, %c0_16] : memref<8x1xf32, #tpu.memory_space<vmem>>, vector<8x1xf32>
    %86 = vector.broadcast %85 : vector<8x1xf32> to vector<8x128xf32>
    %87 = arith.addf %84, %86 : vector<8x128xf32>
    %cst_17 = arith.constant 0.000000e+00 : f32
    %88 = vector.broadcast %cst_17 : f32 to vector<8x128xf32>
    %89 = arith.maximumf %87, %88 : vector<8x128xf32>
    %90 = arith.truncf %89 : vector<8x128xf32> to vector<8x128xbf16>
    %c0_18 = arith.constant 0 : index
    %c0_19 = arith.constant 0 : index
    %c0_20 = arith.constant 0 : index
    %91 = vector.load %arg3[%c0_18, %c0_19, %c0_20] : memref<9x8x8xbf16, #tpu.memory_space<vmem>>, vector<9x8x8xbf16>
    %cst_21 = arith.constant 0.000000e+00 : f32
    %92 = vector.broadcast %cst_21 : f32 to vector<8x128xf32>
    %93 = arith.extf %90 : vector<8x128xbf16> to vector<8x128xf32>
    %c9_i32_22 = arith.constant 9 : i32
    %94 = tpu.dynamic_rotate %93 by %c9_i32_22 dim 1 : vector<8x128xf32>, i32 -> vector<8x128xf32>
    %95 = vector.extract_strided_slice %1 {offsets = [0, 0], sizes = [1, 128], strides = [1, 1]} : vector<9x128xf32> to vector<1x128xf32>
    %96 = vector.broadcast %95 : vector<1x128xf32> to vector<8x128xf32>
    %97 = arith.mulf %94, %96 : vector<8x128xf32>
    %98 = arith.truncf %97 : vector<8x128xf32> to vector<8x128xbf16>
    %99 = vector.extract_strided_slice %91 {offsets = [0, 0, 0], sizes = [1, 8, 8], strides = [1, 1, 1]} : vector<9x8x8xbf16> to vector<1x8x8xbf16>
    %100 = vector.shape_cast %99 : vector<1x8x8xbf16> to vector<8x8xbf16>
    %cst_23 = arith.constant dense<0.000000e+00> : vector<8x128xf32>
    %101 = tpu.matmul %100, %98, %cst_23 {dimension_numbers = #tpu.dot_dimension_numbers<[1], [0], [0], [1], [0, 0, 1, 1], [], []>} : vector<8x8xbf16>, vector<8x128xbf16>, vector<8x128xf32> -> vector<8x128xf32>
    %102 = arith.addf %92, %101 : vector<8x128xf32>
    %c8_i32_24 = arith.constant 8 : i32
    %103 = tpu.dynamic_rotate %93 by %c8_i32_24 dim 1 : vector<8x128xf32>, i32 -> vector<8x128xf32>
    %104 = vector.extract_strided_slice %1 {offsets = [1, 0], sizes = [1, 128], strides = [1, 1]} : vector<9x128xf32> to vector<1x128xf32>
    %105 = vector.broadcast %104 : vector<1x128xf32> to vector<8x128xf32>
    %106 = arith.mulf %103, %105 : vector<8x128xf32>
    %107 = arith.truncf %106 : vector<8x128xf32> to vector<8x128xbf16>
    %108 = vector.extract_strided_slice %91 {offsets = [1, 0, 0], sizes = [1, 8, 8], strides = [1, 1, 1]} : vector<9x8x8xbf16> to vector<1x8x8xbf16>
    %109 = vector.shape_cast %108 : vector<1x8x8xbf16> to vector<8x8xbf16>
    %cst_25 = arith.constant dense<0.000000e+00> : vector<8x128xf32>
    %110 = tpu.matmul %109, %107, %cst_25 {dimension_numbers = #tpu.dot_dimension_numbers<[1], [0], [0], [1], [0, 0, 1, 1], [], []>} : vector<8x8xbf16>, vector<8x128xbf16>, vector<8x128xf32> -> vector<8x128xf32>
    %111 = arith.addf %102, %110 : vector<8x128xf32>
    %c7_i32_26 = arith.constant 7 : i32
    %112 = tpu.dynamic_rotate %93 by %c7_i32_26 dim 1 : vector<8x128xf32>, i32 -> vector<8x128xf32>
    %113 = vector.extract_strided_slice %1 {offsets = [2, 0], sizes = [1, 128], strides = [1, 1]} : vector<9x128xf32> to vector<1x128xf32>
    %114 = vector.broadcast %113 : vector<1x128xf32> to vector<8x128xf32>
    %115 = arith.mulf %112, %114 : vector<8x128xf32>
    %116 = arith.truncf %115 : vector<8x128xf32> to vector<8x128xbf16>
    %117 = vector.extract_strided_slice %91 {offsets = [2, 0, 0], sizes = [1, 8, 8], strides = [1, 1, 1]} : vector<9x8x8xbf16> to vector<1x8x8xbf16>
    %118 = vector.shape_cast %117 : vector<1x8x8xbf16> to vector<8x8xbf16>
    %cst_27 = arith.constant dense<0.000000e+00> : vector<8x128xf32>
    %119 = tpu.matmul %118, %116, %cst_27 {dimension_numbers = #tpu.dot_dimension_numbers<[1], [0], [0], [1], [0, 0, 1, 1], [], []>} : vector<8x8xbf16>, vector<8x128xbf16>, vector<8x128xf32> -> vector<8x128xf32>
    %120 = arith.addf %111, %119 : vector<8x128xf32>
    %c1_i32_28 = arith.constant 1 : i32
    %121 = tpu.dynamic_rotate %93 by %c1_i32_28 dim 1 : vector<8x128xf32>, i32 -> vector<8x128xf32>
    %122 = vector.extract_strided_slice %1 {offsets = [3, 0], sizes = [1, 128], strides = [1, 1]} : vector<9x128xf32> to vector<1x128xf32>
    %123 = vector.broadcast %122 : vector<1x128xf32> to vector<8x128xf32>
    %124 = arith.mulf %121, %123 : vector<8x128xf32>
    %125 = arith.truncf %124 : vector<8x128xf32> to vector<8x128xbf16>
    %126 = vector.extract_strided_slice %91 {offsets = [3, 0, 0], sizes = [1, 8, 8], strides = [1, 1, 1]} : vector<9x8x8xbf16> to vector<1x8x8xbf16>
    %127 = vector.shape_cast %126 : vector<1x8x8xbf16> to vector<8x8xbf16>
    %cst_29 = arith.constant dense<0.000000e+00> : vector<8x128xf32>
    %128 = tpu.matmul %127, %125, %cst_29 {dimension_numbers = #tpu.dot_dimension_numbers<[1], [0], [0], [1], [0, 0, 1, 1], [], []>} : vector<8x8xbf16>, vector<8x128xbf16>, vector<8x128xf32> -> vector<8x128xf32>
    %129 = arith.addf %120, %128 : vector<8x128xf32>
    %130 = vector.extract_strided_slice %1 {offsets = [4, 0], sizes = [1, 128], strides = [1, 1]} : vector<9x128xf32> to vector<1x128xf32>
    %131 = vector.broadcast %130 : vector<1x128xf32> to vector<8x128xf32>
    %132 = arith.mulf %93, %131 : vector<8x128xf32>
    %133 = arith.truncf %132 : vector<8x128xf32> to vector<8x128xbf16>
    %134 = vector.extract_strided_slice %91 {offsets = [4, 0, 0], sizes = [1, 8, 8], strides = [1, 1, 1]} : vector<9x8x8xbf16> to vector<1x8x8xbf16>
    %135 = vector.shape_cast %134 : vector<1x8x8xbf16> to vector<8x8xbf16>
    %cst_30 = arith.constant dense<0.000000e+00> : vector<8x128xf32>
    %136 = tpu.matmul %135, %133, %cst_30 {dimension_numbers = #tpu.dot_dimension_numbers<[1], [0], [0], [1], [0, 0, 1, 1], [], []>} : vector<8x8xbf16>, vector<8x128xbf16>, vector<8x128xf32> -> vector<8x128xf32>
    %137 = arith.addf %129, %136 : vector<8x128xf32>
    %c127_i32_31 = arith.constant 127 : i32
    %138 = tpu.dynamic_rotate %93 by %c127_i32_31 dim 1 : vector<8x128xf32>, i32 -> vector<8x128xf32>
    %139 = vector.extract_strided_slice %1 {offsets = [5, 0], sizes = [1, 128], strides = [1, 1]} : vector<9x128xf32> to vector<1x128xf32>
    %140 = vector.broadcast %139 : vector<1x128xf32> to vector<8x128xf32>
    %141 = arith.mulf %138, %140 : vector<8x128xf32>
    %142 = arith.truncf %141 : vector<8x128xf32> to vector<8x128xbf16>
    %143 = vector.extract_strided_slice %91 {offsets = [5, 0, 0], sizes = [1, 8, 8], strides = [1, 1, 1]} : vector<9x8x8xbf16> to vector<1x8x8xbf16>
    %144 = vector.shape_cast %143 : vector<1x8x8xbf16> to vector<8x8xbf16>
    %cst_32 = arith.constant dense<0.000000e+00> : vector<8x128xf32>
    %145 = tpu.matmul %144, %142, %cst_32 {dimension_numbers = #tpu.dot_dimension_numbers<[1], [0], [0], [1], [0, 0, 1, 1], [], []>} : vector<8x8xbf16>, vector<8x128xbf16>, vector<8x128xf32> -> vector<8x128xf32>
    %146 = arith.addf %137, %145 : vector<8x128xf32>
    %c121_i32_33 = arith.constant 121 : i32
    %147 = tpu.dynamic_rotate %93 by %c121_i32_33 dim 1 : vector<8x128xf32>, i32 -> vector<8x128xf32>
    %148 = vector.extract_strided_slice %1 {offsets = [6, 0], sizes = [1, 128], strides = [1, 1]} : vector<9x128xf32> to vector<1x128xf32>
    %149 = vector.broadcast %148 : vector<1x128xf32> to vector<8x128xf32>
    %150 = arith.mulf %147, %149 : vector<8x128xf32>
    %151 = arith.truncf %150 : vector<8x128xf32> to vector<8x128xbf16>
    %152 = vector.extract_strided_slice %91 {offsets = [6, 0, 0], sizes = [1, 8, 8], strides = [1, 1, 1]} : vector<9x8x8xbf16> to vector<1x8x8xbf16>
    %153 = vector.shape_cast %152 : vector<1x8x8xbf16> to vector<8x8xbf16>
    %cst_34 = arith.constant dense<0.000000e+00> : vector<8x128xf32>
    %154 = tpu.matmul %153, %151, %cst_34 {dimension_numbers = #tpu.dot_dimension_numbers<[1], [0], [0], [1], [0, 0, 1, 1], [], []>} : vector<8x8xbf16>, vector<8x128xbf16>, vector<8x128xf32> -> vector<8x128xf32>
    %155 = arith.addf %146, %154 : vector<8x128xf32>
    %c120_i32_35 = arith.constant 120 : i32
    %156 = tpu.dynamic_rotate %93 by %c120_i32_35 dim 1 : vector<8x128xf32>, i32 -> vector<8x128xf32>
    %157 = vector.extract_strided_slice %1 {offsets = [7, 0], sizes = [1, 128], strides = [1, 1]} : vector<9x128xf32> to vector<1x128xf32>
    %158 = vector.broadcast %157 : vector<1x128xf32> to vector<8x128xf32>
    %159 = arith.mulf %156, %158 : vector<8x128xf32>
    %160 = arith.truncf %159 : vector<8x128xf32> to vector<8x128xbf16>
    %161 = vector.extract_strided_slice %91 {offsets = [7, 0, 0], sizes = [1, 8, 8], strides = [1, 1, 1]} : vector<9x8x8xbf16> to vector<1x8x8xbf16>
    %162 = vector.shape_cast %161 : vector<1x8x8xbf16> to vector<8x8xbf16>
    %cst_36 = arith.constant dense<0.000000e+00> : vector<8x128xf32>
    %163 = tpu.matmul %162, %160, %cst_36 {dimension_numbers = #tpu.dot_dimension_numbers<[1], [0], [0], [1], [0, 0, 1, 1], [], []>} : vector<8x8xbf16>, vector<8x128xbf16>, vector<8x128xf32> -> vector<8x128xf32>
    %164 = arith.addf %155, %163 : vector<8x128xf32>
    %c119_i32_37 = arith.constant 119 : i32
    %165 = tpu.dynamic_rotate %93 by %c119_i32_37 dim 1 : vector<8x128xf32>, i32 -> vector<8x128xf32>
    %166 = vector.extract_strided_slice %1 {offsets = [8, 0], sizes = [1, 128], strides = [1, 1]} : vector<9x128xf32> to vector<1x128xf32>
    %167 = vector.broadcast %166 : vector<1x128xf32> to vector<8x128xf32>
    %168 = arith.mulf %165, %167 : vector<8x128xf32>
    %169 = arith.truncf %168 : vector<8x128xf32> to vector<8x128xbf16>
    %170 = vector.extract_strided_slice %91 {offsets = [8, 0, 0], sizes = [1, 8, 8], strides = [1, 1, 1]} : vector<9x8x8xbf16> to vector<1x8x8xbf16>
    %171 = vector.shape_cast %170 : vector<1x8x8xbf16> to vector<8x8xbf16>
    %cst_38 = arith.constant dense<0.000000e+00> : vector<8x128xf32>
    %172 = tpu.matmul %171, %169, %cst_38 {dimension_numbers = #tpu.dot_dimension_numbers<[1], [0], [0], [1], [0, 0, 1, 1], [], []>} : vector<8x8xbf16>, vector<8x128xbf16>, vector<8x128xf32> -> vector<8x128xf32>
    %173 = arith.addf %164, %172 : vector<8x128xf32>
    %c0_39 = arith.constant 0 : index
    %c0_40 = arith.constant 0 : index
    %174 = vector.load %arg4[%c0_39, %c0_40] : memref<8x1xf32, #tpu.memory_space<vmem>>, vector<8x1xf32>
    %175 = vector.broadcast %174 : vector<8x1xf32> to vector<8x128xf32>
    %176 = arith.addf %173, %175 : vector<8x128xf32>
    %177 = arith.extf %0 : vector<8x128xbf16> to vector<8x128xf32>
    %178 = arith.addf %176, %177 : vector<8x128xf32>
    %cst_41 = arith.constant 0.000000e+00 : f32
    %179 = vector.broadcast %cst_41 : f32 to vector<8x128xf32>
    %180 = arith.maximumf %178, %179 : vector<8x128xf32>
    %181 = arith.truncf %180 : vector<8x128xf32> to vector<8x128xbf16>
    %c0_42 = arith.constant 0 : index
    %c0_43 = arith.constant 0 : index
    %182 = vector.load %arg6[%c0_42, %c0_43] : memref<8x128xbf16, #tpu.memory_space<vmem>>, vector<8x128xbf16>
    tpu.vector_store %arg6[%c0_42, %c0_43], %181 {strides = array<i32>} : memref<8x128xbf16, #tpu.memory_space<vmem>>, vector<8x128xbf16>,
    return
  }
}

module attributes {stable_mosaic.version = 11 : i64} {
  func.func @kernel(%arg0: memref<16x72xbf16, #tpu.memory_space<vmem>>, %arg1: memref<72x32xbf16, #tpu.memory_space<vmem>>, %arg2: memref<16x1xf32, #tpu.memory_space<vmem>>, %arg3: memref<16x32xbf16, #tpu.memory_space<vmem>>) attributes {dimension_semantics = [], scalar_prefetch = 0 : i64, scratch_operands = 0 : i64, tpu.core_type = #tpu.core_type<tc>} {
    %c0 = arith.constant 0 : index
    %c0_0 = arith.constant 0 : index
    %0 = vector.load %arg0[%c0, %c0_0] : memref<16x72xbf16, #tpu.memory_space<vmem>>, vector<16x72xbf16>
    %c0_1 = arith.constant 0 : index
    %c0_2 = arith.constant 0 : index
    %1 = vector.load %arg1[%c0_1, %c0_2] : memref<72x32xbf16, #tpu.memory_space<vmem>>, vector<72x32xbf16>
    %cst = arith.constant dense<0.000000e+00> : vector<16x32xf32>
    %2 = tpu.matmul %0, %1, %cst {dimension_numbers = #tpu.dot_dimension_numbers<[1], [0], [0], [1], [0, 0, 1, 1], [], []>} : vector<16x72xbf16>, vector<72x32xbf16>, vector<16x32xf32> -> vector<16x32xf32>
    %c0_3 = arith.constant 0 : index
    %c0_4 = arith.constant 0 : index
    %3 = vector.load %arg2[%c0_3, %c0_4] : memref<16x1xf32, #tpu.memory_space<vmem>>, vector<16x1xf32>
    %4 = vector.broadcast %3 : vector<16x1xf32> to vector<16x32xf32>
    %5 = arith.addf %2, %4 : vector<16x32xf32>
    %cst_5 = arith.constant 0.000000e+00 : f32
    %6 = vector.broadcast %cst_5 : f32 to vector<16x32xf32>
    %7 = arith.maximumf %5, %6 : vector<16x32xf32>
    %8 = arith.truncf %7 : vector<16x32xf32> to vector<16x32xbf16>
    %c0_6 = arith.constant 0 : index
    %c0_7 = arith.constant 0 : index
    %9 = vector.load %arg3[%c0_6, %c0_7] : memref<16x32xbf16, #tpu.memory_space<vmem>>, vector<16x32xbf16>
    tpu.vector_store %arg3[%c0_6, %c0_7], %8 {strides = array<i32>} : memref<16x32xbf16, #tpu.memory_space<vmem>>, vector<16x32xbf16>,
    return
  }
}

module attributes {stable_mosaic.version = 11 : i64} {
  func.func @kernel(%arg0: memref<16x32xbf16, #tpu.memory_space<vmem>>, %arg1: memref<9x16x16xbf16, #tpu.memory_space<vmem>>, %arg2: memref<16x1xf32, #tpu.memory_space<vmem>>, %arg3: memref<16x8xbf16, #tpu.memory_space<vmem>>, %arg4: memref<8x32xbf16, #tpu.memory_space<vmem>>, %arg5: memref<9x32x32xbf16, #tpu.memory_space<vmem>>, %arg6: memref<16x32xbf16, #tpu.memory_space<vmem>>) attributes {dimension_semantics = [], scalar_prefetch = 0 : i64, scratch_operands = 0 : i64, tpu.core_type = #tpu.core_type<tc>} {
    %c0 = arith.constant 0 : index
    %c0_0 = arith.constant 0 : index
    %0 = vector.load %arg0[%c0, %c0_0] : memref<16x32xbf16, #tpu.memory_space<vmem>>, vector<16x32xbf16>
    %c0_1 = arith.constant 0 : index
    %c0_2 = arith.constant 0 : index
    %c0_3 = arith.constant 0 : index
    %1 = vector.load %arg1[%c0_1, %c0_2, %c0_3] : memref<9x16x16xbf16, #tpu.memory_space<vmem>>, vector<9x16x16xbf16>
    %c0_4 = arith.constant 0 : index
    %c0_5 = arith.constant 0 : index
    %c0_6 = arith.constant 0 : index
    %2 = vector.load %arg5[%c0_4, %c0_5, %c0_6] : memref<9x32x32xbf16, #tpu.memory_space<vmem>>, vector<9x32x32xbf16>
    %cst = arith.constant 0.000000e+00 : f32
    %3 = vector.broadcast %cst : f32 to vector<16x32xf32>
    %4 = vector.extract_strided_slice %2 {offsets = [0, 0, 0], sizes = [1, 32, 32], strides = [1, 1, 1]} : vector<9x32x32xbf16> to vector<1x32x32xbf16>
    %5 = vector.shape_cast %4 : vector<1x32x32xbf16> to vector<32x32xbf16>
    %cst_7 = arith.constant dense<0.000000e+00> : vector<16x32xf32>
    %6 = tpu.matmul %0, %5, %cst_7 {dimension_numbers = #tpu.dot_dimension_numbers<[1], [0], [0], [1], [0, 0, 1, 1], [], []>} : vector<16x32xbf16>, vector<32x32xbf16>, vector<16x32xf32> -> vector<16x32xf32>
    %7 = arith.truncf %6 : vector<16x32xf32> to vector<16x32xbf16>
    %8 = vector.extract_strided_slice %1 {offsets = [0, 0, 0], sizes = [1, 16, 16], strides = [1, 1, 1]} : vector<9x16x16xbf16> to vector<1x16x16xbf16>
    %9 = vector.shape_cast %8 : vector<1x16x16xbf16> to vector<16x16xbf16>
    %cst_8 = arith.constant dense<0.000000e+00> : vector<16x32xf32>
    %10 = tpu.matmul %9, %7, %cst_8 {dimension_numbers = #tpu.dot_dimension_numbers<[1], [0], [0], [1], [0, 0, 1, 1], [], []>} : vector<16x16xbf16>, vector<16x32xbf16>, vector<16x32xf32> -> vector<16x32xf32>
    %11 = arith.addf %3, %10 : vector<16x32xf32>
    %12 = vector.extract_strided_slice %2 {offsets = [1, 0, 0], sizes = [1, 32, 32], strides = [1, 1, 1]} : vector<9x32x32xbf16> to vector<1x32x32xbf16>
    %13 = vector.shape_cast %12 : vector<1x32x32xbf16> to vector<32x32xbf16>
    %cst_9 = arith.constant dense<0.000000e+00> : vector<16x32xf32>
    %14 = tpu.matmul %0, %13, %cst_9 {dimension_numbers = #tpu.dot_dimension_numbers<[1], [0], [0], [1], [0, 0, 1, 1], [], []>} : vector<16x32xbf16>, vector<32x32xbf16>, vector<16x32xf32> -> vector<16x32xf32>
    %15 = arith.truncf %14 : vector<16x32xf32> to vector<16x32xbf16>
    %16 = vector.extract_strided_slice %1 {offsets = [1, 0, 0], sizes = [1, 16, 16], strides = [1, 1, 1]} : vector<9x16x16xbf16> to vector<1x16x16xbf16>
    %17 = vector.shape_cast %16 : vector<1x16x16xbf16> to vector<16x16xbf16>
    %cst_10 = arith.constant dense<0.000000e+00> : vector<16x32xf32>
    %18 = tpu.matmul %17, %15, %cst_10 {dimension_numbers = #tpu.dot_dimension_numbers<[1], [0], [0], [1], [0, 0, 1, 1], [], []>} : vector<16x16xbf16>, vector<16x32xbf16>, vector<16x32xf32> -> vector<16x32xf32>
    %19 = arith.addf %11, %18 : vector<16x32xf32>
    %20 = vector.extract_strided_slice %2 {offsets = [2, 0, 0], sizes = [1, 32, 32], strides = [1, 1, 1]} : vector<9x32x32xbf16> to vector<1x32x32xbf16>
    %21 = vector.shape_cast %20 : vector<1x32x32xbf16> to vector<32x32xbf16>
    %cst_11 = arith.constant dense<0.000000e+00> : vector<16x32xf32>
    %22 = tpu.matmul %0, %21, %cst_11 {dimension_numbers = #tpu.dot_dimension_numbers<[1], [0], [0], [1], [0, 0, 1, 1], [], []>} : vector<16x32xbf16>, vector<32x32xbf16>, vector<16x32xf32> -> vector<16x32xf32>
    %23 = arith.truncf %22 : vector<16x32xf32> to vector<16x32xbf16>
    %24 = vector.extract_strided_slice %1 {offsets = [2, 0, 0], sizes = [1, 16, 16], strides = [1, 1, 1]} : vector<9x16x16xbf16> to vector<1x16x16xbf16>
    %25 = vector.shape_cast %24 : vector<1x16x16xbf16> to vector<16x16xbf16>
    %cst_12 = arith.constant dense<0.000000e+00> : vector<16x32xf32>
    %26 = tpu.matmul %25, %23, %cst_12 {dimension_numbers = #tpu.dot_dimension_numbers<[1], [0], [0], [1], [0, 0, 1, 1], [], []>} : vector<16x16xbf16>, vector<16x32xbf16>, vector<16x32xf32> -> vector<16x32xf32>
    %27 = arith.addf %19, %26 : vector<16x32xf32>
    %28 = vector.extract_strided_slice %2 {offsets = [3, 0, 0], sizes = [1, 32, 32], strides = [1, 1, 1]} : vector<9x32x32xbf16> to vector<1x32x32xbf16>
    %29 = vector.shape_cast %28 : vector<1x32x32xbf16> to vector<32x32xbf16>
    %cst_13 = arith.constant dense<0.000000e+00> : vector<16x32xf32>
    %30 = tpu.matmul %0, %29, %cst_13 {dimension_numbers = #tpu.dot_dimension_numbers<[1], [0], [0], [1], [0, 0, 1, 1], [], []>} : vector<16x32xbf16>, vector<32x32xbf16>, vector<16x32xf32> -> vector<16x32xf32>
    %31 = arith.truncf %30 : vector<16x32xf32> to vector<16x32xbf16>
    %32 = vector.extract_strided_slice %1 {offsets = [3, 0, 0], sizes = [1, 16, 16], strides = [1, 1, 1]} : vector<9x16x16xbf16> to vector<1x16x16xbf16>
    %33 = vector.shape_cast %32 : vector<1x16x16xbf16> to vector<16x16xbf16>
    %cst_14 = arith.constant dense<0.000000e+00> : vector<16x32xf32>
    %34 = tpu.matmul %33, %31, %cst_14 {dimension_numbers = #tpu.dot_dimension_numbers<[1], [0], [0], [1], [0, 0, 1, 1], [], []>} : vector<16x16xbf16>, vector<16x32xbf16>, vector<16x32xf32> -> vector<16x32xf32>
    %35 = arith.addf %27, %34 : vector<16x32xf32>
    %36 = vector.extract_strided_slice %2 {offsets = [4, 0, 0], sizes = [1, 32, 32], strides = [1, 1, 1]} : vector<9x32x32xbf16> to vector<1x32x32xbf16>
    %37 = vector.shape_cast %36 : vector<1x32x32xbf16> to vector<32x32xbf16>
    %cst_15 = arith.constant dense<0.000000e+00> : vector<16x32xf32>
    %38 = tpu.matmul %0, %37, %cst_15 {dimension_numbers = #tpu.dot_dimension_numbers<[1], [0], [0], [1], [0, 0, 1, 1], [], []>} : vector<16x32xbf16>, vector<32x32xbf16>, vector<16x32xf32> -> vector<16x32xf32>
    %39 = arith.truncf %38 : vector<16x32xf32> to vector<16x32xbf16>
    %40 = vector.extract_strided_slice %1 {offsets = [4, 0, 0], sizes = [1, 16, 16], strides = [1, 1, 1]} : vector<9x16x16xbf16> to vector<1x16x16xbf16>
    %41 = vector.shape_cast %40 : vector<1x16x16xbf16> to vector<16x16xbf16>
    %cst_16 = arith.constant dense<0.000000e+00> : vector<16x32xf32>
    %42 = tpu.matmul %41, %39, %cst_16 {dimension_numbers = #tpu.dot_dimension_numbers<[1], [0], [0], [1], [0, 0, 1, 1], [], []>} : vector<16x16xbf16>, vector<16x32xbf16>, vector<16x32xf32> -> vector<16x32xf32>
    %43 = arith.addf %35, %42 : vector<16x32xf32>
    %44 = vector.extract_strided_slice %2 {offsets = [5, 0, 0], sizes = [1, 32, 32], strides = [1, 1, 1]} : vector<9x32x32xbf16> to vector<1x32x32xbf16>
    %45 = vector.shape_cast %44 : vector<1x32x32xbf16> to vector<32x32xbf16>
    %cst_17 = arith.constant dense<0.000000e+00> : vector<16x32xf32>
    %46 = tpu.matmul %0, %45, %cst_17 {dimension_numbers = #tpu.dot_dimension_numbers<[1], [0], [0], [1], [0, 0, 1, 1], [], []>} : vector<16x32xbf16>, vector<32x32xbf16>, vector<16x32xf32> -> vector<16x32xf32>
    %47 = arith.truncf %46 : vector<16x32xf32> to vector<16x32xbf16>
    %48 = vector.extract_strided_slice %1 {offsets = [5, 0, 0], sizes = [1, 16, 16], strides = [1, 1, 1]} : vector<9x16x16xbf16> to vector<1x16x16xbf16>
    %49 = vector.shape_cast %48 : vector<1x16x16xbf16> to vector<16x16xbf16>
    %cst_18 = arith.constant dense<0.000000e+00> : vector<16x32xf32>
    %50 = tpu.matmul %49, %47, %cst_18 {dimension_numbers = #tpu.dot_dimension_numbers<[1], [0], [0], [1], [0, 0, 1, 1], [], []>} : vector<16x16xbf16>, vector<16x32xbf16>, vector<16x32xf32> -> vector<16x32xf32>
    %51 = arith.addf %43, %50 : vector<16x32xf32>
    %52 = vector.extract_strided_slice %2 {offsets = [6, 0, 0], sizes = [1, 32, 32], strides = [1, 1, 1]} : vector<9x32x32xbf16> to vector<1x32x32xbf16>
    %53 = vector.shape_cast %52 : vector<1x32x32xbf16> to vector<32x32xbf16>
    %cst_19 = arith.constant dense<0.000000e+00> : vector<16x32xf32>
    %54 = tpu.matmul %0, %53, %cst_19 {dimension_numbers = #tpu.dot_dimension_numbers<[1], [0], [0], [1], [0, 0, 1, 1], [], []>} : vector<16x32xbf16>, vector<32x32xbf16>, vector<16x32xf32> -> vector<16x32xf32>
    %55 = arith.truncf %54 : vector<16x32xf32> to vector<16x32xbf16>
    %56 = vector.extract_strided_slice %1 {offsets = [6, 0, 0], sizes = [1, 16, 16], strides = [1, 1, 1]} : vector<9x16x16xbf16> to vector<1x16x16xbf16>
    %57 = vector.shape_cast %56 : vector<1x16x16xbf16> to vector<16x16xbf16>
    %cst_20 = arith.constant dense<0.000000e+00> : vector<16x32xf32>
    %58 = tpu.matmul %57, %55, %cst_20 {dimension_numbers = #tpu.dot_dimension_numbers<[1], [0], [0], [1], [0, 0, 1, 1], [], []>} : vector<16x16xbf16>, vector<16x32xbf16>, vector<16x32xf32> -> vector<16x32xf32>
    %59 = arith.addf %51, %58 : vector<16x32xf32>
    %60 = vector.extract_strided_slice %2 {offsets = [7, 0, 0], sizes = [1, 32, 32], strides = [1, 1, 1]} : vector<9x32x32xbf16> to vector<1x32x32xbf16>
    %61 = vector.shape_cast %60 : vector<1x32x32xbf16> to vector<32x32xbf16>
    %cst_21 = arith.constant dense<0.000000e+00> : vector<16x32xf32>
    %62 = tpu.matmul %0, %61, %cst_21 {dimension_numbers = #tpu.dot_dimension_numbers<[1], [0], [0], [1], [0, 0, 1, 1], [], []>} : vector<16x32xbf16>, vector<32x32xbf16>, vector<16x32xf32> -> vector<16x32xf32>
    %63 = arith.truncf %62 : vector<16x32xf32> to vector<16x32xbf16>
    %64 = vector.extract_strided_slice %1 {offsets = [7, 0, 0], sizes = [1, 16, 16], strides = [1, 1, 1]} : vector<9x16x16xbf16> to vector<1x16x16xbf16>
    %65 = vector.shape_cast %64 : vector<1x16x16xbf16> to vector<16x16xbf16>
    %cst_22 = arith.constant dense<0.000000e+00> : vector<16x32xf32>
    %66 = tpu.matmul %65, %63, %cst_22 {dimension_numbers = #tpu.dot_dimension_numbers<[1], [0], [0], [1], [0, 0, 1, 1], [], []>} : vector<16x16xbf16>, vector<16x32xbf16>, vector<16x32xf32> -> vector<16x32xf32>
    %67 = arith.addf %59, %66 : vector<16x32xf32>
    %68 = vector.extract_strided_slice %2 {offsets = [8, 0, 0], sizes = [1, 32, 32], strides = [1, 1, 1]} : vector<9x32x32xbf16> to vector<1x32x32xbf16>
    %69 = vector.shape_cast %68 : vector<1x32x32xbf16> to vector<32x32xbf16>
    %cst_23 = arith.constant dense<0.000000e+00> : vector<16x32xf32>
    %70 = tpu.matmul %0, %69, %cst_23 {dimension_numbers = #tpu.dot_dimension_numbers<[1], [0], [0], [1], [0, 0, 1, 1], [], []>} : vector<16x32xbf16>, vector<32x32xbf16>, vector<16x32xf32> -> vector<16x32xf32>
    %71 = arith.truncf %70 : vector<16x32xf32> to vector<16x32xbf16>
    %72 = vector.extract_strided_slice %1 {offsets = [8, 0, 0], sizes = [1, 16, 16], strides = [1, 1, 1]} : vector<9x16x16xbf16> to vector<1x16x16xbf16>
    %73 = vector.shape_cast %72 : vector<1x16x16xbf16> to vector<16x16xbf16>
    %cst_24 = arith.constant dense<0.000000e+00> : vector<16x32xf32>
    %74 = tpu.matmul %73, %71, %cst_24 {dimension_numbers = #tpu.dot_dimension_numbers<[1], [0], [0], [1], [0, 0, 1, 1], [], []>} : vector<16x16xbf16>, vector<16x32xbf16>, vector<16x32xf32> -> vector<16x32xf32>
    %75 = arith.addf %67, %74 : vector<16x32xf32>
    %c0_25 = arith.constant 0 : index
    %c0_26 = arith.constant 0 : index
    %76 = vector.load %arg2[%c0_25, %c0_26] : memref<16x1xf32, #tpu.memory_space<vmem>>, vector<16x1xf32>
    %77 = vector.broadcast %76 : vector<16x1xf32> to vector<16x32xf32>
    %78 = arith.addf %75, %77 : vector<16x32xf32>
    %c0_27 = arith.constant 0 : index
    %c0_28 = arith.constant 0 : index
    %79 = vector.load %arg3[%c0_27, %c0_28] : memref<16x8xbf16, #tpu.memory_space<vmem>>, vector<16x8xbf16>
    %c0_29 = arith.constant 0 : index
    %c0_30 = arith.constant 0 : index
    %80 = vector.load %arg4[%c0_29, %c0_30] : memref<8x32xbf16, #tpu.memory_space<vmem>>, vector<8x32xbf16>
    %cst_31 = arith.constant dense<0.000000e+00> : vector<16x32xf32>
    %81 = tpu.matmul %79, %80, %cst_31 {dimension_numbers = #tpu.dot_dimension_numbers<[1], [0], [0], [1], [0, 0, 1, 1], [], []>} : vector<16x8xbf16>, vector<8x32xbf16>, vector<16x32xf32> -> vector<16x32xf32>
    %82 = arith.addf %78, %81 : vector<16x32xf32>
    %cst_32 = arith.constant 0.000000e+00 : f32
    %83 = vector.broadcast %cst_32 : f32 to vector<16x32xf32>
    %84 = arith.maximumf %82, %83 : vector<16x32xf32>
    %85 = arith.truncf %84 : vector<16x32xf32> to vector<16x32xbf16>
    %c0_33 = arith.constant 0 : index
    %c0_34 = arith.constant 0 : index
    %86 = vector.load %arg6[%c0_33, %c0_34] : memref<16x32xbf16, #tpu.memory_space<vmem>>, vector<16x32xbf16>
    tpu.vector_store %arg6[%c0_33, %c0_34], %85 {strides = array<i32>} : memref<16x32xbf16, #tpu.memory_space<vmem>>, vector<16x32xbf16>,
    return
  }
}

module attributes {stable_mosaic.version = 11 : i64} {
  func.func @kernel(%arg0: memref<16x32xbf16, #tpu.memory_space<vmem>>, %arg1: memref<9x16x16xbf16, #tpu.memory_space<vmem>>, %arg2: memref<16x1xf32, #tpu.memory_space<vmem>>, %arg3: memref<9x16x16xbf16, #tpu.memory_space<vmem>>, %arg4: memref<16x1xf32, #tpu.memory_space<vmem>>, %arg5: memref<9x32x32xbf16, #tpu.memory_space<vmem>>, %arg6: memref<16x32xbf16, #tpu.memory_space<vmem>>) attributes {dimension_semantics = [], scalar_prefetch = 0 : i64, scratch_operands = 0 : i64, tpu.core_type = #tpu.core_type<tc>} {
    %c0 = arith.constant 0 : index
    %c0_0 = arith.constant 0 : index
    %0 = vector.load %arg0[%c0, %c0_0] : memref<16x32xbf16, #tpu.memory_space<vmem>>, vector<16x32xbf16>
    %c0_1 = arith.constant 0 : index
    %c0_2 = arith.constant 0 : index
    %c0_3 = arith.constant 0 : index
    %1 = vector.load %arg5[%c0_1, %c0_2, %c0_3] : memref<9x32x32xbf16, #tpu.memory_space<vmem>>, vector<9x32x32xbf16>
    %c0_4 = arith.constant 0 : index
    %c0_5 = arith.constant 0 : index
    %c0_6 = arith.constant 0 : index
    %2 = vector.load %arg1[%c0_4, %c0_5, %c0_6] : memref<9x16x16xbf16, #tpu.memory_space<vmem>>, vector<9x16x16xbf16>
    %cst = arith.constant 0.000000e+00 : f32
    %3 = vector.broadcast %cst : f32 to vector<16x32xf32>
    %4 = vector.extract_strided_slice %1 {offsets = [0, 0, 0], sizes = [1, 32, 32], strides = [1, 1, 1]} : vector<9x32x32xbf16> to vector<1x32x32xbf16>
    %5 = vector.shape_cast %4 : vector<1x32x32xbf16> to vector<32x32xbf16>
    %cst_7 = arith.constant dense<0.000000e+00> : vector<16x32xf32>
    %6 = tpu.matmul %0, %5, %cst_7 {dimension_numbers = #tpu.dot_dimension_numbers<[1], [0], [0], [1], [0, 0, 1, 1], [], []>} : vector<16x32xbf16>, vector<32x32xbf16>, vector<16x32xf32> -> vector<16x32xf32>
    %7 = arith.truncf %6 : vector<16x32xf32> to vector<16x32xbf16>
    %8 = vector.extract_strided_slice %2 {offsets = [0, 0, 0], sizes = [1, 16, 16], strides = [1, 1, 1]} : vector<9x16x16xbf16> to vector<1x16x16xbf16>
    %9 = vector.shape_cast %8 : vector<1x16x16xbf16> to vector<16x16xbf16>
    %cst_8 = arith.constant dense<0.000000e+00> : vector<16x32xf32>
    %10 = tpu.matmul %9, %7, %cst_8 {dimension_numbers = #tpu.dot_dimension_numbers<[1], [0], [0], [1], [0, 0, 1, 1], [], []>} : vector<16x16xbf16>, vector<16x32xbf16>, vector<16x32xf32> -> vector<16x32xf32>
    %11 = arith.addf %3, %10 : vector<16x32xf32>
    %12 = vector.extract_strided_slice %1 {offsets = [1, 0, 0], sizes = [1, 32, 32], strides = [1, 1, 1]} : vector<9x32x32xbf16> to vector<1x32x32xbf16>
    %13 = vector.shape_cast %12 : vector<1x32x32xbf16> to vector<32x32xbf16>
    %cst_9 = arith.constant dense<0.000000e+00> : vector<16x32xf32>
    %14 = tpu.matmul %0, %13, %cst_9 {dimension_numbers = #tpu.dot_dimension_numbers<[1], [0], [0], [1], [0, 0, 1, 1], [], []>} : vector<16x32xbf16>, vector<32x32xbf16>, vector<16x32xf32> -> vector<16x32xf32>
    %15 = arith.truncf %14 : vector<16x32xf32> to vector<16x32xbf16>
    %16 = vector.extract_strided_slice %2 {offsets = [1, 0, 0], sizes = [1, 16, 16], strides = [1, 1, 1]} : vector<9x16x16xbf16> to vector<1x16x16xbf16>
    %17 = vector.shape_cast %16 : vector<1x16x16xbf16> to vector<16x16xbf16>
    %cst_10 = arith.constant dense<0.000000e+00> : vector<16x32xf32>
    %18 = tpu.matmul %17, %15, %cst_10 {dimension_numbers = #tpu.dot_dimension_numbers<[1], [0], [0], [1], [0, 0, 1, 1], [], []>} : vector<16x16xbf16>, vector<16x32xbf16>, vector<16x32xf32> -> vector<16x32xf32>
    %19 = arith.addf %11, %18 : vector<16x32xf32>
    %20 = vector.extract_strided_slice %1 {offsets = [2, 0, 0], sizes = [1, 32, 32], strides = [1, 1, 1]} : vector<9x32x32xbf16> to vector<1x32x32xbf16>
    %21 = vector.shape_cast %20 : vector<1x32x32xbf16> to vector<32x32xbf16>
    %cst_11 = arith.constant dense<0.000000e+00> : vector<16x32xf32>
    %22 = tpu.matmul %0, %21, %cst_11 {dimension_numbers = #tpu.dot_dimension_numbers<[1], [0], [0], [1], [0, 0, 1, 1], [], []>} : vector<16x32xbf16>, vector<32x32xbf16>, vector<16x32xf32> -> vector<16x32xf32>
    %23 = arith.truncf %22 : vector<16x32xf32> to vector<16x32xbf16>
    %24 = vector.extract_strided_slice %2 {offsets = [2, 0, 0], sizes = [1, 16, 16], strides = [1, 1, 1]} : vector<9x16x16xbf16> to vector<1x16x16xbf16>
    %25 = vector.shape_cast %24 : vector<1x16x16xbf16> to vector<16x16xbf16>
    %cst_12 = arith.constant dense<0.000000e+00> : vector<16x32xf32>
    %26 = tpu.matmul %25, %23, %cst_12 {dimension_numbers = #tpu.dot_dimension_numbers<[1], [0], [0], [1], [0, 0, 1, 1], [], []>} : vector<16x16xbf16>, vector<16x32xbf16>, vector<16x32xf32> -> vector<16x32xf32>
    %27 = arith.addf %19, %26 : vector<16x32xf32>
    %28 = vector.extract_strided_slice %1 {offsets = [3, 0, 0], sizes = [1, 32, 32], strides = [1, 1, 1]} : vector<9x32x32xbf16> to vector<1x32x32xbf16>
    %29 = vector.shape_cast %28 : vector<1x32x32xbf16> to vector<32x32xbf16>
    %cst_13 = arith.constant dense<0.000000e+00> : vector<16x32xf32>
    %30 = tpu.matmul %0, %29, %cst_13 {dimension_numbers = #tpu.dot_dimension_numbers<[1], [0], [0], [1], [0, 0, 1, 1], [], []>} : vector<16x32xbf16>, vector<32x32xbf16>, vector<16x32xf32> -> vector<16x32xf32>
    %31 = arith.truncf %30 : vector<16x32xf32> to vector<16x32xbf16>
    %32 = vector.extract_strided_slice %2 {offsets = [3, 0, 0], sizes = [1, 16, 16], strides = [1, 1, 1]} : vector<9x16x16xbf16> to vector<1x16x16xbf16>
    %33 = vector.shape_cast %32 : vector<1x16x16xbf16> to vector<16x16xbf16>
    %cst_14 = arith.constant dense<0.000000e+00> : vector<16x32xf32>
    %34 = tpu.matmul %33, %31, %cst_14 {dimension_numbers = #tpu.dot_dimension_numbers<[1], [0], [0], [1], [0, 0, 1, 1], [], []>} : vector<16x16xbf16>, vector<16x32xbf16>, vector<16x32xf32> -> vector<16x32xf32>
    %35 = arith.addf %27, %34 : vector<16x32xf32>
    %36 = vector.extract_strided_slice %1 {offsets = [4, 0, 0], sizes = [1, 32, 32], strides = [1, 1, 1]} : vector<9x32x32xbf16> to vector<1x32x32xbf16>
    %37 = vector.shape_cast %36 : vector<1x32x32xbf16> to vector<32x32xbf16>
    %cst_15 = arith.constant dense<0.000000e+00> : vector<16x32xf32>
    %38 = tpu.matmul %0, %37, %cst_15 {dimension_numbers = #tpu.dot_dimension_numbers<[1], [0], [0], [1], [0, 0, 1, 1], [], []>} : vector<16x32xbf16>, vector<32x32xbf16>, vector<16x32xf32> -> vector<16x32xf32>
    %39 = arith.truncf %38 : vector<16x32xf32> to vector<16x32xbf16>
    %40 = vector.extract_strided_slice %2 {offsets = [4, 0, 0], sizes = [1, 16, 16], strides = [1, 1, 1]} : vector<9x16x16xbf16> to vector<1x16x16xbf16>
    %41 = vector.shape_cast %40 : vector<1x16x16xbf16> to vector<16x16xbf16>
    %cst_16 = arith.constant dense<0.000000e+00> : vector<16x32xf32>
    %42 = tpu.matmul %41, %39, %cst_16 {dimension_numbers = #tpu.dot_dimension_numbers<[1], [0], [0], [1], [0, 0, 1, 1], [], []>} : vector<16x16xbf16>, vector<16x32xbf16>, vector<16x32xf32> -> vector<16x32xf32>
    %43 = arith.addf %35, %42 : vector<16x32xf32>
    %44 = vector.extract_strided_slice %1 {offsets = [5, 0, 0], sizes = [1, 32, 32], strides = [1, 1, 1]} : vector<9x32x32xbf16> to vector<1x32x32xbf16>
    %45 = vector.shape_cast %44 : vector<1x32x32xbf16> to vector<32x32xbf16>
    %cst_17 = arith.constant dense<0.000000e+00> : vector<16x32xf32>
    %46 = tpu.matmul %0, %45, %cst_17 {dimension_numbers = #tpu.dot_dimension_numbers<[1], [0], [0], [1], [0, 0, 1, 1], [], []>} : vector<16x32xbf16>, vector<32x32xbf16>, vector<16x32xf32> -> vector<16x32xf32>
    %47 = arith.truncf %46 : vector<16x32xf32> to vector<16x32xbf16>
    %48 = vector.extract_strided_slice %2 {offsets = [5, 0, 0], sizes = [1, 16, 16], strides = [1, 1, 1]} : vector<9x16x16xbf16> to vector<1x16x16xbf16>
    %49 = vector.shape_cast %48 : vector<1x16x16xbf16> to vector<16x16xbf16>
    %cst_18 = arith.constant dense<0.000000e+00> : vector<16x32xf32>
    %50 = tpu.matmul %49, %47, %cst_18 {dimension_numbers = #tpu.dot_dimension_numbers<[1], [0], [0], [1], [0, 0, 1, 1], [], []>} : vector<16x16xbf16>, vector<16x32xbf16>, vector<16x32xf32> -> vector<16x32xf32>
    %51 = arith.addf %43, %50 : vector<16x32xf32>
    %52 = vector.extract_strided_slice %1 {offsets = [6, 0, 0], sizes = [1, 32, 32], strides = [1, 1, 1]} : vector<9x32x32xbf16> to vector<1x32x32xbf16>
    %53 = vector.shape_cast %52 : vector<1x32x32xbf16> to vector<32x32xbf16>
    %cst_19 = arith.constant dense<0.000000e+00> : vector<16x32xf32>
    %54 = tpu.matmul %0, %53, %cst_19 {dimension_numbers = #tpu.dot_dimension_numbers<[1], [0], [0], [1], [0, 0, 1, 1], [], []>} : vector<16x32xbf16>, vector<32x32xbf16>, vector<16x32xf32> -> vector<16x32xf32>
    %55 = arith.truncf %54 : vector<16x32xf32> to vector<16x32xbf16>
    %56 = vector.extract_strided_slice %2 {offsets = [6, 0, 0], sizes = [1, 16, 16], strides = [1, 1, 1]} : vector<9x16x16xbf16> to vector<1x16x16xbf16>
    %57 = vector.shape_cast %56 : vector<1x16x16xbf16> to vector<16x16xbf16>
    %cst_20 = arith.constant dense<0.000000e+00> : vector<16x32xf32>
    %58 = tpu.matmul %57, %55, %cst_20 {dimension_numbers = #tpu.dot_dimension_numbers<[1], [0], [0], [1], [0, 0, 1, 1], [], []>} : vector<16x16xbf16>, vector<16x32xbf16>, vector<16x32xf32> -> vector<16x32xf32>
    %59 = arith.addf %51, %58 : vector<16x32xf32>
    %60 = vector.extract_strided_slice %1 {offsets = [7, 0, 0], sizes = [1, 32, 32], strides = [1, 1, 1]} : vector<9x32x32xbf16> to vector<1x32x32xbf16>
    %61 = vector.shape_cast %60 : vector<1x32x32xbf16> to vector<32x32xbf16>
    %cst_21 = arith.constant dense<0.000000e+00> : vector<16x32xf32>
    %62 = tpu.matmul %0, %61, %cst_21 {dimension_numbers = #tpu.dot_dimension_numbers<[1], [0], [0], [1], [0, 0, 1, 1], [], []>} : vector<16x32xbf16>, vector<32x32xbf16>, vector<16x32xf32> -> vector<16x32xf32>
    %63 = arith.truncf %62 : vector<16x32xf32> to vector<16x32xbf16>
    %64 = vector.extract_strided_slice %2 {offsets = [7, 0, 0], sizes = [1, 16, 16], strides = [1, 1, 1]} : vector<9x16x16xbf16> to vector<1x16x16xbf16>
    %65 = vector.shape_cast %64 : vector<1x16x16xbf16> to vector<16x16xbf16>
    %cst_22 = arith.constant dense<0.000000e+00> : vector<16x32xf32>
    %66 = tpu.matmul %65, %63, %cst_22 {dimension_numbers = #tpu.dot_dimension_numbers<[1], [0], [0], [1], [0, 0, 1, 1], [], []>} : vector<16x16xbf16>, vector<16x32xbf16>, vector<16x32xf32> -> vector<16x32xf32>
    %67 = arith.addf %59, %66 : vector<16x32xf32>
    %68 = vector.extract_strided_slice %1 {offsets = [8, 0, 0], sizes = [1, 32, 32], strides = [1, 1, 1]} : vector<9x32x32xbf16> to vector<1x32x32xbf16>
    %69 = vector.shape_cast %68 : vector<1x32x32xbf16> to vector<32x32xbf16>
    %cst_23 = arith.constant dense<0.000000e+00> : vector<16x32xf32>
    %70 = tpu.matmul %0, %69, %cst_23 {dimension_numbers = #tpu.dot_dimension_numbers<[1], [0], [0], [1], [0, 0, 1, 1], [], []>} : vector<16x32xbf16>, vector<32x32xbf16>, vector<16x32xf32> -> vector<16x32xf32>
    %71 = arith.truncf %70 : vector<16x32xf32> to vector<16x32xbf16>
    %72 = vector.extract_strided_slice %2 {offsets = [8, 0, 0], sizes = [1, 16, 16], strides = [1, 1, 1]} : vector<9x16x16xbf16> to vector<1x16x16xbf16>
    %73 = vector.shape_cast %72 : vector<1x16x16xbf16> to vector<16x16xbf16>
    %cst_24 = arith.constant dense<0.000000e+00> : vector<16x32xf32>
    %74 = tpu.matmul %73, %71, %cst_24 {dimension_numbers = #tpu.dot_dimension_numbers<[1], [0], [0], [1], [0, 0, 1, 1], [], []>} : vector<16x16xbf16>, vector<16x32xbf16>, vector<16x32xf32> -> vector<16x32xf32>
    %75 = arith.addf %67, %74 : vector<16x32xf32>
    %c0_25 = arith.constant 0 : index
    %c0_26 = arith.constant 0 : index
    %76 = vector.load %arg2[%c0_25, %c0_26] : memref<16x1xf32, #tpu.memory_space<vmem>>, vector<16x1xf32>
    %77 = vector.broadcast %76 : vector<16x1xf32> to vector<16x32xf32>
    %78 = arith.addf %75, %77 : vector<16x32xf32>
    %cst_27 = arith.constant 0.000000e+00 : f32
    %79 = vector.broadcast %cst_27 : f32 to vector<16x32xf32>
    %80 = arith.maximumf %78, %79 : vector<16x32xf32>
    %81 = arith.truncf %80 : vector<16x32xf32> to vector<16x32xbf16>
    %c0_28 = arith.constant 0 : index
    %c0_29 = arith.constant 0 : index
    %c0_30 = arith.constant 0 : index
    %82 = vector.load %arg3[%c0_28, %c0_29, %c0_30] : memref<9x16x16xbf16, #tpu.memory_space<vmem>>, vector<9x16x16xbf16>
    %cst_31 = arith.constant 0.000000e+00 : f32
    %83 = vector.broadcast %cst_31 : f32 to vector<16x32xf32>
    %84 = vector.extract_strided_slice %1 {offsets = [0, 0, 0], sizes = [1, 32, 32], strides = [1, 1, 1]} : vector<9x32x32xbf16> to vector<1x32x32xbf16>
    %85 = vector.shape_cast %84 : vector<1x32x32xbf16> to vector<32x32xbf16>
    %cst_32 = arith.constant dense<0.000000e+00> : vector<16x32xf32>
    %86 = tpu.matmul %81, %85, %cst_32 {dimension_numbers = #tpu.dot_dimension_numbers<[1], [0], [0], [1], [0, 0, 1, 1], [], []>} : vector<16x32xbf16>, vector<32x32xbf16>, vector<16x32xf32> -> vector<16x32xf32>
    %87 = arith.truncf %86 : vector<16x32xf32> to vector<16x32xbf16>
    %88 = vector.extract_strided_slice %82 {offsets = [0, 0, 0], sizes = [1, 16, 16], strides = [1, 1, 1]} : vector<9x16x16xbf16> to vector<1x16x16xbf16>
    %89 = vector.shape_cast %88 : vector<1x16x16xbf16> to vector<16x16xbf16>
    %cst_33 = arith.constant dense<0.000000e+00> : vector<16x32xf32>
    %90 = tpu.matmul %89, %87, %cst_33 {dimension_numbers = #tpu.dot_dimension_numbers<[1], [0], [0], [1], [0, 0, 1, 1], [], []>} : vector<16x16xbf16>, vector<16x32xbf16>, vector<16x32xf32> -> vector<16x32xf32>
    %91 = arith.addf %83, %90 : vector<16x32xf32>
    %92 = vector.extract_strided_slice %1 {offsets = [1, 0, 0], sizes = [1, 32, 32], strides = [1, 1, 1]} : vector<9x32x32xbf16> to vector<1x32x32xbf16>
    %93 = vector.shape_cast %92 : vector<1x32x32xbf16> to vector<32x32xbf16>
    %cst_34 = arith.constant dense<0.000000e+00> : vector<16x32xf32>
    %94 = tpu.matmul %81, %93, %cst_34 {dimension_numbers = #tpu.dot_dimension_numbers<[1], [0], [0], [1], [0, 0, 1, 1], [], []>} : vector<16x32xbf16>, vector<32x32xbf16>, vector<16x32xf32> -> vector<16x32xf32>
    %95 = arith.truncf %94 : vector<16x32xf32> to vector<16x32xbf16>
    %96 = vector.extract_strided_slice %82 {offsets = [1, 0, 0], sizes = [1, 16, 16], strides = [1, 1, 1]} : vector<9x16x16xbf16> to vector<1x16x16xbf16>
    %97 = vector.shape_cast %96 : vector<1x16x16xbf16> to vector<16x16xbf16>
    %cst_35 = arith.constant dense<0.000000e+00> : vector<16x32xf32>
    %98 = tpu.matmul %97, %95, %cst_35 {dimension_numbers = #tpu.dot_dimension_numbers<[1], [0], [0], [1], [0, 0, 1, 1], [], []>} : vector<16x16xbf16>, vector<16x32xbf16>, vector<16x32xf32> -> vector<16x32xf32>
    %99 = arith.addf %91, %98 : vector<16x32xf32>
    %100 = vector.extract_strided_slice %1 {offsets = [2, 0, 0], sizes = [1, 32, 32], strides = [1, 1, 1]} : vector<9x32x32xbf16> to vector<1x32x32xbf16>
    %101 = vector.shape_cast %100 : vector<1x32x32xbf16> to vector<32x32xbf16>
    %cst_36 = arith.constant dense<0.000000e+00> : vector<16x32xf32>
    %102 = tpu.matmul %81, %101, %cst_36 {dimension_numbers = #tpu.dot_dimension_numbers<[1], [0], [0], [1], [0, 0, 1, 1], [], []>} : vector<16x32xbf16>, vector<32x32xbf16>, vector<16x32xf32> -> vector<16x32xf32>
    %103 = arith.truncf %102 : vector<16x32xf32> to vector<16x32xbf16>
    %104 = vector.extract_strided_slice %82 {offsets = [2, 0, 0], sizes = [1, 16, 16], strides = [1, 1, 1]} : vector<9x16x16xbf16> to vector<1x16x16xbf16>
    %105 = vector.shape_cast %104 : vector<1x16x16xbf16> to vector<16x16xbf16>
    %cst_37 = arith.constant dense<0.000000e+00> : vector<16x32xf32>
    %106 = tpu.matmul %105, %103, %cst_37 {dimension_numbers = #tpu.dot_dimension_numbers<[1], [0], [0], [1], [0, 0, 1, 1], [], []>} : vector<16x16xbf16>, vector<16x32xbf16>, vector<16x32xf32> -> vector<16x32xf32>
    %107 = arith.addf %99, %106 : vector<16x32xf32>
    %108 = vector.extract_strided_slice %1 {offsets = [3, 0, 0], sizes = [1, 32, 32], strides = [1, 1, 1]} : vector<9x32x32xbf16> to vector<1x32x32xbf16>
    %109 = vector.shape_cast %108 : vector<1x32x32xbf16> to vector<32x32xbf16>
    %cst_38 = arith.constant dense<0.000000e+00> : vector<16x32xf32>
    %110 = tpu.matmul %81, %109, %cst_38 {dimension_numbers = #tpu.dot_dimension_numbers<[1], [0], [0], [1], [0, 0, 1, 1], [], []>} : vector<16x32xbf16>, vector<32x32xbf16>, vector<16x32xf32> -> vector<16x32xf32>
    %111 = arith.truncf %110 : vector<16x32xf32> to vector<16x32xbf16>
    %112 = vector.extract_strided_slice %82 {offsets = [3, 0, 0], sizes = [1, 16, 16], strides = [1, 1, 1]} : vector<9x16x16xbf16> to vector<1x16x16xbf16>
    %113 = vector.shape_cast %112 : vector<1x16x16xbf16> to vector<16x16xbf16>
    %cst_39 = arith.constant dense<0.000000e+00> : vector<16x32xf32>
    %114 = tpu.matmul %113, %111, %cst_39 {dimension_numbers = #tpu.dot_dimension_numbers<[1], [0], [0], [1], [0, 0, 1, 1], [], []>} : vector<16x16xbf16>, vector<16x32xbf16>, vector<16x32xf32> -> vector<16x32xf32>
    %115 = arith.addf %107, %114 : vector<16x32xf32>
    %116 = vector.extract_strided_slice %1 {offsets = [4, 0, 0], sizes = [1, 32, 32], strides = [1, 1, 1]} : vector<9x32x32xbf16> to vector<1x32x32xbf16>
    %117 = vector.shape_cast %116 : vector<1x32x32xbf16> to vector<32x32xbf16>
    %cst_40 = arith.constant dense<0.000000e+00> : vector<16x32xf32>
    %118 = tpu.matmul %81, %117, %cst_40 {dimension_numbers = #tpu.dot_dimension_numbers<[1], [0], [0], [1], [0, 0, 1, 1], [], []>} : vector<16x32xbf16>, vector<32x32xbf16>, vector<16x32xf32> -> vector<16x32xf32>
    %119 = arith.truncf %118 : vector<16x32xf32> to vector<16x32xbf16>
    %120 = vector.extract_strided_slice %82 {offsets = [4, 0, 0], sizes = [1, 16, 16], strides = [1, 1, 1]} : vector<9x16x16xbf16> to vector<1x16x16xbf16>
    %121 = vector.shape_cast %120 : vector<1x16x16xbf16> to vector<16x16xbf16>
    %cst_41 = arith.constant dense<0.000000e+00> : vector<16x32xf32>
    %122 = tpu.matmul %121, %119, %cst_41 {dimension_numbers = #tpu.dot_dimension_numbers<[1], [0], [0], [1], [0, 0, 1, 1], [], []>} : vector<16x16xbf16>, vector<16x32xbf16>, vector<16x32xf32> -> vector<16x32xf32>
    %123 = arith.addf %115, %122 : vector<16x32xf32>
    %124 = vector.extract_strided_slice %1 {offsets = [5, 0, 0], sizes = [1, 32, 32], strides = [1, 1, 1]} : vector<9x32x32xbf16> to vector<1x32x32xbf16>
    %125 = vector.shape_cast %124 : vector<1x32x32xbf16> to vector<32x32xbf16>
    %cst_42 = arith.constant dense<0.000000e+00> : vector<16x32xf32>
    %126 = tpu.matmul %81, %125, %cst_42 {dimension_numbers = #tpu.dot_dimension_numbers<[1], [0], [0], [1], [0, 0, 1, 1], [], []>} : vector<16x32xbf16>, vector<32x32xbf16>, vector<16x32xf32> -> vector<16x32xf32>
    %127 = arith.truncf %126 : vector<16x32xf32> to vector<16x32xbf16>
    %128 = vector.extract_strided_slice %82 {offsets = [5, 0, 0], sizes = [1, 16, 16], strides = [1, 1, 1]} : vector<9x16x16xbf16> to vector<1x16x16xbf16>
    %129 = vector.shape_cast %128 : vector<1x16x16xbf16> to vector<16x16xbf16>
    %cst_43 = arith.constant dense<0.000000e+00> : vector<16x32xf32>
    %130 = tpu.matmul %129, %127, %cst_43 {dimension_numbers = #tpu.dot_dimension_numbers<[1], [0], [0], [1], [0, 0, 1, 1], [], []>} : vector<16x16xbf16>, vector<16x32xbf16>, vector<16x32xf32> -> vector<16x32xf32>
    %131 = arith.addf %123, %130 : vector<16x32xf32>
    %132 = vector.extract_strided_slice %1 {offsets = [6, 0, 0], sizes = [1, 32, 32], strides = [1, 1, 1]} : vector<9x32x32xbf16> to vector<1x32x32xbf16>
    %133 = vector.shape_cast %132 : vector<1x32x32xbf16> to vector<32x32xbf16>
    %cst_44 = arith.constant dense<0.000000e+00> : vector<16x32xf32>
    %134 = tpu.matmul %81, %133, %cst_44 {dimension_numbers = #tpu.dot_dimension_numbers<[1], [0], [0], [1], [0, 0, 1, 1], [], []>} : vector<16x32xbf16>, vector<32x32xbf16>, vector<16x32xf32> -> vector<16x32xf32>
    %135 = arith.truncf %134 : vector<16x32xf32> to vector<16x32xbf16>
    %136 = vector.extract_strided_slice %82 {offsets = [6, 0, 0], sizes = [1, 16, 16], strides = [1, 1, 1]} : vector<9x16x16xbf16> to vector<1x16x16xbf16>
    %137 = vector.shape_cast %136 : vector<1x16x16xbf16> to vector<16x16xbf16>
    %cst_45 = arith.constant dense<0.000000e+00> : vector<16x32xf32>
    %138 = tpu.matmul %137, %135, %cst_45 {dimension_numbers = #tpu.dot_dimension_numbers<[1], [0], [0], [1], [0, 0, 1, 1], [], []>} : vector<16x16xbf16>, vector<16x32xbf16>, vector<16x32xf32> -> vector<16x32xf32>
    %139 = arith.addf %131, %138 : vector<16x32xf32>
    %140 = vector.extract_strided_slice %1 {offsets = [7, 0, 0], sizes = [1, 32, 32], strides = [1, 1, 1]} : vector<9x32x32xbf16> to vector<1x32x32xbf16>
    %141 = vector.shape_cast %140 : vector<1x32x32xbf16> to vector<32x32xbf16>
    %cst_46 = arith.constant dense<0.000000e+00> : vector<16x32xf32>
    %142 = tpu.matmul %81, %141, %cst_46 {dimension_numbers = #tpu.dot_dimension_numbers<[1], [0], [0], [1], [0, 0, 1, 1], [], []>} : vector<16x32xbf16>, vector<32x32xbf16>, vector<16x32xf32> -> vector<16x32xf32>
    %143 = arith.truncf %142 : vector<16x32xf32> to vector<16x32xbf16>
    %144 = vector.extract_strided_slice %82 {offsets = [7, 0, 0], sizes = [1, 16, 16], strides = [1, 1, 1]} : vector<9x16x16xbf16> to vector<1x16x16xbf16>
    %145 = vector.shape_cast %144 : vector<1x16x16xbf16> to vector<16x16xbf16>
    %cst_47 = arith.constant dense<0.000000e+00> : vector<16x32xf32>
    %146 = tpu.matmul %145, %143, %cst_47 {dimension_numbers = #tpu.dot_dimension_numbers<[1], [0], [0], [1], [0, 0, 1, 1], [], []>} : vector<16x16xbf16>, vector<16x32xbf16>, vector<16x32xf32> -> vector<16x32xf32>
    %147 = arith.addf %139, %146 : vector<16x32xf32>
    %148 = vector.extract_strided_slice %1 {offsets = [8, 0, 0], sizes = [1, 32, 32], strides = [1, 1, 1]} : vector<9x32x32xbf16> to vector<1x32x32xbf16>
    %149 = vector.shape_cast %148 : vector<1x32x32xbf16> to vector<32x32xbf16>
    %cst_48 = arith.constant dense<0.000000e+00> : vector<16x32xf32>
    %150 = tpu.matmul %81, %149, %cst_48 {dimension_numbers = #tpu.dot_dimension_numbers<[1], [0], [0], [1], [0, 0, 1, 1], [], []>} : vector<16x32xbf16>, vector<32x32xbf16>, vector<16x32xf32> -> vector<16x32xf32>
    %151 = arith.truncf %150 : vector<16x32xf32> to vector<16x32xbf16>
    %152 = vector.extract_strided_slice %82 {offsets = [8, 0, 0], sizes = [1, 16, 16], strides = [1, 1, 1]} : vector<9x16x16xbf16> to vector<1x16x16xbf16>
    %153 = vector.shape_cast %152 : vector<1x16x16xbf16> to vector<16x16xbf16>
    %cst_49 = arith.constant dense<0.000000e+00> : vector<16x32xf32>
    %154 = tpu.matmul %153, %151, %cst_49 {dimension_numbers = #tpu.dot_dimension_numbers<[1], [0], [0], [1], [0, 0, 1, 1], [], []>} : vector<16x16xbf16>, vector<16x32xbf16>, vector<16x32xf32> -> vector<16x32xf32>
    %155 = arith.addf %147, %154 : vector<16x32xf32>
    %c0_50 = arith.constant 0 : index
    %c0_51 = arith.constant 0 : index
    %156 = vector.load %arg4[%c0_50, %c0_51] : memref<16x1xf32, #tpu.memory_space<vmem>>, vector<16x1xf32>
    %157 = vector.broadcast %156 : vector<16x1xf32> to vector<16x32xf32>
    %158 = arith.addf %155, %157 : vector<16x32xf32>
    %159 = arith.extf %0 : vector<16x32xbf16> to vector<16x32xf32>
    %160 = arith.addf %158, %159 : vector<16x32xf32>
    %cst_52 = arith.constant 0.000000e+00 : f32
    %161 = vector.broadcast %cst_52 : f32 to vector<16x32xf32>
    %162 = arith.maximumf %160, %161 : vector<16x32xf32>
    %163 = arith.truncf %162 : vector<16x32xf32> to vector<16x32xbf16>
    %c0_53 = arith.constant 0 : index
    %c0_54 = arith.constant 0 : index
    %164 = vector.load %arg6[%c0_53, %c0_54] : memref<16x32xbf16, #tpu.memory_space<vmem>>, vector<16x32xbf16>
    tpu.vector_store %arg6[%c0_53, %c0_54], %163 {strides = array<i32>} : memref<16x32xbf16, #tpu.memory_space<vmem>>, vector<16x32xbf16>,
    return
  }
}

module attributes {stable_mosaic.version = 11 : i64} {
  func.func @kernel(%arg0: memref<32x144xbf16, #tpu.memory_space<vmem>>, %arg1: memref<144x8xbf16, #tpu.memory_space<vmem>>, %arg2: memref<32x1xf32, #tpu.memory_space<vmem>>, %arg3: memref<32x8xbf16, #tpu.memory_space<vmem>>) attributes {dimension_semantics = [], scalar_prefetch = 0 : i64, scratch_operands = 0 : i64, tpu.core_type = #tpu.core_type<tc>} {
    %c0 = arith.constant 0 : index
    %c0_0 = arith.constant 0 : index
    %0 = vector.load %arg0[%c0, %c0_0] : memref<32x144xbf16, #tpu.memory_space<vmem>>, vector<32x144xbf16>
    %c0_1 = arith.constant 0 : index
    %c0_2 = arith.constant 0 : index
    %1 = vector.load %arg1[%c0_1, %c0_2] : memref<144x8xbf16, #tpu.memory_space<vmem>>, vector<144x8xbf16>
    %cst = arith.constant dense<0.000000e+00> : vector<32x8xf32>
    %2 = tpu.matmul %0, %1, %cst {dimension_numbers = #tpu.dot_dimension_numbers<[1], [0], [0], [1], [0, 0, 1, 1], [], []>} : vector<32x144xbf16>, vector<144x8xbf16>, vector<32x8xf32> -> vector<32x8xf32>
    %c0_3 = arith.constant 0 : index
    %c0_4 = arith.constant 0 : index
    %3 = vector.load %arg2[%c0_3, %c0_4] : memref<32x1xf32, #tpu.memory_space<vmem>>, vector<32x1xf32>
    %4 = vector.broadcast %3 : vector<32x1xf32> to vector<32x8xf32>
    %5 = arith.addf %2, %4 : vector<32x8xf32>
    %cst_5 = arith.constant 0.000000e+00 : f32
    %6 = vector.broadcast %cst_5 : f32 to vector<32x8xf32>
    %7 = arith.maximumf %5, %6 : vector<32x8xf32>
    %8 = arith.truncf %7 : vector<32x8xf32> to vector<32x8xbf16>
    %c0_6 = arith.constant 0 : index
    %c0_7 = arith.constant 0 : index
    %9 = vector.load %arg3[%c0_6, %c0_7] : memref<32x8xbf16, #tpu.memory_space<vmem>>, vector<32x8xbf16>
    tpu.vector_store %arg3[%c0_6, %c0_7], %8 {strides = array<i32>} : memref<32x8xbf16, #tpu.memory_space<vmem>>, vector<32x8xbf16>,
    return
  }
}

module attributes {stable_mosaic.version = 11 : i64} {
  func.func @kernel(%arg0: memref<32x8xbf16, #tpu.memory_space<vmem>>, %arg1: memref<9x32x32xbf16, #tpu.memory_space<vmem>>, %arg2: memref<32x1xf32, #tpu.memory_space<vmem>>, %arg3: memref<9x32x32xbf16, #tpu.memory_space<vmem>>, %arg4: memref<32x1xf32, #tpu.memory_space<vmem>>, %arg5: memref<9x8x8xbf16, #tpu.memory_space<vmem>>, %arg6: memref<32x8xbf16, #tpu.memory_space<vmem>>) attributes {dimension_semantics = [], scalar_prefetch = 0 : i64, scratch_operands = 0 : i64, tpu.core_type = #tpu.core_type<tc>} {
    %c0 = arith.constant 0 : index
    %c0_0 = arith.constant 0 : index
    %0 = vector.load %arg0[%c0, %c0_0] : memref<32x8xbf16, #tpu.memory_space<vmem>>, vector<32x8xbf16>
    %c0_1 = arith.constant 0 : index
    %c0_2 = arith.constant 0 : index
    %c0_3 = arith.constant 0 : index
    %1 = vector.load %arg5[%c0_1, %c0_2, %c0_3] : memref<9x8x8xbf16, #tpu.memory_space<vmem>>, vector<9x8x8xbf16>
    %c0_4 = arith.constant 0 : index
    %c0_5 = arith.constant 0 : index
    %c0_6 = arith.constant 0 : index
    %2 = vector.load %arg1[%c0_4, %c0_5, %c0_6] : memref<9x32x32xbf16, #tpu.memory_space<vmem>>, vector<9x32x32xbf16>
    %cst = arith.constant 0.000000e+00 : f32
    %3 = vector.broadcast %cst : f32 to vector<32x8xf32>
    %4 = vector.extract_strided_slice %1 {offsets = [0, 0, 0], sizes = [1, 8, 8], strides = [1, 1, 1]} : vector<9x8x8xbf16> to vector<1x8x8xbf16>
    %5 = vector.shape_cast %4 : vector<1x8x8xbf16> to vector<8x8xbf16>
    %cst_7 = arith.constant dense<0.000000e+00> : vector<32x8xf32>
    %6 = tpu.matmul %0, %5, %cst_7 {dimension_numbers = #tpu.dot_dimension_numbers<[1], [0], [0], [1], [0, 0, 1, 1], [], []>} : vector<32x8xbf16>, vector<8x8xbf16>, vector<32x8xf32> -> vector<32x8xf32>
    %7 = arith.truncf %6 : vector<32x8xf32> to vector<32x8xbf16>
    %8 = vector.extract_strided_slice %2 {offsets = [0, 0, 0], sizes = [1, 32, 32], strides = [1, 1, 1]} : vector<9x32x32xbf16> to vector<1x32x32xbf16>
    %9 = vector.shape_cast %8 : vector<1x32x32xbf16> to vector<32x32xbf16>
    %cst_8 = arith.constant dense<0.000000e+00> : vector<32x8xf32>
    %10 = tpu.matmul %9, %7, %cst_8 {dimension_numbers = #tpu.dot_dimension_numbers<[1], [0], [0], [1], [0, 0, 1, 1], [], []>} : vector<32x32xbf16>, vector<32x8xbf16>, vector<32x8xf32> -> vector<32x8xf32>
    %11 = arith.addf %3, %10 : vector<32x8xf32>
    %12 = vector.extract_strided_slice %1 {offsets = [1, 0, 0], sizes = [1, 8, 8], strides = [1, 1, 1]} : vector<9x8x8xbf16> to vector<1x8x8xbf16>
    %13 = vector.shape_cast %12 : vector<1x8x8xbf16> to vector<8x8xbf16>
    %cst_9 = arith.constant dense<0.000000e+00> : vector<32x8xf32>
    %14 = tpu.matmul %0, %13, %cst_9 {dimension_numbers = #tpu.dot_dimension_numbers<[1], [0], [0], [1], [0, 0, 1, 1], [], []>} : vector<32x8xbf16>, vector<8x8xbf16>, vector<32x8xf32> -> vector<32x8xf32>
    %15 = arith.truncf %14 : vector<32x8xf32> to vector<32x8xbf16>
    %16 = vector.extract_strided_slice %2 {offsets = [1, 0, 0], sizes = [1, 32, 32], strides = [1, 1, 1]} : vector<9x32x32xbf16> to vector<1x32x32xbf16>
    %17 = vector.shape_cast %16 : vector<1x32x32xbf16> to vector<32x32xbf16>
    %cst_10 = arith.constant dense<0.000000e+00> : vector<32x8xf32>
    %18 = tpu.matmul %17, %15, %cst_10 {dimension_numbers = #tpu.dot_dimension_numbers<[1], [0], [0], [1], [0, 0, 1, 1], [], []>} : vector<32x32xbf16>, vector<32x8xbf16>, vector<32x8xf32> -> vector<32x8xf32>
    %19 = arith.addf %11, %18 : vector<32x8xf32>
    %20 = vector.extract_strided_slice %1 {offsets = [2, 0, 0], sizes = [1, 8, 8], strides = [1, 1, 1]} : vector<9x8x8xbf16> to vector<1x8x8xbf16>
    %21 = vector.shape_cast %20 : vector<1x8x8xbf16> to vector<8x8xbf16>
    %cst_11 = arith.constant dense<0.000000e+00> : vector<32x8xf32>
    %22 = tpu.matmul %0, %21, %cst_11 {dimension_numbers = #tpu.dot_dimension_numbers<[1], [0], [0], [1], [0, 0, 1, 1], [], []>} : vector<32x8xbf16>, vector<8x8xbf16>, vector<32x8xf32> -> vector<32x8xf32>
    %23 = arith.truncf %22 : vector<32x8xf32> to vector<32x8xbf16>
    %24 = vector.extract_strided_slice %2 {offsets = [2, 0, 0], sizes = [1, 32, 32], strides = [1, 1, 1]} : vector<9x32x32xbf16> to vector<1x32x32xbf16>
    %25 = vector.shape_cast %24 : vector<1x32x32xbf16> to vector<32x32xbf16>
    %cst_12 = arith.constant dense<0.000000e+00> : vector<32x8xf32>
    %26 = tpu.matmul %25, %23, %cst_12 {dimension_numbers = #tpu.dot_dimension_numbers<[1], [0], [0], [1], [0, 0, 1, 1], [], []>} : vector<32x32xbf16>, vector<32x8xbf16>, vector<32x8xf32> -> vector<32x8xf32>
    %27 = arith.addf %19, %26 : vector<32x8xf32>
    %28 = vector.extract_strided_slice %1 {offsets = [3, 0, 0], sizes = [1, 8, 8], strides = [1, 1, 1]} : vector<9x8x8xbf16> to vector<1x8x8xbf16>
    %29 = vector.shape_cast %28 : vector<1x8x8xbf16> to vector<8x8xbf16>
    %cst_13 = arith.constant dense<0.000000e+00> : vector<32x8xf32>
    %30 = tpu.matmul %0, %29, %cst_13 {dimension_numbers = #tpu.dot_dimension_numbers<[1], [0], [0], [1], [0, 0, 1, 1], [], []>} : vector<32x8xbf16>, vector<8x8xbf16>, vector<32x8xf32> -> vector<32x8xf32>
    %31 = arith.truncf %30 : vector<32x8xf32> to vector<32x8xbf16>
    %32 = vector.extract_strided_slice %2 {offsets = [3, 0, 0], sizes = [1, 32, 32], strides = [1, 1, 1]} : vector<9x32x32xbf16> to vector<1x32x32xbf16>
    %33 = vector.shape_cast %32 : vector<1x32x32xbf16> to vector<32x32xbf16>
    %cst_14 = arith.constant dense<0.000000e+00> : vector<32x8xf32>
    %34 = tpu.matmul %33, %31, %cst_14 {dimension_numbers = #tpu.dot_dimension_numbers<[1], [0], [0], [1], [0, 0, 1, 1], [], []>} : vector<32x32xbf16>, vector<32x8xbf16>, vector<32x8xf32> -> vector<32x8xf32>
    %35 = arith.addf %27, %34 : vector<32x8xf32>
    %36 = vector.extract_strided_slice %1 {offsets = [4, 0, 0], sizes = [1, 8, 8], strides = [1, 1, 1]} : vector<9x8x8xbf16> to vector<1x8x8xbf16>
    %37 = vector.shape_cast %36 : vector<1x8x8xbf16> to vector<8x8xbf16>
    %cst_15 = arith.constant dense<0.000000e+00> : vector<32x8xf32>
    %38 = tpu.matmul %0, %37, %cst_15 {dimension_numbers = #tpu.dot_dimension_numbers<[1], [0], [0], [1], [0, 0, 1, 1], [], []>} : vector<32x8xbf16>, vector<8x8xbf16>, vector<32x8xf32> -> vector<32x8xf32>
    %39 = arith.truncf %38 : vector<32x8xf32> to vector<32x8xbf16>
    %40 = vector.extract_strided_slice %2 {offsets = [4, 0, 0], sizes = [1, 32, 32], strides = [1, 1, 1]} : vector<9x32x32xbf16> to vector<1x32x32xbf16>
    %41 = vector.shape_cast %40 : vector<1x32x32xbf16> to vector<32x32xbf16>
    %cst_16 = arith.constant dense<0.000000e+00> : vector<32x8xf32>
    %42 = tpu.matmul %41, %39, %cst_16 {dimension_numbers = #tpu.dot_dimension_numbers<[1], [0], [0], [1], [0, 0, 1, 1], [], []>} : vector<32x32xbf16>, vector<32x8xbf16>, vector<32x8xf32> -> vector<32x8xf32>
    %43 = arith.addf %35, %42 : vector<32x8xf32>
    %44 = vector.extract_strided_slice %1 {offsets = [5, 0, 0], sizes = [1, 8, 8], strides = [1, 1, 1]} : vector<9x8x8xbf16> to vector<1x8x8xbf16>
    %45 = vector.shape_cast %44 : vector<1x8x8xbf16> to vector<8x8xbf16>
    %cst_17 = arith.constant dense<0.000000e+00> : vector<32x8xf32>
    %46 = tpu.matmul %0, %45, %cst_17 {dimension_numbers = #tpu.dot_dimension_numbers<[1], [0], [0], [1], [0, 0, 1, 1], [], []>} : vector<32x8xbf16>, vector<8x8xbf16>, vector<32x8xf32> -> vector<32x8xf32>
    %47 = arith.truncf %46 : vector<32x8xf32> to vector<32x8xbf16>
    %48 = vector.extract_strided_slice %2 {offsets = [5, 0, 0], sizes = [1, 32, 32], strides = [1, 1, 1]} : vector<9x32x32xbf16> to vector<1x32x32xbf16>
    %49 = vector.shape_cast %48 : vector<1x32x32xbf16> to vector<32x32xbf16>
    %cst_18 = arith.constant dense<0.000000e+00> : vector<32x8xf32>
    %50 = tpu.matmul %49, %47, %cst_18 {dimension_numbers = #tpu.dot_dimension_numbers<[1], [0], [0], [1], [0, 0, 1, 1], [], []>} : vector<32x32xbf16>, vector<32x8xbf16>, vector<32x8xf32> -> vector<32x8xf32>
    %51 = arith.addf %43, %50 : vector<32x8xf32>
    %52 = vector.extract_strided_slice %1 {offsets = [6, 0, 0], sizes = [1, 8, 8], strides = [1, 1, 1]} : vector<9x8x8xbf16> to vector<1x8x8xbf16>
    %53 = vector.shape_cast %52 : vector<1x8x8xbf16> to vector<8x8xbf16>
    %cst_19 = arith.constant dense<0.000000e+00> : vector<32x8xf32>
    %54 = tpu.matmul %0, %53, %cst_19 {dimension_numbers = #tpu.dot_dimension_numbers<[1], [0], [0], [1], [0, 0, 1, 1], [], []>} : vector<32x8xbf16>, vector<8x8xbf16>, vector<32x8xf32> -> vector<32x8xf32>
    %55 = arith.truncf %54 : vector<32x8xf32> to vector<32x8xbf16>
    %56 = vector.extract_strided_slice %2 {offsets = [6, 0, 0], sizes = [1, 32, 32], strides = [1, 1, 1]} : vector<9x32x32xbf16> to vector<1x32x32xbf16>
    %57 = vector.shape_cast %56 : vector<1x32x32xbf16> to vector<32x32xbf16>
    %cst_20 = arith.constant dense<0.000000e+00> : vector<32x8xf32>
    %58 = tpu.matmul %57, %55, %cst_20 {dimension_numbers = #tpu.dot_dimension_numbers<[1], [0], [0], [1], [0, 0, 1, 1], [], []>} : vector<32x32xbf16>, vector<32x8xbf16>, vector<32x8xf32> -> vector<32x8xf32>
    %59 = arith.addf %51, %58 : vector<32x8xf32>
    %60 = vector.extract_strided_slice %1 {offsets = [7, 0, 0], sizes = [1, 8, 8], strides = [1, 1, 1]} : vector<9x8x8xbf16> to vector<1x8x8xbf16>
    %61 = vector.shape_cast %60 : vector<1x8x8xbf16> to vector<8x8xbf16>
    %cst_21 = arith.constant dense<0.000000e+00> : vector<32x8xf32>
    %62 = tpu.matmul %0, %61, %cst_21 {dimension_numbers = #tpu.dot_dimension_numbers<[1], [0], [0], [1], [0, 0, 1, 1], [], []>} : vector<32x8xbf16>, vector<8x8xbf16>, vector<32x8xf32> -> vector<32x8xf32>
    %63 = arith.truncf %62 : vector<32x8xf32> to vector<32x8xbf16>
    %64 = vector.extract_strided_slice %2 {offsets = [7, 0, 0], sizes = [1, 32, 32], strides = [1, 1, 1]} : vector<9x32x32xbf16> to vector<1x32x32xbf16>
    %65 = vector.shape_cast %64 : vector<1x32x32xbf16> to vector<32x32xbf16>
    %cst_22 = arith.constant dense<0.000000e+00> : vector<32x8xf32>
    %66 = tpu.matmul %65, %63, %cst_22 {dimension_numbers = #tpu.dot_dimension_numbers<[1], [0], [0], [1], [0, 0, 1, 1], [], []>} : vector<32x32xbf16>, vector<32x8xbf16>, vector<32x8xf32> -> vector<32x8xf32>
    %67 = arith.addf %59, %66 : vector<32x8xf32>
    %68 = vector.extract_strided_slice %1 {offsets = [8, 0, 0], sizes = [1, 8, 8], strides = [1, 1, 1]} : vector<9x8x8xbf16> to vector<1x8x8xbf16>
    %69 = vector.shape_cast %68 : vector<1x8x8xbf16> to vector<8x8xbf16>
    %cst_23 = arith.constant dense<0.000000e+00> : vector<32x8xf32>
    %70 = tpu.matmul %0, %69, %cst_23 {dimension_numbers = #tpu.dot_dimension_numbers<[1], [0], [0], [1], [0, 0, 1, 1], [], []>} : vector<32x8xbf16>, vector<8x8xbf16>, vector<32x8xf32> -> vector<32x8xf32>
    %71 = arith.truncf %70 : vector<32x8xf32> to vector<32x8xbf16>
    %72 = vector.extract_strided_slice %2 {offsets = [8, 0, 0], sizes = [1, 32, 32], strides = [1, 1, 1]} : vector<9x32x32xbf16> to vector<1x32x32xbf16>
    %73 = vector.shape_cast %72 : vector<1x32x32xbf16> to vector<32x32xbf16>
    %cst_24 = arith.constant dense<0.000000e+00> : vector<32x8xf32>
    %74 = tpu.matmul %73, %71, %cst_24 {dimension_numbers = #tpu.dot_dimension_numbers<[1], [0], [0], [1], [0, 0, 1, 1], [], []>} : vector<32x32xbf16>, vector<32x8xbf16>, vector<32x8xf32> -> vector<32x8xf32>
    %75 = arith.addf %67, %74 : vector<32x8xf32>
    %c0_25 = arith.constant 0 : index
    %c0_26 = arith.constant 0 : index
    %76 = vector.load %arg2[%c0_25, %c0_26] : memref<32x1xf32, #tpu.memory_space<vmem>>, vector<32x1xf32>
    %77 = vector.broadcast %76 : vector<32x1xf32> to vector<32x8xf32>
    %78 = arith.addf %75, %77 : vector<32x8xf32>
    %cst_27 = arith.constant 0.000000e+00 : f32
    %79 = vector.broadcast %cst_27 : f32 to vector<32x8xf32>
    %80 = arith.maximumf %78, %79 : vector<32x8xf32>
    %81 = arith.truncf %80 : vector<32x8xf32> to vector<32x8xbf16>
    %c0_28 = arith.constant 0 : index
    %c0_29 = arith.constant 0 : index
    %c0_30 = arith.constant 0 : index
    %82 = vector.load %arg3[%c0_28, %c0_29, %c0_30] : memref<9x32x32xbf16, #tpu.memory_space<vmem>>, vector<9x32x32xbf16>
    %cst_31 = arith.constant 0.000000e+00 : f32
    %83 = vector.broadcast %cst_31 : f32 to vector<32x8xf32>
    %84 = vector.extract_strided_slice %1 {offsets = [0, 0, 0], sizes = [1, 8, 8], strides = [1, 1, 1]} : vector<9x8x8xbf16> to vector<1x8x8xbf16>
    %85 = vector.shape_cast %84 : vector<1x8x8xbf16> to vector<8x8xbf16>
    %cst_32 = arith.constant dense<0.000000e+00> : vector<32x8xf32>
    %86 = tpu.matmul %81, %85, %cst_32 {dimension_numbers = #tpu.dot_dimension_numbers<[1], [0], [0], [1], [0, 0, 1, 1], [], []>} : vector<32x8xbf16>, vector<8x8xbf16>, vector<32x8xf32> -> vector<32x8xf32>
    %87 = arith.truncf %86 : vector<32x8xf32> to vector<32x8xbf16>
    %88 = vector.extract_strided_slice %82 {offsets = [0, 0, 0], sizes = [1, 32, 32], strides = [1, 1, 1]} : vector<9x32x32xbf16> to vector<1x32x32xbf16>
    %89 = vector.shape_cast %88 : vector<1x32x32xbf16> to vector<32x32xbf16>
    %cst_33 = arith.constant dense<0.000000e+00> : vector<32x8xf32>
    %90 = tpu.matmul %89, %87, %cst_33 {dimension_numbers = #tpu.dot_dimension_numbers<[1], [0], [0], [1], [0, 0, 1, 1], [], []>} : vector<32x32xbf16>, vector<32x8xbf16>, vector<32x8xf32> -> vector<32x8xf32>
    %91 = arith.addf %83, %90 : vector<32x8xf32>
    %92 = vector.extract_strided_slice %1 {offsets = [1, 0, 0], sizes = [1, 8, 8], strides = [1, 1, 1]} : vector<9x8x8xbf16> to vector<1x8x8xbf16>
    %93 = vector.shape_cast %92 : vector<1x8x8xbf16> to vector<8x8xbf16>
    %cst_34 = arith.constant dense<0.000000e+00> : vector<32x8xf32>
    %94 = tpu.matmul %81, %93, %cst_34 {dimension_numbers = #tpu.dot_dimension_numbers<[1], [0], [0], [1], [0, 0, 1, 1], [], []>} : vector<32x8xbf16>, vector<8x8xbf16>, vector<32x8xf32> -> vector<32x8xf32>
    %95 = arith.truncf %94 : vector<32x8xf32> to vector<32x8xbf16>
    %96 = vector.extract_strided_slice %82 {offsets = [1, 0, 0], sizes = [1, 32, 32], strides = [1, 1, 1]} : vector<9x32x32xbf16> to vector<1x32x32xbf16>
    %97 = vector.shape_cast %96 : vector<1x32x32xbf16> to vector<32x32xbf16>
    %cst_35 = arith.constant dense<0.000000e+00> : vector<32x8xf32>
    %98 = tpu.matmul %97, %95, %cst_35 {dimension_numbers = #tpu.dot_dimension_numbers<[1], [0], [0], [1], [0, 0, 1, 1], [], []>} : vector<32x32xbf16>, vector<32x8xbf16>, vector<32x8xf32> -> vector<32x8xf32>
    %99 = arith.addf %91, %98 : vector<32x8xf32>
    %100 = vector.extract_strided_slice %1 {offsets = [2, 0, 0], sizes = [1, 8, 8], strides = [1, 1, 1]} : vector<9x8x8xbf16> to vector<1x8x8xbf16>
    %101 = vector.shape_cast %100 : vector<1x8x8xbf16> to vector<8x8xbf16>
    %cst_36 = arith.constant dense<0.000000e+00> : vector<32x8xf32>
    %102 = tpu.matmul %81, %101, %cst_36 {dimension_numbers = #tpu.dot_dimension_numbers<[1], [0], [0], [1], [0, 0, 1, 1], [], []>} : vector<32x8xbf16>, vector<8x8xbf16>, vector<32x8xf32> -> vector<32x8xf32>
    %103 = arith.truncf %102 : vector<32x8xf32> to vector<32x8xbf16>
    %104 = vector.extract_strided_slice %82 {offsets = [2, 0, 0], sizes = [1, 32, 32], strides = [1, 1, 1]} : vector<9x32x32xbf16> to vector<1x32x32xbf16>
    %105 = vector.shape_cast %104 : vector<1x32x32xbf16> to vector<32x32xbf16>
    %cst_37 = arith.constant dense<0.000000e+00> : vector<32x8xf32>
    %106 = tpu.matmul %105, %103, %cst_37 {dimension_numbers = #tpu.dot_dimension_numbers<[1], [0], [0], [1], [0, 0, 1, 1], [], []>} : vector<32x32xbf16>, vector<32x8xbf16>, vector<32x8xf32> -> vector<32x8xf32>
    %107 = arith.addf %99, %106 : vector<32x8xf32>
    %108 = vector.extract_strided_slice %1 {offsets = [3, 0, 0], sizes = [1, 8, 8], strides = [1, 1, 1]} : vector<9x8x8xbf16> to vector<1x8x8xbf16>
    %109 = vector.shape_cast %108 : vector<1x8x8xbf16> to vector<8x8xbf16>
    %cst_38 = arith.constant dense<0.000000e+00> : vector<32x8xf32>
    %110 = tpu.matmul %81, %109, %cst_38 {dimension_numbers = #tpu.dot_dimension_numbers<[1], [0], [0], [1], [0, 0, 1, 1], [], []>} : vector<32x8xbf16>, vector<8x8xbf16>, vector<32x8xf32> -> vector<32x8xf32>
    %111 = arith.truncf %110 : vector<32x8xf32> to vector<32x8xbf16>
    %112 = vector.extract_strided_slice %82 {offsets = [3, 0, 0], sizes = [1, 32, 32], strides = [1, 1, 1]} : vector<9x32x32xbf16> to vector<1x32x32xbf16>
    %113 = vector.shape_cast %112 : vector<1x32x32xbf16> to vector<32x32xbf16>
    %cst_39 = arith.constant dense<0.000000e+00> : vector<32x8xf32>
    %114 = tpu.matmul %113, %111, %cst_39 {dimension_numbers = #tpu.dot_dimension_numbers<[1], [0], [0], [1], [0, 0, 1, 1], [], []>} : vector<32x32xbf16>, vector<32x8xbf16>, vector<32x8xf32> -> vector<32x8xf32>
    %115 = arith.addf %107, %114 : vector<32x8xf32>
    %116 = vector.extract_strided_slice %1 {offsets = [4, 0, 0], sizes = [1, 8, 8], strides = [1, 1, 1]} : vector<9x8x8xbf16> to vector<1x8x8xbf16>
    %117 = vector.shape_cast %116 : vector<1x8x8xbf16> to vector<8x8xbf16>
    %cst_40 = arith.constant dense<0.000000e+00> : vector<32x8xf32>
    %118 = tpu.matmul %81, %117, %cst_40 {dimension_numbers = #tpu.dot_dimension_numbers<[1], [0], [0], [1], [0, 0, 1, 1], [], []>} : vector<32x8xbf16>, vector<8x8xbf16>, vector<32x8xf32> -> vector<32x8xf32>
    %119 = arith.truncf %118 : vector<32x8xf32> to vector<32x8xbf16>
    %120 = vector.extract_strided_slice %82 {offsets = [4, 0, 0], sizes = [1, 32, 32], strides = [1, 1, 1]} : vector<9x32x32xbf16> to vector<1x32x32xbf16>
    %121 = vector.shape_cast %120 : vector<1x32x32xbf16> to vector<32x32xbf16>
    %cst_41 = arith.constant dense<0.000000e+00> : vector<32x8xf32>
    %122 = tpu.matmul %121, %119, %cst_41 {dimension_numbers = #tpu.dot_dimension_numbers<[1], [0], [0], [1], [0, 0, 1, 1], [], []>} : vector<32x32xbf16>, vector<32x8xbf16>, vector<32x8xf32> -> vector<32x8xf32>
    %123 = arith.addf %115, %122 : vector<32x8xf32>
    %124 = vector.extract_strided_slice %1 {offsets = [5, 0, 0], sizes = [1, 8, 8], strides = [1, 1, 1]} : vector<9x8x8xbf16> to vector<1x8x8xbf16>
    %125 = vector.shape_cast %124 : vector<1x8x8xbf16> to vector<8x8xbf16>
    %cst_42 = arith.constant dense<0.000000e+00> : vector<32x8xf32>
    %126 = tpu.matmul %81, %125, %cst_42 {dimension_numbers = #tpu.dot_dimension_numbers<[1], [0], [0], [1], [0, 0, 1, 1], [], []>} : vector<32x8xbf16>, vector<8x8xbf16>, vector<32x8xf32> -> vector<32x8xf32>
    %127 = arith.truncf %126 : vector<32x8xf32> to vector<32x8xbf16>
    %128 = vector.extract_strided_slice %82 {offsets = [5, 0, 0], sizes = [1, 32, 32], strides = [1, 1, 1]} : vector<9x32x32xbf16> to vector<1x32x32xbf16>
    %129 = vector.shape_cast %128 : vector<1x32x32xbf16> to vector<32x32xbf16>
    %cst_43 = arith.constant dense<0.000000e+00> : vector<32x8xf32>
    %130 = tpu.matmul %129, %127, %cst_43 {dimension_numbers = #tpu.dot_dimension_numbers<[1], [0], [0], [1], [0, 0, 1, 1], [], []>} : vector<32x32xbf16>, vector<32x8xbf16>, vector<32x8xf32> -> vector<32x8xf32>
    %131 = arith.addf %123, %130 : vector<32x8xf32>
    %132 = vector.extract_strided_slice %1 {offsets = [6, 0, 0], sizes = [1, 8, 8], strides = [1, 1, 1]} : vector<9x8x8xbf16> to vector<1x8x8xbf16>
    %133 = vector.shape_cast %132 : vector<1x8x8xbf16> to vector<8x8xbf16>
    %cst_44 = arith.constant dense<0.000000e+00> : vector<32x8xf32>
    %134 = tpu.matmul %81, %133, %cst_44 {dimension_numbers = #tpu.dot_dimension_numbers<[1], [0], [0], [1], [0, 0, 1, 1], [], []>} : vector<32x8xbf16>, vector<8x8xbf16>, vector<32x8xf32> -> vector<32x8xf32>
    %135 = arith.truncf %134 : vector<32x8xf32> to vector<32x8xbf16>
    %136 = vector.extract_strided_slice %82 {offsets = [6, 0, 0], sizes = [1, 32, 32], strides = [1, 1, 1]} : vector<9x32x32xbf16> to vector<1x32x32xbf16>
    %137 = vector.shape_cast %136 : vector<1x32x32xbf16> to vector<32x32xbf16>
    %cst_45 = arith.constant dense<0.000000e+00> : vector<32x8xf32>
    %138 = tpu.matmul %137, %135, %cst_45 {dimension_numbers = #tpu.dot_dimension_numbers<[1], [0], [0], [1], [0, 0, 1, 1], [], []>} : vector<32x32xbf16>, vector<32x8xbf16>, vector<32x8xf32> -> vector<32x8xf32>
    %139 = arith.addf %131, %138 : vector<32x8xf32>
    %140 = vector.extract_strided_slice %1 {offsets = [7, 0, 0], sizes = [1, 8, 8], strides = [1, 1, 1]} : vector<9x8x8xbf16> to vector<1x8x8xbf16>
    %141 = vector.shape_cast %140 : vector<1x8x8xbf16> to vector<8x8xbf16>
    %cst_46 = arith.constant dense<0.000000e+00> : vector<32x8xf32>
    %142 = tpu.matmul %81, %141, %cst_46 {dimension_numbers = #tpu.dot_dimension_numbers<[1], [0], [0], [1], [0, 0, 1, 1], [], []>} : vector<32x8xbf16>, vector<8x8xbf16>, vector<32x8xf32> -> vector<32x8xf32>
    %143 = arith.truncf %142 : vector<32x8xf32> to vector<32x8xbf16>
    %144 = vector.extract_strided_slice %82 {offsets = [7, 0, 0], sizes = [1, 32, 32], strides = [1, 1, 1]} : vector<9x32x32xbf16> to vector<1x32x32xbf16>
    %145 = vector.shape_cast %144 : vector<1x32x32xbf16> to vector<32x32xbf16>
    %cst_47 = arith.constant dense<0.000000e+00> : vector<32x8xf32>
    %146 = tpu.matmul %145, %143, %cst_47 {dimension_numbers = #tpu.dot_dimension_numbers<[1], [0], [0], [1], [0, 0, 1, 1], [], []>} : vector<32x32xbf16>, vector<32x8xbf16>, vector<32x8xf32> -> vector<32x8xf32>
    %147 = arith.addf %139, %146 : vector<32x8xf32>
    %148 = vector.extract_strided_slice %1 {offsets = [8, 0, 0], sizes = [1, 8, 8], strides = [1, 1, 1]} : vector<9x8x8xbf16> to vector<1x8x8xbf16>
    %149 = vector.shape_cast %148 : vector<1x8x8xbf16> to vector<8x8xbf16>
    %cst_48 = arith.constant dense<0.000000e+00> : vector<32x8xf32>
    %150 = tpu.matmul %81, %149, %cst_48 {dimension_numbers = #tpu.dot_dimension_numbers<[1], [0], [0], [1], [0, 0, 1, 1], [], []>} : vector<32x8xbf16>, vector<8x8xbf16>, vector<32x8xf32> -> vector<32x8xf32>
    %151 = arith.truncf %150 : vector<32x8xf32> to vector<32x8xbf16>
    %152 = vector.extract_strided_slice %82 {offsets = [8, 0, 0], sizes = [1, 32, 32], strides = [1, 1, 1]} : vector<9x32x32xbf16> to vector<1x32x32xbf16>
    %153 = vector.shape_cast %152 : vector<1x32x32xbf16> to vector<32x32xbf16>
    %cst_49 = arith.constant dense<0.000000e+00> : vector<32x8xf32>
    %154 = tpu.matmul %153, %151, %cst_49 {dimension_numbers = #tpu.dot_dimension_numbers<[1], [0], [0], [1], [0, 0, 1, 1], [], []>} : vector<32x32xbf16>, vector<32x8xbf16>, vector<32x8xf32> -> vector<32x8xf32>
    %155 = arith.addf %147, %154 : vector<32x8xf32>
    %c0_50 = arith.constant 0 : index
    %c0_51 = arith.constant 0 : index
    %156 = vector.load %arg4[%c0_50, %c0_51] : memref<32x1xf32, #tpu.memory_space<vmem>>, vector<32x1xf32>
    %157 = vector.broadcast %156 : vector<32x1xf32> to vector<32x8xf32>
    %158 = arith.addf %155, %157 : vector<32x8xf32>
    %159 = arith.extf %0 : vector<32x8xbf16> to vector<32x8xf32>
    %160 = arith.addf %158, %159 : vector<32x8xf32>
    %cst_52 = arith.constant 0.000000e+00 : f32
    %161 = vector.broadcast %cst_52 : f32 to vector<32x8xf32>
    %162 = arith.maximumf %160, %161 : vector<32x8xf32>
    %163 = arith.truncf %162 : vector<32x8xf32> to vector<32x8xbf16>
    %c0_53 = arith.constant 0 : index
    %c0_54 = arith.constant 0 : index
    %164 = vector.load %arg6[%c0_53, %c0_54] : memref<32x8xbf16, #tpu.memory_space<vmem>>, vector<32x8xbf16>
    tpu.vector_store %arg6[%c0_53, %c0_54], %163 {strides = array<i32>} : memref<32x8xbf16, #tpu.memory_space<vmem>>, vector<32x8xbf16>,
    return
  }
}

module attributes {stable_mosaic.version = 11 : i64} {
  func.func @kernel(%arg0: memref<32x8xbf16, #tpu.memory_space<vmem>>, %arg1: memref<9x32x32xbf16, #tpu.memory_space<vmem>>, %arg2: memref<32x1xf32, #tpu.memory_space<vmem>>, %arg3: memref<32x16xbf16, #tpu.memory_space<vmem>>, %arg4: memref<16x8xbf16, #tpu.memory_space<vmem>>, %arg5: memref<9x8x8xbf16, #tpu.memory_space<vmem>>, %arg6: memref<32x8xbf16, #tpu.memory_space<vmem>>) attributes {dimension_semantics = [], scalar_prefetch = 0 : i64, scratch_operands = 0 : i64, tpu.core_type = #tpu.core_type<tc>} {
    %c0 = arith.constant 0 : index
    %c0_0 = arith.constant 0 : index
    %0 = vector.load %arg0[%c0, %c0_0] : memref<32x8xbf16, #tpu.memory_space<vmem>>, vector<32x8xbf16>
    %c0_1 = arith.constant 0 : index
    %c0_2 = arith.constant 0 : index
    %c0_3 = arith.constant 0 : index
    %1 = vector.load %arg1[%c0_1, %c0_2, %c0_3] : memref<9x32x32xbf16, #tpu.memory_space<vmem>>, vector<9x32x32xbf16>
    %c0_4 = arith.constant 0 : index
    %c0_5 = arith.constant 0 : index
    %c0_6 = arith.constant 0 : index
    %2 = vector.load %arg5[%c0_4, %c0_5, %c0_6] : memref<9x8x8xbf16, #tpu.memory_space<vmem>>, vector<9x8x8xbf16>
    %cst = arith.constant 0.000000e+00 : f32
    %3 = vector.broadcast %cst : f32 to vector<32x8xf32>
    %4 = vector.extract_strided_slice %2 {offsets = [0, 0, 0], sizes = [1, 8, 8], strides = [1, 1, 1]} : vector<9x8x8xbf16> to vector<1x8x8xbf16>
    %5 = vector.shape_cast %4 : vector<1x8x8xbf16> to vector<8x8xbf16>
    %cst_7 = arith.constant dense<0.000000e+00> : vector<32x8xf32>
    %6 = tpu.matmul %0, %5, %cst_7 {dimension_numbers = #tpu.dot_dimension_numbers<[1], [0], [0], [1], [0, 0, 1, 1], [], []>} : vector<32x8xbf16>, vector<8x8xbf16>, vector<32x8xf32> -> vector<32x8xf32>
    %7 = arith.truncf %6 : vector<32x8xf32> to vector<32x8xbf16>
    %8 = vector.extract_strided_slice %1 {offsets = [0, 0, 0], sizes = [1, 32, 32], strides = [1, 1, 1]} : vector<9x32x32xbf16> to vector<1x32x32xbf16>
    %9 = vector.shape_cast %8 : vector<1x32x32xbf16> to vector<32x32xbf16>
    %cst_8 = arith.constant dense<0.000000e+00> : vector<32x8xf32>
    %10 = tpu.matmul %9, %7, %cst_8 {dimension_numbers = #tpu.dot_dimension_numbers<[1], [0], [0], [1], [0, 0, 1, 1], [], []>} : vector<32x32xbf16>, vector<32x8xbf16>, vector<32x8xf32> -> vector<32x8xf32>
    %11 = arith.addf %3, %10 : vector<32x8xf32>
    %12 = vector.extract_strided_slice %2 {offsets = [1, 0, 0], sizes = [1, 8, 8], strides = [1, 1, 1]} : vector<9x8x8xbf16> to vector<1x8x8xbf16>
    %13 = vector.shape_cast %12 : vector<1x8x8xbf16> to vector<8x8xbf16>
    %cst_9 = arith.constant dense<0.000000e+00> : vector<32x8xf32>
    %14 = tpu.matmul %0, %13, %cst_9 {dimension_numbers = #tpu.dot_dimension_numbers<[1], [0], [0], [1], [0, 0, 1, 1], [], []>} : vector<32x8xbf16>, vector<8x8xbf16>, vector<32x8xf32> -> vector<32x8xf32>
    %15 = arith.truncf %14 : vector<32x8xf32> to vector<32x8xbf16>
    %16 = vector.extract_strided_slice %1 {offsets = [1, 0, 0], sizes = [1, 32, 32], strides = [1, 1, 1]} : vector<9x32x32xbf16> to vector<1x32x32xbf16>
    %17 = vector.shape_cast %16 : vector<1x32x32xbf16> to vector<32x32xbf16>
    %cst_10 = arith.constant dense<0.000000e+00> : vector<32x8xf32>
    %18 = tpu.matmul %17, %15, %cst_10 {dimension_numbers = #tpu.dot_dimension_numbers<[1], [0], [0], [1], [0, 0, 1, 1], [], []>} : vector<32x32xbf16>, vector<32x8xbf16>, vector<32x8xf32> -> vector<32x8xf32>
    %19 = arith.addf %11, %18 : vector<32x8xf32>
    %20 = vector.extract_strided_slice %2 {offsets = [2, 0, 0], sizes = [1, 8, 8], strides = [1, 1, 1]} : vector<9x8x8xbf16> to vector<1x8x8xbf16>
    %21 = vector.shape_cast %20 : vector<1x8x8xbf16> to vector<8x8xbf16>
    %cst_11 = arith.constant dense<0.000000e+00> : vector<32x8xf32>
    %22 = tpu.matmul %0, %21, %cst_11 {dimension_numbers = #tpu.dot_dimension_numbers<[1], [0], [0], [1], [0, 0, 1, 1], [], []>} : vector<32x8xbf16>, vector<8x8xbf16>, vector<32x8xf32> -> vector<32x8xf32>
    %23 = arith.truncf %22 : vector<32x8xf32> to vector<32x8xbf16>
    %24 = vector.extract_strided_slice %1 {offsets = [2, 0, 0], sizes = [1, 32, 32], strides = [1, 1, 1]} : vector<9x32x32xbf16> to vector<1x32x32xbf16>
    %25 = vector.shape_cast %24 : vector<1x32x32xbf16> to vector<32x32xbf16>
    %cst_12 = arith.constant dense<0.000000e+00> : vector<32x8xf32>
    %26 = tpu.matmul %25, %23, %cst_12 {dimension_numbers = #tpu.dot_dimension_numbers<[1], [0], [0], [1], [0, 0, 1, 1], [], []>} : vector<32x32xbf16>, vector<32x8xbf16>, vector<32x8xf32> -> vector<32x8xf32>
    %27 = arith.addf %19, %26 : vector<32x8xf32>
    %28 = vector.extract_strided_slice %2 {offsets = [3, 0, 0], sizes = [1, 8, 8], strides = [1, 1, 1]} : vector<9x8x8xbf16> to vector<1x8x8xbf16>
    %29 = vector.shape_cast %28 : vector<1x8x8xbf16> to vector<8x8xbf16>
    %cst_13 = arith.constant dense<0.000000e+00> : vector<32x8xf32>
    %30 = tpu.matmul %0, %29, %cst_13 {dimension_numbers = #tpu.dot_dimension_numbers<[1], [0], [0], [1], [0, 0, 1, 1], [], []>} : vector<32x8xbf16>, vector<8x8xbf16>, vector<32x8xf32> -> vector<32x8xf32>
    %31 = arith.truncf %30 : vector<32x8xf32> to vector<32x8xbf16>
    %32 = vector.extract_strided_slice %1 {offsets = [3, 0, 0], sizes = [1, 32, 32], strides = [1, 1, 1]} : vector<9x32x32xbf16> to vector<1x32x32xbf16>
    %33 = vector.shape_cast %32 : vector<1x32x32xbf16> to vector<32x32xbf16>
    %cst_14 = arith.constant dense<0.000000e+00> : vector<32x8xf32>
    %34 = tpu.matmul %33, %31, %cst_14 {dimension_numbers = #tpu.dot_dimension_numbers<[1], [0], [0], [1], [0, 0, 1, 1], [], []>} : vector<32x32xbf16>, vector<32x8xbf16>, vector<32x8xf32> -> vector<32x8xf32>
    %35 = arith.addf %27, %34 : vector<32x8xf32>
    %36 = vector.extract_strided_slice %2 {offsets = [4, 0, 0], sizes = [1, 8, 8], strides = [1, 1, 1]} : vector<9x8x8xbf16> to vector<1x8x8xbf16>
    %37 = vector.shape_cast %36 : vector<1x8x8xbf16> to vector<8x8xbf16>
    %cst_15 = arith.constant dense<0.000000e+00> : vector<32x8xf32>
    %38 = tpu.matmul %0, %37, %cst_15 {dimension_numbers = #tpu.dot_dimension_numbers<[1], [0], [0], [1], [0, 0, 1, 1], [], []>} : vector<32x8xbf16>, vector<8x8xbf16>, vector<32x8xf32> -> vector<32x8xf32>
    %39 = arith.truncf %38 : vector<32x8xf32> to vector<32x8xbf16>
    %40 = vector.extract_strided_slice %1 {offsets = [4, 0, 0], sizes = [1, 32, 32], strides = [1, 1, 1]} : vector<9x32x32xbf16> to vector<1x32x32xbf16>
    %41 = vector.shape_cast %40 : vector<1x32x32xbf16> to vector<32x32xbf16>
    %cst_16 = arith.constant dense<0.000000e+00> : vector<32x8xf32>
    %42 = tpu.matmul %41, %39, %cst_16 {dimension_numbers = #tpu.dot_dimension_numbers<[1], [0], [0], [1], [0, 0, 1, 1], [], []>} : vector<32x32xbf16>, vector<32x8xbf16>, vector<32x8xf32> -> vector<32x8xf32>
    %43 = arith.addf %35, %42 : vector<32x8xf32>
    %44 = vector.extract_strided_slice %2 {offsets = [5, 0, 0], sizes = [1, 8, 8], strides = [1, 1, 1]} : vector<9x8x8xbf16> to vector<1x8x8xbf16>
    %45 = vector.shape_cast %44 : vector<1x8x8xbf16> to vector<8x8xbf16>
    %cst_17 = arith.constant dense<0.000000e+00> : vector<32x8xf32>
    %46 = tpu.matmul %0, %45, %cst_17 {dimension_numbers = #tpu.dot_dimension_numbers<[1], [0], [0], [1], [0, 0, 1, 1], [], []>} : vector<32x8xbf16>, vector<8x8xbf16>, vector<32x8xf32> -> vector<32x8xf32>
    %47 = arith.truncf %46 : vector<32x8xf32> to vector<32x8xbf16>
    %48 = vector.extract_strided_slice %1 {offsets = [5, 0, 0], sizes = [1, 32, 32], strides = [1, 1, 1]} : vector<9x32x32xbf16> to vector<1x32x32xbf16>
    %49 = vector.shape_cast %48 : vector<1x32x32xbf16> to vector<32x32xbf16>
    %cst_18 = arith.constant dense<0.000000e+00> : vector<32x8xf32>
    %50 = tpu.matmul %49, %47, %cst_18 {dimension_numbers = #tpu.dot_dimension_numbers<[1], [0], [0], [1], [0, 0, 1, 1], [], []>} : vector<32x32xbf16>, vector<32x8xbf16>, vector<32x8xf32> -> vector<32x8xf32>
    %51 = arith.addf %43, %50 : vector<32x8xf32>
    %52 = vector.extract_strided_slice %2 {offsets = [6, 0, 0], sizes = [1, 8, 8], strides = [1, 1, 1]} : vector<9x8x8xbf16> to vector<1x8x8xbf16>
    %53 = vector.shape_cast %52 : vector<1x8x8xbf16> to vector<8x8xbf16>
    %cst_19 = arith.constant dense<0.000000e+00> : vector<32x8xf32>
    %54 = tpu.matmul %0, %53, %cst_19 {dimension_numbers = #tpu.dot_dimension_numbers<[1], [0], [0], [1], [0, 0, 1, 1], [], []>} : vector<32x8xbf16>, vector<8x8xbf16>, vector<32x8xf32> -> vector<32x8xf32>
    %55 = arith.truncf %54 : vector<32x8xf32> to vector<32x8xbf16>
    %56 = vector.extract_strided_slice %1 {offsets = [6, 0, 0], sizes = [1, 32, 32], strides = [1, 1, 1]} : vector<9x32x32xbf16> to vector<1x32x32xbf16>
    %57 = vector.shape_cast %56 : vector<1x32x32xbf16> to vector<32x32xbf16>
    %cst_20 = arith.constant dense<0.000000e+00> : vector<32x8xf32>
    %58 = tpu.matmul %57, %55, %cst_20 {dimension_numbers = #tpu.dot_dimension_numbers<[1], [0], [0], [1], [0, 0, 1, 1], [], []>} : vector<32x32xbf16>, vector<32x8xbf16>, vector<32x8xf32> -> vector<32x8xf32>
    %59 = arith.addf %51, %58 : vector<32x8xf32>
    %60 = vector.extract_strided_slice %2 {offsets = [7, 0, 0], sizes = [1, 8, 8], strides = [1, 1, 1]} : vector<9x8x8xbf16> to vector<1x8x8xbf16>
    %61 = vector.shape_cast %60 : vector<1x8x8xbf16> to vector<8x8xbf16>
    %cst_21 = arith.constant dense<0.000000e+00> : vector<32x8xf32>
    %62 = tpu.matmul %0, %61, %cst_21 {dimension_numbers = #tpu.dot_dimension_numbers<[1], [0], [0], [1], [0, 0, 1, 1], [], []>} : vector<32x8xbf16>, vector<8x8xbf16>, vector<32x8xf32> -> vector<32x8xf32>
    %63 = arith.truncf %62 : vector<32x8xf32> to vector<32x8xbf16>
    %64 = vector.extract_strided_slice %1 {offsets = [7, 0, 0], sizes = [1, 32, 32], strides = [1, 1, 1]} : vector<9x32x32xbf16> to vector<1x32x32xbf16>
    %65 = vector.shape_cast %64 : vector<1x32x32xbf16> to vector<32x32xbf16>
    %cst_22 = arith.constant dense<0.000000e+00> : vector<32x8xf32>
    %66 = tpu.matmul %65, %63, %cst_22 {dimension_numbers = #tpu.dot_dimension_numbers<[1], [0], [0], [1], [0, 0, 1, 1], [], []>} : vector<32x32xbf16>, vector<32x8xbf16>, vector<32x8xf32> -> vector<32x8xf32>
    %67 = arith.addf %59, %66 : vector<32x8xf32>
    %68 = vector.extract_strided_slice %2 {offsets = [8, 0, 0], sizes = [1, 8, 8], strides = [1, 1, 1]} : vector<9x8x8xbf16> to vector<1x8x8xbf16>
    %69 = vector.shape_cast %68 : vector<1x8x8xbf16> to vector<8x8xbf16>
    %cst_23 = arith.constant dense<0.000000e+00> : vector<32x8xf32>
    %70 = tpu.matmul %0, %69, %cst_23 {dimension_numbers = #tpu.dot_dimension_numbers<[1], [0], [0], [1], [0, 0, 1, 1], [], []>} : vector<32x8xbf16>, vector<8x8xbf16>, vector<32x8xf32> -> vector<32x8xf32>
    %71 = arith.truncf %70 : vector<32x8xf32> to vector<32x8xbf16>
    %72 = vector.extract_strided_slice %1 {offsets = [8, 0, 0], sizes = [1, 32, 32], strides = [1, 1, 1]} : vector<9x32x32xbf16> to vector<1x32x32xbf16>
    %73 = vector.shape_cast %72 : vector<1x32x32xbf16> to vector<32x32xbf16>
    %cst_24 = arith.constant dense<0.000000e+00> : vector<32x8xf32>
    %74 = tpu.matmul %73, %71, %cst_24 {dimension_numbers = #tpu.dot_dimension_numbers<[1], [0], [0], [1], [0, 0, 1, 1], [], []>} : vector<32x32xbf16>, vector<32x8xbf16>, vector<32x8xf32> -> vector<32x8xf32>
    %75 = arith.addf %67, %74 : vector<32x8xf32>
    %c0_25 = arith.constant 0 : index
    %c0_26 = arith.constant 0 : index
    %76 = vector.load %arg2[%c0_25, %c0_26] : memref<32x1xf32, #tpu.memory_space<vmem>>, vector<32x1xf32>
    %77 = vector.broadcast %76 : vector<32x1xf32> to vector<32x8xf32>
    %78 = arith.addf %75, %77 : vector<32x8xf32>
    %c0_27 = arith.constant 0 : index
    %c0_28 = arith.constant 0 : index
    %79 = vector.load %arg3[%c0_27, %c0_28] : memref<32x16xbf16, #tpu.memory_space<vmem>>, vector<32x16xbf16>
    %c0_29 = arith.constant 0 : index
    %c0_30 = arith.constant 0 : index
    %80 = vector.load %arg4[%c0_29, %c0_30] : memref<16x8xbf16, #tpu.memory_space<vmem>>, vector<16x8xbf16>
    %cst_31 = arith.constant dense<0.000000e+00> : vector<32x8xf32>
    %81 = tpu.matmul %79, %80, %cst_31 {dimension_numbers = #tpu.dot_dimension_numbers<[1], [0], [0], [1], [0, 0, 1, 1], [], []>} : vector<32x16xbf16>, vector<16x8xbf16>, vector<32x8xf32> -> vector<32x8xf32>
    %82 = arith.addf %78, %81 : vector<32x8xf32>
    %cst_32 = arith.constant 0.000000e+00 : f32
    %83 = vector.broadcast %cst_32 : f32 to vector<32x8xf32>
    %84 = arith.maximumf %82, %83 : vector<32x8xf32>
    %85 = arith.truncf %84 : vector<32x8xf32> to vector<32x8xbf16>
    %c0_33 = arith.constant 0 : index
    %c0_34 = arith.constant 0 : index
    %86 = vector.load %arg6[%c0_33, %c0_34] : memref<32x8xbf16, #tpu.memory_space<vmem>>, vector<32x8xbf16>
    tpu.vector_store %arg6[%c0_33, %c0_34], %85 {strides = array<i32>} : memref<32x8xbf16, #tpu.memory_space<vmem>>, vector<32x8xbf16>,
    return
  }
}

module attributes {stable_mosaic.version = 11 : i64} {
  func.func @kernel(%arg0: memref<64x288xbf16, #tpu.memory_space<vmem>>, %arg1: memref<288x2xbf16, #tpu.memory_space<vmem>>, %arg2: memref<64x1xf32, #tpu.memory_space<vmem>>, %arg3: memref<64x2xbf16, #tpu.memory_space<vmem>>) attributes {dimension_semantics = [], scalar_prefetch = 0 : i64, scratch_operands = 0 : i64, tpu.core_type = #tpu.core_type<tc>} {
    %c0 = arith.constant 0 : index
    %c0_0 = arith.constant 0 : index
    %0 = vector.load %arg0[%c0, %c0_0] : memref<64x288xbf16, #tpu.memory_space<vmem>>, vector<64x288xbf16>
    %c0_1 = arith.constant 0 : index
    %c0_2 = arith.constant 0 : index
    %1 = vector.load %arg1[%c0_1, %c0_2] : memref<288x2xbf16, #tpu.memory_space<vmem>>, vector<288x2xbf16>
    %cst = arith.constant dense<0.000000e+00> : vector<64x2xf32>
    %2 = tpu.matmul %0, %1, %cst {dimension_numbers = #tpu.dot_dimension_numbers<[1], [0], [0], [1], [0, 0, 1, 1], [], []>} : vector<64x288xbf16>, vector<288x2xbf16>, vector<64x2xf32> -> vector<64x2xf32>
    %c0_3 = arith.constant 0 : index
    %c0_4 = arith.constant 0 : index
    %3 = vector.load %arg2[%c0_3, %c0_4] : memref<64x1xf32, #tpu.memory_space<vmem>>, vector<64x1xf32>
    %4 = vector.broadcast %3 : vector<64x1xf32> to vector<64x2xf32>
    %5 = arith.addf %2, %4 : vector<64x2xf32>
    %cst_5 = arith.constant 0.000000e+00 : f32
    %6 = vector.broadcast %cst_5 : f32 to vector<64x2xf32>
    %7 = arith.maximumf %5, %6 : vector<64x2xf32>
    %8 = arith.truncf %7 : vector<64x2xf32> to vector<64x2xbf16>
    %c0_6 = arith.constant 0 : index
    %c0_7 = arith.constant 0 : index
    %9 = vector.load %arg3[%c0_6, %c0_7] : memref<64x2xbf16, #tpu.memory_space<vmem>>, vector<64x2xbf16>
    tpu.vector_store %arg3[%c0_6, %c0_7], %8 {strides = array<i32>} : memref<64x2xbf16, #tpu.memory_space<vmem>>, vector<64x2xbf16>,
    return
  }
}

module attributes {stable_mosaic.version = 11 : i64} {
  func.func @kernel(%arg0: memref<64x2xbf16, #tpu.memory_space<vmem>>, %arg1: memref<9x64x64xbf16, #tpu.memory_space<vmem>>, %arg2: memref<64x1xf32, #tpu.memory_space<vmem>>, %arg3: memref<64x32xbf16, #tpu.memory_space<vmem>>, %arg4: memref<32x2xbf16, #tpu.memory_space<vmem>>, %arg5: memref<9x2x2xbf16, #tpu.memory_space<vmem>>, %arg6: memref<64x2xbf16, #tpu.memory_space<vmem>>) attributes {dimension_semantics = [], scalar_prefetch = 0 : i64, scratch_operands = 0 : i64, tpu.core_type = #tpu.core_type<tc>} {
    %c0 = arith.constant 0 : index
    %c0_0 = arith.constant 0 : index
    %0 = vector.load %arg0[%c0, %c0_0] : memref<64x2xbf16, #tpu.memory_space<vmem>>, vector<64x2xbf16>
    %c0_1 = arith.constant 0 : index
    %c0_2 = arith.constant 0 : index
    %c0_3 = arith.constant 0 : index
    %1 = vector.load %arg1[%c0_1, %c0_2, %c0_3] : memref<9x64x64xbf16, #tpu.memory_space<vmem>>, vector<9x64x64xbf16>
    %c0_4 = arith.constant 0 : index
    %c0_5 = arith.constant 0 : index
    %c0_6 = arith.constant 0 : index
    %2 = vector.load %arg5[%c0_4, %c0_5, %c0_6] : memref<9x2x2xbf16, #tpu.memory_space<vmem>>, vector<9x2x2xbf16>
    %cst = arith.constant 0.000000e+00 : f32
    %3 = vector.broadcast %cst : f32 to vector<64x2xf32>
    %4 = vector.extract_strided_slice %2 {offsets = [4, 0, 0], sizes = [1, 2, 2], strides = [1, 1, 1]} : vector<9x2x2xbf16> to vector<1x2x2xbf16>
    %5 = vector.shape_cast %4 : vector<1x2x2xbf16> to vector<2x2xbf16>
    %cst_7 = arith.constant dense<0.000000e+00> : vector<64x2xf32>
    %6 = tpu.matmul %0, %5, %cst_7 {dimension_numbers = #tpu.dot_dimension_numbers<[1], [0], [0], [1], [0, 0, 1, 1], [], []>} : vector<64x2xbf16>, vector<2x2xbf16>, vector<64x2xf32> -> vector<64x2xf32>
    %7 = arith.truncf %6 : vector<64x2xf32> to vector<64x2xbf16>
    %8 = vector.extract_strided_slice %1 {offsets = [4, 0, 0], sizes = [1, 64, 64], strides = [1, 1, 1]} : vector<9x64x64xbf16> to vector<1x64x64xbf16>
    %9 = vector.shape_cast %8 : vector<1x64x64xbf16> to vector<64x64xbf16>
    %cst_8 = arith.constant dense<0.000000e+00> : vector<64x2xf32>
    %10 = tpu.matmul %9, %7, %cst_8 {dimension_numbers = #tpu.dot_dimension_numbers<[1], [0], [0], [1], [0, 0, 1, 1], [], []>} : vector<64x64xbf16>, vector<64x2xbf16>, vector<64x2xf32> -> vector<64x2xf32>
    %11 = arith.addf %3, %10 : vector<64x2xf32>
    %c0_9 = arith.constant 0 : index
    %c0_10 = arith.constant 0 : index
    %12 = vector.load %arg2[%c0_9, %c0_10] : memref<64x1xf32, #tpu.memory_space<vmem>>, vector<64x1xf32>
    %13 = vector.broadcast %12 : vector<64x1xf32> to vector<64x2xf32>
    %14 = arith.addf %11, %13 : vector<64x2xf32>
    %c0_11 = arith.constant 0 : index
    %c0_12 = arith.constant 0 : index
    %15 = vector.load %arg3[%c0_11, %c0_12] : memref<64x32xbf16, #tpu.memory_space<vmem>>, vector<64x32xbf16>
    %c0_13 = arith.constant 0 : index
    %c0_14 = arith.constant 0 : index
    %16 = vector.load %arg4[%c0_13, %c0_14] : memref<32x2xbf16, #tpu.memory_space<vmem>>, vector<32x2xbf16>
    %cst_15 = arith.constant dense<0.000000e+00> : vector<64x2xf32>
    %17 = tpu.matmul %15, %16, %cst_15 {dimension_numbers = #tpu.dot_dimension_numbers<[1], [0], [0], [1], [0, 0, 1, 1], [], []>} : vector<64x32xbf16>, vector<32x2xbf16>, vector<64x2xf32> -> vector<64x2xf32>
    %18 = arith.addf %14, %17 : vector<64x2xf32>
    %cst_16 = arith.constant 0.000000e+00 : f32
    %19 = vector.broadcast %cst_16 : f32 to vector<64x2xf32>
    %20 = arith.maximumf %18, %19 : vector<64x2xf32>
    %21 = arith.truncf %20 : vector<64x2xf32> to vector<64x2xbf16>
    %c0_17 = arith.constant 0 : index
    %c0_18 = arith.constant 0 : index
    %22 = vector.load %arg6[%c0_17, %c0_18] : memref<64x2xbf16, #tpu.memory_space<vmem>>, vector<64x2xbf16>
    tpu.vector_store %arg6[%c0_17, %c0_18], %21 {strides = array<i32>} : memref<64x2xbf16, #tpu.memory_space<vmem>>, vector<64x2xbf16>,
    return
  }
}

module attributes {stable_mosaic.version = 11 : i64} {
  func.func @kernel(%arg0: memref<64x2xbf16, #tpu.memory_space<vmem>>, %arg1: memref<9x64x64xbf16, #tpu.memory_space<vmem>>, %arg2: memref<64x1xf32, #tpu.memory_space<vmem>>, %arg3: memref<9x64x64xbf16, #tpu.memory_space<vmem>>, %arg4: memref<64x1xf32, #tpu.memory_space<vmem>>, %arg5: memref<9x2x2xbf16, #tpu.memory_space<vmem>>, %arg6: memref<64x2xbf16, #tpu.memory_space<vmem>>) attributes {dimension_semantics = [], scalar_prefetch = 0 : i64, scratch_operands = 0 : i64, tpu.core_type = #tpu.core_type<tc>} {
    %c0 = arith.constant 0 : index
    %c0_0 = arith.constant 0 : index
    %0 = vector.load %arg0[%c0, %c0_0] : memref<64x2xbf16, #tpu.memory_space<vmem>>, vector<64x2xbf16>
    %c0_1 = arith.constant 0 : index
    %c0_2 = arith.constant 0 : index
    %c0_3 = arith.constant 0 : index
    %1 = vector.load %arg5[%c0_1, %c0_2, %c0_3] : memref<9x2x2xbf16, #tpu.memory_space<vmem>>, vector<9x2x2xbf16>
    %c0_4 = arith.constant 0 : index
    %c0_5 = arith.constant 0 : index
    %c0_6 = arith.constant 0 : index
    %2 = vector.load %arg1[%c0_4, %c0_5, %c0_6] : memref<9x64x64xbf16, #tpu.memory_space<vmem>>, vector<9x64x64xbf16>
    %cst = arith.constant 0.000000e+00 : f32
    %3 = vector.broadcast %cst : f32 to vector<64x2xf32>
    %4 = vector.extract_strided_slice %1 {offsets = [4, 0, 0], sizes = [1, 2, 2], strides = [1, 1, 1]} : vector<9x2x2xbf16> to vector<1x2x2xbf16>
    %5 = vector.shape_cast %4 : vector<1x2x2xbf16> to vector<2x2xbf16>
    %cst_7 = arith.constant dense<0.000000e+00> : vector<64x2xf32>
    %6 = tpu.matmul %0, %5, %cst_7 {dimension_numbers = #tpu.dot_dimension_numbers<[1], [0], [0], [1], [0, 0, 1, 1], [], []>} : vector<64x2xbf16>, vector<2x2xbf16>, vector<64x2xf32> -> vector<64x2xf32>
    %7 = arith.truncf %6 : vector<64x2xf32> to vector<64x2xbf16>
    %8 = vector.extract_strided_slice %2 {offsets = [4, 0, 0], sizes = [1, 64, 64], strides = [1, 1, 1]} : vector<9x64x64xbf16> to vector<1x64x64xbf16>
    %9 = vector.shape_cast %8 : vector<1x64x64xbf16> to vector<64x64xbf16>
    %cst_8 = arith.constant dense<0.000000e+00> : vector<64x2xf32>
    %10 = tpu.matmul %9, %7, %cst_8 {dimension_numbers = #tpu.dot_dimension_numbers<[1], [0], [0], [1], [0, 0, 1, 1], [], []>} : vector<64x64xbf16>, vector<64x2xbf16>, vector<64x2xf32> -> vector<64x2xf32>
    %11 = arith.addf %3, %10 : vector<64x2xf32>
    %c0_9 = arith.constant 0 : index
    %c0_10 = arith.constant 0 : index
    %12 = vector.load %arg2[%c0_9, %c0_10] : memref<64x1xf32, #tpu.memory_space<vmem>>, vector<64x1xf32>
    %13 = vector.broadcast %12 : vector<64x1xf32> to vector<64x2xf32>
    %14 = arith.addf %11, %13 : vector<64x2xf32>
    %cst_11 = arith.constant 0.000000e+00 : f32
    %15 = vector.broadcast %cst_11 : f32 to vector<64x2xf32>
    %16 = arith.maximumf %14, %15 : vector<64x2xf32>
    %17 = arith.truncf %16 : vector<64x2xf32> to vector<64x2xbf16>
    %c0_12 = arith.constant 0 : index
    %c0_13 = arith.constant 0 : index
    %c0_14 = arith.constant 0 : index
    %18 = vector.load %arg3[%c0_12, %c0_13, %c0_14] : memref<9x64x64xbf16, #tpu.memory_space<vmem>>, vector<9x64x64xbf16>
    %cst_15 = arith.constant 0.000000e+00 : f32
    %19 = vector.broadcast %cst_15 : f32 to vector<64x2xf32>
    %20 = vector.extract_strided_slice %1 {offsets = [4, 0, 0], sizes = [1, 2, 2], strides = [1, 1, 1]} : vector<9x2x2xbf16> to vector<1x2x2xbf16>
    %21 = vector.shape_cast %20 : vector<1x2x2xbf16> to vector<2x2xbf16>
    %cst_16 = arith.constant dense<0.000000e+00> : vector<64x2xf32>
    %22 = tpu.matmul %17, %21, %cst_16 {dimension_numbers = #tpu.dot_dimension_numbers<[1], [0], [0], [1], [0, 0, 1, 1], [], []>} : vector<64x2xbf16>, vector<2x2xbf16>, vector<64x2xf32> -> vector<64x2xf32>
    %23 = arith.truncf %22 : vector<64x2xf32> to vector<64x2xbf16>
    %24 = vector.extract_strided_slice %18 {offsets = [4, 0, 0], sizes = [1, 64, 64], strides = [1, 1, 1]} : vector<9x64x64xbf16> to vector<1x64x64xbf16>
    %25 = vector.shape_cast %24 : vector<1x64x64xbf16> to vector<64x64xbf16>
    %cst_17 = arith.constant dense<0.000000e+00> : vector<64x2xf32>
    %26 = tpu.matmul %25, %23, %cst_17 {dimension_numbers = #tpu.dot_dimension_numbers<[1], [0], [0], [1], [0, 0, 1, 1], [], []>} : vector<64x64xbf16>, vector<64x2xbf16>, vector<64x2xf32> -> vector<64x2xf32>
    %27 = arith.addf %19, %26 : vector<64x2xf32>
    %c0_18 = arith.constant 0 : index
    %c0_19 = arith.constant 0 : index
    %28 = vector.load %arg4[%c0_18, %c0_19] : memref<64x1xf32, #tpu.memory_space<vmem>>, vector<64x1xf32>
    %29 = vector.broadcast %28 : vector<64x1xf32> to vector<64x2xf32>
    %30 = arith.addf %27, %29 : vector<64x2xf32>
    %31 = arith.extf %0 : vector<64x2xbf16> to vector<64x2xf32>
    %32 = arith.addf %30, %31 : vector<64x2xf32>
    %cst_20 = arith.constant 0.000000e+00 : f32
    %33 = vector.broadcast %cst_20 : f32 to vector<64x2xf32>
    %34 = arith.maximumf %32, %33 : vector<64x2xf32>
    %35 = arith.truncf %34 : vector<64x2xf32> to vector<64x2xbf16>
    %c0_21 = arith.constant 0 : index
    %c0_22 = arith.constant 0 : index
    %36 = vector.load %arg6[%c0_21, %c0_22] : memref<64x2xbf16, #tpu.memory_space<vmem>>, vector<64x2xbf16>
    tpu.vector_store %arg6[%c0_21, %c0_22], %35 {strides = array<i32>} : memref<64x2xbf16, #tpu.memory_space<vmem>>, vector<64x2xbf16>,
    return
  }
}

</mosaic_0001>

<bundles_post_ra>
// kernel: resnet_forward.12
= control target key start
LH: loop header
LB: loop body
LE: loop exit
PB: predicated region body
PF: predicated region fallthrough
CT: control target
= control target key end

     0   :  { %v495_v2 = vmov 0   ;;  %vm260_vm0 = vcmask 1040384   ;;  %vm261_vm1 = vcmask 1041408   ;;  %v496_v29 = vmov 65535   ;;  %s644_s1 = inlined_call_operand.vmem [shape: bf16[147,512], index: 1, kind: input, shape index: {}]   ;;  %s645_s0 = inlined_call_operand.vmem [shape: bf16[8,147], index: 0, kind: input, shape index: {}]   ;;  %s646_s2 = inlined_call_operand.vmem [shape: f32[8,1], index: 2, kind: input, shape index: {}]   ;;  %s647_s3 = inlined_call_operand.vmem [shape: bf16[8,512], index: 3, kind: output, shape index: {}]  }
   0x1   :  { %v435_v0 = vld [vmem:[%s644_s1 + $0xe4] ss:$16 sps:$4 sm:$0xff]   ;;  %v437_v1 = vld [vmem:[%s644_s1 + $0xec] ss:$16 sps:$4 sm:$0xff]   ;;  %434 = vset.pattern.permute.xlu0 %v495_v2  ;;  %v439_v3 = vld [vmem:[%s644_s1 + $0xe0] ss:$16 sps:$4 sm:$0xff]  }
   0x2   :  { %276 = vmatprep.subr.bf16.mxu0 %v435_v0  ;;  %v440_v4 = vld [vmem:[%s644_s1 + $0xe8] ss:$16 sps:$4 sm:$0xff]   ;;  %317 = vmatprep.subr.bf16.mxu1 %v437_v1  ;;  %v441_v5 = vld [vmem:[%s644_s1 + $0xc4] ss:$16 sps:$4 sm:$0xff]   ;;  %v443_v6 = vld [vmem:[%s644_s1 + $0xcc] ss:$16 sps:$4 sm:$0xff]  }
   0x3   :  { %277 = vmatpush1.bf16.msra.mxu0 %v439_v3  ;;  %318 = vmatpush1.bf16.msra.mxu1 %v440_v4  ;;  %v445_v7 = vld [vmem:[%s644_s1 + $0xc0] ss:$16 sps:$4 sm:$0xff]   ;;  %v446_v8 = vld [vmem:[%s644_s1 + $0xc8] ss:$16 sps:$4 sm:$0xff]   ;;  %v447_v9 = vld [vmem:[%s644_s1 + $0xa4] ss:$16 sps:$4 sm:$0xff]  }
   0x4   :  { %278 = vmatprep.subr.bf16.mxu0 %v441_v5  ;;  %319 = vmatprep.subr.bf16.mxu1 %v443_v6  ;;  %v449_v10 = vld [vmem:[%s644_s1 + $0xac] ss:$16 sps:$4 sm:$0xff]   ;;  %v451_v11 = vld [vmem:[%s644_s1 + $0xa0] ss:$16 sps:$4 sm:$0xff]   ;;  %v452_v12 = vld [vmem:[%s644_s1 + $0xa8] ss:$16 sps:$4 sm:$0xff]  }
   0x5   :  { %v453_v13 = vld [vmem:[%s644_s1 + $0x84] ss:$16 sps:$4 sm:$0xff]   ;;  %v455_v14 = vld [vmem:[%s644_s1 + $0x8c] ss:$16 sps:$4 sm:$0xff]   ;;  %v457_v15 = vld [vmem:[%s644_s1 + $0x80] ss:$16 sps:$4 sm:$0xff]  }
   0x6   :  { %v458_v16 = vld [vmem:[%s644_s1 + $0x88] ss:$16 sps:$4 sm:$0xff]   ;;  %v459_v17 = vld [vmem:[%s644_s1 + $0x64] ss:$16 sps:$4 sm:$0xff]   ;;  %v461_v18 = vld [vmem:[%s644_s1 + $0x6c] ss:$16 sps:$4 sm:$0xff]  }
   0x7   :  { %279 = vmatpush1.bf16.msra.mxu0 %v445_v7  ;;  %320 = vmatpush1.bf16.msra.mxu1 %v446_v8  ;;  %v463_v19 = vld [vmem:[%s644_s1 + $0x60] ss:$16 sps:$4 sm:$0xff]   ;;  %v464_v20 = vld [vmem:[%s644_s1 + $0x68] ss:$16 sps:$4 sm:$0xff]   ;;  %v465_v21 = vld [vmem:[%s644_s1 + $0x44] ss:$16 sps:$4 sm:$0xff]  }
   0x8   :  { %280 = vmatprep.subr.bf16.mxu0 %v447_v9  ;;  %321 = vmatprep.subr.bf16.mxu1 %v449_v10  ;;  %v467_v22 = vld [vmem:[%s644_s1 + $0x4c] ss:$16 sps:$4 sm:$0xff]   ;;  %v469_v23 = vld [vmem:[%s644_s1 + $0x40] ss:$16 sps:$4 sm:$0xff]   ;;  %v470_v24 = vld [vmem:[%s644_s1 + $0x48] ss:$16 sps:$4 sm:$0xff]  }
   0x9   :  { %v471_v25 = vld [vmem:[%s644_s1 + $0x24] ss:$16 sps:$4 sm:$0xff]   ;;  %v473_v26 = vld [vmem:[%s644_s1 + $0x2c] ss:$16 sps:$4 sm:$0xff]   ;;  %v262_v30 = vsel %vm260_vm0, 4294967295, %v496_v29  ;;  %vm256_vm2 = vcmask 154624  }
   0xa   :  { %v52_v27 = vld [vmem:[%s644_s1 + $0x120] sm:$0x33]  ;;  %v53_v28 = vld [vmem:[%s644_s1 + $0x128] sm:$0x33]  ;;  %v263_v40 = vsel %vm261_vm1, %v262_v30, 0 }
   0xb   :  { %281 = vmatpush1.bf16.msra.mxu0 %v451_v11  ;;  %322 = vmatpush1.bf16.msra.mxu1 %v452_v12  ;;  %v475_v31 = vld [vmem:[%s644_s1 + $0x20] ss:$16 sps:$4 sm:$0xff]   ;;  %v476_v32 = vld [vmem:[%s644_s1 + $0x28] ss:$16 sps:$4 sm:$0xff]   ;;  %v477_v34 = vld [vmem:[%s644_s1 + $0x4] ss:$16 sps:$4 sm:$0xff]   ;;  %v423_v36 = vcombine.high %v52_v27, %v52_v27  ;;  %v425_v37 = vcombine.high %v53_v28, %v53_v28  ;;  %v422_v43 = vcombine.low %v52_v27, %v52_v27 }
   0xc   :  { %282 = vmatprep.subr.bf16.mxu0 %v453_v13  ;;  %323 = vmatprep.subr.bf16.mxu1 %v455_v14  ;;  %v15_v33 = vld [vmem:[%s645_s0] sm:$0xff]  ;;  %v479_v35 = vld [vmem:[%s644_s1 + $0xc] ss:$16 sps:$4 sm:$0xff]   ;;  %v482_v42 = vld [vmem:[%s644_s1 + $0x8] ss:$16 sps:$4 sm:$0xff]   ;;  %v424_v44 = vcombine.low %v53_v28, %v53_v28 }
   0xd   :  { %v385_v38 = vcombine.high %v15_v33, %v15_v33  ;;  %v54_v39 = vld [vmem:[%s646_s2] sm:$0xff]  ;;  %v268_v45 = vand.u32 %v423_v36, %v263_v40  ;;  %v274_v46 = vand.u32 %v425_v37, %v263_v40  ;;  %v265_v47 = vand.u32 %v422_v43, %v263_v40  ;;  %v489_v50 = vld [vmem:[%s644_s1 + $0x10c] ss:$16 sps:$4 sm:$0xff]   ;;  %v492_v52 = vld [vmem:[%s644_s1 + $0x108] ss:$16 sps:$4 sm:$0xff]  }
   0xe   :  { %57 = vperm.xlu0 %434, %v54_v39   ;;  %v481_v41 = vld [vmem:[%s644_s1] ss:$16 sps:$4 sm:$0xff]   ;;  %v271_v48 = vand.u32 %v424_v44, %v263_v40  ;;  %v487_v49 = vld [vmem:[%s644_s1 + $0x104] ss:$16 sps:$4 sm:$0xff]   ;;  %v384_v53 = vcombine.low %v15_v33, %v15_v33 }
   0xf   :  { %283 = vmatpush1.bf16.msra.mxu0 %v457_v15  ;;  %324 = vmatpush1.bf16.msra.mxu1 %v458_v16  ;;  %v491_v51 = vld [vmem:[%s644_s1 + $0x100] ss:$16 sps:$4 sm:$0xff]  }
  0x10   :  { %284 = vmatprep.subr.bf16.mxu0 %v459_v17  ;;  %325 = vmatprep.subr.bf16.mxu1 %v461_v18 }
  0x11   :  { %426 = vmatprep.mubr.msk.bf16.mxu0 %vm256_vm2, %v385_v38  ;;  %427 = vmatprep.mubr.msk.bf16.mxu1 %vm256_vm2, %v385_v38 }
  0x13   :  { %285 = vmatpush1.bf16.msra.mxu0 %v463_v19  ;;  %326 = vmatpush1.bf16.msra.mxu1 %v464_v20 }
  0x14   :  { %286 = vmatprep.subr.bf16.mxu0 %v465_v21  ;;  %327 = vmatprep.subr.bf16.mxu1 %v467_v22 }
  0x17   :  { %287 = vmatpush1.bf16.msra.mxu0 %v469_v23  ;;  %328 = vmatpush1.bf16.msra.mxu1 %v470_v24 }
  0x18   :  { %288 = vmatprep.subr.bf16.mxu0 %v471_v25  ;;  %329 = vmatprep.subr.bf16.mxu1 %v473_v26 }
  0x1b   :  { %289 = vmatpush1.bf16.msra.mxu0 %v475_v31  ;;  %330 = vmatpush1.bf16.msra.mxu1 %v476_v32 }
  0x1c   :  { %290 = vmatprep.subr.bf16.mxu0 %v477_v34  ;;  %331 = vmatprep.subr.bf16.mxu1 %v479_v35 }
  0x1f   :  { %291 = vmatpush1.bf16.msra.mxu0 %v481_v41  ;;  %332 = vmatpush1.bf16.msra.mxu1 %v482_v42 }
  0x20   :  { %304 = vmatprep.subr.bf16.mxu0 %v268_v45  ;;  %345 = vmatprep.subr.bf16.mxu1 %v274_v46 }
  0x23   :  { %305 = vmatpush2.bf16.msra.mxu0 %v265_v47  ;;  %346 = vmatpush2.bf16.msra.mxu1 %v271_v48 }
  0x24   :  { %306 = vmatprep.subr.bf16.mxu0 %v487_v49  ;;  %347 = vmatprep.subr.bf16.mxu1 %v489_v50 }
  0x27   :  { %307 = vmatpush2.bf16.msra.mxu0 %v491_v51  ;;  %348 = vmatpush2.bf16.msra.mxu1 %v492_v52 }
  0x2a   :  { %309 = vmatmul.mubr.bf16.vlgmr.msra.gmra.mxu0 %v384_v53  ;;  %350 = vmatmul.mubr.bf16.vlgmr.msra.gmra.mxu1 %v384_v53 }
  0x89   :  { %v58_v54 = vpop.permute.xlu0 %57 }
  0xea   :  { %v310_v55 = vpop.f32.mrf.mxu0  ;;  %v351_v56 = vpop.f32.mrf.mxu1 }
  0xeb   :  { %v311_v57 = vadd.f32 %v310_v55, %v58_v54  ;;  %v352_v58 = vadd.f32 %v351_v56, %v58_v54 }
  0xec   :  { %v312_v59 = vpop.f32.mrf.mxu0  ;;  %v353_v60 = vpop.f32.mrf.mxu1 }
  0xed   :  { %v313_v61 = vadd.f32 %v312_v59, %v58_v54  ;;  %v354_v62 = vadd.f32 %v353_v60, %v58_v54  ;;  %v358_v1 = vmax.f32 %v311_v57, 0.0  ;;  %v360_v2 = vmax.f32 %v352_v58, 0.0 }
  0xee   :  { %v314_v63 = vpop.f32.mrf.mxu0  ;;  %v355_v0 = vpop.f32.mrf.mxu1 }
  0xef   :  { %v359_v3 = vmax.f32 %v313_v61, 0.0  ;;  %v361_v4 = vmax.f32 %v354_v62, 0.0 }
  0xf0   :  { %v315_v5 = vpop.f32.mrf.mxu0  ;;  %v356_v6 = vpop.f32.mrf.mxu1 }
  0xf1   :  { %v430_v7 = vpack.c.bf16 %v359_v3, %v358_v1  ;;  %v431_v8 = vpack.c.bf16 %v361_v4, %v360_v2 }
  0xf3   :  { %378 = vst [vmem:[%s647_s3] sm:$0xff] %v430_v7  ;;  %379 = vst [vmem:[%s647_s3 + $0x8] sm:$0xff] %v431_v8 }

// kernel: resnet_forward.13
= control target key start
LH: loop header
LB: loop body
LE: loop exit
PB: predicated region body
PF: predicated region fallthrough
CT: control target
= control target key end

     0   :  { %v1194_v1 = vmov 0.0   ;;  %vm1195_vm0 = vmmov 0   ;;  %s1196_s23 = smov 8   ;;  %s1197_s24 = smov 7   ;;  %v1204_v3 = vmov 0   ;;  %v39_v5 = vlaneseq  ;;  %s1466_s0 = inlined_call_operand.vmem [shape: bf16[8,128], index: 0, kind: input, shape index: {}]   ;;  %s1467_s2 = inlined_call_operand.vmem [shape: f32[8,1], index: 2, kind: input, shape index: {}]   ;;  %s1468_s5 = inlined_call_operand.vmem [shape: f32[9,128], index: 5, kind: input, shape index: {}]   ;;  %s1469_s1 = inlined_call_operand.vmem [shape: bf16[9,8,8], index: 1, kind: input, shape index: {}]   ;;  %s1470_s4 = inlined_call_operand.vmem [shape: f32[8,1], index: 4, kind: input, shape index: {}]   ;;  %s1471_s3 = inlined_call_operand.vmem [shape: bf16[9,8,8], index: 3, kind: input, shape index: {}]   ;;  %s1472_s6 = inlined_call_operand.vmem [shape: bf16[8,128], index: 6, kind: output, shape index: {}]  }
   0x1   :  { %v24_v0 = vld [vmem:[%s1466_s0] sm:$0xf]  ;;  %1074 = vmatprep.subr.bf16.mxu0 %v1194_v1  ;;  %1076 = vmatprep.mubr.msk.bf16.mxu0 %vm1195_vm0, %v1194_v1  ;;  %s1198_s0 = smov 9   ;;  %s1199_s25 = smov 1   ;;  %vm57_vm1 = vcmask 1043456   ;;  %vm53_vm2 = vcmask 64512  }
   0x2   :  { %v1246_v2 = vunpack.c.l.bf16 %v24_v0  ;;  %1080 = vmatprep.subr.bf16.mxu1 %v1194_v1  ;;  %1082 = vmatprep.mubr.msk.bf16.mxu1 %vm1195_vm0, %v1194_v1  ;;  %s1200_s26 = smov 127   ;;  %s1201_s27 = smov 121   ;;  %v530_v4 = vld [vmem:[%s1467_s2] sm:$0xff]  ;;  %v40_v6 = vshrl.u32 %v39_v5, 7  ;;  %v29_v46 = vld [vmem:[%s1469_s1 + $0x8] sm:$0xf] }
   0x3   :  { %s1202_s28 = smov 120   ;;  %s1203_s29 = smov 119   ;;  %1193 = vset.pattern.permute.xlu0 %v1204_v3  ;;  %v25_v9 = vld [vmem:[%s1468_s5] sm:$0xff]  ;;  %v30_v52 = vld [vmem:[%s1469_s1 + $0xc] sm:$0xf] }
   0x4   :  { %45 = vrot.lane.b32.xlu0 %v1246_v2, %s1196_s23  ;;  %147 = vrot.lane.b32.xlu1 %v1246_v2, %s1197_s24  ;;  %v49_v7 = vsub.s32 1, %v40_v6  ;;  %v151_v8 = vsub.s32 2, %v40_v6  ;;  %v41_v11 = vsub.s32 0, %v40_v6  ;;  %v206_v13 = vsub.s32 3, %v40_v6  ;;  %v28_v30 = vld [vmem:[%s1469_s1 + $0x4] sm:$0xf] }
   0x5   :  { %v259_v14 = vsub.s32 4, %v40_v6  ;;  %v314_v21 = vsub.s32 5, %v40_v6  ;;  %v369_v36 = vsub.s32 6, %v40_v6  ;;  %v27_v39 = vld [vmem:[%s1469_s1] sm:$0xf]  ;;  %v424_v44 = vsub.s32 7, %v40_v6 }
   0x6   :  { %v1273_v10 = vrot.slane %v25_v9, %v49_v7  ;;  %v1275_v12 = vrot.slane %v25_v9, %v151_v8  ;;  %v1278_v18 = vrot.slane %v25_v9, %v41_v11  ;;  %v1281_v20 = vrot.slane %v25_v9, %v206_v13  ;;  %v1333_v56 = vld [vmem:[%s1468_s5 + $0x8] ss:$0 sm:$0xff]  ;;  %v31_v58 = vld [vmem:[%s1469_s1 + $0x10] sm:$0xf]  ;;  %v32_v62 = vld [vmem:[%s1469_s1 + $0x14] sm:$0xf] }
   0x7   :  { %v1283_v22 = vrot.slane %v25_v9, %v259_v14  ;;  %v1291_v31 = vrot.slane %v25_v9, %v314_v21  ;;  %v1307_v43 = vrot.slane %v25_v9, %v369_v36  ;;  %v1319_v50 = vrot.slane %v25_v9, %v424_v44  ;;  %v33_v3 = vld [vmem:[%s1469_s1 + $0x18] sm:$0xf]  ;;  %v34_v5 = vld [vmem:[%s1469_s1 + $0x1c] sm:$0xf]  ;;  %v35_v6 = vld [vmem:[%s1469_s1 + $0x20] sm:$0xf] }
   0x8   :  { %37 = vrot.lane.b32.xlu0 %v1246_v2, %s1198_s0  ;;  %202 = vrot.lane.b32.xlu1 %v1246_v2, %s1199_s25 }
   0x9   :  { %v261_v32 = vmul.f32 %v1283_v22, %v1246_v2 }
   0xb   :  { %v262_v40 = vpack.c.bf16 %v261_v32, %v261_v32 }
   0xc   :  { %310 = vrot.lane.b32.xlu0 %v1246_v2, %s1200_s26  ;;  %365 = vrot.lane.b32.xlu1 %v1246_v2, %s1201_s27 }
   0xd   :  { %v267_v48 = vsel %vm57_vm1, %v262_v40, 0 }
  0x10   :  { %420 = vrot.lane.b32.xlu0 %v1246_v2, %s1202_s28  ;;  %475 = vrot.lane.b32.xlu1 %v1246_v2, %s1203_s29 }
  0x14   :  { %533 = vperm.xlu0 %1193, %v530_v4  }
  0x76   :  { %v46_v15 = vpop.permute.xlu0 %45  ;;  %v148_v16 = vpop.permute.xlu1 %147 }
  0x77   :  { %v51_v17 = vmul.f32 %v1273_v10, %v46_v15  ;;  %v153_v19 = vmul.f32 %v1275_v12, %v148_v16 }
  0x79   :  { %v52_v23 = vpack.c.bf16 %v51_v17, %v51_v17  ;;  %v154_v24 = vpack.c.bf16 %v153_v19, %v153_v19 }
  0x7a   :  { %v38_v25 = vpop.permute.xlu0 %37  ;;  %v203_v26 = vpop.permute.xlu1 %202 }
  0x7b   :  { %v43_v27 = vmul.f32 %v1278_v18, %v38_v25  ;;  %v59_v28 = vsel %vm57_vm1, %v52_v23, 0  ;;  %v208_v29 = vmul.f32 %v1281_v20, %v203_v26  ;;  %v159_v34 = vsel %vm57_vm1, %v154_v24, 0 }
  0x7c   :  { %1075 = vmatpush3.bf16.msra.mxu0 %v59_v28 }
  0x7d   :  { %v44_v33 = vpack.c.bf16 %v43_v27, %v43_v27  ;;  %v209_v35 = vpack.c.bf16 %v208_v29, %v208_v29  ;;  %1086 = vmatprep.subr.bf16.mxu0 %v1194_v1 }
  0x7e   :  { %v311_v37 = vpop.permute.xlu0 %310  ;;  %v366_v45 = vpop.permute.xlu1 %365 }
  0x7f   :  { %1077 = vmatmul.mubr.msk.bf16.vlgmr.msra.gmra.mxu0 %vm53_vm2, %v28_v30  ;;  %v105_v38 = vsel %vm57_vm1, %v44_v33, 0  ;;  %v214_v41 = vsel %vm57_vm1, %v209_v35, 0  ;;  %v316_v42 = vmul.f32 %v1291_v31, %v311_v37  ;;  %v371_v49 = vmul.f32 %v1307_v43, %v366_v45 }
  0x80   :  { %1081 = vmatpush3.bf16.msra.mxu1 %v105_v38  ;;  %1087 = vmatpush3.bf16.msra.mxu0 %v159_v34 }
  0x81   :  { %1088 = vmatprep.mubr.msk.bf16.mxu0 %vm1195_vm0, %v1194_v1  ;;  %1092 = vmatprep.subr.bf16.mxu1 %v1194_v1  ;;  %v317_v47 = vpack.c.bf16 %v316_v42, %v316_v42  ;;  %v372_v54 = vpack.c.bf16 %v371_v49, %v371_v49 }
  0x82   :  { %1098 = vmatprep.subr.bf16.mxu0 %v1194_v1  ;;  %v421_v51 = vpop.permute.xlu0 %420  ;;  %v476_v57 = vpop.permute.xlu1 %475 }
  0x83   :  { %1083 = vmatmul.mubr.msk.bf16.vlgmr.msra.gmra.mxu1 %vm53_vm2, %v27_v39  ;;  %v322_v53 = vsel %vm57_vm1, %v317_v47, 0  ;;  %v426_v55 = vmul.f32 %v1319_v50, %v421_v51  ;;  %v377_v59 = vsel %vm57_vm1, %v372_v54, 0  ;;  %v481_v61 = vmul.f32 %v1333_v56, %v476_v57 }
  0x84   :  { %1093 = vmatpush3.bf16.msra.mxu1 %v214_v41  ;;  %1094 = vmatprep.mubr.msk.bf16.mxu1 %vm1195_vm0, %v1194_v1 }
  0x85   :  { %1104 = vmatprep.subr.bf16.mxu1 %v1194_v1  ;;  %v427_v60 = vpack.c.bf16 %v426_v55, %v426_v55  ;;  %v482_v0 = vpack.c.bf16 %v481_v61, %v481_v61 }
  0x87   :  { %1089 = vmatmul.mubr.msk.bf16.vlgmr.msra.gmra.mxu0 %vm53_vm2, %v29_v46  ;;  %v432_v63 = vsel %vm57_vm1, %v427_v60, 0  ;;  %v487_v4 = vsel %vm57_vm1, %v482_v0, 0 }
  0x88   :  { %1099 = vmatpush3.bf16.msra.mxu0 %v267_v48  ;;  %1100 = vmatprep.mubr.msk.bf16.mxu0 %vm1195_vm0, %v1194_v1 }
  0x89   :  { %1110 = vmatprep.subr.bf16.mxu0 %v1194_v1 }
  0x8b   :  { %1095 = vmatmul.mubr.msk.bf16.vlgmr.msra.gmra.mxu1 %vm53_vm2, %v30_v52 }
  0x8c   :  { %1105 = vmatpush3.bf16.msra.mxu1 %v322_v53  ;;  %1106 = vmatprep.mubr.msk.bf16.mxu1 %vm1195_vm0, %v1194_v1 }
  0x8d   :  { %1116 = vmatprep.subr.bf16.mxu1 %v1194_v1 }
  0x8f   :  { %1101 = vmatmul.mubr.msk.bf16.vlgmr.msra.gmra.mxu0 %vm53_vm2, %v31_v58  ;;  %v534_v52 = vpop.permute.xlu0 %533 }
  0x90   :  { %1111 = vmatpush3.bf16.msra.mxu0 %v377_v59  ;;  %1112 = vmatprep.mubr.msk.bf16.mxu0 %vm1195_vm0, %v1194_v1 }
  0x91   :  { %1122 = vmatprep.subr.bf16.mxu0 %v1194_v1 }
  0x93   :  { %1107 = vmatmul.mubr.msk.bf16.vlgmr.msra.gmra.mxu1 %vm53_vm2, %v32_v62 }
  0x94   :  { %1117 = vmatpush3.bf16.msra.mxu1 %v432_v63  ;;  %1118 = vmatprep.mubr.msk.bf16.mxu1 %vm1195_vm0, %v1194_v1 }
  0x95   :  { %1128 = vmatprep.subr.bf16.mxu1 %v1194_v1 }
  0x97   :  { %1113 = vmatmul.mubr.msk.bf16.vlgmr.msra.gmra.mxu0 %vm53_vm2, %v33_v3  ;;  %v1004_v3 = vld [vmem:[%s1470_s4] sm:$0xff] }
  0x98   :  { %1123 = vmatpush3.bf16.msra.mxu0 %v487_v4  ;;  %1124 = vmatprep.mubr.msk.bf16.mxu0 %vm1195_vm0, %v1194_v1 }
  0x99   :  { %1134 = vmatprep.subr.bf16.mxu0 %v1194_v1 }
  0x9b   :  { %1119 = vmatmul.mubr.msk.bf16.vlgmr.msra.gmra.mxu1 %vm53_vm2, %v34_v5 }
  0x9c   :  { %1130 = vmatprep.mubr.msk.bf16.mxu1 %vm1195_vm0, %v1194_v1 }
  0x9f   :  { %1125 = vmatmul.mubr.msk.bf16.vlgmr.msra.gmra.mxu0 %vm53_vm2, %v35_v6 }
  0xa0   :  { %1136 = vmatprep.mubr.msk.bf16.mxu0 %vm1195_vm0, %v1194_v1 }
 0x13f   :  { %v95_v7 = vpop.f32.mrf.mxu0 }
 0x141   :  { %v1078_v8 = vpop.f32.mrf.mxu0 }
 0x143   :  { %v98_v9 = vpop.f32.mrf.mxu0  ;;  %v141_v11 = vpop.f32.mrf.mxu1 }
 0x144   :  { %v142_v30 = vadd.f32 %v141_v11, %v95_v7 }
 0x145   :  { %v1079_v13 = vpop.f32.mrf.mxu0  ;;  %v1084_v14 = vpop.f32.mrf.mxu1 }
 0x147   :  { %v144_v15 = vpop.f32.mrf.mxu1  ;;  %v195_v16 = vpop.f32.mrf.mxu0 }
 0x148   :  { %v201_v34 = vadd.f32 %v195_v16, %v142_v30  ;;  %v540_v15 = vld [vmem:[%s1471_s3 + $0x4] sm:$0xf] }
 0x149   :  { %v1085_v17 = vpop.f32.mrf.mxu1  ;;  %v1090_v19 = vpop.f32.mrf.mxu0 }
 0x14b   :  { %v198_v21 = vpop.f32.mrf.mxu0  ;;  %v250_v23 = vpop.f32.mrf.mxu1 }
 0x14c   :  { %v256_v37 = vadd.f32 %v250_v23, %v201_v34  ;;  %v539_v23 = vld [vmem:[%s1471_s3] sm:$0xf] }
 0x14d   :  { %v1091_v24 = vpop.f32.mrf.mxu0  ;;  %v1096_v25 = vpop.f32.mrf.mxu1 }
 0x14f   :  { %v253_v26 = vpop.f32.mrf.mxu1  ;;  %v303_v27 = vpop.f32.mrf.mxu0 }
 0x150   :  { %v309_v40 = vadd.f32 %v303_v27, %v256_v37  ;;  %v541_v27 = vld [vmem:[%s1471_s3 + $0x8] sm:$0xf] }
 0x151   :  { %v1097_v28 = vpop.f32.mrf.mxu1  ;;  %v1102_v29 = vpop.f32.mrf.mxu0 }
 0x153   :  { %v306_v32 = vpop.f32.mrf.mxu0  ;;  %v358_v33 = vpop.f32.mrf.mxu1 }
 0x154   :  { %v364_v44 = vadd.f32 %v358_v33, %v309_v40  ;;  %v542_v32 = vld [vmem:[%s1471_s3 + $0xc] sm:$0xf] }
 0x155   :  { %v1103_v35 = vpop.f32.mrf.mxu0  ;;  %v1108_v36 = vpop.f32.mrf.mxu1 }
 0x156   :  { %v543_v36 = vld [vmem:[%s1471_s3 + $0x10] sm:$0xf] }
 0x157   :  { %v361_v38 = vpop.f32.mrf.mxu1  ;;  %v413_v39 = vpop.f32.mrf.mxu0 }
 0x158   :  { %v419_v47 = vadd.f32 %v413_v39, %v364_v44  ;;  %v546_v44 = vld [vmem:[%s1471_s3 + $0x1c] sm:$0xf] }
 0x159   :  { %v1109_v41 = vpop.f32.mrf.mxu1  ;;  %v1114_v42 = vpop.f32.mrf.mxu0 }
 0x15b   :  { %v416_v45 = vpop.f32.mrf.mxu0  ;;  %v468_v46 = vpop.f32.mrf.mxu1 }
 0x15c   :  { %v474_v51 = vadd.f32 %v468_v46, %v419_v47  ;;  %v547_v45 = vld [vmem:[%s1471_s3 + $0x20] sm:$0xf] }
 0x15d   :  { %v1115_v48 = vpop.f32.mrf.mxu0  ;;  %v1120_v49 = vpop.f32.mrf.mxu1 }
 0x15f   :  { %v471_v53 = vpop.f32.mrf.mxu1  ;;  %v523_v54 = vpop.f32.mrf.mxu0 }
 0x160   :  { %v529_v55 = vadd.f32 %v523_v54, %v474_v51 }
 0x161   :  { %v1121_v57 = vpop.f32.mrf.mxu1  ;;  %v1126_v58 = vpop.f32.mrf.mxu0 }
 0x162   :  { %v536_v59 = vadd.f32 %v534_v52, %v529_v55 }
 0x163   :  { %v526_v60 = vpop.f32.mrf.mxu0 }
 0x164   :  { %v537_v61 = vmax.f32 %v536_v59, 0.0 }
 0x165   :  { %v1127_v62 = vpop.f32.mrf.mxu0 }
 0x166   :  { %v538_v63 = vpack.c.bf16 %v537_v61, %v537_v61 }
 0x168   :  { %v548_v0 = vunpack.c.l.bf16 %v538_v63 }
 0x16a   :  { %649 = vrot.lane.b32.xlu0 %v548_v0, %s1197_s24  ;;  %553 = vrot.lane.b32.xlu1 %v548_v0, %s1196_s23  ;;  %v751_v21 = vmul.f32 %v548_v0, %v1283_v22 }
 0x16c   :  { %v752_v22 = vpack.c.bf16 %v751_v21, %v751_v21 }
 0x16e   :  { %800 = vrot.lane.b32.xlu0 %v548_v0, %s1200_s26  ;;  %549 = vrot.lane.b32.xlu1 %v548_v0, %s1198_s0 }
 0x172   :  { %902 = vrot.lane.b32.xlu0 %v548_v0, %s1202_s28  ;;  %700 = vrot.lane.b32.xlu1 %v548_v0, %s1199_s25 }
 0x176   :  { %1007 = vperm.xlu0 %1193, %v1004_v3   ;;  %851 = vrot.lane.b32.xlu1 %v548_v0, %s1201_s27 }
 0x17a   :  { %953 = vrot.lane.b32.xlu1 %v548_v0, %s1203_s29 }
 0x1dc   :  { %v650_v4 = vpop.permute.xlu0 %649  ;;  %v554_v5 = vpop.permute.xlu1 %553 }
 0x1dd   :  { %v651_v6 = vmul.f32 %v650_v4, %v1275_v12  ;;  %v555_v7 = vmul.f32 %v554_v5, %v1273_v10 }
 0x1df   :  { %v556_v8 = vpack.c.bf16 %v555_v7, %v555_v7  ;;  %v652_v11 = vpack.c.bf16 %v651_v6, %v651_v6 }
 0x1e0   :  { %v550_v9 = vpop.permute.xlu1 %549 }
 0x1e1   :  { %v561_v13 = vsel %vm57_vm1, %v556_v8, 0  ;;  %v551_v14 = vmul.f32 %v550_v9, %v1278_v18  ;;  %v657_v12 = vsel %vm57_vm1, %v652_v11, 0  ;;  %v801_v18 = vpop.permute.xlu0 %800 }
 0x1e2   :  { %1129 = vmatpush3.bf16.msra.mxu1 %v561_v13 }
 0x1e3   :  { %v552_v16 = vpack.c.bf16 %v551_v14, %v551_v14  ;;  %1140 = vmatprep.subr.bf16.mxu1 %v1194_v1 }
 0x1e4   :  { %v701_v17 = vpop.permute.xlu1 %700 }
 0x1e5   :  { %v607_v10 = vsel %vm57_vm1, %v552_v16, 0  ;;  %v702_v19 = vmul.f32 %v701_v17, %v1281_v20  ;;  %1131 = vmatmul.mubr.msk.bf16.vlgmr.msra.gmra.mxu1 %vm53_vm2, %v540_v15  ;;  %v802_v20 = vmul.f32 %v801_v18, %v1291_v31  ;;  %v757_v31 = vsel %vm57_vm1, %v752_v22, 0  ;;  %v903_v30 = vpop.permute.xlu0 %902 }
 0x1e6   :  { %1135 = vmatpush3.bf16.msra.mxu0 %v607_v10  ;;  %1141 = vmatpush3.bf16.msra.mxu1 %v657_v12  ;;  %v904_v34 = vmul.f32 %v903_v30, %v1319_v50  ;;  %v544_v50 = vld [vmem:[%s1471_s3 + $0x14] sm:$0xf] }
 0x1e7   :  { %v703_v24 = vpack.c.bf16 %v702_v19, %v702_v19  ;;  %1146 = vmatprep.subr.bf16.mxu0 %v1194_v1  ;;  %1142 = vmatprep.mubr.msk.bf16.mxu1 %vm1195_vm0, %v1194_v1  ;;  %v803_v28 = vpack.c.bf16 %v802_v20, %v802_v20 }
 0x1e8   :  { %1152 = vmatprep.subr.bf16.mxu1 %v1194_v1  ;;  %v852_v26 = vpop.permute.xlu1 %851  ;;  %v905_v37 = vpack.c.bf16 %v904_v34, %v904_v34 }
 0x1e9   :  { %v708_v25 = vsel %vm57_vm1, %v703_v24, 0  ;;  %1137 = vmatmul.mubr.msk.bf16.vlgmr.msra.gmra.mxu0 %vm53_vm2, %v539_v23  ;;  %v853_v29 = vmul.f32 %v852_v26, %v1307_v43  ;;  %v808_v33 = vsel %vm57_vm1, %v803_v28, 0 }
 0x1ea   :  { %1147 = vmatpush3.bf16.msra.mxu0 %v708_v25  ;;  %1148 = vmatprep.mubr.msk.bf16.mxu0 %vm1195_vm0, %v1194_v1  ;;  %v910_v40 = vsel %vm57_vm1, %v905_v37, 0 }
 0x1eb   :  { %1158 = vmatprep.subr.bf16.mxu0 %v1194_v1  ;;  %v854_v43 = vpack.c.bf16 %v853_v29, %v853_v29 }
 0x1ec   :  { %v954_v35 = vpop.permute.xlu1 %953 }
 0x1ed   :  { %1143 = vmatmul.mubr.msk.bf16.vlgmr.msra.gmra.mxu1 %vm53_vm2, %v541_v27  ;;  %v859_v38 = vsel %vm57_vm1, %v854_v43, 0  ;;  %v955_v39 = vmul.f32 %v1333_v56, %v954_v35  ;;  %v545_v56 = vld [vmem:[%s1471_s3 + $0x18] sm:$0xf] }
 0x1ee   :  { %1153 = vmatpush3.bf16.msra.mxu1 %v757_v31  ;;  %1154 = vmatprep.mubr.msk.bf16.mxu1 %vm1195_vm0, %v1194_v1 }
 0x1ef   :  { %1164 = vmatprep.subr.bf16.mxu1 %v1194_v1  ;;  %v956_v41 = vpack.c.bf16 %v955_v39, %v955_v39 }
 0x1f1   :  { %1149 = vmatmul.mubr.msk.bf16.vlgmr.msra.gmra.mxu0 %vm53_vm2, %v542_v32  ;;  %v961_v42 = vsel %vm57_vm1, %v956_v41, 0  ;;  %v1008_v25 = vpop.permute.xlu0 %1007 }
 0x1f2   :  { %1159 = vmatpush3.bf16.msra.mxu0 %v808_v33  ;;  %1160 = vmatprep.mubr.msk.bf16.mxu0 %vm1195_vm0, %v1194_v1 }
 0x1f3   :  { %1170 = vmatprep.subr.bf16.mxu0 %v1194_v1 }
 0x1f5   :  { %1155 = vmatmul.mubr.msk.bf16.vlgmr.msra.gmra.mxu1 %vm53_vm2, %v543_v36 }
 0x1f6   :  { %1165 = vmatpush3.bf16.msra.mxu1 %v859_v38  ;;  %1166 = vmatprep.mubr.msk.bf16.mxu1 %vm1195_vm0, %v1194_v1 }
 0x1f7   :  { %1176 = vmatprep.subr.bf16.mxu1 %v1194_v1 }
 0x1f9   :  { %1161 = vmatmul.mubr.msk.bf16.vlgmr.msra.gmra.mxu0 %vm53_vm2, %v544_v50 }
 0x1fa   :  { %1171 = vmatpush3.bf16.msra.mxu0 %v910_v40  ;;  %1172 = vmatprep.mubr.msk.bf16.mxu0 %vm1195_vm0, %v1194_v1 }
 0x1fd   :  { %1167 = vmatmul.mubr.msk.bf16.vlgmr.msra.gmra.mxu1 %vm53_vm2, %v545_v56 }
 0x1fe   :  { %1177 = vmatpush3.bf16.msra.mxu1 %v961_v42  ;;  %1178 = vmatprep.mubr.msk.bf16.mxu1 %vm1195_vm0, %v1194_v1 }
 0x201   :  { %1173 = vmatmul.mubr.msk.bf16.vlgmr.msra.gmra.mxu0 %vm53_vm2, %v546_v44 }
 0x205   :  { %1179 = vmatmul.mubr.msk.bf16.vlgmr.msra.gmra.mxu1 %vm53_vm2, %v547_v45 }
 0x2a5   :  { %v597_v46 = vpop.f32.mrf.mxu1 }
 0x2a7   :  { %v1132_v47 = vpop.f32.mrf.mxu1 }
 0x2a9   :  { %v600_v48 = vpop.f32.mrf.mxu1  ;;  %v643_v49 = vpop.f32.mrf.mxu0 }
 0x2aa   :  { %v644_v3 = vadd.f32 %v643_v49, %v597_v46 }
 0x2ab   :  { %v1133_v51 = vpop.f32.mrf.mxu1  ;;  %v1138_v52 = vpop.f32.mrf.mxu0 }
 0x2ad   :  { %v646_v53 = vpop.f32.mrf.mxu0  ;;  %v693_v54 = vpop.f32.mrf.mxu1 }
 0x2ae   :  { %v699_v6 = vadd.f32 %v693_v54, %v644_v3 }
 0x2af   :  { %v1139_v55 = vpop.f32.mrf.mxu0  ;;  %v1144_v57 = vpop.f32.mrf.mxu1 }
 0x2b1   :  { %v696_v58 = vpop.f32.mrf.mxu1  ;;  %v744_v1 = vpop.f32.mrf.mxu0 }
 0x2b2   :  { %v750_v9 = vadd.f32 %v744_v1, %v699_v6 }
 0x2b3   :  { %v1145_v59 = vpop.f32.mrf.mxu1  ;;  %v1150_v60 = vpop.f32.mrf.mxu0 }
 0x2b5   :  { %v747_v61 = vpop.f32.mrf.mxu0  ;;  %v793_v62 = vpop.f32.mrf.mxu1 }
 0x2b6   :  { %v799_v14 = vadd.f32 %v793_v62, %v750_v9 }
 0x2b7   :  { %v1151_v63 = vpop.f32.mrf.mxu0  ;;  %v1156_v0 = vpop.f32.mrf.mxu1 }
 0x2b9   :  { %v796_v4 = vpop.f32.mrf.mxu1  ;;  %v844_v5 = vpop.f32.mrf.mxu0 }
 0x2ba   :  { %v850_v17 = vadd.f32 %v844_v5, %v799_v14 }
 0x2bb   :  { %v1157_v7 = vpop.f32.mrf.mxu1  ;;  %v1162_v8 = vpop.f32.mrf.mxu0 }
 0x2bd   :  { %v847_v11 = vpop.f32.mrf.mxu0  ;;  %v895_v13 = vpop.f32.mrf.mxu1 }
 0x2be   :  { %v901_v19 = vadd.f32 %v895_v13, %v850_v17 }
 0x2bf   :  { %v1163_v15 = vpop.f32.mrf.mxu0  ;;  %v1168_v16 = vpop.f32.mrf.mxu1 }
 0x2c1   :  { %v898_v12 = vpop.f32.mrf.mxu1  ;;  %v946_v10 = vpop.f32.mrf.mxu0 }
 0x2c2   :  { %v952_v23 = vadd.f32 %v946_v10, %v901_v19 }
 0x2c3   :  { %v1169_v21 = vpop.f32.mrf.mxu1  ;;  %v1174_v18 = vpop.f32.mrf.mxu0 }
 0x2c5   :  { %v997_v24 = vpop.f32.mrf.mxu1  ;;  %v949_v20 = vpop.f32.mrf.mxu0 }
 0x2c6   :  { %v1003_v22 = vadd.f32 %v997_v24, %v952_v23 }
 0x2c7   :  { %v1180_v26 = vpop.f32.mrf.mxu1  ;;  %v1175_v27 = vpop.f32.mrf.mxu0 }
 0x2c8   :  { %v1010_v28 = vadd.f32 %v1008_v25, %v1003_v22 }
 0x2c9   :  { %v1000_v29 = vpop.f32.mrf.mxu1 }
 0x2ca   :  { %v1011_v31 = vadd.f32 %v1010_v28, %v1246_v2 }
 0x2cb   :  { %v1181_v30 = vpop.f32.mrf.mxu1 }
 0x2cc   :  { %v1012_v32 = vmax.f32 %v1011_v31, 0.0 }
 0x2ce   :  { %v1013_v33 = vpack.c.bf16 %v1012_v32, %v1012_v32 }
 0x2d0   :  { %1014 = vst [vmem:[%s1472_s6] sm:$0xf] %v1013_v33 }

// kernel: resnet_forward.15
= control target key start
LH: loop header
LB: loop body
LE: loop exit
PB: predicated region body
PF: predicated region fallthrough
CT: control target
= control target key end

     0   :  { %vm74_vm0 = vcmask 1043456   ;;  %v177_v0 = vmov 0.0   ;;  %vm178_vm1 = vmmov 0   ;;  %v179_v3 = vmov 0   ;;  %s230_s1 = inlined_call_operand.vmem [shape: bf16[72,32], index: 1, kind: input, shape index: {}]   ;;  %s231_s2 = inlined_call_operand.vmem [shape: f32[16,1], index: 2, kind: input, shape index: {}]   ;;  %s232_s0 = inlined_call_operand.vmem [shape: bf16[16,72], index: 0, kind: input, shape index: {}]   ;;  %s233_s3 = inlined_call_operand.vmem [shape: bf16[16,32], index: 3, kind: output, shape index: {}]  }
   0x1   :  { %153 = vmatprep.subr.bf16.mxu0 %v177_v0  ;;  %v171_v1 = vld [vmem:[%s230_s1 + $0x20] ss:$0 sps:$4 sm:$0xff]   ;;  %163 = vmatprep.mubr.msk.bf16.mxu0 %vm178_vm1, %v177_v0  ;;  %v172_v4 = vld [vmem:[%s230_s1 + $0x18] sm:$0xff]   ;;  %v173_v6 = vld [vmem:[%s230_s1 + $0x10] sm:$0xff]   ;;  %vm70_vm2 = vcmask 588800   ;;  %vm129_vm3 = vcmask 257024  }
   0x2   :  { %v76_v2 = vsel %vm74_vm0, %v171_v1, 0  ;;  %170 = vset.pattern.permute.xlu0 %v179_v3  ;;  %v26_v5 = vld [vmem:[%s231_s2] sm:$0xff]  ;;  %v27_v7 = vld [vmem:[%s231_s2 + $0x8] sm:$0xff] }
   0x3   :  { %154 = vmatpush3.bf16.msra.mxu0 %v76_v2  ;;  %30 = vperm.xlu0 %170, %v26_v5   ;;  %v174_v8 = vld [vmem:[%s230_s1 + $0x8] sm:$0xff]   ;;  %v175_v9 = vld [vmem:[%s230_s1] sm:$0xff]  }
   0x4   :  { %155 = vmatprep.subr.bf16.mxu0 %v177_v0  ;;  %v176_v10 = vld [vmem:[%s232_s0] sm:$0xff]  }
   0x7   :  { %156 = vmatpush3.bf16.msra.mxu0 %v172_v4  ;;  %35 = vperm.xlu0 %170, %v27_v7  }
   0x8   :  { %157 = vmatprep.subr.bf16.mxu0 %v177_v0 }
   0xb   :  { %158 = vmatpush3.bf16.msra.mxu0 %v173_v6 }
   0xc   :  { %159 = vmatprep.subr.bf16.mxu0 %v177_v0 }
   0xf   :  { %160 = vmatpush3.bf16.msra.mxu0 %v174_v8 }
  0x10   :  { %161 = vmatprep.subr.bf16.mxu0 %v177_v0 }
  0x13   :  { %162 = vmatpush3.bf16.msra.mxu0 %v175_v9 }
  0x16   :  { %164 = vmatmul.mubr.msk.bf16.vlgmr.msra.gmra.mxu0 %vm70_vm2, %v176_v10 }
  0x7e   :  { %v31_v11 = vpop.permute.xlu0 %30 }
  0x82   :  { %v36_v16 = vpop.permute.xlu0 %35 }
  0xd6   :  { %v112_v12 = vpop.f32.mrf.mxu0 }
  0xd7   :  { %v113_v13 = vadd.f32 %v112_v12, %v31_v11 }
  0xd8   :  { %v165_v14 = vpop.f32.mrf.mxu0 }
  0xd9   :  { %v119_v15 = vmax.f32 %v113_v13, 0.0 }
  0xda   :  { %v115_v17 = vpop.f32.mrf.mxu0 }
  0xdb   :  { %v145_v18 = vpack.c.bf16 %v119_v15, %v119_v15  ;;  %v116_v19 = vadd.f32 %v115_v17, %v36_v16 }
  0xdc   :  { %v166_v20 = vpop.f32.mrf.mxu0 }
  0xdd   :  { %130 = vst.msk [vmem:[%s233_s3] sm:$0xf] %vm129_vm3, %v145_v18  ;;  %v120_v21 = vmax.f32 %v116_v19, 0.0 }
  0xdf   :  { %v146_v22 = vpack.c.bf16 %v120_v21, %v120_v21 }
  0xe1   :  { %131 = vst.msk [vmem:[%s233_s3 + $0x4] sm:$0xf] %vm129_vm3, %v146_v22 }

// kernel: resnet_forward.16
= control target key start
LH: loop header
LB: loop body
LE: loop exit
PB: predicated region body
PF: predicated region fallthrough
CT: control target
= control target key end

     0   :  { %v1385_v0 = vmov 0.0   ;;  %vm1386_vm0 = vmmov 0   ;;  %vm97_vm1 = vcmask 261120   ;;  %vm202_vm2 = vcmask 130048   ;;  %s1626_s5 = inlined_call_operand.vmem [shape: bf16[9,32,32], index: 5, kind: input, shape index: {}]   ;;  %s1627_s0 = inlined_call_operand.vmem [shape: bf16[16,32], index: 0, kind: input, shape index: {}]   ;;  %s1628_s1 = inlined_call_operand.vmem [shape: bf16[9,16,16], index: 1, kind: input, shape index: {}]   ;;  %s1629_s4 = inlined_call_operand.vmem [shape: bf16[8,32], index: 4, kind: input, shape index: {}]   ;;  %s1630_s3 = inlined_call_operand.vmem [shape: bf16[16,8], index: 3, kind: input, shape index: {}]   ;;  %s1631_s2 = inlined_call_operand.vmem [shape: f32[16,1], index: 2, kind: input, shape index: {}]   ;;  %s1632_s6 = inlined_call_operand.vmem [shape: bf16[16,32], index: 6, kind: output, shape index: {}]  }
   0x1   :  { %1220 = vmatprep.subr.bf16.mxu0 %v1385_v0  ;;  %1228 = vmatprep.subr.bf16.mxu1 %v1385_v0  ;;  %v1356_v1 = vld [vmem:[%s1626_s5 + $0x8] sm:$0xff]   ;;  %v1357_v2 = vld [vmem:[%s1626_s5 + $0x18] sm:$0xff]   ;;  %v1358_v3 = vld [vmem:[%s1626_s5] sm:$0xff]   ;;  %vm1057_vm3 = vcmask 1043456   ;;  %vm1053_vm4 = vcmask 64512   ;;  %v1387_v35 = vmov 0  }
   0x2   :  { %1224 = vmatprep.mubr.msk.bf16.mxu0 %vm1386_vm0, %v1385_v0  ;;  %1232 = vmatprep.mubr.msk.bf16.mxu1 %vm1386_vm0, %v1385_v0  ;;  %v1359_v4 = vld [vmem:[%s1626_s5 + $0x10] sm:$0xff]   ;;  %v1446_v5 = vld [vmem:[%s1627_s0] sm:$0xff]   ;;  %v1361_v17 = vld [vmem:[%s1628_s1 + $0x8] sm:$0xff]   ;;  %vm1114_vm5 = vcmask 257024  }
   0x3   :  { %1221 = vmatpush3.bf16.msra.mxu0 %v1356_v1  ;;  %1229 = vmatpush3.bf16.msra.mxu1 %v1357_v2  ;;  %v1362_v14 = vld [vmem:[%s1628_s1] sm:$0xff]   ;;  %v1363_v18 = vld [vmem:[%s1626_s5 + $0x28] sm:$0xff]   ;;  %v1365_v20 = vld [vmem:[%s1626_s5 + $0x38] sm:$0xff]  }
   0x4   :  { %1222 = vmatprep.subr.bf16.mxu0 %v1385_v0  ;;  %1230 = vmatprep.subr.bf16.mxu1 %v1385_v0  ;;  %v1364_v19 = vld [vmem:[%s1626_s5 + $0x20] sm:$0xff]   ;;  %v1366_v21 = vld [vmem:[%s1626_s5 + $0x30] sm:$0xff]   ;;  %v1367_v22 = vld [vmem:[%s1626_s5 + $0x48] sm:$0xff]  }
   0x5   :  { %v1368_v23 = vld [vmem:[%s1626_s5 + $0x40] sm:$0xff]   ;;  %v1369_v24 = vld [vmem:[%s1626_s5 + $0x58] sm:$0xff]   ;;  %v1370_v25 = vld [vmem:[%s1626_s5 + $0x50] sm:$0xff]   ;;  %1355 = vset.pattern.permute.xlu0 %v1387_v35 }
   0x6   :  { %v1371_v26 = vld [vmem:[%s1626_s5 + $0x68] sm:$0xff]   ;;  %v1372_v27 = vld [vmem:[%s1626_s5 + $0x60] sm:$0xff]   ;;  %v1373_v28 = vld [vmem:[%s1626_s5 + $0x78] sm:$0xff]  }
   0x7   :  { %1223 = vmatpush3.bf16.msra.mxu0 %v1358_v3  ;;  %1231 = vmatpush3.bf16.msra.mxu1 %v1359_v4  ;;  %v1374_v29 = vld [vmem:[%s1626_s5 + $0x70] sm:$0xff]   ;;  %v1375_v30 = vld [vmem:[%s1626_s5 + $0x88] sm:$0xff]   ;;  %v1376_v31 = vld [vmem:[%s1626_s5 + $0x80] sm:$0xff]  }
   0x8   :  { %1236 = vmatprep.subr.bf16.mxu0 %v1385_v0  ;;  %1242 = vmatprep.subr.bf16.mxu1 %v1385_v0  ;;  %v1047_v32 = vld [vmem:[%s1629_s4] sm:$0xf]  ;;  %v1032_v37 = vld [vmem:[%s1631_s2 + $0x8] sm:$0xff]  ;;  %v1377_v53 = vld [vmem:[%s1628_s1 + $0x10] sm:$0xff]  }
   0x9   :  { %v1059_v33 = vsel %vm1057_vm3, %v1047_v32, 0  ;;  %v1384_v34 = vld [vmem:[%s1630_s3] sm:$0xff]   ;;  %v1378_v59 = vld [vmem:[%s1628_s1 + $0x18] sm:$0xff]  }
   0xa   :  { %1225 = vmatmul.mubr.msk.bf16.vlgmr.msra.gmra.mxu0 %vm97_vm1, %v1446_v5  ;;  %1233 = vmatmul.mubr.msk.bf16.vlgmr.msra.gmra.mxu1 %vm97_vm1, %v1446_v5  ;;  %v1031_v36 = vld [vmem:[%s1631_s2] sm:$0xff] }
   0xb   :  { %1238 = vmatprep.mubr.msk.bf16.mxu0 %vm1386_vm0, %v1385_v0  ;;  %1244 = vmatprep.mubr.msk.bf16.mxu1 %vm1386_vm0, %v1385_v0  ;;  %v1379_v2 = vld [vmem:[%s1628_s1 + $0x20] sm:$0xff]  }
   0xc   :  { %1035 = vperm.xlu0 %1355, %v1031_v36  }
  0x10   :  { %1040 = vperm.xlu0 %1355, %v1032_v37  }
  0xca   :  { %v135_v6 = vpop.f32.mrf.mxu0  ;;  %v189_v7 = vpop.f32.mrf.mxu1 }
  0xcc   :  { %v1226_v8 = vpop.f32.mrf.mxu0  ;;  %v1234_v9 = vpop.f32.mrf.mxu1 }
  0xcd   :  { %v1380_v8 = vld [vmem:[%s1628_s1 + $0x28] sm:$0xff]  }
  0xce   :  { %v138_v10 = vpop.f32.mrf.mxu0  ;;  %v192_v12 = vpop.f32.mrf.mxu1 }
  0xcf   :  { %v142_v11 = vpack.c.bf16 %v138_v10, %v135_v6  ;;  %v196_v13 = vpack.c.bf16 %v192_v12, %v189_v7 }
  0xd0   :  { %v1227_v15 = vpop.f32.mrf.mxu0  ;;  %v1235_v16 = vpop.f32.mrf.mxu1 }
  0xd1   :  { %1243 = vmatpush3.bf16.msra.mxu1 %v142_v11  ;;  %1237 = vmatpush3.bf16.msra.mxu0 %v196_v13 }
  0xd2   :  { %1256 = vmatprep.subr.bf16.mxu1 %v1385_v0  ;;  %1248 = vmatprep.subr.bf16.mxu0 %v1385_v0 }
  0xd4   :  { %1245 = vmatmul.mubr.msk.bf16.vlgmr.msra.gmra.mxu1 %vm202_vm2, %v1362_v14  ;;  %1239 = vmatmul.mubr.msk.bf16.vlgmr.msra.gmra.mxu0 %vm202_vm2, %v1361_v17  ;;  %v1381_v14 = vld [vmem:[%s1628_s1 + $0x30] sm:$0xff]  }
  0xd5   :  { %1258 = vmatprep.mubr.msk.bf16.mxu1 %vm1386_vm0, %v1385_v0  ;;  %1249 = vmatpush3.bf16.msra.mxu0 %v1363_v18 }
  0xd6   :  { %1252 = vmatprep.mubr.msk.bf16.mxu0 %vm1386_vm0, %v1385_v0  ;;  %1250 = vmatprep.subr.bf16.mxu0 %v1385_v0 }
  0xd9   :  { %1251 = vmatpush3.bf16.msra.mxu0 %v1364_v19 }
  0xda   :  { %1262 = vmatprep.subr.bf16.mxu0 %v1385_v0 }
  0xdc   :  { %1253 = vmatmul.mubr.msk.bf16.vlgmr.msra.gmra.mxu0 %vm97_vm1, %v1446_v5 }
  0xdd   :  { %1263 = vmatpush3.bf16.msra.mxu0 %v1365_v20  ;;  %1266 = vmatprep.mubr.msk.bf16.mxu0 %vm1386_vm0, %v1385_v0  ;;  %v1382_v20 = vld [vmem:[%s1628_s1 + $0x38] sm:$0xff]  }
  0xde   :  { %1264 = vmatprep.subr.bf16.mxu0 %v1385_v0 }
  0xe1   :  { %1265 = vmatpush3.bf16.msra.mxu0 %v1366_v21 }
  0xe2   :  { %1276 = vmatprep.subr.bf16.mxu0 %v1385_v0 }
  0xe4   :  { %1267 = vmatmul.mubr.msk.bf16.vlgmr.msra.gmra.mxu0 %vm97_vm1, %v1446_v5 }
  0xe5   :  { %1277 = vmatpush3.bf16.msra.mxu0 %v1367_v22  ;;  %1280 = vmatprep.mubr.msk.bf16.mxu0 %vm1386_vm0, %v1385_v0 }
  0xe6   :  { %1278 = vmatprep.subr.bf16.mxu0 %v1385_v0 }
  0xe9   :  { %1279 = vmatpush3.bf16.msra.mxu0 %v1368_v23 }
  0xea   :  { %1290 = vmatprep.subr.bf16.mxu0 %v1385_v0 }
  0xec   :  { %1281 = vmatmul.mubr.msk.bf16.vlgmr.msra.gmra.mxu0 %vm97_vm1, %v1446_v5 }
  0xed   :  { %1291 = vmatpush3.bf16.msra.mxu0 %v1369_v24  ;;  %1294 = vmatprep.mubr.msk.bf16.mxu0 %vm1386_vm0, %v1385_v0 }
  0xee   :  { %1292 = vmatprep.subr.bf16.mxu0 %v1385_v0 }
  0xf1   :  { %1293 = vmatpush3.bf16.msra.mxu0 %v1370_v25 }
  0xf2   :  { %1304 = vmatprep.subr.bf16.mxu0 %v1385_v0 }
  0xf4   :  { %1295 = vmatmul.mubr.msk.bf16.vlgmr.msra.gmra.mxu0 %vm97_vm1, %v1446_v5 }
  0xf5   :  { %1305 = vmatpush3.bf16.msra.mxu0 %v1371_v26  ;;  %1308 = vmatprep.mubr.msk.bf16.mxu0 %vm1386_vm0, %v1385_v0  ;;  %v1383_v26 = vld [vmem:[%s1628_s1 + $0x40] sm:$0xff]  }
  0xf6   :  { %1306 = vmatprep.subr.bf16.mxu0 %v1385_v0 }
  0xf9   :  { %1307 = vmatpush3.bf16.msra.mxu0 %v1372_v27 }
  0xfa   :  { %1318 = vmatprep.subr.bf16.mxu0 %v1385_v0 }
  0xfc   :  { %1309 = vmatmul.mubr.msk.bf16.vlgmr.msra.gmra.mxu0 %vm97_vm1, %v1446_v5 }
  0xfd   :  { %1319 = vmatpush3.bf16.msra.mxu0 %v1373_v28  ;;  %1322 = vmatprep.mubr.msk.bf16.mxu0 %vm1386_vm0, %v1385_v0 }
  0xfe   :  { %1320 = vmatprep.subr.bf16.mxu0 %v1385_v0 }
 0x101   :  { %1321 = vmatpush3.bf16.msra.mxu0 %v1374_v29 }
 0x102   :  { %1332 = vmatprep.subr.bf16.mxu0 %v1385_v0 }
 0x104   :  { %1323 = vmatmul.mubr.msk.bf16.vlgmr.msra.gmra.mxu0 %vm97_vm1, %v1446_v5 }
 0x105   :  { %1333 = vmatpush3.bf16.msra.mxu0 %v1375_v30  ;;  %1336 = vmatprep.mubr.msk.bf16.mxu0 %vm1386_vm0, %v1385_v0 }
 0x106   :  { %1334 = vmatprep.subr.bf16.mxu0 %v1385_v0 }
 0x109   :  { %1335 = vmatpush3.bf16.msra.mxu0 %v1376_v31 }
 0x10a   :  { %1346 = vmatprep.subr.bf16.mxu0 %v1385_v0 }
 0x10c   :  { %1337 = vmatmul.mubr.msk.bf16.vlgmr.msra.gmra.mxu0 %vm97_vm1, %v1446_v5 }
 0x10d   :  { %1348 = vmatprep.mubr.msk.bf16.mxu0 %vm1386_vm0, %v1385_v0  ;;  %1347 = vmatpush3.bf16.msra.mxu0 %v1059_v33 }
 0x114   :  { %1349 = vmatmul.mubr.msk.bf16.vlgmr.msra.gmra.mxu0 %vm1053_vm4, %v1384_v34 }
 0x194   :  { %v289_v38 = vpop.f32.mrf.mxu1  ;;  %v240_v39 = vpop.f32.mrf.mxu0 }
 0x195   :  { %v1568_v40 = vadd.f32 %v289_v38, %v240_v39 }
 0x196   :  { %v1246_v41 = vpop.f32.mrf.mxu1  ;;  %v1240_v42 = vpop.f32.mrf.mxu0 }
 0x198   :  { %v292_v43 = vpop.f32.mrf.mxu1  ;;  %v243_v44 = vpop.f32.mrf.mxu0 }
 0x199   :  { %v1570_v45 = vadd.f32 %v292_v43, %v243_v44 }
 0x19a   :  { %v1247_v46 = vpop.f32.mrf.mxu1  ;;  %v1241_v47 = vpop.f32.mrf.mxu0 }
 0x19c   :  { %v342_v48 = vpop.f32.mrf.mxu0 }
 0x19e   :  { %v1254_v49 = vpop.f32.mrf.mxu0 }
 0x1a0   :  { %v345_v50 = vpop.f32.mrf.mxu0 }
 0x1a1   :  { %v349_v51 = vpack.c.bf16 %v345_v50, %v342_v48 }
 0x1a2   :  { %v1255_v52 = vpop.f32.mrf.mxu0 }
 0x1a3   :  { %1257 = vmatpush3.bf16.msra.mxu1 %v349_v51 }
 0x1a4   :  { %v447_v54 = vpop.f32.mrf.mxu0  ;;  %1270 = vmatprep.subr.bf16.mxu1 %v1385_v0 }
 0x1a6   :  { %1259 = vmatmul.mubr.msk.bf16.vlgmr.msra.gmra.mxu1 %vm202_vm2, %v1377_v53  ;;  %v1268_v55 = vpop.f32.mrf.mxu0 }
 0x1a7   :  { %1272 = vmatprep.mubr.msk.bf16.mxu1 %vm1386_vm0, %v1385_v0 }
 0x1a8   :  { %v450_v56 = vpop.f32.mrf.mxu0 }
 0x1a9   :  { %v454_v57 = vpack.c.bf16 %v450_v56, %v447_v54 }
 0x1aa   :  { %v1269_v58 = vpop.f32.mrf.mxu0 }
 0x1ab   :  { %1271 = vmatpush3.bf16.msra.mxu1 %v454_v57 }
 0x1ac   :  { %v552_v60 = vpop.f32.mrf.mxu0  ;;  %1284 = vmatprep.subr.bf16.mxu1 %v1385_v0 }
 0x1ae   :  { %1273 = vmatmul.mubr.msk.bf16.vlgmr.msra.gmra.mxu1 %vm202_vm2, %v1378_v59  ;;  %v1282_v61 = vpop.f32.mrf.mxu0 }
 0x1af   :  { %1286 = vmatprep.mubr.msk.bf16.mxu1 %vm1386_vm0, %v1385_v0 }
 0x1b0   :  { %v555_v62 = vpop.f32.mrf.mxu0 }
 0x1b1   :  { %v559_v63 = vpack.c.bf16 %v555_v62, %v552_v60 }
 0x1b2   :  { %v1283_v1 = vpop.f32.mrf.mxu0 }
 0x1b3   :  { %1285 = vmatpush3.bf16.msra.mxu1 %v559_v63 }
 0x1b4   :  { %v657_v3 = vpop.f32.mrf.mxu0  ;;  %1298 = vmatprep.subr.bf16.mxu1 %v1385_v0 }
 0x1b6   :  { %1287 = vmatmul.mubr.msk.bf16.vlgmr.msra.gmra.mxu1 %vm202_vm2, %v1379_v2  ;;  %v1296_v4 = vpop.f32.mrf.mxu0 }
 0x1b7   :  { %1300 = vmatprep.mubr.msk.bf16.mxu1 %vm1386_vm0, %v1385_v0  ;;  %v1036_v4 = vpop.permute.xlu0 %1035 }
 0x1b8   :  { %v660_v5 = vpop.f32.mrf.mxu0 }
 0x1b9   :  { %v664_v6 = vpack.c.bf16 %v660_v5, %v657_v3 }
 0x1ba   :  { %v1297_v7 = vpop.f32.mrf.mxu0 }
 0x1bb   :  { %1299 = vmatpush3.bf16.msra.mxu1 %v664_v6 }
 0x1bc   :  { %v762_v9 = vpop.f32.mrf.mxu0  ;;  %1312 = vmatprep.subr.bf16.mxu1 %v1385_v0 }
 0x1be   :  { %1301 = vmatmul.mubr.msk.bf16.vlgmr.msra.gmra.mxu1 %vm202_vm2, %v1380_v8  ;;  %v1310_v10 = vpop.f32.mrf.mxu0 }
 0x1bf   :  { %1314 = vmatprep.mubr.msk.bf16.mxu1 %vm1386_vm0, %v1385_v0 }
 0x1c0   :  { %v765_v11 = vpop.f32.mrf.mxu0 }
 0x1c1   :  { %v769_v12 = vpack.c.bf16 %v765_v11, %v762_v9  ;;  %v1041_v11 = vpop.permute.xlu0 %1040 }
 0x1c2   :  { %v1311_v13 = vpop.f32.mrf.mxu0 }
 0x1c3   :  { %1313 = vmatpush3.bf16.msra.mxu1 %v769_v12 }
 0x1c4   :  { %v867_v15 = vpop.f32.mrf.mxu0  ;;  %1326 = vmatprep.subr.bf16.mxu1 %v1385_v0 }
 0x1c6   :  { %1315 = vmatmul.mubr.msk.bf16.vlgmr.msra.gmra.mxu1 %vm202_vm2, %v1381_v14  ;;  %v1324_v16 = vpop.f32.mrf.mxu0 }
 0x1c7   :  { %1328 = vmatprep.mubr.msk.bf16.mxu1 %vm1386_vm0, %v1385_v0 }
 0x1c8   :  { %v870_v17 = vpop.f32.mrf.mxu0 }
 0x1c9   :  { %v874_v18 = vpack.c.bf16 %v870_v17, %v867_v15 }
 0x1ca   :  { %v1325_v19 = vpop.f32.mrf.mxu0 }
 0x1cb   :  { %1327 = vmatpush3.bf16.msra.mxu1 %v874_v18 }
 0x1cc   :  { %v972_v21 = vpop.f32.mrf.mxu0  ;;  %1340 = vmatprep.subr.bf16.mxu1 %v1385_v0 }
 0x1ce   :  { %1329 = vmatmul.mubr.msk.bf16.vlgmr.msra.gmra.mxu1 %vm202_vm2, %v1382_v20  ;;  %v1338_v22 = vpop.f32.mrf.mxu0 }
 0x1cf   :  { %1342 = vmatprep.mubr.msk.bf16.mxu1 %vm1386_vm0, %v1385_v0 }
 0x1d0   :  { %v975_v23 = vpop.f32.mrf.mxu0 }
 0x1d1   :  { %v979_v24 = vpack.c.bf16 %v975_v23, %v972_v21 }
 0x1d2   :  { %v1339_v25 = vpop.f32.mrf.mxu0 }
 0x1d3   :  { %1341 = vmatpush3.bf16.msra.mxu1 %v979_v24 }
 0x1d4   :  { %v1095_v27 = vpop.f32.mrf.mxu0 }
 0x1d6   :  { %1343 = vmatmul.mubr.msk.bf16.vlgmr.msra.gmra.mxu1 %vm202_vm2, %v1383_v26  ;;  %v1350_v28 = vpop.f32.mrf.mxu0 }
 0x1d8   :  { %v1098_v29 = vpop.f32.mrf.mxu0 }
 0x1da   :  { %v1351_v30 = vpop.f32.mrf.mxu0 }
 0x266   :  { %v392_v31 = vpop.f32.mrf.mxu1 }
 0x267   :  { %v399_v51 = vadd.f32 %v392_v31, %v1568_v40 }
 0x268   :  { %v1260_v32 = vpop.f32.mrf.mxu1 }
 0x26a   :  { %v395_v33 = vpop.f32.mrf.mxu1 }
 0x26b   :  { %v400_v55 = vadd.f32 %v395_v33, %v1570_v45 }
 0x26c   :  { %v1261_v34 = vpop.f32.mrf.mxu1 }
 0x26e   :  { %v497_v35 = vpop.f32.mrf.mxu1 }
 0x26f   :  { %v504_v53 = vadd.f32 %v497_v35, %v399_v51 }
 0x270   :  { %v1274_v0 = vpop.f32.mrf.mxu1 }
 0x272   :  { %v500_v36 = vpop.f32.mrf.mxu1 }
 0x273   :  { %v505_v58 = vadd.f32 %v500_v36, %v400_v55 }
 0x274   :  { %v1275_v37 = vpop.f32.mrf.mxu1 }
 0x276   :  { %v602_v38 = vpop.f32.mrf.mxu1 }
 0x277   :  { %v609_v56 = vadd.f32 %v602_v38, %v504_v53 }
 0x278   :  { %v1288_v39 = vpop.f32.mrf.mxu1 }
 0x27a   :  { %v605_v41 = vpop.f32.mrf.mxu1 }
 0x27b   :  { %v610_v61 = vadd.f32 %v605_v41, %v505_v58 }
 0x27c   :  { %v1289_v42 = vpop.f32.mrf.mxu1 }
 0x27e   :  { %v707_v43 = vpop.f32.mrf.mxu1 }
 0x27f   :  { %v714_v59 = vadd.f32 %v707_v43, %v609_v56 }
 0x280   :  { %v1302_v44 = vpop.f32.mrf.mxu1 }
 0x282   :  { %v710_v46 = vpop.f32.mrf.mxu1 }
 0x283   :  { %v715_v1 = vadd.f32 %v710_v46, %v610_v61 }
 0x284   :  { %v1303_v47 = vpop.f32.mrf.mxu1 }
 0x286   :  { %v812_v48 = vpop.f32.mrf.mxu1 }
 0x287   :  { %v819_v62 = vadd.f32 %v812_v48, %v714_v59 }
 0x288   :  { %v1316_v49 = vpop.f32.mrf.mxu1 }
 0x28a   :  { %v815_v50 = vpop.f32.mrf.mxu1 }
 0x28b   :  { %v820_v5 = vadd.f32 %v815_v50, %v715_v1 }
 0x28c   :  { %v1317_v52 = vpop.f32.mrf.mxu1 }
 0x28e   :  { %v917_v54 = vpop.f32.mrf.mxu1 }
 0x28f   :  { %v924_v2 = vadd.f32 %v917_v54, %v819_v62 }
 0x290   :  { %v1330_v57 = vpop.f32.mrf.mxu1 }
 0x292   :  { %v920_v60 = vpop.f32.mrf.mxu1 }
 0x293   :  { %v925_v7 = vadd.f32 %v920_v60, %v820_v5 }
 0x294   :  { %v1331_v63 = vpop.f32.mrf.mxu1 }
 0x296   :  { %v1022_v3 = vpop.f32.mrf.mxu1 }
 0x297   :  { %v1029_v6 = vadd.f32 %v1022_v3, %v924_v2 }
 0x298   :  { %v1344_v40 = vpop.f32.mrf.mxu1 }
 0x299   :  { %v1043_v8 = vadd.f32 %v1036_v4, %v1029_v6 }
 0x29a   :  { %v1025_v9 = vpop.f32.mrf.mxu1 }
 0x29b   :  { %v1102_v10 = vadd.f32 %v1095_v27, %v1043_v8  ;;  %v1030_v45 = vadd.f32 %v1025_v9, %v925_v7 }
 0x29c   :  { %v1345_v12 = vpop.f32.mrf.mxu1 }
 0x29d   :  { %v1104_v13 = vmax.f32 %v1102_v10, 0.0  ;;  %v1044_v14 = vadd.f32 %v1041_v11, %v1030_v45 }
 0x29f   :  { %v1171_v15 = vpack.c.bf16 %v1104_v13, %v1104_v13  ;;  %v1103_v16 = vadd.f32 %v1098_v29, %v1044_v14 }
 0x2a1   :  { %1115 = vst.msk [vmem:[%s1632_s6] sm:$0xf] %vm1114_vm5, %v1171_v15  ;;  %v1105_v17 = vmax.f32 %v1103_v16, 0.0 }
 0x2a3   :  { %v1172_v18 = vpack.c.bf16 %v1105_v17, %v1105_v17 }
 0x2a5   :  { %1116 = vst.msk [vmem:[%s1632_s6 + $0x4] sm:$0xf] %vm1114_vm5, %v1172_v18 }

// kernel: resnet_forward.17
= control target key start
LH: loop header
LB: loop body
LE: loop exit
PB: predicated region body
PF: predicated region fallthrough
CT: control target
= control target key end

     0   :  { %v2399_v0 = vmov 0.0   ;;  %vm2400_vm0 = vmmov 0   ;;  %vm97_vm1 = vcmask 261120   ;;  %vm202_vm2 = vcmask 130048   ;;  %s2836_s5 = inlined_call_operand.vmem [shape: bf16[9,32,32], index: 5, kind: input, shape index: {}]   ;;  %s2837_s0 = inlined_call_operand.vmem [shape: bf16[16,32], index: 0, kind: input, shape index: {}]   ;;  %s2838_s1 = inlined_call_operand.vmem [shape: bf16[9,16,16], index: 1, kind: input, shape index: {}]   ;;  %s2839_s2 = inlined_call_operand.vmem [shape: f32[16,1], index: 2, kind: input, shape index: {}]   ;;  %s2840_s3 = inlined_call_operand.vmem [shape: bf16[9,16,16], index: 3, kind: input, shape index: {}]   ;;  %s2841_s4 = inlined_call_operand.vmem [shape: f32[16,1], index: 4, kind: input, shape index: {}]   ;;  %s2842_s6 = inlined_call_operand.vmem [shape: bf16[16,32], index: 6, kind: output, shape index: {}]  }
   0x1   :  { %2104 = vmatprep.subr.bf16.mxu0 %v2399_v0  ;;  %2112 = vmatprep.subr.bf16.mxu1 %v2399_v0  ;;  %v2442_v1 = vld [vmem:[%s2836_s5 + $0x8] sm:$0xff]   ;;  %v2447_v2 = vld [vmem:[%s2836_s5 + $0x18] sm:$0xff]   ;;  %v2457_v3 = vld [vmem:[%s2836_s5] sm:$0xff]   ;;  %v2401_v32 = vmov 0   ;;  %vm1930_vm3 = vcmask 257024  }
   0x2   :  { %2108 = vmatprep.mubr.msk.bf16.mxu0 %vm2400_vm0, %v2399_v0  ;;  %2116 = vmatprep.mubr.msk.bf16.mxu1 %vm2400_vm0, %v2399_v0  ;;  %v2464_v4 = vld [vmem:[%s2836_s5 + $0x10] sm:$0xff]   ;;  %v2470_v5 = vld [vmem:[%s2837_s0] sm:$0xff]   ;;  %v2366_v17 = vld [vmem:[%s2838_s1 + $0x8] sm:$0xff]  }
   0x3   :  { %2105 = vmatpush3.bf16.msra.mxu0 %v2442_v1  ;;  %2113 = vmatpush3.bf16.msra.mxu1 %v2447_v2  ;;  %v2367_v14 = vld [vmem:[%s2838_s1] sm:$0xff]   ;;  %v2493_v18 = vld [vmem:[%s2836_s5 + $0x28] sm:$0xff]   ;;  %v2514_v20 = vld [vmem:[%s2836_s5 + $0x38] sm:$0xff]  }
   0x4   :  { %2106 = vmatprep.subr.bf16.mxu0 %v2399_v0  ;;  %2114 = vmatprep.subr.bf16.mxu1 %v2399_v0  ;;  %v2505_v19 = vld [vmem:[%s2836_s5 + $0x20] sm:$0xff]   ;;  %v2523_v21 = vld [vmem:[%s2836_s5 + $0x30] sm:$0xff]   ;;  %v2532_v22 = vld [vmem:[%s2836_s5 + $0x48] sm:$0xff]  }
   0x5   :  { %v2541_v23 = vld [vmem:[%s2836_s5 + $0x40] sm:$0xff]   ;;  %v2550_v24 = vld [vmem:[%s2836_s5 + $0x58] sm:$0xff]   ;;  %v2559_v25 = vld [vmem:[%s2836_s5 + $0x50] sm:$0xff]   ;;  %2359 = vset.pattern.permute.xlu0 %v2401_v32  ;;  %2360 = vset.pattern.permute.xlu1 %v2401_v32 }
   0x6   :  { %v2568_v26 = vld [vmem:[%s2836_s5 + $0x68] sm:$0xff]   ;;  %v2577_v27 = vld [vmem:[%s2836_s5 + $0x60] sm:$0xff]   ;;  %v2586_v28 = vld [vmem:[%s2836_s5 + $0x78] sm:$0xff]  }
   0x7   :  { %2107 = vmatpush3.bf16.msra.mxu0 %v2457_v3  ;;  %2115 = vmatpush3.bf16.msra.mxu1 %v2464_v4  ;;  %v2595_v29 = vld [vmem:[%s2836_s5 + $0x70] sm:$0xff]   ;;  %v2604_v30 = vld [vmem:[%s2836_s5 + $0x88] sm:$0xff]   ;;  %v2613_v31 = vld [vmem:[%s2836_s5 + $0x80] sm:$0xff]  }
   0x8   :  { %2120 = vmatprep.subr.bf16.mxu0 %v2399_v0  ;;  %2126 = vmatprep.subr.bf16.mxu1 %v2399_v0  ;;  %v1031_v33 = vld [vmem:[%s2839_s2] sm:$0xff]  ;;  %v1032_v34 = vld [vmem:[%s2839_s2 + $0x8] sm:$0xff]  ;;  %v2382_v50 = vld [vmem:[%s2838_s1 + $0x10] sm:$0xff]  }
   0x9   :  { %1035 = vperm.xlu0 %2359, %v1031_v33   ;;  %v2383_v56 = vld [vmem:[%s2838_s1 + $0x18] sm:$0xff]   ;;  %v2384_v62 = vld [vmem:[%s2838_s1 + $0x20] sm:$0xff]  }
   0xa   :  { %2109 = vmatmul.mubr.msk.bf16.vlgmr.msra.gmra.mxu0 %vm97_vm1, %v2470_v5  ;;  %2117 = vmatmul.mubr.msk.bf16.vlgmr.msra.gmra.mxu1 %vm97_vm1, %v2470_v5 }
   0xb   :  { %2122 = vmatprep.mubr.msk.bf16.mxu0 %vm2400_vm0, %v2399_v0  ;;  %2128 = vmatprep.mubr.msk.bf16.mxu1 %vm2400_vm0, %v2399_v0 }
   0xd   :  { %1040 = vperm.xlu0 %2359, %v1032_v34   ;;  %v2387_v34 = vld [vmem:[%s2838_s1 + $0x38] sm:$0xff]  }
  0xca   :  { %v135_v6 = vpop.f32.mrf.mxu0  ;;  %v189_v7 = vpop.f32.mrf.mxu1 }
  0xcc   :  { %v2110_v8 = vpop.f32.mrf.mxu0  ;;  %v2118_v9 = vpop.f32.mrf.mxu1 }
  0xcd   :  { %v2385_v8 = vld [vmem:[%s2838_s1 + $0x28] sm:$0xff]  }
  0xce   :  { %v138_v10 = vpop.f32.mrf.mxu0  ;;  %v192_v12 = vpop.f32.mrf.mxu1 }
  0xcf   :  { %v142_v11 = vpack.c.bf16 %v138_v10, %v135_v6  ;;  %v196_v13 = vpack.c.bf16 %v192_v12, %v189_v7 }
  0xd0   :  { %v2111_v15 = vpop.f32.mrf.mxu0  ;;  %v2119_v16 = vpop.f32.mrf.mxu1 }
  0xd1   :  { %2127 = vmatpush3.bf16.msra.mxu1 %v142_v11  ;;  %2121 = vmatpush3.bf16.msra.mxu0 %v196_v13 }
  0xd2   :  { %2140 = vmatprep.subr.bf16.mxu1 %v2399_v0  ;;  %2132 = vmatprep.subr.bf16.mxu0 %v2399_v0 }
  0xd4   :  { %2129 = vmatmul.mubr.msk.bf16.vlgmr.msra.gmra.mxu1 %vm202_vm2, %v2367_v14  ;;  %2123 = vmatmul.mubr.msk.bf16.vlgmr.msra.gmra.mxu0 %vm202_vm2, %v2366_v17  ;;  %v2386_v14 = vld [vmem:[%s2838_s1 + $0x30] sm:$0xff]  }
  0xd5   :  { %2142 = vmatprep.mubr.msk.bf16.mxu1 %vm2400_vm0, %v2399_v0  ;;  %2133 = vmatpush3.bf16.msra.mxu0 %v2493_v18 }
  0xd6   :  { %2136 = vmatprep.mubr.msk.bf16.mxu0 %vm2400_vm0, %v2399_v0  ;;  %2134 = vmatprep.subr.bf16.mxu0 %v2399_v0 }
  0xd9   :  { %2135 = vmatpush3.bf16.msra.mxu0 %v2505_v19 }
  0xda   :  { %2146 = vmatprep.subr.bf16.mxu0 %v2399_v0 }
  0xdc   :  { %2137 = vmatmul.mubr.msk.bf16.vlgmr.msra.gmra.mxu0 %vm97_vm1, %v2470_v5 }
  0xdd   :  { %2147 = vmatpush3.bf16.msra.mxu0 %v2514_v20  ;;  %2150 = vmatprep.mubr.msk.bf16.mxu0 %vm2400_vm0, %v2399_v0 }
  0xde   :  { %2148 = vmatprep.subr.bf16.mxu0 %v2399_v0 }
  0xe1   :  { %2149 = vmatpush3.bf16.msra.mxu0 %v2523_v21 }
  0xe2   :  { %2160 = vmatprep.subr.bf16.mxu0 %v2399_v0 }
  0xe4   :  { %2151 = vmatmul.mubr.msk.bf16.vlgmr.msra.gmra.mxu0 %vm97_vm1, %v2470_v5 }
  0xe5   :  { %2161 = vmatpush3.bf16.msra.mxu0 %v2532_v22  ;;  %2164 = vmatprep.mubr.msk.bf16.mxu0 %vm2400_vm0, %v2399_v0 }
  0xe6   :  { %2162 = vmatprep.subr.bf16.mxu0 %v2399_v0 }
  0xe9   :  { %2163 = vmatpush3.bf16.msra.mxu0 %v2541_v23 }
  0xea   :  { %2174 = vmatprep.subr.bf16.mxu0 %v2399_v0 }
  0xec   :  { %2165 = vmatmul.mubr.msk.bf16.vlgmr.msra.gmra.mxu0 %vm97_vm1, %v2470_v5 }
  0xed   :  { %2175 = vmatpush3.bf16.msra.mxu0 %v2550_v24  ;;  %2178 = vmatprep.mubr.msk.bf16.mxu0 %vm2400_vm0, %v2399_v0 }
  0xee   :  { %2176 = vmatprep.subr.bf16.mxu0 %v2399_v0 }
  0xf1   :  { %2177 = vmatpush3.bf16.msra.mxu0 %v2559_v25 }
  0xf2   :  { %2188 = vmatprep.subr.bf16.mxu0 %v2399_v0 }
  0xf4   :  { %2179 = vmatmul.mubr.msk.bf16.vlgmr.msra.gmra.mxu0 %vm97_vm1, %v2470_v5 }
  0xf5   :  { %2189 = vmatpush3.bf16.msra.mxu0 %v2568_v26  ;;  %2192 = vmatprep.mubr.msk.bf16.mxu0 %vm2400_vm0, %v2399_v0 }
  0xf6   :  { %2190 = vmatprep.subr.bf16.mxu0 %v2399_v0 }
  0xf9   :  { %2191 = vmatpush3.bf16.msra.mxu0 %v2577_v27 }
  0xfa   :  { %2202 = vmatprep.subr.bf16.mxu0 %v2399_v0 }
  0xfc   :  { %2193 = vmatmul.mubr.msk.bf16.vlgmr.msra.gmra.mxu0 %vm97_vm1, %v2470_v5 }
  0xfd   :  { %2203 = vmatpush3.bf16.msra.mxu0 %v2586_v28  ;;  %2206 = vmatprep.mubr.msk.bf16.mxu0 %vm2400_vm0, %v2399_v0 }
  0xfe   :  { %2204 = vmatprep.subr.bf16.mxu0 %v2399_v0 }
 0x101   :  { %2205 = vmatpush3.bf16.msra.mxu0 %v2595_v29 }
 0x102   :  { %2216 = vmatprep.subr.bf16.mxu0 %v2399_v0 }
 0x104   :  { %2207 = vmatmul.mubr.msk.bf16.vlgmr.msra.gmra.mxu0 %vm97_vm1, %v2470_v5 }
 0x105   :  { %2217 = vmatpush3.bf16.msra.mxu0 %v2604_v30  ;;  %2220 = vmatprep.mubr.msk.bf16.mxu0 %vm2400_vm0, %v2399_v0 }
 0x106   :  { %2218 = vmatprep.subr.bf16.mxu0 %v2399_v0 }
 0x109   :  { %2219 = vmatpush3.bf16.msra.mxu0 %v2613_v31 }
 0x10a   :  { %2230 = vmatprep.subr.bf16.mxu0 %v2399_v0 }
 0x10c   :  { %2221 = vmatmul.mubr.msk.bf16.vlgmr.msra.gmra.mxu0 %vm97_vm1, %v2470_v5 }
 0x10d   :  { %2231 = vmatpush3.bf16.msra.mxu0 %v2442_v1  ;;  %2234 = vmatprep.mubr.msk.bf16.mxu0 %vm2400_vm0, %v2399_v0 }
 0x10e   :  { %2232 = vmatprep.subr.bf16.mxu0 %v2399_v0 }
 0x111   :  { %2233 = vmatpush3.bf16.msra.mxu0 %v2457_v3 }
 0x112   :  { %2246 = vmatprep.subr.bf16.mxu0 %v2399_v0 }
 0x194   :  { %v289_v35 = vpop.f32.mrf.mxu1  ;;  %v240_v36 = vpop.f32.mrf.mxu0 }
 0x195   :  { %v2634_v37 = vadd.f32 %v289_v35, %v240_v36 }
 0x196   :  { %v2130_v38 = vpop.f32.mrf.mxu1  ;;  %v2124_v39 = vpop.f32.mrf.mxu0 }
 0x198   :  { %v292_v40 = vpop.f32.mrf.mxu1  ;;  %v243_v41 = vpop.f32.mrf.mxu0 }
 0x199   :  { %v2636_v42 = vadd.f32 %v292_v40, %v243_v41  ;;  %v2388_v41 = vld [vmem:[%s2838_s1 + $0x40] sm:$0xff]  }
 0x19a   :  { %v2131_v43 = vpop.f32.mrf.mxu1  ;;  %v2125_v44 = vpop.f32.mrf.mxu0 }
 0x19c   :  { %v342_v45 = vpop.f32.mrf.mxu0 }
 0x19e   :  { %v2138_v46 = vpop.f32.mrf.mxu0 }
 0x1a0   :  { %v345_v47 = vpop.f32.mrf.mxu0 }
 0x1a1   :  { %v349_v48 = vpack.c.bf16 %v345_v47, %v342_v45 }
 0x1a2   :  { %v2139_v49 = vpop.f32.mrf.mxu0 }
 0x1a3   :  { %2141 = vmatpush3.bf16.msra.mxu1 %v349_v48 }
 0x1a4   :  { %v447_v51 = vpop.f32.mrf.mxu0  ;;  %2154 = vmatprep.subr.bf16.mxu1 %v2399_v0 }
 0x1a6   :  { %2143 = vmatmul.mubr.msk.bf16.vlgmr.msra.gmra.mxu1 %vm202_vm2, %v2382_v50  ;;  %v2152_v52 = vpop.f32.mrf.mxu0 }
 0x1a7   :  { %2156 = vmatprep.mubr.msk.bf16.mxu1 %vm2400_vm0, %v2399_v0 }
 0x1a8   :  { %v450_v53 = vpop.f32.mrf.mxu0 }
 0x1a9   :  { %v454_v54 = vpack.c.bf16 %v450_v53, %v447_v51 }
 0x1aa   :  { %v2153_v55 = vpop.f32.mrf.mxu0 }
 0x1ab   :  { %2155 = vmatpush3.bf16.msra.mxu1 %v454_v54 }
 0x1ac   :  { %v552_v57 = vpop.f32.mrf.mxu0  ;;  %2168 = vmatprep.subr.bf16.mxu1 %v2399_v0 }
 0x1ae   :  { %2157 = vmatmul.mubr.msk.bf16.vlgmr.msra.gmra.mxu1 %vm202_vm2, %v2383_v56  ;;  %v2166_v58 = vpop.f32.mrf.mxu0 }
 0x1af   :  { %2170 = vmatprep.mubr.msk.bf16.mxu1 %vm2400_vm0, %v2399_v0 }
 0x1b0   :  { %v555_v59 = vpop.f32.mrf.mxu0 }
 0x1b1   :  { %v559_v60 = vpack.c.bf16 %v555_v59, %v552_v57 }
 0x1b2   :  { %v2167_v61 = vpop.f32.mrf.mxu0 }
 0x1b3   :  { %2169 = vmatpush3.bf16.msra.mxu1 %v559_v60 }
 0x1b4   :  { %v657_v63 = vpop.f32.mrf.mxu0  ;;  %2182 = vmatprep.subr.bf16.mxu1 %v2399_v0 }
 0x1b6   :  { %2171 = vmatmul.mubr.msk.bf16.vlgmr.msra.gmra.mxu1 %vm202_vm2, %v2384_v62  ;;  %v2180_v1 = vpop.f32.mrf.mxu0 }
 0x1b7   :  { %2184 = vmatprep.mubr.msk.bf16.mxu1 %vm2400_vm0, %v2399_v0 }
 0x1b8   :  { %v660_v3 = vpop.f32.mrf.mxu0 }
 0x1b9   :  { %v664_v6 = vpack.c.bf16 %v660_v3, %v657_v63 }
 0x1ba   :  { %v2181_v7 = vpop.f32.mrf.mxu0 }
 0x1bb   :  { %2183 = vmatpush3.bf16.msra.mxu1 %v664_v6 }
 0x1bc   :  { %v762_v9 = vpop.f32.mrf.mxu0  ;;  %2196 = vmatprep.subr.bf16.mxu1 %v2399_v0 }
 0x1be   :  { %2185 = vmatmul.mubr.msk.bf16.vlgmr.msra.gmra.mxu1 %vm202_vm2, %v2385_v8  ;;  %v2194_v10 = vpop.f32.mrf.mxu0 }
 0x1bf   :  { %2198 = vmatprep.mubr.msk.bf16.mxu1 %vm2400_vm0, %v2399_v0 }
 0x1c0   :  { %v765_v11 = vpop.f32.mrf.mxu0 }
 0x1c1   :  { %v769_v12 = vpack.c.bf16 %v765_v11, %v762_v9 }
 0x1c2   :  { %v2195_v13 = vpop.f32.mrf.mxu0 }
 0x1c3   :  { %2197 = vmatpush3.bf16.msra.mxu1 %v769_v12 }
 0x1c4   :  { %v867_v15 = vpop.f32.mrf.mxu0  ;;  %2210 = vmatprep.subr.bf16.mxu1 %v2399_v0 }
 0x1c6   :  { %2199 = vmatmul.mubr.msk.bf16.vlgmr.msra.gmra.mxu1 %vm202_vm2, %v2386_v14  ;;  %v2208_v16 = vpop.f32.mrf.mxu0 }
 0x1c7   :  { %2212 = vmatprep.mubr.msk.bf16.mxu1 %vm2400_vm0, %v2399_v0 }
 0x1c8   :  { %v870_v17 = vpop.f32.mrf.mxu0 }
 0x1c9   :  { %v874_v32 = vpack.c.bf16 %v870_v17, %v867_v15  ;;  %v1036_v15 = vpop.permute.xlu0 %1035 }
 0x1ca   :  { %v2209_v33 = vpop.f32.mrf.mxu0 }
 0x1cb   :  { %2211 = vmatpush3.bf16.msra.mxu1 %v874_v32 }
 0x1cc   :  { %v972_v35 = vpop.f32.mrf.mxu0  ;;  %2224 = vmatprep.subr.bf16.mxu1 %v2399_v0 }
 0x1ce   :  { %2213 = vmatmul.mubr.msk.bf16.vlgmr.msra.gmra.mxu1 %vm202_vm2, %v2387_v34  ;;  %v2222_v36 = vpop.f32.mrf.mxu0 }
 0x1cf   :  { %2226 = vmatprep.mubr.msk.bf16.mxu1 %vm2400_vm0, %v2399_v0 }
 0x1d0   :  { %v975_v38 = vpop.f32.mrf.mxu0 }
 0x1d1   :  { %v979_v39 = vpack.c.bf16 %v975_v38, %v972_v35 }
 0x1d2   :  { %v2223_v40 = vpop.f32.mrf.mxu0 }
 0x1d3   :  { %2225 = vmatpush3.bf16.msra.mxu1 %v979_v39 }
 0x1d4   :  { %2238 = vmatprep.subr.bf16.mxu1 %v2399_v0 }
 0x1d6   :  { %2227 = vmatmul.mubr.msk.bf16.vlgmr.msra.gmra.mxu1 %vm202_vm2, %v2388_v41 }
 0x1d7   :  { %2239 = vmatpush3.bf16.msra.mxu1 %v2447_v2  ;;  %2242 = vmatprep.mubr.msk.bf16.mxu1 %vm2400_vm0, %v2399_v0 }
 0x1d8   :  { %2240 = vmatprep.subr.bf16.mxu1 %v2399_v0 }
 0x1db   :  { %2241 = vmatpush3.bf16.msra.mxu1 %v2464_v4 }
 0x1dc   :  { %2252 = vmatprep.subr.bf16.mxu1 %v2399_v0 }
 0x266   :  { %v392_v43 = vpop.f32.mrf.mxu1 }
 0x267   :  { %v399_v60 = vadd.f32 %v392_v43, %v2634_v37 }
 0x268   :  { %v2144_v44 = vpop.f32.mrf.mxu1 }
 0x26a   :  { %v395_v45 = vpop.f32.mrf.mxu1 }
 0x26b   :  { %v400_v1 = vadd.f32 %v395_v45, %v2636_v42  ;;  %v1041_v42 = vpop.permute.xlu0 %1040 }
 0x26c   :  { %v2145_v46 = vpop.f32.mrf.mxu1 }
 0x26e   :  { %v497_v47 = vpop.f32.mrf.mxu1 }
 0x26f   :  { %v504_v62 = vadd.f32 %v497_v47, %v399_v60 }
 0x270   :  { %v2158_v48 = vpop.f32.mrf.mxu1 }
 0x272   :  { %v500_v49 = vpop.f32.mrf.mxu1 }
 0x273   :  { %v505_v7 = vadd.f32 %v500_v49, %v400_v1 }
 0x274   :  { %v2159_v50 = vpop.f32.mrf.mxu1 }
 0x276   :  { %v602_v51 = vpop.f32.mrf.mxu1 }
 0x277   :  { %v609_v3 = vadd.f32 %v602_v51, %v504_v62 }
 0x278   :  { %v2172_v52 = vpop.f32.mrf.mxu1 }
 0x27a   :  { %v605_v2 = vpop.f32.mrf.mxu1 }
 0x27b   :  { %v610_v10 = vadd.f32 %v605_v2, %v505_v7 }
 0x27c   :  { %v2173_v53 = vpop.f32.mrf.mxu1 }
 0x27d   :  { %v2389_v53 = vld [vmem:[%s2840_s3 + $0x8] sm:$0xff]  }
 0x27e   :  { %v707_v54 = vpop.f32.mrf.mxu1 }
 0x27f   :  { %v714_v8 = vadd.f32 %v707_v54, %v609_v3  ;;  %v2390_v54 = vld [vmem:[%s2840_s3] sm:$0xff]  }
 0x280   :  { %v2186_v55 = vpop.f32.mrf.mxu1 }
 0x282   :  { %v710_v56 = vpop.f32.mrf.mxu1 }
 0x283   :  { %v715_v13 = vadd.f32 %v710_v56, %v610_v10 }
 0x284   :  { %v2187_v57 = vpop.f32.mrf.mxu1 }
 0x286   :  { %v812_v58 = vpop.f32.mrf.mxu1 }
 0x287   :  { %v819_v11 = vadd.f32 %v812_v58, %v714_v8  ;;  %v2391_v58 = vld [vmem:[%s2840_s3 + $0x10] sm:$0xff]  }
 0x288   :  { %v2200_v4 = vpop.f32.mrf.mxu1 }
 0x28a   :  { %v815_v59 = vpop.f32.mrf.mxu1 }
 0x28b   :  { %v820_v17 = vadd.f32 %v815_v59, %v715_v13 }
 0x28c   :  { %v2201_v61 = vpop.f32.mrf.mxu1 }
 0x28e   :  { %v917_v63 = vpop.f32.mrf.mxu1 }
 0x28f   :  { %v924_v14 = vadd.f32 %v917_v63, %v819_v11  ;;  %v2392_v63 = vld [vmem:[%s2840_s3 + $0x18] sm:$0xff]  }
 0x290   :  { %v2214_v6 = vpop.f32.mrf.mxu1 }
 0x292   :  { %v920_v9 = vpop.f32.mrf.mxu1 }
 0x293   :  { %v925_v33 = vadd.f32 %v920_v9, %v820_v17  ;;  %v2393_v9 = vld [vmem:[%s2840_s3 + $0x20] sm:$0xff]  }
 0x294   :  { %v2215_v12 = vpop.f32.mrf.mxu1 }
 0x296   :  { %v1022_v16 = vpop.f32.mrf.mxu1 }
 0x297   :  { %v1029_v32 = vadd.f32 %v1022_v16, %v924_v14 }
 0x298   :  { %v2228_v37 = vpop.f32.mrf.mxu1 }
 0x299   :  { %v1043_v35 = vadd.f32 %v1036_v15, %v1029_v32  ;;  %v2394_v15 = vld [vmem:[%s2840_s3 + $0x28] sm:$0xff]  }
 0x29a   :  { %v1025_v34 = vpop.f32.mrf.mxu1 }
 0x29b   :  { %v1030_v36 = vadd.f32 %v1025_v34, %v925_v33  ;;  %v1045_v40 = vmax.f32 %v1043_v35, 0.0  ;;  %v2395_v34 = vld [vmem:[%s2840_s3 + $0x30] sm:$0xff]  }
 0x29c   :  { %v2229_v38 = vpop.f32.mrf.mxu1 }
 0x29d   :  { %v1044_v39 = vadd.f32 %v1041_v42, %v1030_v36 }
 0x29f   :  { %v1046_v41 = vmax.f32 %v1044_v39, 0.0 }
 0x2a1   :  { %v2693_v43 = vpack.c.bf16 %v1046_v41, %v1045_v40  ;;  %v2396_v40 = vld [vmem:[%s2840_s3 + $0x38] sm:$0xff]  }
 0x2a3   :  { %2235 = vmatmul.mubr.msk.bf16.vlgmr.msra.gmra.mxu0 %vm97_vm1, %v2693_v43  ;;  %2243 = vmatmul.mubr.msk.bf16.vlgmr.msra.gmra.mxu1 %vm97_vm1, %v2693_v43 }
 0x2a4   :  { %2248 = vmatprep.mubr.msk.bf16.mxu0 %vm2400_vm0, %v2399_v0  ;;  %2254 = vmatprep.mubr.msk.bf16.mxu1 %vm2400_vm0, %v2399_v0 }
 0x363   :  { %v1103_v44 = vpop.f32.mrf.mxu0  ;;  %v1145_v45 = vpop.f32.mrf.mxu1 }
 0x365   :  { %v2236_v46 = vpop.f32.mrf.mxu0  ;;  %v2244_v47 = vpop.f32.mrf.mxu1 }
 0x366   :  { %v2397_v47 = vld [vmem:[%s2840_s3 + $0x40] sm:$0xff]  }
 0x367   :  { %v1106_v48 = vpop.f32.mrf.mxu0  ;;  %v1148_v49 = vpop.f32.mrf.mxu1 }
 0x368   :  { %v1110_v50 = vpack.c.bf16 %v1106_v48, %v1103_v44  ;;  %v1152_v51 = vpack.c.bf16 %v1148_v49, %v1145_v45 }
 0x369   :  { %v2237_v52 = vpop.f32.mrf.mxu0  ;;  %v2245_v2 = vpop.f32.mrf.mxu1 }
 0x36a   :  { %2247 = vmatpush3.bf16.msra.mxu0 %v1152_v51  ;;  %2253 = vmatpush3.bf16.msra.mxu1 %v1110_v50 }
 0x36b   :  { %2258 = vmatprep.subr.bf16.mxu0 %v2399_v0  ;;  %2266 = vmatprep.subr.bf16.mxu1 %v2399_v0 }
 0x36d   :  { %2249 = vmatmul.mubr.msk.bf16.vlgmr.msra.gmra.mxu0 %vm202_vm2, %v2389_v53  ;;  %2255 = vmatmul.mubr.msk.bf16.vlgmr.msra.gmra.mxu1 %vm202_vm2, %v2390_v54 }
 0x36e   :  { %2259 = vmatpush3.bf16.msra.mxu0 %v2493_v18  ;;  %2262 = vmatprep.mubr.msk.bf16.mxu0 %vm2400_vm0, %v2399_v0  ;;  %v1902_v18 = vld [vmem:[%s2841_s4] sm:$0xff] }
 0x36f   :  { %2260 = vmatprep.subr.bf16.mxu0 %v2399_v0  ;;  %2268 = vmatprep.mubr.msk.bf16.mxu1 %vm2400_vm0, %v2399_v0 }
 0x370   :  { %1906 = vperm.xlu1 %2360, %v1902_v18  }
 0x372   :  { %2261 = vmatpush3.bf16.msra.mxu0 %v2505_v19  ;;  %v1903_v19 = vld [vmem:[%s2841_s4 + $0x8] sm:$0xff] }
 0x373   :  { %2272 = vmatprep.subr.bf16.mxu0 %v2399_v0 }
 0x374   :  { %1911 = vperm.xlu1 %2360, %v1903_v19  }
 0x375   :  { %2263 = vmatmul.mubr.msk.bf16.vlgmr.msra.gmra.mxu0 %vm97_vm1, %v2693_v43 }
 0x376   :  { %2273 = vmatpush3.bf16.msra.mxu0 %v2514_v20  ;;  %2276 = vmatprep.mubr.msk.bf16.mxu0 %vm2400_vm0, %v2399_v0 }
 0x377   :  { %2274 = vmatprep.subr.bf16.mxu0 %v2399_v0 }
 0x37a   :  { %2275 = vmatpush3.bf16.msra.mxu0 %v2523_v21 }
 0x37b   :  { %2286 = vmatprep.subr.bf16.mxu0 %v2399_v0 }
 0x37d   :  { %2277 = vmatmul.mubr.msk.bf16.vlgmr.msra.gmra.mxu0 %vm97_vm1, %v2693_v43 }
 0x37e   :  { %2287 = vmatpush3.bf16.msra.mxu0 %v2532_v22  ;;  %2290 = vmatprep.mubr.msk.bf16.mxu0 %vm2400_vm0, %v2399_v0 }
 0x37f   :  { %2288 = vmatprep.subr.bf16.mxu0 %v2399_v0 }
 0x382   :  { %2289 = vmatpush3.bf16.msra.mxu0 %v2541_v23 }
 0x383   :  { %2300 = vmatprep.subr.bf16.mxu0 %v2399_v0 }
 0x385   :  { %2291 = vmatmul.mubr.msk.bf16.vlgmr.msra.gmra.mxu0 %vm97_vm1, %v2693_v43 }
 0x386   :  { %2301 = vmatpush3.bf16.msra.mxu0 %v2550_v24  ;;  %2304 = vmatprep.mubr.msk.bf16.mxu0 %vm2400_vm0, %v2399_v0 }
 0x387   :  { %2302 = vmatprep.subr.bf16.mxu0 %v2399_v0 }
 0x38a   :  { %2303 = vmatpush3.bf16.msra.mxu0 %v2559_v25 }
 0x38b   :  { %2314 = vmatprep.subr.bf16.mxu0 %v2399_v0 }
 0x38d   :  { %2305 = vmatmul.mubr.msk.bf16.vlgmr.msra.gmra.mxu0 %vm97_vm1, %v2693_v43 }
 0x38e   :  { %2315 = vmatpush3.bf16.msra.mxu0 %v2568_v26  ;;  %2318 = vmatprep.mubr.msk.bf16.mxu0 %vm2400_vm0, %v2399_v0 }
 0x38f   :  { %2316 = vmatprep.subr.bf16.mxu0 %v2399_v0 }
 0x392   :  { %2317 = vmatpush3.bf16.msra.mxu0 %v2577_v27 }
 0x393   :  { %2328 = vmatprep.subr.bf16.mxu0 %v2399_v0 }
 0x395   :  { %2319 = vmatmul.mubr.msk.bf16.vlgmr.msra.gmra.mxu0 %vm97_vm1, %v2693_v43 }
 0x396   :  { %2329 = vmatpush3.bf16.msra.mxu0 %v2586_v28  ;;  %2332 = vmatprep.mubr.msk.bf16.mxu0 %vm2400_vm0, %v2399_v0 }
 0x397   :  { %2330 = vmatprep.subr.bf16.mxu0 %v2399_v0 }
 0x39a   :  { %2331 = vmatpush3.bf16.msra.mxu0 %v2595_v29 }
 0x39b   :  { %2342 = vmatprep.subr.bf16.mxu0 %v2399_v0 }
 0x39d   :  { %2333 = vmatmul.mubr.msk.bf16.vlgmr.msra.gmra.mxu0 %vm97_vm1, %v2693_v43 }
 0x39e   :  { %2343 = vmatpush3.bf16.msra.mxu0 %v2604_v30  ;;  %2346 = vmatprep.mubr.msk.bf16.mxu0 %vm2400_vm0, %v2399_v0 }
 0x39f   :  { %2344 = vmatprep.subr.bf16.mxu0 %v2399_v0 }
 0x3a2   :  { %2345 = vmatpush3.bf16.msra.mxu0 %v2613_v31 }
 0x3a5   :  { %2347 = vmatmul.mubr.msk.bf16.vlgmr.msra.gmra.mxu0 %vm97_vm1, %v2693_v43 }
 0x42d   :  { %v1195_v20 = vpop.f32.mrf.mxu0  ;;  %v1244_v21 = vpop.f32.mrf.mxu1 }
 0x42e   :  { %v2776_v22 = vadd.f32 %v1244_v21, %v1195_v20 }
 0x42f   :  { %v2250_v23 = vpop.f32.mrf.mxu0  ;;  %v2256_v24 = vpop.f32.mrf.mxu1 }
 0x431   :  { %v1198_v25 = vpop.f32.mrf.mxu0  ;;  %v1247_v26 = vpop.f32.mrf.mxu1 }
 0x432   :  { %v2778_v27 = vadd.f32 %v1247_v26, %v1198_v25 }
 0x433   :  { %v2251_v28 = vpop.f32.mrf.mxu0  ;;  %v2257_v29 = vpop.f32.mrf.mxu1 }
 0x435   :  { %v1285_v30 = vpop.f32.mrf.mxu0 }
 0x437   :  { %v2264_v31 = vpop.f32.mrf.mxu0 }
 0x439   :  { %v1288_v55 = vpop.f32.mrf.mxu0 }
 0x43a   :  { %v1292_v56 = vpack.c.bf16 %v1288_v55, %v1285_v30 }
 0x43b   :  { %v2265_v57 = vpop.f32.mrf.mxu0 }
 0x43c   :  { %2267 = vmatpush3.bf16.msra.mxu1 %v1292_v56 }
 0x43d   :  { %v1378_v4 = vpop.f32.mrf.mxu0  ;;  %2280 = vmatprep.subr.bf16.mxu1 %v2399_v0 }
 0x43f   :  { %2269 = vmatmul.mubr.msk.bf16.vlgmr.msra.gmra.mxu1 %vm202_vm2, %v2391_v58  ;;  %v2278_v59 = vpop.f32.mrf.mxu0 }
 0x440   :  { %2282 = vmatprep.mubr.msk.bf16.mxu1 %vm2400_vm0, %v2399_v0 }
 0x441   :  { %v1381_v60 = vpop.f32.mrf.mxu0 }
 0x442   :  { %v1385_v61 = vpack.c.bf16 %v1381_v60, %v1378_v4 }
 0x443   :  { %v2279_v62 = vpop.f32.mrf.mxu0 }
 0x444   :  { %2281 = vmatpush3.bf16.msra.mxu1 %v1385_v61 }
 0x445   :  { %v1471_v1 = vpop.f32.mrf.mxu0  ;;  %2294 = vmatprep.subr.bf16.mxu1 %v2399_v0 }
 0x447   :  { %2283 = vmatmul.mubr.msk.bf16.vlgmr.msra.gmra.mxu1 %vm202_vm2, %v2392_v63  ;;  %v2292_v3 = vpop.f32.mrf.mxu0 }
 0x448   :  { %2296 = vmatprep.mubr.msk.bf16.mxu1 %vm2400_vm0, %v2399_v0 }
 0x449   :  { %v1474_v6 = vpop.f32.mrf.mxu0 }
 0x44a   :  { %v1478_v7 = vpack.c.bf16 %v1474_v6, %v1471_v1 }
 0x44b   :  { %v2293_v8 = vpop.f32.mrf.mxu0 }
 0x44c   :  { %2295 = vmatpush3.bf16.msra.mxu1 %v1478_v7  ;;  %v1907_v8 = vpop.permute.xlu1 %1906 }
 0x44d   :  { %v1564_v10 = vpop.f32.mrf.mxu0  ;;  %2308 = vmatprep.subr.bf16.mxu1 %v2399_v0 }
 0x44f   :  { %2297 = vmatmul.mubr.msk.bf16.vlgmr.msra.gmra.mxu1 %vm202_vm2, %v2393_v9  ;;  %v2306_v11 = vpop.f32.mrf.mxu0 }
 0x450   :  { %2310 = vmatprep.mubr.msk.bf16.mxu1 %vm2400_vm0, %v2399_v0 }
 0x451   :  { %v1567_v12 = vpop.f32.mrf.mxu0 }
 0x452   :  { %v1571_v13 = vpack.c.bf16 %v1567_v12, %v1564_v10 }
 0x453   :  { %v2307_v14 = vpop.f32.mrf.mxu0 }
 0x454   :  { %2309 = vmatpush3.bf16.msra.mxu1 %v1571_v13 }
 0x455   :  { %v1657_v16 = vpop.f32.mrf.mxu0  ;;  %2322 = vmatprep.subr.bf16.mxu1 %v2399_v0 }
 0x457   :  { %2311 = vmatmul.mubr.msk.bf16.vlgmr.msra.gmra.mxu1 %vm202_vm2, %v2394_v15  ;;  %v2320_v17 = vpop.f32.mrf.mxu0 }
 0x458   :  { %2324 = vmatprep.mubr.msk.bf16.mxu1 %vm2400_vm0, %v2399_v0  ;;  %v1912_v17 = vpop.permute.xlu1 %1911 }
 0x459   :  { %v1660_v32 = vpop.f32.mrf.mxu0 }
 0x45a   :  { %v1664_v37 = vpack.c.bf16 %v1660_v32, %v1657_v16  ;;  %v1917_v16 = vunpack.c.h.bf16 %v2470_v5 }
 0x45b   :  { %v2321_v33 = vpop.f32.mrf.mxu0 }
 0x45c   :  { %2323 = vmatpush3.bf16.msra.mxu1 %v1664_v37 }
 0x45d   :  { %v1750_v35 = vpop.f32.mrf.mxu0  ;;  %2336 = vmatprep.subr.bf16.mxu1 %v2399_v0 }
 0x45f   :  { %2325 = vmatmul.mubr.msk.bf16.vlgmr.msra.gmra.mxu1 %vm202_vm2, %v2395_v34  ;;  %v2334_v36 = vpop.f32.mrf.mxu0 }
 0x460   :  { %2338 = vmatprep.mubr.msk.bf16.mxu1 %vm2400_vm0, %v2399_v0 }
 0x461   :  { %v1753_v42 = vpop.f32.mrf.mxu0 }
 0x462   :  { %v1757_v38 = vpack.c.bf16 %v1753_v42, %v1750_v35 }
 0x463   :  { %v2335_v39 = vpop.f32.mrf.mxu0 }
 0x464   :  { %2337 = vmatpush3.bf16.msra.mxu1 %v1757_v38 }
 0x465   :  { %v1843_v41 = vpop.f32.mrf.mxu0  ;;  %2350 = vmatprep.subr.bf16.mxu1 %v2399_v0 }
 0x467   :  { %2339 = vmatmul.mubr.msk.bf16.vlgmr.msra.gmra.mxu1 %vm202_vm2, %v2396_v40  ;;  %v2348_v43 = vpop.f32.mrf.mxu0 }
 0x468   :  { %2352 = vmatprep.mubr.msk.bf16.mxu1 %vm2400_vm0, %v2399_v0 }
 0x469   :  { %v1846_v44 = vpop.f32.mrf.mxu0 }
 0x46a   :  { %v1850_v45 = vpack.c.bf16 %v1846_v44, %v1843_v41 }
 0x46b   :  { %v2349_v46 = vpop.f32.mrf.mxu0 }
 0x46c   :  { %2351 = vmatpush3.bf16.msra.mxu1 %v1850_v45 }
 0x46f   :  { %2353 = vmatmul.mubr.msk.bf16.vlgmr.msra.gmra.mxu1 %vm202_vm2, %v2397_v47 }
 0x4ff   :  { %v1335_v48 = vpop.f32.mrf.mxu1 }
 0x500   :  { %v1342_v30 = vadd.f32 %v1335_v48, %v2776_v22  ;;  %v1916_v22 = vunpack.c.l.bf16 %v2470_v5 }
 0x501   :  { %v2270_v49 = vpop.f32.mrf.mxu1 }
 0x503   :  { %v1338_v50 = vpop.f32.mrf.mxu1 }
 0x504   :  { %v1343_v57 = vadd.f32 %v1338_v50, %v2778_v27 }
 0x505   :  { %v2271_v51 = vpop.f32.mrf.mxu1 }
 0x507   :  { %v1428_v52 = vpop.f32.mrf.mxu1 }
 0x508   :  { %v1435_v55 = vadd.f32 %v1428_v52, %v1342_v30 }
 0x509   :  { %v2284_v2 = vpop.f32.mrf.mxu1 }
 0x50b   :  { %v1431_v53 = vpop.f32.mrf.mxu1 }
 0x50c   :  { %v1436_v59 = vadd.f32 %v1431_v53, %v1343_v57 }
 0x50d   :  { %v2285_v54 = vpop.f32.mrf.mxu1 }
 0x50f   :  { %v1521_v18 = vpop.f32.mrf.mxu1 }
 0x510   :  { %v1528_v58 = vadd.f32 %v1521_v18, %v1435_v55 }
 0x511   :  { %v2298_v0 = vpop.f32.mrf.mxu1 }
 0x513   :  { %v1524_v19 = vpop.f32.mrf.mxu1 }
 0x514   :  { %v1529_v62 = vadd.f32 %v1524_v19, %v1436_v59 }
 0x515   :  { %v2299_v20 = vpop.f32.mrf.mxu1 }
 0x517   :  { %v1614_v21 = vpop.f32.mrf.mxu1 }
 0x518   :  { %v1621_v60 = vadd.f32 %v1614_v21, %v1528_v58 }
 0x519   :  { %v2312_v23 = vpop.f32.mrf.mxu1 }
 0x51b   :  { %v1617_v24 = vpop.f32.mrf.mxu1 }
 0x51c   :  { %v1622_v3 = vadd.f32 %v1617_v24, %v1529_v62 }
 0x51d   :  { %v2313_v25 = vpop.f32.mrf.mxu1 }
 0x51f   :  { %v1707_v26 = vpop.f32.mrf.mxu1 }
 0x520   :  { %v1714_v63 = vadd.f32 %v1707_v26, %v1621_v60 }
 0x521   :  { %v2326_v28 = vpop.f32.mrf.mxu1 }
 0x523   :  { %v1710_v29 = vpop.f32.mrf.mxu1 }
 0x524   :  { %v1715_v9 = vadd.f32 %v1710_v29, %v1622_v3 }
 0x525   :  { %v2327_v31 = vpop.f32.mrf.mxu1 }
 0x527   :  { %v1800_v56 = vpop.f32.mrf.mxu1 }
 0x528   :  { %v1807_v6 = vadd.f32 %v1800_v56, %v1714_v63 }
 0x529   :  { %v2340_v4 = vpop.f32.mrf.mxu1 }
 0x52b   :  { %v1803_v61 = vpop.f32.mrf.mxu1 }
 0x52c   :  { %v1808_v12 = vadd.f32 %v1803_v61, %v1715_v9 }
 0x52d   :  { %v2341_v1 = vpop.f32.mrf.mxu1 }
 0x52f   :  { %v1893_v7 = vpop.f32.mrf.mxu1 }
 0x530   :  { %v1900_v10 = vadd.f32 %v1893_v7, %v1807_v6 }
 0x531   :  { %v2354_v11 = vpop.f32.mrf.mxu1 }
 0x532   :  { %v1914_v13 = vadd.f32 %v1907_v8, %v1900_v10 }
 0x533   :  { %v1896_v27 = vpop.f32.mrf.mxu1 }
 0x534   :  { %v1918_v14 = vadd.f32 %v1916_v22, %v1914_v13  ;;  %v1901_v15 = vadd.f32 %v1896_v27, %v1808_v12 }
 0x535   :  { %v2355_v32 = vpop.f32.mrf.mxu1 }
 0x536   :  { %v1920_v37 = vmax.f32 %v1918_v14, 0.0  ;;  %v1915_v33 = vadd.f32 %v1912_v17, %v1901_v15 }
 0x538   :  { %v2012_v34 = vpack.c.bf16 %v1920_v37, %v1920_v37  ;;  %v1919_v35 = vadd.f32 %v1917_v16, %v1915_v33 }
 0x53a   :  { %1931 = vst.msk [vmem:[%s2842_s6] sm:$0xf] %vm1930_vm3, %v2012_v34  ;;  %v1921_v36 = vmax.f32 %v1919_v35, 0.0 }
 0x53c   :  { %v2013_v42 = vpack.c.bf16 %v1921_v36, %v1921_v36 }
 0x53e   :  { %1932 = vst.msk [vmem:[%s2842_s6 + $0x4] sm:$0xf] %vm1930_vm3, %v2013_v42 }

// kernel: resnet_forward.18
= control target key start
LH: loop header
LB: loop body
LE: loop exit
PB: predicated region body
PF: predicated region fallthrough
CT: control target
= control target key end

     0   :  { %v277_v0 = vmov 0   ;;  %vm133_vm0 = vcmask 130048   ;;  %vm209_vm1 = vcmask 60416   ;;  %s365_s1 = inlined_call_operand.vmem [shape: bf16[144,8], index: 1, kind: input, shape index: {}]   ;;  %s366_s0 = inlined_call_operand.vmem [shape: bf16[32,144], index: 0, kind: input, shape index: {}]   ;;  %s367_s2 = inlined_call_operand.vmem [shape: f32[32,1], index: 2, kind: input, shape index: {}]   ;;  %s368_s3 = inlined_call_operand.vmem [shape: bf16[32,8], index: 3, kind: output, shape index: {}]  }
   0x1   :  { %140 = vmatprep.subr.bf16.mxu0 %v277_v0  ;;  %241 = vmatprep.subr.bf16.mxu1 %v277_v0  ;;  %v262_v1 = vld [vmem:[%s365_s1 + $0x38] sm:$0xff]   ;;  %v263_v2 = vld [vmem:[%s365_s1 + $0x30] sm:$0xff]   ;;  %v264_v3 = vld [vmem:[%s365_s1 + $0x28] sm:$0xff]  }
   0x2   :  { %261 = vset.pattern.permute.xlu1 %v277_v0  ;;  %260 = vset.pattern.permute.xlu0 %v277_v0  ;;  %v265_v4 = vld [vmem:[%s365_s1 + $0x20] sm:$0xff]   ;;  %v276_v6 = vld [vmem:[%s366_s0 + $0x14] ss:$8 sps:$4 sm:$0xff]   ;;  %v38_v11 = vld [vmem:[%s367_s2 + $0x8] sm:$0xff] }
   0x3   :  { %141 = vmatpush1.bf16.msra.mxu0 %v262_v1  ;;  %250 = vmatpush1.bf16.msra.mxu1 %v262_v1  ;;  %v273_v5 = vld [vmem:[%s366_s0 + $0x4] ss:$8 sps:$4 sm:$0xff]   ;;  %v39_v7 = vld [vmem:[%s367_s2 + $0x10] sm:$0xff]  ;;  %v40_v9 = vld [vmem:[%s367_s2 + $0x18] sm:$0xff] }
   0x4   :  { %142 = vmatprep.subr.bf16.mxu0 %v277_v0  ;;  %242 = vmatprep.subr.bf16.mxu1 %v277_v0  ;;  %v37_v8 = vld [vmem:[%s367_s2] sm:$0xff]  ;;  %v266_v10 = vld [vmem:[%s365_s1 + $0x18] sm:$0xff]   ;;  %v267_v12 = vld [vmem:[%s365_s1 + $0x10] sm:$0xff]  }
   0x5   :  { %231 = vmatprep.mubr.msk.bf16.mxu0 %vm133_vm0, %v273_v5  ;;  %53 = vperm.xlu1 %261, %v39_v7   ;;  %v268_v13 = vld [vmem:[%s365_s1 + $0x8] sm:$0xff]   ;;  %v269_v14 = vld [vmem:[%s365_s1] sm:$0xff]   ;;  %v274_v17 = vld [vmem:[%s366_s0 + $0x10] ss:$8 sps:$4 sm:$0xff]  }
   0x6   :  { %232 = vmatprep.mubr.msk.bf16.mxu1 %vm133_vm0, %v276_v6  ;;  %43 = vperm.xlu0 %260, %v37_v8   ;;  %v270_v15 = vld [vmem:[%s365_s1 + $0x40] sm:$0xff]  }
   0x7   :  { %143 = vmatpush1.bf16.msra.mxu0 %v263_v2  ;;  %251 = vmatpush1.bf16.msra.mxu1 %v263_v2  ;;  %v271_v16 = vld [vmem:[%s366_s0] ss:$8 sps:$4 sm:$0xff]  }
   0x8   :  { %144 = vmatprep.subr.bf16.mxu0 %v277_v0  ;;  %243 = vmatprep.subr.bf16.mxu1 %v277_v0 }
   0x9   :  { %58 = vperm.xlu1 %261, %v40_v9  }
   0xa   :  { %48 = vperm.xlu0 %260, %v38_v11  }
   0xb   :  { %145 = vmatpush1.bf16.msra.mxu0 %v264_v3  ;;  %252 = vmatpush1.bf16.msra.mxu1 %v264_v3 }
   0xc   :  { %146 = vmatprep.subr.bf16.mxu0 %v277_v0  ;;  %244 = vmatprep.subr.bf16.mxu1 %v277_v0 }
   0xf   :  { %147 = vmatpush1.bf16.msra.mxu0 %v265_v4  ;;  %253 = vmatpush1.bf16.msra.mxu1 %v265_v4 }
  0x10   :  { %148 = vmatprep.subr.bf16.mxu0 %v277_v0  ;;  %245 = vmatprep.subr.bf16.mxu1 %v277_v0 }
  0x13   :  { %149 = vmatpush1.bf16.msra.mxu0 %v266_v10  ;;  %254 = vmatpush1.bf16.msra.mxu1 %v266_v10 }
  0x14   :  { %150 = vmatprep.subr.bf16.mxu0 %v277_v0  ;;  %246 = vmatprep.subr.bf16.mxu1 %v277_v0 }
  0x17   :  { %151 = vmatpush1.bf16.msra.mxu0 %v267_v12  ;;  %255 = vmatpush1.bf16.msra.mxu1 %v267_v12 }
  0x18   :  { %152 = vmatprep.subr.bf16.mxu0 %v277_v0  ;;  %247 = vmatprep.subr.bf16.mxu1 %v277_v0 }
  0x1b   :  { %153 = vmatpush1.bf16.msra.mxu0 %v268_v13  ;;  %256 = vmatpush1.bf16.msra.mxu1 %v268_v13 }
  0x1c   :  { %154 = vmatprep.subr.bf16.mxu0 %v277_v0  ;;  %248 = vmatprep.subr.bf16.mxu1 %v277_v0 }
  0x1f   :  { %155 = vmatpush1.bf16.msra.mxu0 %v269_v14  ;;  %257 = vmatpush1.bf16.msra.mxu1 %v269_v14 }
  0x20   :  { %170 = vmatprep.subr.bf16.mxu0 %v277_v0  ;;  %249 = vmatprep.subr.bf16.mxu1 %v277_v0 }
  0x23   :  { %171 = vmatpush2.bf16.msra.mxu0 %v270_v15  ;;  %258 = vmatpush2.bf16.msra.mxu1 %v270_v15 }
  0x26   :  { %173 = vmatmul.mubr.bf16.vlgmr.msra.gmra.mxu0 %v271_v16  ;;  %181 = vmatmul.mubr.bf16.vlgmr.msra.gmra.mxu1 %v274_v17 }
  0x80   :  { %v54_v18 = vpop.permute.xlu1 %53 }
  0x81   :  { %v44_v19 = vpop.permute.xlu0 %43 }
  0x84   :  { %v59_v26 = vpop.permute.xlu1 %58 }
  0x85   :  { %v49_v27 = vpop.permute.xlu0 %48 }
  0xe6   :  { %v174_v20 = vpop.f32.mrf.mxu0  ;;  %v182_v21 = vpop.f32.mrf.mxu1 }
  0xe7   :  { %v175_v22 = vadd.f32 %v174_v20, %v44_v19  ;;  %v183_v23 = vadd.f32 %v182_v21, %v54_v18 }
  0xe8   :  { %v176_v24 = vpop.f32.mrf.mxu0  ;;  %v184_v25 = vpop.f32.mrf.mxu1 }
  0xe9   :  { %v189_v28 = vmax.f32 %v175_v22, 0.0  ;;  %v191_v29 = vmax.f32 %v183_v23, 0.0 }
  0xea   :  { %v177_v30 = vpop.f32.mrf.mxu0  ;;  %v185_v31 = vpop.f32.mrf.mxu1 }
  0xeb   :  { %v237_v32 = vpack.c.bf16 %v189_v28, %v189_v28  ;;  %v239_v33 = vpack.c.bf16 %v191_v29, %v191_v29  ;;  %v178_v34 = vadd.f32 %v177_v30, %v49_v27  ;;  %v186_v35 = vadd.f32 %v185_v31, %v59_v26 }
  0xec   :  { %v179_v36 = vpop.f32.mrf.mxu0  ;;  %v187_v37 = vpop.f32.mrf.mxu1 }
  0xed   :  { %210 = vst.msk [vmem:[%s368_s3] sm:$0xf] %vm209_vm1, %v237_v32  ;;  %212 = vst.msk [vmem:[%s368_s3 + $0x8] sm:$0xf] %vm209_vm1, %v239_v33  ;;  %v190_v38 = vmax.f32 %v178_v34, 0.0  ;;  %v192_v39 = vmax.f32 %v186_v35, 0.0 }
  0xef   :  { %v238_v40 = vpack.c.bf16 %v190_v38, %v190_v38  ;;  %v240_v41 = vpack.c.bf16 %v192_v39, %v192_v39 }
  0xf1   :  { %211 = vst.msk [vmem:[%s368_s3 + $0x4] sm:$0xf] %vm209_vm1, %v238_v40  ;;  %213 = vst.msk [vmem:[%s368_s3 + $0xc] sm:$0xf] %vm209_vm1, %v240_v41 }

// kernel: resnet_forward.19
= control target key start
LH: loop header
LB: loop body
LE: loop exit
PB: predicated region body
PF: predicated region fallthrough
CT: control target
= control target key end

     0   :  { %vm90_vm0 = vcmask 1043456   ;;  %vm83_vm1 = vcmask 64512   ;;  %vm209_vm2 = vcmask 261120   ;;  %vm1241_vm3 = vcmask 130048   ;;  %s1880_s5 = inlined_call_operand.vmem [shape: bf16[9,8,8], index: 5, kind: input, shape index: {}]   ;;  %s1881_s0 = inlined_call_operand.vmem [shape: bf16[32,8], index: 0, kind: input, shape index: {}]   ;;  %s1882_s1 = inlined_call_operand.vmem [shape: bf16[9,32,32], index: 1, kind: input, shape index: {}]   ;;  %s1883_s4 = inlined_call_operand.vmem [shape: bf16[16,8], index: 4, kind: input, shape index: {}]   ;;  %s1884_s3 = inlined_call_operand.vmem [shape: bf16[32,16], index: 3, kind: input, shape index: {}]   ;;  %s1885_s2 = inlined_call_operand.vmem [shape: f32[32,1], index: 2, kind: input, shape index: {}]   ;;  %s1886_s6 = inlined_call_operand.vmem [shape: bf16[32,8], index: 6, kind: output, shape index: {}]  }
   0x1   :  { %v64_v0 = vld [vmem:[%s1880_s5] sm:$0xf]  ;;  %v65_v1 = vld [vmem:[%s1880_s5 + $0x4] sm:$0xf]  ;;  %v1686_v5 = vld [vmem:[%s1881_s0 + $0x8] sm:$0xff]   ;;  %v1632_v40 = vmov 0  }
   0x2   :  { %1597 = vmatprep.subr.msk.bf16.mxu0 %vm90_vm0, %v64_v0  ;;  %1598 = vmatprep.subr.msk.bf16.mxu1 %vm90_vm0, %v65_v1  ;;  %v92_v2 = vsel %vm90_vm0, %v64_v0, 0  ;;  %v146_v3 = vsel %vm90_vm0, %v65_v1, 0  ;;  %v1681_v4 = vld [vmem:[%s1881_s0] sm:$0xff]   ;;  %v1611_v6 = vld [vmem:[%s1882_s1 + $0x10] sm:$0xff]   ;;  %v66_v20 = vld [vmem:[%s1880_s5 + $0x8] sm:$0xf] }
   0x3   :  { %1466 = vmatpush3.bf16.msra.mxu0 %v92_v2  ;;  %1472 = vmatpush3.bf16.msra.mxu1 %v146_v3  ;;  %v1612_v7 = vld [vmem:[%s1882_s1] sm:$0xff]   ;;  %v1613_v21 = vld [vmem:[%s1882_s1 + $0x18] sm:$0xff]   ;;  %v1614_v22 = vld [vmem:[%s1882_s1 + $0x8] sm:$0xff]   ;;  %v331_v23 = vsel %vm90_vm0, %v66_v20, 0  ;;  %vm1321_vm4 = vcmask 60416  }
   0x4   :  { %1467 = vmatprep.mubr.msk.bf16.mxu0 %vm83_vm1, %v1681_v4  ;;  %1473 = vmatprep.mubr.msk.bf16.mxu1 %vm83_vm1, %v1681_v4  ;;  %v67_v24 = vld [vmem:[%s1880_s5 + $0xc] sm:$0xf]  ;;  %v68_v26 = vld [vmem:[%s1880_s5 + $0x10] sm:$0xf]  ;;  %v69_v28 = vld [vmem:[%s1880_s5 + $0x14] sm:$0xf] }
   0x5   :  { %v454_v25 = vsel %vm90_vm0, %v67_v24, 0  ;;  %v577_v27 = vsel %vm90_vm0, %v68_v26, 0  ;;  %v700_v29 = vsel %vm90_vm0, %v69_v28, 0  ;;  %v70_v30 = vld [vmem:[%s1880_s5 + $0x18] sm:$0xf]  ;;  %v1615_v36 = vld [vmem:[%s1882_s1 + $0x20] sm:$0xff]   ;;  %1608 = vset.pattern.permute.xlu1 %v1632_v40  ;;  %1607 = vset.pattern.permute.xlu0 %v1632_v40 }
   0x6   :  { %1468 = vmatmul.mubr.msk.bf16.vlgmr.msra.gmra.mxu0 %vm83_vm1, %v1686_v5  ;;  %1474 = vmatmul.mubr.msk.bf16.vlgmr.msra.gmra.mxu1 %vm83_vm1, %v1686_v5  ;;  %v823_v31 = vsel %vm90_vm0, %v70_v30, 0  ;;  %v71_v32 = vld [vmem:[%s1880_s5 + $0x1c] sm:$0xf]  ;;  %v72_v34 = vld [vmem:[%s1880_s5 + $0x20] sm:$0xf]  ;;  %v1630_v39 = vld [vmem:[%s1884_s3 + $0x8] sm:$0xff]  }
   0x7   :  { %1481 = vmatprep.mubr.msk.bf16.mxu0 %vm209_vm2, %v1611_v6  ;;  %1489 = vmatprep.mubr.msk.bf16.mxu1 %vm209_vm2, %v1612_v7  ;;  %v946_v33 = vsel %vm90_vm0, %v71_v32, 0  ;;  %v1069_v35 = vsel %vm90_vm0, %v72_v34, 0  ;;  %v1627_v37 = vld [vmem:[%s1883_s4] sm:$0xff]   ;;  %v1193_v41 = vld [vmem:[%s1885_s2 + $0x10] sm:$0xff]  ;;  %v1194_v43 = vld [vmem:[%s1885_s2 + $0x18] sm:$0xff] }
   0x8   :  { %v1628_v38 = vld [vmem:[%s1884_s3] sm:$0xff]   ;;  %1207 = vperm.xlu1 %1608, %v1193_v41   ;;  %v1192_v44 = vld [vmem:[%s1885_s2 + $0x8] sm:$0xff]  ;;  %v1617_v59 = vld [vmem:[%s1882_s1 + $0x30] sm:$0xff]  }
   0x9   :  { %v1191_v42 = vld [vmem:[%s1885_s2] sm:$0xff]  ;;  %v1616_v57 = vld [vmem:[%s1882_s1 + $0x28] sm:$0xff]   ;;  %v1618_v1 = vld [vmem:[%s1882_s1 + $0x38] sm:$0xff]  }
   0xa   :  { %1197 = vperm.xlu0 %1607, %v1191_v42   ;;  %v1619_v3 = vld [vmem:[%s1882_s1 + $0x40] sm:$0xff]  }
   0xc   :  { %1212 = vperm.xlu1 %1608, %v1194_v43  }
   0xe   :  { %1202 = vperm.xlu0 %1607, %v1192_v44  }
  0xc6   :  { %v1469_v8 = vpop.f32.mrf.mxu0  ;;  %v1475_v9 = vpop.f32.mrf.mxu1 }
  0xc8   :  { %v128_v10 = vpop.f32.mrf.mxu0  ;;  %v182_v11 = vpop.f32.mrf.mxu1 }
  0xca   :  { %v1470_v12 = vpop.f32.mrf.mxu0  ;;  %v1476_v13 = vpop.f32.mrf.mxu1 }
  0xcb   :  { %v144_v14 = vpack.c.bf16 %v1470_v12, %v1469_v8  ;;  %v198_v15 = vpack.c.bf16 %v1476_v13, %v1475_v9  ;;  %v1620_v9 = vld [vmem:[%s1882_s1 + $0x48] sm:$0xff]  }
  0xcc   :  { %v185_v16 = vpop.f32.mrf.mxu1  ;;  %v131_v17 = vpop.f32.mrf.mxu0 }
  0xcd   :  { %v197_v18 = vpack.c.bf16 %v185_v16, %v182_v11  ;;  %1477 = vmatprep.subr.bf16.mxu0 %v198_v15  ;;  %1485 = vmatprep.subr.bf16.mxu1 %v144_v14  ;;  %v143_v19 = vpack.c.bf16 %v131_v17, %v128_v10  ;;  %v1621_v11 = vld [vmem:[%s1882_s1 + $0x50] sm:$0xff]   ;;  %v1622_v17 = vld [vmem:[%s1882_s1 + $0x58] sm:$0xff]  }
  0xce   :  { %1478 = vmatpush3.bf16.msra.mxu0 %v198_v15  ;;  %1486 = vmatpush3.bf16.msra.mxu1 %v144_v14 }
  0xcf   :  { %1479 = vmatprep.subr.bf16.mxu0 %v197_v18  ;;  %1487 = vmatprep.subr.bf16.mxu1 %v143_v19 }
  0xd2   :  { %1480 = vmatpush3.bf16.msra.mxu0 %v197_v18  ;;  %1488 = vmatpush3.bf16.msra.mxu1 %v143_v19  ;;  %v1623_v19 = vld [vmem:[%s1882_s1 + $0x60] sm:$0xff]  }
  0xd3   :  { %1599 = vmatprep.subr.msk.bf16.mxu0 %vm90_vm0, %v66_v20 }
  0xd5   :  { %1482 = vmatmul.mubr.msk.bf16.vlgmr.msra.gmra.mxu0 %vm209_vm2, %v1613_v21  ;;  %1490 = vmatmul.mubr.msk.bf16.vlgmr.msra.gmra.mxu1 %vm209_vm2, %v1614_v22 }
  0xd6   :  { %1494 = vmatpush3.bf16.msra.mxu0 %v331_v23  ;;  %1495 = vmatprep.mubr.msk.bf16.mxu0 %vm83_vm1, %v1681_v4 }
  0xd7   :  { %1600 = vmatprep.subr.msk.bf16.mxu0 %vm90_vm0, %v67_v24  ;;  %1503 = vmatprep.mubr.msk.bf16.mxu1 %vm209_vm2, %v1615_v36 }
  0xdd   :  { %1496 = vmatmul.mubr.msk.bf16.vlgmr.msra.gmra.mxu0 %vm83_vm1, %v1686_v5 }
  0xde   :  { %1508 = vmatpush3.bf16.msra.mxu0 %v454_v25  ;;  %1509 = vmatprep.mubr.msk.bf16.mxu0 %vm83_vm1, %v1681_v4  ;;  %v1624_v25 = vld [vmem:[%s1882_s1 + $0x68] sm:$0xff]  }
  0xdf   :  { %1601 = vmatprep.subr.msk.bf16.mxu0 %vm90_vm0, %v68_v26 }
  0xe5   :  { %1510 = vmatmul.mubr.msk.bf16.vlgmr.msra.gmra.mxu0 %vm83_vm1, %v1686_v5 }
  0xe6   :  { %1522 = vmatpush3.bf16.msra.mxu0 %v577_v27  ;;  %1523 = vmatprep.mubr.msk.bf16.mxu0 %vm83_vm1, %v1681_v4  ;;  %v1625_v27 = vld [vmem:[%s1882_s1 + $0x70] sm:$0xff]  }
  0xe7   :  { %1602 = vmatprep.subr.msk.bf16.mxu0 %vm90_vm0, %v69_v28 }
  0xed   :  { %1524 = vmatmul.mubr.msk.bf16.vlgmr.msra.gmra.mxu0 %vm83_vm1, %v1686_v5 }
  0xee   :  { %1536 = vmatpush3.bf16.msra.mxu0 %v700_v29  ;;  %1537 = vmatprep.mubr.msk.bf16.mxu0 %vm83_vm1, %v1681_v4 }
  0xef   :  { %1603 = vmatprep.subr.msk.bf16.mxu0 %vm90_vm0, %v70_v30 }
  0xf5   :  { %1538 = vmatmul.mubr.msk.bf16.vlgmr.msra.gmra.mxu0 %vm83_vm1, %v1686_v5 }
  0xf6   :  { %1550 = vmatpush3.bf16.msra.mxu0 %v823_v31  ;;  %1551 = vmatprep.mubr.msk.bf16.mxu0 %vm83_vm1, %v1681_v4 }
  0xf7   :  { %1604 = vmatprep.subr.msk.bf16.mxu0 %vm90_vm0, %v71_v32 }
  0xfd   :  { %1552 = vmatmul.mubr.msk.bf16.vlgmr.msra.gmra.mxu0 %vm83_vm1, %v1686_v5 }
  0xfe   :  { %1564 = vmatpush3.bf16.msra.mxu0 %v946_v33  ;;  %1565 = vmatprep.mubr.msk.bf16.mxu0 %vm83_vm1, %v1681_v4  ;;  %v1626_v33 = vld [vmem:[%s1882_s1 + $0x78] sm:$0xff]  }
  0xff   :  { %1605 = vmatprep.subr.msk.bf16.mxu0 %vm90_vm0, %v72_v34 }
 0x105   :  { %1566 = vmatmul.mubr.msk.bf16.vlgmr.msra.gmra.mxu0 %vm83_vm1, %v1686_v5 }
 0x106   :  { %1578 = vmatpush3.bf16.msra.mxu0 %v1069_v35  ;;  %1579 = vmatprep.mubr.msk.bf16.mxu0 %vm83_vm1, %v1681_v4  ;;  %v1629_v35 = vld [vmem:[%s1882_s1 + $0x80] sm:$0xff]  }
 0x107   :  { %1591 = vmatprep.subr.bf16.mxu0 %v1627_v37 }
 0x10d   :  { %1580 = vmatmul.mubr.msk.bf16.vlgmr.msra.gmra.mxu0 %vm83_vm1, %v1686_v5 }
 0x10e   :  { %1592 = vmatpush3.bf16.msra.mxu0 %v1627_v37  ;;  %1593 = vmatprep.mubr.msk.bf16.mxu0 %vm1241_vm3, %v1628_v38 }
 0x115   :  { %1594 = vmatmul.mubr.msk.bf16.vlgmr.msra.gmra.mxu0 %vm1241_vm3, %v1630_v39  ;;  %v1631_v39 = vld [vmem:[%s1882_s1 + $0x88] sm:$0xff]  }
 0x195   :  { %v1800_v45 = vpop.f32.mrf.mxu0  ;;  %v1491_v40 = vpop.f32.mrf.mxu1 }
 0x197   :  { %v1802_v46 = vpop.f32.mrf.mxu0  ;;  %v315_v41 = vpop.f32.mrf.mxu1 }
 0x199   :  { %v1804_v47 = vpop.f32.mrf.mxu0  ;;  %v1492_v42 = vpop.f32.mrf.mxu1 }
 0x19b   :  { %v1806_v48 = vpop.f32.mrf.mxu0  ;;  %v318_v43 = vpop.f32.mrf.mxu1 }
 0x19d   :  { %v1497_v49 = vpop.f32.mrf.mxu0 }
 0x19f   :  { %v367_v50 = vpop.f32.mrf.mxu0 }
 0x1a1   :  { %v1498_v51 = vpop.f32.mrf.mxu0 }
 0x1a2   :  { %v383_v52 = vpack.c.bf16 %v1498_v51, %v1497_v49 }
 0x1a3   :  { %v370_v53 = vpop.f32.mrf.mxu0 }
 0x1a4   :  { %v382_v54 = vpack.c.bf16 %v370_v53, %v367_v50  ;;  %1499 = vmatprep.subr.bf16.mxu1 %v383_v52 }
 0x1a5   :  { %1500 = vmatpush3.bf16.msra.mxu1 %v383_v52  ;;  %v1511_v55 = vpop.f32.mrf.mxu0 }
 0x1a6   :  { %1501 = vmatprep.subr.bf16.mxu1 %v382_v54 }
 0x1a7   :  { %v490_v56 = vpop.f32.mrf.mxu0 }
 0x1a9   :  { %1502 = vmatpush3.bf16.msra.mxu1 %v382_v54  ;;  %v1512_v58 = vpop.f32.mrf.mxu0 }
 0x1aa   :  { %v506_v60 = vpack.c.bf16 %v1512_v58, %v1511_v55 }
 0x1ab   :  { %v493_v61 = vpop.f32.mrf.mxu0 }
 0x1ac   :  { %v505_v62 = vpack.c.bf16 %v493_v61, %v490_v56  ;;  %1504 = vmatmul.mubr.msk.bf16.vlgmr.msra.gmra.mxu1 %vm209_vm2, %v1616_v57  ;;  %1513 = vmatprep.subr.bf16.mxu1 %v506_v60 }
 0x1ad   :  { %1514 = vmatpush3.bf16.msra.mxu1 %v506_v60  ;;  %v1525_v63 = vpop.f32.mrf.mxu0  ;;  %1517 = vmatprep.mubr.msk.bf16.mxu1 %vm209_vm2, %v1617_v59 }
 0x1ae   :  { %1515 = vmatprep.subr.bf16.mxu1 %v505_v62 }
 0x1af   :  { %v613_v0 = vpop.f32.mrf.mxu0 }
 0x1b1   :  { %1516 = vmatpush3.bf16.msra.mxu1 %v505_v62  ;;  %v1526_v2 = vpop.f32.mrf.mxu0 }
 0x1b2   :  { %v629_v4 = vpack.c.bf16 %v1526_v2, %v1525_v63  ;;  %v324_v2 = vadd.f32 %v1491_v40, %v1800_v45 }
 0x1b3   :  { %v616_v5 = vpop.f32.mrf.mxu0 }
 0x1b4   :  { %v628_v6 = vpack.c.bf16 %v616_v5, %v613_v0  ;;  %1518 = vmatmul.mubr.msk.bf16.vlgmr.msra.gmra.mxu1 %vm209_vm2, %v1618_v1  ;;  %1527 = vmatprep.subr.bf16.mxu1 %v629_v4 }
 0x1b5   :  { %1528 = vmatpush3.bf16.msra.mxu1 %v629_v4  ;;  %v1539_v7 = vpop.f32.mrf.mxu0  ;;  %1531 = vmatprep.mubr.msk.bf16.mxu1 %vm209_vm2, %v1619_v3  ;;  %v316_v4 = vadd.f32 %v315_v41, %v1802_v46 }
 0x1b6   :  { %1529 = vmatprep.subr.bf16.mxu1 %v628_v6 }
 0x1b7   :  { %v736_v8 = vpop.f32.mrf.mxu0 }
 0x1b9   :  { %1530 = vmatpush3.bf16.msra.mxu1 %v628_v6  ;;  %v1540_v10 = vpop.f32.mrf.mxu0 }
 0x1ba   :  { %v752_v12 = vpack.c.bf16 %v1540_v10, %v1539_v7  ;;  %v327_v7 = vadd.f32 %v1492_v42, %v1804_v47 }
 0x1bb   :  { %v739_v13 = vpop.f32.mrf.mxu0 }
 0x1bc   :  { %v751_v14 = vpack.c.bf16 %v739_v13, %v736_v8  ;;  %1532 = vmatmul.mubr.msk.bf16.vlgmr.msra.gmra.mxu1 %vm209_vm2, %v1620_v9  ;;  %1541 = vmatprep.subr.bf16.mxu1 %v752_v12 }
 0x1bd   :  { %1542 = vmatpush3.bf16.msra.mxu1 %v752_v12  ;;  %v1553_v15 = vpop.f32.mrf.mxu0  ;;  %1545 = vmatprep.mubr.msk.bf16.mxu1 %vm209_vm2, %v1621_v11  ;;  %v319_v11 = vadd.f32 %v318_v43, %v1806_v48 }
 0x1be   :  { %1543 = vmatprep.subr.bf16.mxu1 %v751_v14 }
 0x1bf   :  { %v859_v16 = vpop.f32.mrf.mxu0 }
 0x1c1   :  { %1544 = vmatpush3.bf16.msra.mxu1 %v751_v14  ;;  %v1554_v18 = vpop.f32.mrf.mxu0 }
 0x1c2   :  { %v875_v20 = vpack.c.bf16 %v1554_v18, %v1553_v15 }
 0x1c3   :  { %v862_v21 = vpop.f32.mrf.mxu0 }
 0x1c4   :  { %v874_v22 = vpack.c.bf16 %v862_v21, %v859_v16  ;;  %1546 = vmatmul.mubr.msk.bf16.vlgmr.msra.gmra.mxu1 %vm209_vm2, %v1622_v17  ;;  %1555 = vmatprep.subr.bf16.mxu1 %v875_v20 }
 0x1c5   :  { %1556 = vmatpush3.bf16.msra.mxu1 %v875_v20  ;;  %v1567_v23 = vpop.f32.mrf.mxu0  ;;  %1559 = vmatprep.mubr.msk.bf16.mxu1 %vm209_vm2, %v1623_v19 }
 0x1c6   :  { %1557 = vmatprep.subr.bf16.mxu1 %v874_v22 }
 0x1c7   :  { %v982_v24 = vpop.f32.mrf.mxu0 }
 0x1c9   :  { %1558 = vmatpush3.bf16.msra.mxu1 %v874_v22  ;;  %v1568_v26 = vpop.f32.mrf.mxu0 }
 0x1ca   :  { %v998_v28 = vpack.c.bf16 %v1568_v26, %v1567_v23 }
 0x1cb   :  { %v985_v29 = vpop.f32.mrf.mxu0 }
 0x1cc   :  { %v997_v30 = vpack.c.bf16 %v985_v29, %v982_v24  ;;  %1560 = vmatmul.mubr.msk.bf16.vlgmr.msra.gmra.mxu1 %vm209_vm2, %v1624_v25  ;;  %1569 = vmatprep.subr.bf16.mxu1 %v998_v28 }
 0x1cd   :  { %1570 = vmatpush3.bf16.msra.mxu1 %v998_v28  ;;  %v1581_v31 = vpop.f32.mrf.mxu0  ;;  %1573 = vmatprep.mubr.msk.bf16.mxu1 %vm209_vm2, %v1625_v27  ;;  %v1208_v28 = vpop.permute.xlu1 %1207 }
 0x1ce   :  { %1571 = vmatprep.subr.bf16.mxu1 %v997_v30 }
 0x1cf   :  { %v1105_v32 = vpop.f32.mrf.mxu0 }
 0x1d1   :  { %1572 = vmatpush3.bf16.msra.mxu1 %v997_v30  ;;  %v1582_v34 = vpop.f32.mrf.mxu0 }
 0x1d2   :  { %v1121_v36 = vpack.c.bf16 %v1582_v34, %v1581_v31  ;;  %v1198_v34 = vpop.permute.xlu0 %1197 }
 0x1d3   :  { %v1108_v37 = vpop.f32.mrf.mxu0 }
 0x1d4   :  { %v1120_v38 = vpack.c.bf16 %v1108_v37, %v1105_v32  ;;  %1574 = vmatmul.mubr.msk.bf16.vlgmr.msra.gmra.mxu1 %vm209_vm2, %v1626_v33  ;;  %1583 = vmatprep.subr.bf16.mxu1 %v1121_v36 }
 0x1d5   :  { %1584 = vmatpush3.bf16.msra.mxu1 %v1121_v36  ;;  %1587 = vmatprep.mubr.msk.bf16.mxu1 %vm209_vm2, %v1629_v35  ;;  %v1595_v23 = vpop.f32.mrf.mxu0 }
 0x1d6   :  { %1585 = vmatprep.subr.bf16.mxu1 %v1120_v38 }
 0x1d7   :  { %v1282_v33 = vpop.f32.mrf.mxu0 }
 0x1d9   :  { %1586 = vmatpush3.bf16.msra.mxu1 %v1120_v38 }
 0x1dc   :  { %1588 = vmatmul.mubr.msk.bf16.vlgmr.msra.gmra.mxu1 %vm209_vm2, %v1631_v39 }
 0x26c   :  { %v1505_v44 = vpop.f32.mrf.mxu1 }
 0x26d   :  { %v451_v5 = vadd.f32 %v1505_v44, %v324_v2  ;;  %v1596_v44 = vpop.f32.mrf.mxu0 }
 0x26e   :  { %v434_v49 = vpop.f32.mrf.mxu1 }
 0x26f   :  { %v449_v8 = vadd.f32 %v434_v49, %v316_v4 }
 0x270   :  { %v1506_v50 = vpop.f32.mrf.mxu1 }
 0x271   :  { %v452_v12 = vadd.f32 %v1506_v50, %v327_v7  ;;  %v1213_v50 = vpop.permute.xlu1 %1212 }
 0x272   :  { %v437_v51 = vpop.f32.mrf.mxu1 }
 0x273   :  { %v450_v16 = vadd.f32 %v437_v51, %v319_v11 }
 0x274   :  { %v1519_v52 = vpop.f32.mrf.mxu1 }
 0x275   :  { %v574_v9 = vadd.f32 %v1519_v52, %v451_v5 }
 0x276   :  { %v557_v53 = vpop.f32.mrf.mxu1 }
 0x277   :  { %v572_v13 = vadd.f32 %v557_v53, %v449_v8 }
 0x278   :  { %v1520_v54 = vpop.f32.mrf.mxu1 }
 0x279   :  { %v575_v17 = vadd.f32 %v1520_v54, %v452_v12 }
 0x27a   :  { %v560_v55 = vpop.f32.mrf.mxu1 }
 0x27b   :  { %v573_v20 = vadd.f32 %v560_v55, %v450_v16 }
 0x27c   :  { %v1533_v56 = vpop.f32.mrf.mxu1 }
 0x27d   :  { %v697_v14 = vadd.f32 %v1533_v56, %v574_v9  ;;  %v1203_v56 = vpop.permute.xlu0 %1202 }
 0x27e   :  { %v680_v57 = vpop.f32.mrf.mxu1 }
 0x27f   :  { %v695_v18 = vadd.f32 %v680_v57, %v572_v13 }
 0x280   :  { %v1534_v58 = vpop.f32.mrf.mxu1 }
 0x281   :  { %v698_v46 = vadd.f32 %v1534_v58, %v575_v17 }
 0x282   :  { %v683_v59 = vpop.f32.mrf.mxu1 }
 0x283   :  { %v696_v24 = vadd.f32 %v683_v59, %v573_v20 }
 0x284   :  { %v1547_v60 = vpop.f32.mrf.mxu1 }
 0x285   :  { %v820_v45 = vadd.f32 %v1547_v60, %v697_v14 }
 0x286   :  { %v803_v61 = vpop.f32.mrf.mxu1 }
 0x287   :  { %v818_v21 = vadd.f32 %v803_v61, %v695_v18  ;;  %v1285_v61 = vpop.f32.mrf.mxu0 }
 0x288   :  { %v1548_v62 = vpop.f32.mrf.mxu1 }
 0x289   :  { %v821_v25 = vadd.f32 %v1548_v62, %v698_v46 }
 0x28a   :  { %v806_v63 = vpop.f32.mrf.mxu1 }
 0x28b   :  { %v819_v29 = vadd.f32 %v806_v63, %v696_v24 }
 0x28c   :  { %v1561_v0 = vpop.f32.mrf.mxu1 }
 0x28d   :  { %v943_v22 = vadd.f32 %v1561_v0, %v820_v45 }
 0x28e   :  { %v926_v1 = vpop.f32.mrf.mxu1 }
 0x28f   :  { %v941_v26 = vadd.f32 %v926_v1, %v818_v21 }
 0x290   :  { %v1562_v3 = vpop.f32.mrf.mxu1 }
 0x291   :  { %v944_v30 = vadd.f32 %v1562_v3, %v821_v25 }
 0x292   :  { %v929_v6 = vpop.f32.mrf.mxu1 }
 0x293   :  { %v942_v36 = vadd.f32 %v929_v6, %v819_v29 }
 0x294   :  { %v1575_v10 = vpop.f32.mrf.mxu1 }
 0x295   :  { %v1066_v27 = vadd.f32 %v1575_v10, %v943_v22 }
 0x296   :  { %v1049_v15 = vpop.f32.mrf.mxu1 }
 0x297   :  { %v1064_v31 = vadd.f32 %v1049_v15, %v941_v26 }
 0x298   :  { %v1576_v19 = vpop.f32.mrf.mxu1 }
 0x299   :  { %v1067_v37 = vadd.f32 %v1576_v19, %v944_v30 }
 0x29a   :  { %v1052_v47 = vpop.f32.mrf.mxu1 }
 0x29b   :  { %v1065_v41 = vadd.f32 %v1052_v47, %v942_v36 }
 0x29c   :  { %v1589_v48 = vpop.f32.mrf.mxu1 }
 0x29d   :  { %v1189_v32 = vadd.f32 %v1589_v48, %v1066_v27 }
 0x29e   :  { %v1172_v35 = vpop.f32.mrf.mxu1 }
 0x29f   :  { %v1217_v38 = vadd.f32 %v1208_v28, %v1189_v32  ;;  %v1187_v39 = vadd.f32 %v1172_v35, %v1064_v31 }
 0x2a0   :  { %v1590_v40 = vpop.f32.mrf.mxu1 }
 0x2a1   :  { %v1299_v42 = vadd.f32 %v1595_v23, %v1217_v38  ;;  %v1215_v43 = vadd.f32 %v1198_v34, %v1187_v39  ;;  %v1190_v49 = vadd.f32 %v1590_v40, %v1067_v37 }
 0x2a2   :  { %v1175_v51 = vpop.f32.mrf.mxu1 }
 0x2a3   :  { %v1303_v52 = vmax.f32 %v1299_v42, 0.0  ;;  %v1297_v53 = vadd.f32 %v1282_v33, %v1215_v43  ;;  %v1218_v54 = vadd.f32 %v1213_v50, %v1190_v49  ;;  %v1188_v55 = vadd.f32 %v1175_v51, %v1065_v41 }
 0x2a5   :  { %v1397_v57 = vpack.c.bf16 %v1303_v52, %v1303_v52  ;;  %v1301_v58 = vmax.f32 %v1297_v53, 0.0  ;;  %v1300_v59 = vadd.f32 %v1596_v44, %v1218_v54  ;;  %v1216_v60 = vadd.f32 %v1203_v56, %v1188_v55 }
 0x2a7   :  { %1324 = vst.msk [vmem:[%s1886_s6 + $0x8] sm:$0xf] %vm1321_vm4, %v1397_v57  ;;  %v1395_v62 = vpack.c.bf16 %v1301_v58, %v1301_v58  ;;  %v1304_v63 = vmax.f32 %v1300_v59, 0.0  ;;  %v1298_v0 = vadd.f32 %v1285_v61, %v1216_v60 }
 0x2a9   :  { %1322 = vst.msk [vmem:[%s1886_s6] sm:$0xf] %vm1321_vm4, %v1395_v62  ;;  %v1398_v1 = vpack.c.bf16 %v1304_v63, %v1304_v63  ;;  %v1302_v2 = vmax.f32 %v1298_v0, 0.0 }
 0x2ab   :  { %1325 = vst.msk [vmem:[%s1886_s6 + $0xc] sm:$0xf] %vm1321_vm4, %v1398_v1  ;;  %v1396_v3 = vpack.c.bf16 %v1302_v2, %v1302_v2 }
 0x2ad   :  { %1323 = vst.msk [vmem:[%s1886_s6 + $0x4] sm:$0xf] %vm1321_vm4, %v1396_v3 }

// kernel: resnet_forward.20
= control target key start
LH: loop header
LB: loop body
LE: loop exit
PB: predicated region body
PF: predicated region fallthrough
CT: control target
= control target key end

     0   :  { %vm90_vm0 = vcmask 1043456   ;;  %vm83_vm1 = vcmask 64512   ;;  %vm209_vm2 = vcmask 261120   ;;  %v2963_v37 = vmov 0   ;;  %s3419_s5 = inlined_call_operand.vmem [shape: bf16[9,8,8], index: 5, kind: input, shape index: {}]   ;;  %s3420_s0 = inlined_call_operand.vmem [shape: bf16[32,8], index: 0, kind: input, shape index: {}]   ;;  %s3421_s1 = inlined_call_operand.vmem [shape: bf16[9,32,32], index: 1, kind: input, shape index: {}]   ;;  %s3422_s2 = inlined_call_operand.vmem [shape: f32[32,1], index: 2, kind: input, shape index: {}]   ;;  %s3423_s4 = inlined_call_operand.vmem [shape: f32[32,1], index: 4, kind: input, shape index: {}]   ;;  %s3424_s3 = inlined_call_operand.vmem [shape: bf16[9,32,32], index: 3, kind: input, shape index: {}]   ;;  %s3425_s6 = inlined_call_operand.vmem [shape: bf16[32,8], index: 6, kind: output, shape index: {}]  }
   0x1   :  { %v3002_v0 = vld [vmem:[%s3419_s5] sm:$0xf]  ;;  %v3007_v1 = vld [vmem:[%s3419_s5 + $0x4] sm:$0xf]  ;;  %v3029_v5 = vld [vmem:[%s3420_s0 + $0x8] sm:$0xff]   ;;  %2919 = vset.pattern.permute.xlu0 %v2963_v37  ;;  %2920 = vset.pattern.permute.xlu1 %v2963_v37  ;;  %vm2395_vm3 = vcmask 60416  }
   0x2   :  { %v3012_v2 = vld [vmem:[%s3420_s0] sm:$0xff]   ;;  %2900 = vmatprep.subr.msk.bf16.mxu0 %vm90_vm0, %v3002_v0  ;;  %2901 = vmatprep.subr.msk.bf16.mxu1 %vm90_vm0, %v3007_v1  ;;  %v3020_v3 = vsel %vm90_vm0, %v3002_v0, 0  ;;  %v3024_v4 = vsel %vm90_vm0, %v3007_v1, 0  ;;  %v2923_v6 = vld [vmem:[%s3421_s1 + $0x10] sm:$0xff]   ;;  %v3052_v20 = vld [vmem:[%s3419_s5 + $0x8] sm:$0xf] }
   0x3   :  { %2649 = vmatpush3.bf16.msra.mxu0 %v3020_v3  ;;  %2655 = vmatpush3.bf16.msra.mxu1 %v3024_v4  ;;  %v2924_v7 = vld [vmem:[%s3421_s1] sm:$0xff]   ;;  %v2925_v21 = vld [vmem:[%s3421_s1 + $0x18] sm:$0xff]   ;;  %v2926_v22 = vld [vmem:[%s3421_s1 + $0x8] sm:$0xff]   ;;  %v3064_v23 = vsel %vm90_vm0, %v3052_v20, 0 }
   0x4   :  { %2650 = vmatprep.mubr.msk.bf16.mxu0 %vm83_vm1, %v3012_v2  ;;  %2656 = vmatprep.mubr.msk.bf16.mxu1 %vm83_vm1, %v3012_v2  ;;  %v3069_v24 = vld [vmem:[%s3419_s5 + $0xc] sm:$0xf]  ;;  %v3085_v26 = vld [vmem:[%s3419_s5 + $0x10] sm:$0xf]  ;;  %v3101_v28 = vld [vmem:[%s3419_s5 + $0x14] sm:$0xf] }
   0x5   :  { %v3080_v25 = vsel %vm90_vm0, %v3069_v24, 0  ;;  %v3096_v27 = vsel %vm90_vm0, %v3085_v26, 0  ;;  %v3112_v29 = vsel %vm90_vm0, %v3101_v28, 0  ;;  %v3117_v30 = vld [vmem:[%s3419_s5 + $0x18] sm:$0xf]  ;;  %v2927_v36 = vld [vmem:[%s3421_s1 + $0x20] sm:$0xff]  }
   0x6   :  { %2651 = vmatmul.mubr.msk.bf16.vlgmr.msra.gmra.mxu0 %vm83_vm1, %v3029_v5  ;;  %2657 = vmatmul.mubr.msk.bf16.vlgmr.msra.gmra.mxu1 %vm83_vm1, %v3029_v5  ;;  %v3128_v31 = vsel %vm90_vm0, %v3117_v30, 0  ;;  %v3133_v32 = vld [vmem:[%s3419_s5 + $0x1c] sm:$0xf]  ;;  %v3149_v34 = vld [vmem:[%s3419_s5 + $0x20] sm:$0xf]  ;;  %v1193_v39 = vld [vmem:[%s3422_s2 + $0x10] sm:$0xff] }
   0x7   :  { %2664 = vmatprep.mubr.msk.bf16.mxu0 %vm209_vm2, %v2923_v6  ;;  %2672 = vmatprep.mubr.msk.bf16.mxu1 %vm209_vm2, %v2924_v7  ;;  %v3144_v33 = vsel %vm90_vm0, %v3133_v32, 0  ;;  %v3160_v35 = vsel %vm90_vm0, %v3149_v34, 0  ;;  %v1191_v38 = vld [vmem:[%s3422_s2] sm:$0xff]  ;;  %v1192_v40 = vld [vmem:[%s3422_s2 + $0x8] sm:$0xff]  ;;  %v1194_v41 = vld [vmem:[%s3422_s2 + $0x18] sm:$0xff] }
   0x8   :  { %1197 = vperm.xlu0 %2919, %v1191_v38   ;;  %1207 = vperm.xlu1 %2920, %v1193_v39   ;;  %v2339_v42 = vld [vmem:[%s3423_s4] sm:$0xff]  ;;  %v2340_v43 = vld [vmem:[%s3423_s4 + $0x8] sm:$0xff]  ;;  %v2341_v44 = vld [vmem:[%s3423_s4 + $0x10] sm:$0xff] }
   0x9   :  { %v2342_v45 = vld [vmem:[%s3423_s4 + $0x18] sm:$0xff]  ;;  %v2928_v58 = vld [vmem:[%s3421_s1 + $0x28] sm:$0xff]   ;;  %v2929_v60 = vld [vmem:[%s3421_s1 + $0x30] sm:$0xff]  }
   0xa   :  { %v2931_v6 = vld [vmem:[%s3421_s1 + $0x40] sm:$0xff]  }
   0xc   :  { %1202 = vperm.xlu0 %2919, %v1192_v40   ;;  %1212 = vperm.xlu1 %2920, %v1194_v41  }
  0x10   :  { %2345 = vperm.xlu0 %2919, %v2339_v42   ;;  %2350 = vperm.xlu1 %2920, %v2340_v43   ;;  %v2936_v42 = vld [vmem:[%s3421_s1 + $0x68] sm:$0xff]  }
  0x14   :  { %2355 = vperm.xlu0 %2919, %v2341_v44   ;;  %2360 = vperm.xlu1 %2920, %v2342_v45   ;;  %v2937_v44 = vld [vmem:[%s3421_s1 + $0x70] sm:$0xff]  }
  0xc6   :  { %v2652_v8 = vpop.f32.mrf.mxu0  ;;  %v2658_v9 = vpop.f32.mrf.mxu1 }
  0xc8   :  { %v128_v10 = vpop.f32.mrf.mxu0  ;;  %v182_v11 = vpop.f32.mrf.mxu1 }
  0xca   :  { %v2653_v12 = vpop.f32.mrf.mxu0  ;;  %v2659_v13 = vpop.f32.mrf.mxu1 }
  0xcb   :  { %v144_v14 = vpack.c.bf16 %v2653_v12, %v2652_v8  ;;  %v198_v15 = vpack.c.bf16 %v2659_v13, %v2658_v9  ;;  %v2932_v12 = vld [vmem:[%s3421_s1 + $0x48] sm:$0xff]  }
  0xcc   :  { %v185_v16 = vpop.f32.mrf.mxu1  ;;  %v131_v17 = vpop.f32.mrf.mxu0 }
  0xcd   :  { %v197_v18 = vpack.c.bf16 %v185_v16, %v182_v11  ;;  %2660 = vmatprep.subr.bf16.mxu0 %v198_v15  ;;  %2668 = vmatprep.subr.bf16.mxu1 %v144_v14  ;;  %v143_v19 = vpack.c.bf16 %v131_v17, %v128_v10 }
  0xce   :  { %2661 = vmatpush3.bf16.msra.mxu0 %v198_v15  ;;  %2669 = vmatpush3.bf16.msra.mxu1 %v144_v14  ;;  %v2933_v14 = vld [vmem:[%s3421_s1 + $0x50] sm:$0xff]  }
  0xcf   :  { %2662 = vmatprep.subr.bf16.mxu0 %v197_v18  ;;  %2670 = vmatprep.subr.bf16.mxu1 %v143_v19 }
  0xd2   :  { %2663 = vmatpush3.bf16.msra.mxu0 %v197_v18  ;;  %2671 = vmatpush3.bf16.msra.mxu1 %v143_v19 }
  0xd3   :  { %2902 = vmatprep.subr.msk.bf16.mxu0 %vm90_vm0, %v3052_v20 }
  0xd5   :  { %2665 = vmatmul.mubr.msk.bf16.vlgmr.msra.gmra.mxu0 %vm209_vm2, %v2925_v21  ;;  %2673 = vmatmul.mubr.msk.bf16.vlgmr.msra.gmra.mxu1 %vm209_vm2, %v2926_v22  ;;  %v2934_v21 = vld [vmem:[%s3421_s1 + $0x58] sm:$0xff]  }
  0xd6   :  { %2677 = vmatpush3.bf16.msra.mxu0 %v3064_v23  ;;  %2678 = vmatprep.mubr.msk.bf16.mxu0 %vm83_vm1, %v3012_v2 }
  0xd7   :  { %2903 = vmatprep.subr.msk.bf16.mxu0 %vm90_vm0, %v3069_v24  ;;  %2686 = vmatprep.mubr.msk.bf16.mxu1 %vm209_vm2, %v2927_v36  ;;  %v2935_v36 = vld [vmem:[%s3421_s1 + $0x60] sm:$0xff]  }
  0xdd   :  { %2679 = vmatmul.mubr.msk.bf16.vlgmr.msra.gmra.mxu0 %vm83_vm1, %v3029_v5 }
  0xde   :  { %2691 = vmatpush3.bf16.msra.mxu0 %v3080_v25  ;;  %2692 = vmatprep.mubr.msk.bf16.mxu0 %vm83_vm1, %v3012_v2 }
  0xdf   :  { %2904 = vmatprep.subr.msk.bf16.mxu0 %vm90_vm0, %v3085_v26 }
  0xe5   :  { %2693 = vmatmul.mubr.msk.bf16.vlgmr.msra.gmra.mxu0 %vm83_vm1, %v3029_v5 }
  0xe6   :  { %2705 = vmatpush3.bf16.msra.mxu0 %v3096_v27  ;;  %2706 = vmatprep.mubr.msk.bf16.mxu0 %vm83_vm1, %v3012_v2 }
  0xe7   :  { %2905 = vmatprep.subr.msk.bf16.mxu0 %vm90_vm0, %v3101_v28 }
  0xed   :  { %2707 = vmatmul.mubr.msk.bf16.vlgmr.msra.gmra.mxu0 %vm83_vm1, %v3029_v5 }
  0xee   :  { %2719 = vmatpush3.bf16.msra.mxu0 %v3112_v29  ;;  %2720 = vmatprep.mubr.msk.bf16.mxu0 %vm83_vm1, %v3012_v2 }
  0xef   :  { %2906 = vmatprep.subr.msk.bf16.mxu0 %vm90_vm0, %v3117_v30 }
  0xf5   :  { %2721 = vmatmul.mubr.msk.bf16.vlgmr.msra.gmra.mxu0 %vm83_vm1, %v3029_v5 }
  0xf6   :  { %2733 = vmatpush3.bf16.msra.mxu0 %v3128_v31  ;;  %2734 = vmatprep.mubr.msk.bf16.mxu0 %vm83_vm1, %v3012_v2 }
  0xf7   :  { %2907 = vmatprep.subr.msk.bf16.mxu0 %vm90_vm0, %v3133_v32 }
  0xfd   :  { %2735 = vmatmul.mubr.msk.bf16.vlgmr.msra.gmra.mxu0 %vm83_vm1, %v3029_v5 }
  0xfe   :  { %2747 = vmatpush3.bf16.msra.mxu0 %v3144_v33  ;;  %2748 = vmatprep.mubr.msk.bf16.mxu0 %vm83_vm1, %v3012_v2 }
  0xff   :  { %2908 = vmatprep.subr.msk.bf16.mxu0 %vm90_vm0, %v3149_v34 }
 0x105   :  { %2749 = vmatmul.mubr.msk.bf16.vlgmr.msra.gmra.mxu0 %vm83_vm1, %v3029_v5 }
 0x106   :  { %2761 = vmatpush3.bf16.msra.mxu0 %v3160_v35  ;;  %2762 = vmatprep.mubr.msk.bf16.mxu0 %vm83_vm1, %v3012_v2 }
 0x107   :  { %2909 = vmatprep.subr.msk.bf16.mxu0 %vm90_vm0, %v3002_v0 }
 0x10d   :  { %2763 = vmatmul.mubr.msk.bf16.vlgmr.msra.gmra.mxu0 %vm83_vm1, %v3029_v5 }
 0x10e   :  { %2775 = vmatpush3.bf16.msra.mxu0 %v3020_v3  ;;  %v2930_v3 = vld [vmem:[%s3421_s1 + $0x38] sm:$0xff]  }
 0x195   :  { %v3200_v46 = vpop.f32.mrf.mxu0 }
 0x197   :  { %v3202_v47 = vpop.f32.mrf.mxu0 }
 0x199   :  { %v3204_v48 = vpop.f32.mrf.mxu0 }
 0x19b   :  { %v3206_v49 = vpop.f32.mrf.mxu0 }
 0x19d   :  { %v2680_v50 = vpop.f32.mrf.mxu0 }
 0x19f   :  { %v367_v51 = vpop.f32.mrf.mxu0 }
 0x1a1   :  { %v2681_v52 = vpop.f32.mrf.mxu0 }
 0x1a2   :  { %v383_v53 = vpack.c.bf16 %v2681_v52, %v2680_v50 }
 0x1a3   :  { %v370_v54 = vpop.f32.mrf.mxu0 }
 0x1a4   :  { %v382_v55 = vpack.c.bf16 %v370_v54, %v367_v51  ;;  %2682 = vmatprep.subr.bf16.mxu1 %v383_v53  ;;  %v2938_v54 = vld [vmem:[%s3421_s1 + $0x78] sm:$0xff]  }
 0x1a5   :  { %2683 = vmatpush3.bf16.msra.mxu1 %v383_v53  ;;  %v2694_v56 = vpop.f32.mrf.mxu0 }
 0x1a6   :  { %2684 = vmatprep.subr.bf16.mxu1 %v382_v55 }
 0x1a7   :  { %v490_v57 = vpop.f32.mrf.mxu0 }
 0x1a9   :  { %2685 = vmatpush3.bf16.msra.mxu1 %v382_v55  ;;  %v2695_v59 = vpop.f32.mrf.mxu0 }
 0x1aa   :  { %v506_v61 = vpack.c.bf16 %v2695_v59, %v2694_v56  ;;  %v2939_v56 = vld [vmem:[%s3421_s1 + $0x80] sm:$0xff]  }
 0x1ab   :  { %v493_v62 = vpop.f32.mrf.mxu0 }
 0x1ac   :  { %v505_v63 = vpack.c.bf16 %v493_v62, %v490_v57  ;;  %2687 = vmatmul.mubr.msk.bf16.vlgmr.msra.gmra.mxu1 %vm209_vm2, %v2928_v58  ;;  %2696 = vmatprep.subr.bf16.mxu1 %v506_v61 }
 0x1ad   :  { %2697 = vmatpush3.bf16.msra.mxu1 %v506_v61  ;;  %v2708_v0 = vpop.f32.mrf.mxu0  ;;  %2700 = vmatprep.mubr.msk.bf16.mxu1 %vm209_vm2, %v2929_v60  ;;  %v2940_v60 = vld [vmem:[%s3421_s1 + $0x88] sm:$0xff]   ;;  %v2674_v61 = vpop.f32.mrf.mxu1 }
 0x1ae   :  { %2698 = vmatprep.subr.bf16.mxu1 %v505_v63 }
 0x1af   :  { %v613_v2 = vpop.f32.mrf.mxu0  ;;  %v315_v62 = vpop.f32.mrf.mxu1 }
 0x1b1   :  { %2699 = vmatpush3.bf16.msra.mxu1 %v505_v63  ;;  %v2709_v5 = vpop.f32.mrf.mxu0  ;;  %v2675_v63 = vpop.f32.mrf.mxu1 }
 0x1b2   :  { %v629_v7 = vpack.c.bf16 %v2709_v5, %v2708_v0 }
 0x1b3   :  { %v616_v8 = vpop.f32.mrf.mxu0  ;;  %v318_v0 = vpop.f32.mrf.mxu1 }
 0x1b4   :  { %v628_v9 = vpack.c.bf16 %v616_v8, %v613_v2  ;;  %2701 = vmatmul.mubr.msk.bf16.vlgmr.msra.gmra.mxu1 %vm209_vm2, %v2930_v3  ;;  %2710 = vmatprep.subr.bf16.mxu1 %v629_v7 }
 0x1b5   :  { %2711 = vmatpush3.bf16.msra.mxu1 %v629_v7  ;;  %v2722_v10 = vpop.f32.mrf.mxu0  ;;  %2714 = vmatprep.mubr.msk.bf16.mxu1 %vm209_vm2, %v2931_v6 }
 0x1b6   :  { %2712 = vmatprep.subr.bf16.mxu1 %v628_v9 }
 0x1b7   :  { %v736_v11 = vpop.f32.mrf.mxu0 }
 0x1b9   :  { %2713 = vmatpush3.bf16.msra.mxu1 %v628_v9  ;;  %v2723_v13 = vpop.f32.mrf.mxu0 }
 0x1ba   :  { %v752_v15 = vpack.c.bf16 %v2723_v13, %v2722_v10 }
 0x1bb   :  { %v739_v16 = vpop.f32.mrf.mxu0 }
 0x1bc   :  { %v751_v17 = vpack.c.bf16 %v739_v16, %v736_v11  ;;  %2715 = vmatmul.mubr.msk.bf16.vlgmr.msra.gmra.mxu1 %vm209_vm2, %v2932_v12  ;;  %2724 = vmatprep.subr.bf16.mxu1 %v752_v15 }
 0x1bd   :  { %2725 = vmatpush3.bf16.msra.mxu1 %v752_v15  ;;  %v2736_v18 = vpop.f32.mrf.mxu0  ;;  %2728 = vmatprep.mubr.msk.bf16.mxu1 %vm209_vm2, %v2933_v14 }
 0x1be   :  { %2726 = vmatprep.subr.bf16.mxu1 %v751_v17 }
 0x1bf   :  { %v859_v19 = vpop.f32.mrf.mxu0 }
 0x1c1   :  { %2727 = vmatpush3.bf16.msra.mxu1 %v751_v17  ;;  %v2737_v22 = vpop.f32.mrf.mxu0 }
 0x1c2   :  { %v875_v37 = vpack.c.bf16 %v2737_v22, %v2736_v18  ;;  %v316_v22 = vadd.f32 %v315_v62, %v3202_v47  ;;  %v1208_v62 = vpop.permute.xlu1 %1207 }
 0x1c3   :  { %v862_v38 = vpop.f32.mrf.mxu0 }
 0x1c4   :  { %v874_v39 = vpack.c.bf16 %v862_v38, %v859_v19  ;;  %2729 = vmatmul.mubr.msk.bf16.vlgmr.msra.gmra.mxu1 %vm209_vm2, %v2934_v21  ;;  %2738 = vmatprep.subr.bf16.mxu1 %v875_v37  ;;  %v324_v19 = vadd.f32 %v2674_v61, %v3200_v46  ;;  %v327_v38 = vadd.f32 %v2675_v63, %v3204_v48 }
 0x1c5   :  { %2739 = vmatpush3.bf16.msra.mxu1 %v875_v37  ;;  %v2750_v40 = vpop.f32.mrf.mxu0  ;;  %2742 = vmatprep.mubr.msk.bf16.mxu1 %vm209_vm2, %v2935_v36 }
 0x1c6   :  { %2740 = vmatprep.subr.bf16.mxu1 %v874_v39 }
 0x1c7   :  { %v982_v41 = vpop.f32.mrf.mxu0 }
 0x1c9   :  { %2741 = vmatpush3.bf16.msra.mxu1 %v874_v39  ;;  %v2751_v43 = vpop.f32.mrf.mxu0 }
 0x1ca   :  { %v998_v45 = vpack.c.bf16 %v2751_v43, %v2750_v40 }
 0x1cb   :  { %v985_v50 = vpop.f32.mrf.mxu0 }
 0x1cc   :  { %v997_v51 = vpack.c.bf16 %v985_v50, %v982_v41  ;;  %2743 = vmatmul.mubr.msk.bf16.vlgmr.msra.gmra.mxu1 %vm209_vm2, %v2936_v42  ;;  %2752 = vmatprep.subr.bf16.mxu1 %v998_v45  ;;  %v319_v42 = vadd.f32 %v318_v0, %v3206_v49 }
 0x1cd   :  { %2753 = vmatpush3.bf16.msra.mxu1 %v998_v45  ;;  %v2764_v52 = vpop.f32.mrf.mxu0  ;;  %2756 = vmatprep.mubr.msk.bf16.mxu1 %vm209_vm2, %v2937_v44 }
 0x1ce   :  { %2754 = vmatprep.subr.bf16.mxu1 %v997_v51 }
 0x1cf   :  { %v1105_v53 = vpop.f32.mrf.mxu0 }
 0x1d1   :  { %2755 = vmatpush3.bf16.msra.mxu1 %v997_v51  ;;  %v2765_v55 = vpop.f32.mrf.mxu0 }
 0x1d2   :  { %v1121_v57 = vpack.c.bf16 %v2765_v55, %v2764_v52 }
 0x1d3   :  { %v1108_v58 = vpop.f32.mrf.mxu0 }
 0x1d4   :  { %v1120_v59 = vpack.c.bf16 %v1108_v58, %v1105_v53  ;;  %2757 = vmatmul.mubr.msk.bf16.vlgmr.msra.gmra.mxu1 %vm209_vm2, %v2938_v54  ;;  %2766 = vmatprep.subr.bf16.mxu1 %v1121_v57 }
 0x1d5   :  { %2767 = vmatpush3.bf16.msra.mxu1 %v1121_v57  ;;  %2770 = vmatprep.mubr.msk.bf16.mxu1 %vm209_vm2, %v2939_v56 }
 0x1d6   :  { %2768 = vmatprep.subr.bf16.mxu1 %v1120_v59 }
 0x1d9   :  { %2769 = vmatpush3.bf16.msra.mxu1 %v1120_v59 }
 0x1da   :  { %2910 = vmatprep.subr.msk.bf16.mxu1 %vm90_vm0, %v3007_v1 }
 0x1dc   :  { %2771 = vmatmul.mubr.msk.bf16.vlgmr.msra.gmra.mxu1 %vm209_vm2, %v2940_v60 }
 0x1dd   :  { %2781 = vmatpush3.bf16.msra.mxu1 %v3024_v4 }
 0x26c   :  { %v2688_v2 = vpop.f32.mrf.mxu1 }
 0x26d   :  { %v451_v36 = vadd.f32 %v2688_v2, %v324_v19 }
 0x26e   :  { %v434_v3 = vpop.f32.mrf.mxu1 }
 0x26f   :  { %v449_v39 = vadd.f32 %v434_v3, %v316_v22 }
 0x270   :  { %v2689_v5 = vpop.f32.mrf.mxu1 }
 0x271   :  { %v452_v43 = vadd.f32 %v2689_v5, %v327_v38  ;;  %v1198_v5 = vpop.permute.xlu0 %1197 }
 0x272   :  { %v437_v6 = vpop.f32.mrf.mxu1 }
 0x273   :  { %v450_v51 = vadd.f32 %v437_v6, %v319_v42 }
 0x274   :  { %v2702_v7 = vpop.f32.mrf.mxu1 }
 0x275   :  { %v574_v40 = vadd.f32 %v2702_v7, %v451_v36 }
 0x276   :  { %v557_v8 = vpop.f32.mrf.mxu1 }
 0x277   :  { %v572_v44 = vadd.f32 %v557_v8, %v449_v39  ;;  %v2941_v39 = vld [vmem:[%s3424_s3 + $0x10] sm:$0xff]  }
 0x278   :  { %v2703_v9 = vpop.f32.mrf.mxu1 }
 0x279   :  { %v575_v52 = vadd.f32 %v2703_v9, %v452_v43 }
 0x27a   :  { %v560_v10 = vpop.f32.mrf.mxu1 }
 0x27b   :  { %v573_v55 = vadd.f32 %v560_v10, %v450_v51 }
 0x27c   :  { %v2716_v11 = vpop.f32.mrf.mxu1 }
 0x27d   :  { %v697_v45 = vadd.f32 %v2716_v11, %v574_v40  ;;  %v2942_v40 = vld [vmem:[%s3424_s3] sm:$0xff]  }
 0x27e   :  { %v680_v12 = vpop.f32.mrf.mxu1 }
 0x27f   :  { %v695_v53 = vadd.f32 %v680_v12, %v572_v44 }
 0x280   :  { %v2717_v13 = vpop.f32.mrf.mxu1 }
 0x281   :  { %v698_v47 = vadd.f32 %v2717_v13, %v575_v52 }
 0x282   :  { %v683_v1 = vpop.f32.mrf.mxu1 }
 0x283   :  { %v696_v48 = vadd.f32 %v683_v1, %v573_v55 }
 0x284   :  { %v2730_v14 = vpop.f32.mrf.mxu1 }
 0x285   :  { %v820_v46 = vadd.f32 %v2730_v14, %v697_v45  ;;  %v1213_v14 = vpop.permute.xlu1 %1212 }
 0x286   :  { %v803_v15 = vpop.f32.mrf.mxu1 }
 0x287   :  { %v818_v56 = vadd.f32 %v803_v15, %v695_v53 }
 0x288   :  { %v2731_v16 = vpop.f32.mrf.mxu1 }
 0x289   :  { %v821_v59 = vadd.f32 %v2731_v16, %v698_v47  ;;  %v2943_v47 = vld [vmem:[%s3424_s3 + $0x18] sm:$0xff]  }
 0x28a   :  { %v806_v4 = vpop.f32.mrf.mxu1 }
 0x28b   :  { %v819_v63 = vadd.f32 %v806_v4, %v696_v48 }
 0x28c   :  { %v2744_v17 = vpop.f32.mrf.mxu1 }
 0x28d   :  { %v943_v57 = vadd.f32 %v2744_v17, %v820_v46 }
 0x28e   :  { %v926_v18 = vpop.f32.mrf.mxu1 }
 0x28f   :  { %v941_v60 = vadd.f32 %v926_v18, %v818_v56  ;;  %v1203_v18 = vpop.permute.xlu0 %1202  ;;  %v2944_v56 = vld [vmem:[%s3424_s3 + $0x8] sm:$0xff]  }
 0x290   :  { %v2745_v21 = vpop.f32.mrf.mxu1 }
 0x291   :  { %v944_v0 = vadd.f32 %v2745_v21, %v821_v59 }
 0x292   :  { %v929_v37 = vpop.f32.mrf.mxu1 }
 0x293   :  { %v942_v7 = vadd.f32 %v929_v37, %v819_v63 }
 0x294   :  { %v2758_v41 = vpop.f32.mrf.mxu1 }
 0x295   :  { %v1066_v61 = vadd.f32 %v2758_v41, %v943_v57 }
 0x296   :  { %v1049_v50 = vpop.f32.mrf.mxu1 }
 0x297   :  { %v1064_v2 = vadd.f32 %v1049_v50, %v941_v60 }
 0x298   :  { %v2759_v54 = vpop.f32.mrf.mxu1 }
 0x299   :  { %v1067_v8 = vadd.f32 %v2759_v54, %v944_v0  ;;  %v2949_v0 = vld [vmem:[%s3424_s3 + $0x40] sm:$0xff]  }
 0x29a   :  { %v1052_v58 = vpop.f32.mrf.mxu1 }
 0x29b   :  { %v1065_v11 = vadd.f32 %v1052_v58, %v942_v7  ;;  %v2947_v58 = vld [vmem:[%s3424_s3 + $0x30] sm:$0xff]  }
 0x29c   :  { %v2772_v49 = vpop.f32.mrf.mxu1 }
 0x29d   :  { %v1189_v3 = vadd.f32 %v2772_v49, %v1066_v61  ;;  %v2948_v49 = vld [vmem:[%s3424_s3 + $0x38] sm:$0xff]  }
 0x29e   :  { %v1172_v6 = vpop.f32.mrf.mxu1 }
 0x29f   :  { %v1187_v9 = vadd.f32 %v1172_v6, %v1064_v2  ;;  %v1217_v12 = vadd.f32 %v1208_v62, %v1189_v3 }
 0x2a0   :  { %v2773_v10 = vpop.f32.mrf.mxu1 }
 0x2a1   :  { %v1190_v13 = vadd.f32 %v2773_v10, %v1067_v8  ;;  %v1215_v15 = vadd.f32 %v1198_v5, %v1187_v9  ;;  %v1221_v19 = vmax.f32 %v1217_v12, 0.0  ;;  %v2950_v8 = vld [vmem:[%s3424_s3 + $0x48] sm:$0xff]   ;;  %v2951_v10 = vld [vmem:[%s3424_s3 + $0x50] sm:$0xff]  }
 0x2a2   :  { %v1175_v1 = vpop.f32.mrf.mxu1 }
 0x2a3   :  { %v1218_v16 = vadd.f32 %v1213_v14, %v1190_v13  ;;  %v1188_v17 = vadd.f32 %v1175_v1, %v1065_v11  ;;  %v1219_v22 = vmax.f32 %v1215_v15, 0.0  ;;  %v2952_v15 = vld [vmem:[%s3424_s3 + $0x58] sm:$0xff]  }
 0x2a5   :  { %v1222_v4 = vmax.f32 %v1218_v16, 0.0  ;;  %v1216_v21 = vadd.f32 %v1203_v18, %v1188_v17  ;;  %v2953_v17 = vld [vmem:[%s3424_s3 + $0x60] sm:$0xff]  }
 0x2a7   :  { %v3267_v36 = vpack.c.bf16 %v1222_v4, %v1221_v19  ;;  %v1220_v38 = vmax.f32 %v1216_v21, 0.0 }
 0x2a9   :  { %v1223_v37 = vpack.c.bf16 %v1220_v38, %v1219_v22 }
 0x2ab   :  { %2776 = vmatprep.mubr.msk.bf16.mxu0 %vm83_vm1, %v1223_v37  ;;  %2782 = vmatprep.mubr.msk.bf16.mxu1 %vm83_vm1, %v1223_v37 }
 0x2ac   :  { %2777 = vmatmul.mubr.msk.bf16.vlgmr.msra.gmra.mxu0 %vm83_vm1, %v3267_v36  ;;  %2783 = vmatmul.mubr.msk.bf16.vlgmr.msra.gmra.mxu1 %vm83_vm1, %v3267_v36 }
 0x2ad   :  { %2790 = vmatprep.mubr.msk.bf16.mxu0 %vm209_vm2, %v2941_v39  ;;  %2798 = vmatprep.mubr.msk.bf16.mxu1 %vm209_vm2, %v2942_v40 }
 0x36c   :  { %v2778_v41 = vpop.f32.mrf.mxu0  ;;  %v2784_v42 = vpop.f32.mrf.mxu1 }
 0x36e   :  { %v1301_v43 = vpop.f32.mrf.mxu0  ;;  %v1352_v44 = vpop.f32.mrf.mxu1 }
 0x370   :  { %v2779_v45 = vpop.f32.mrf.mxu0  ;;  %v2785_v50 = vpop.f32.mrf.mxu1 }
 0x371   :  { %v1317_v51 = vpack.c.bf16 %v2779_v45, %v2778_v41  ;;  %v1368_v52 = vpack.c.bf16 %v2785_v50, %v2784_v42  ;;  %v2957_v50 = vld [vmem:[%s3424_s3 + $0x80] sm:$0xff]  }
 0x372   :  { %v1304_v53 = vpop.f32.mrf.mxu0  ;;  %v1355_v46 = vpop.f32.mrf.mxu1 }
 0x373   :  { %v1316_v54 = vpack.c.bf16 %v1304_v53, %v1301_v43  ;;  %v1367_v55 = vpack.c.bf16 %v1355_v46, %v1352_v44  ;;  %2786 = vmatprep.subr.bf16.mxu0 %v1368_v52  ;;  %2794 = vmatprep.subr.bf16.mxu1 %v1317_v51  ;;  %v2956_v44 = vld [vmem:[%s3424_s3 + $0x78] sm:$0xff]   ;;  %v2958_v46 = vld [vmem:[%s3424_s3 + $0x88] sm:$0xff]  }
 0x374   :  { %2787 = vmatpush3.bf16.msra.mxu0 %v1368_v52  ;;  %2795 = vmatpush3.bf16.msra.mxu1 %v1317_v51 }
 0x375   :  { %2788 = vmatprep.subr.bf16.mxu0 %v1367_v55  ;;  %2796 = vmatprep.subr.bf16.mxu1 %v1316_v54 }
 0x378   :  { %2789 = vmatpush3.bf16.msra.mxu0 %v1367_v55  ;;  %2797 = vmatpush3.bf16.msra.mxu1 %v1316_v54 }
 0x379   :  { %2911 = vmatprep.subr.msk.bf16.mxu0 %vm90_vm0, %v3052_v20  ;;  %v2945_v20 = vld [vmem:[%s3424_s3 + $0x20] sm:$0xff]  }
 0x37b   :  { %2791 = vmatmul.mubr.msk.bf16.vlgmr.msra.gmra.mxu0 %vm209_vm2, %v2943_v47  ;;  %2799 = vmatmul.mubr.msk.bf16.vlgmr.msra.gmra.mxu1 %vm209_vm2, %v2944_v56 }
 0x37c   :  { %2803 = vmatpush3.bf16.msra.mxu0 %v3064_v23  ;;  %2804 = vmatprep.mubr.msk.bf16.mxu0 %vm83_vm1, %v1223_v37 }
 0x37d   :  { %2912 = vmatprep.subr.msk.bf16.mxu0 %vm90_vm0, %v3069_v24  ;;  %2812 = vmatprep.mubr.msk.bf16.mxu1 %vm209_vm2, %v2945_v20 }
 0x383   :  { %2805 = vmatmul.mubr.msk.bf16.vlgmr.msra.gmra.mxu0 %vm83_vm1, %v3267_v36 }
 0x384   :  { %2817 = vmatpush3.bf16.msra.mxu0 %v3080_v25  ;;  %2818 = vmatprep.mubr.msk.bf16.mxu0 %vm83_vm1, %v1223_v37 }
 0x385   :  { %2913 = vmatprep.subr.msk.bf16.mxu0 %vm90_vm0, %v3085_v26 }
 0x38b   :  { %2819 = vmatmul.mubr.msk.bf16.vlgmr.msra.gmra.mxu0 %vm83_vm1, %v3267_v36 }
 0x38c   :  { %2831 = vmatpush3.bf16.msra.mxu0 %v3096_v27  ;;  %2832 = vmatprep.mubr.msk.bf16.mxu0 %vm83_vm1, %v1223_v37 }
 0x38d   :  { %2914 = vmatprep.subr.msk.bf16.mxu0 %vm90_vm0, %v3101_v28 }
 0x393   :  { %2833 = vmatmul.mubr.msk.bf16.vlgmr.msra.gmra.mxu0 %vm83_vm1, %v3267_v36 }
 0x394   :  { %2845 = vmatpush3.bf16.msra.mxu0 %v3112_v29  ;;  %2846 = vmatprep.mubr.msk.bf16.mxu0 %vm83_vm1, %v1223_v37 }
 0x395   :  { %2915 = vmatprep.subr.msk.bf16.mxu0 %vm90_vm0, %v3117_v30 }
 0x39b   :  { %2847 = vmatmul.mubr.msk.bf16.vlgmr.msra.gmra.mxu0 %vm83_vm1, %v3267_v36 }
 0x39c   :  { %2859 = vmatpush3.bf16.msra.mxu0 %v3128_v31  ;;  %2860 = vmatprep.mubr.msk.bf16.mxu0 %vm83_vm1, %v1223_v37 }
 0x39d   :  { %2916 = vmatprep.subr.msk.bf16.mxu0 %vm90_vm0, %v3133_v32 }
 0x3a3   :  { %2861 = vmatmul.mubr.msk.bf16.vlgmr.msra.gmra.mxu0 %vm83_vm1, %v3267_v36 }
 0x3a4   :  { %2873 = vmatpush3.bf16.msra.mxu0 %v3144_v33  ;;  %2874 = vmatprep.mubr.msk.bf16.mxu0 %vm83_vm1, %v1223_v37 }
 0x3a5   :  { %2917 = vmatprep.subr.msk.bf16.mxu0 %vm90_vm0, %v3149_v34 }
 0x3ab   :  { %2875 = vmatmul.mubr.msk.bf16.vlgmr.msra.gmra.mxu0 %vm83_vm1, %v3267_v36 }
 0x3ac   :  { %2887 = vmatpush3.bf16.msra.mxu0 %v3160_v35  ;;  %2888 = vmatprep.mubr.msk.bf16.mxu0 %vm83_vm1, %v1223_v37  ;;  %v2946_v35 = vld [vmem:[%s3424_s3 + $0x28] sm:$0xff]   ;;  %v2955_v37 = vld [vmem:[%s3424_s3 + $0x70] sm:$0xff]  }
 0x3b3   :  { %2889 = vmatmul.mubr.msk.bf16.vlgmr.msra.gmra.mxu0 %vm83_vm1, %v3267_v36  ;;  %v2954_v36 = vld [vmem:[%s3424_s3 + $0x68] sm:$0xff]  }
 0x43b   :  { %v3337_v23 = vpop.f32.mrf.mxu0  ;;  %v2800_v54 = vpop.f32.mrf.mxu1 }
 0x43d   :  { %v3339_v24 = vpop.f32.mrf.mxu0  ;;  %v1484_v55 = vpop.f32.mrf.mxu1 }
 0x43f   :  { %v3341_v25 = vpop.f32.mrf.mxu0  ;;  %v2801_v47 = vpop.f32.mrf.mxu1 }
 0x441   :  { %v3343_v26 = vpop.f32.mrf.mxu0  ;;  %v1487_v56 = vpop.f32.mrf.mxu1 }
 0x443   :  { %v2806_v27 = vpop.f32.mrf.mxu0 }
 0x445   :  { %v1533_v28 = vpop.f32.mrf.mxu0 }
 0x447   :  { %v2807_v29 = vpop.f32.mrf.mxu0 }
 0x448   :  { %v1549_v30 = vpack.c.bf16 %v2807_v29, %v2806_v27 }
 0x449   :  { %v1536_v31 = vpop.f32.mrf.mxu0 }
 0x44a   :  { %v1548_v32 = vpack.c.bf16 %v1536_v31, %v1533_v28  ;;  %2808 = vmatprep.subr.bf16.mxu1 %v1549_v30 }
 0x44b   :  { %2809 = vmatpush3.bf16.msra.mxu1 %v1549_v30  ;;  %v2820_v33 = vpop.f32.mrf.mxu0 }
 0x44c   :  { %2810 = vmatprep.subr.bf16.mxu1 %v1548_v32 }
 0x44d   :  { %v1653_v34 = vpop.f32.mrf.mxu0 }
 0x44f   :  { %2811 = vmatpush3.bf16.msra.mxu1 %v1548_v32  ;;  %v2821_v57 = vpop.f32.mrf.mxu0 }
 0x450   :  { %v1669_v48 = vpack.c.bf16 %v2821_v57, %v2820_v33 }
 0x451   :  { %v1656_v59 = vpop.f32.mrf.mxu0 }
 0x452   :  { %v1668_v60 = vpack.c.bf16 %v1656_v59, %v1653_v34  ;;  %2813 = vmatmul.mubr.msk.bf16.vlgmr.msra.gmra.mxu1 %vm209_vm2, %v2946_v35  ;;  %2822 = vmatprep.subr.bf16.mxu1 %v1669_v48 }
 0x453   :  { %2823 = vmatpush3.bf16.msra.mxu1 %v1669_v48  ;;  %v2834_v61 = vpop.f32.mrf.mxu0  ;;  %2826 = vmatprep.mubr.msk.bf16.mxu1 %vm209_vm2, %v2947_v58 }
 0x454   :  { %2824 = vmatprep.subr.bf16.mxu1 %v1668_v60 }
 0x455   :  { %v1773_v62 = vpop.f32.mrf.mxu0 }
 0x457   :  { %2825 = vmatpush3.bf16.msra.mxu1 %v1668_v60  ;;  %v2835_v63 = vpop.f32.mrf.mxu0 }
 0x458   :  { %v1789_v2 = vpack.c.bf16 %v2835_v63, %v2834_v61  ;;  %v1493_v63 = vadd.f32 %v2800_v54, %v3337_v23 }
 0x459   :  { %v1776_v3 = vpop.f32.mrf.mxu0 }
 0x45a   :  { %v1788_v5 = vpack.c.bf16 %v1776_v3, %v1773_v62  ;;  %2827 = vmatmul.mubr.msk.bf16.vlgmr.msra.gmra.mxu1 %vm209_vm2, %v2948_v49  ;;  %2836 = vmatprep.subr.bf16.mxu1 %v1789_v2 }
 0x45b   :  { %2837 = vmatpush3.bf16.msra.mxu1 %v1789_v2  ;;  %v2848_v6 = vpop.f32.mrf.mxu0  ;;  %2840 = vmatprep.mubr.msk.bf16.mxu1 %vm209_vm2, %v2949_v0  ;;  %v1485_v2 = vadd.f32 %v1484_v55, %v3339_v24 }
 0x45c   :  { %2838 = vmatprep.subr.bf16.mxu1 %v1788_v5 }
 0x45d   :  { %v1893_v7 = vpop.f32.mrf.mxu0 }
 0x45f   :  { %2839 = vmatpush3.bf16.msra.mxu1 %v1788_v5  ;;  %v2849_v9 = vpop.f32.mrf.mxu0 }
 0x460   :  { %v1909_v11 = vpack.c.bf16 %v2849_v9, %v2848_v6  ;;  %v1496_v6 = vadd.f32 %v2801_v47, %v3341_v25 }
 0x461   :  { %v1896_v12 = vpop.f32.mrf.mxu0 }
 0x462   :  { %v1908_v13 = vpack.c.bf16 %v1896_v12, %v1893_v7  ;;  %2841 = vmatmul.mubr.msk.bf16.vlgmr.msra.gmra.mxu1 %vm209_vm2, %v2950_v8  ;;  %2850 = vmatprep.subr.bf16.mxu1 %v1909_v11 }
 0x463   :  { %2851 = vmatpush3.bf16.msra.mxu1 %v1909_v11  ;;  %v2862_v14 = vpop.f32.mrf.mxu0  ;;  %2854 = vmatprep.mubr.msk.bf16.mxu1 %vm209_vm2, %v2951_v10  ;;  %v1488_v10 = vadd.f32 %v1487_v56, %v3343_v26  ;;  %v2351_v26 = vpop.permute.xlu1 %2350 }
 0x464   :  { %2852 = vmatprep.subr.bf16.mxu1 %v1908_v13 }
 0x465   :  { %v2013_v1 = vpop.f32.mrf.mxu0 }
 0x467   :  { %2853 = vmatpush3.bf16.msra.mxu1 %v1908_v13  ;;  %v2863_v16 = vpop.f32.mrf.mxu0 }
 0x468   :  { %v2029_v18 = vpack.c.bf16 %v2863_v16, %v2862_v14 }
 0x469   :  { %v2016_v19 = vpop.f32.mrf.mxu0 }
 0x46a   :  { %v2028_v4 = vpack.c.bf16 %v2016_v19, %v2013_v1  ;;  %2855 = vmatmul.mubr.msk.bf16.vlgmr.msra.gmra.mxu1 %vm209_vm2, %v2952_v15  ;;  %2864 = vmatprep.subr.bf16.mxu1 %v2029_v18 }
 0x46b   :  { %2865 = vmatpush3.bf16.msra.mxu1 %v2029_v18  ;;  %v2876_v21 = vpop.f32.mrf.mxu0  ;;  %2868 = vmatprep.mubr.msk.bf16.mxu1 %vm209_vm2, %v2953_v17  ;;  %v2346_v17 = vpop.permute.xlu0 %2345 }
 0x46c   :  { %2866 = vmatprep.subr.bf16.mxu1 %v2028_v4 }
 0x46d   :  { %v2133_v22 = vpop.f32.mrf.mxu0 }
 0x46f   :  { %2867 = vmatpush3.bf16.msra.mxu1 %v2028_v4  ;;  %v2877_v38 = vpop.f32.mrf.mxu0 }
 0x470   :  { %v2149_v39 = vpack.c.bf16 %v2877_v38, %v2876_v21 }
 0x471   :  { %v2136_v40 = vpop.f32.mrf.mxu0 }
 0x472   :  { %v2148_v41 = vpack.c.bf16 %v2136_v40, %v2133_v22  ;;  %2869 = vmatmul.mubr.msk.bf16.vlgmr.msra.gmra.mxu1 %vm209_vm2, %v2954_v36  ;;  %2878 = vmatprep.subr.bf16.mxu1 %v2149_v39  ;;  %v2961_v40 = vld [vmem:[%s3420_s0 + $0x8] sm:$0xff]  }
 0x473   :  { %2879 = vmatpush3.bf16.msra.mxu1 %v2149_v39  ;;  %v2890_v42 = vpop.f32.mrf.mxu0  ;;  %2882 = vmatprep.mubr.msk.bf16.mxu1 %vm209_vm2, %v2955_v37 }
 0x474   :  { %2880 = vmatprep.subr.bf16.mxu1 %v2148_v41 }
 0x475   :  { %v2253_v43 = vpop.f32.mrf.mxu0 }
 0x477   :  { %2881 = vmatpush3.bf16.msra.mxu1 %v2148_v41  ;;  %v2891_v45 = vpop.f32.mrf.mxu0  ;;  %v2369_v41 = vunpack.c.l.bf16 %v2961_v40 }
 0x478   :  { %v2269_v51 = vpack.c.bf16 %v2891_v45, %v2890_v42 }
 0x479   :  { %v2256_v52 = vpop.f32.mrf.mxu0 }
 0x47a   :  { %v2268_v53 = vpack.c.bf16 %v2256_v52, %v2253_v43  ;;  %2883 = vmatmul.mubr.msk.bf16.vlgmr.msra.gmra.mxu1 %vm209_vm2, %v2956_v44  ;;  %2892 = vmatprep.subr.bf16.mxu1 %v2269_v51  ;;  %v2962_v52 = vld [vmem:[%s3420_s0] sm:$0xff]  }
 0x47b   :  { %2893 = vmatpush3.bf16.msra.mxu1 %v2269_v51  ;;  %2896 = vmatprep.mubr.msk.bf16.mxu1 %vm209_vm2, %v2957_v50  ;;  %v2356_v50 = vpop.permute.xlu0 %2355 }
 0x47c   :  { %2894 = vmatprep.subr.bf16.mxu1 %v2268_v53 }
 0x47f   :  { %2895 = vmatpush3.bf16.msra.mxu1 %v2268_v53  ;;  %v2367_v53 = vunpack.c.l.bf16 %v2962_v52 }
 0x482   :  { %2897 = vmatmul.mubr.msk.bf16.vlgmr.msra.gmra.mxu1 %vm209_vm2, %v2958_v46 }
 0x512   :  { %v2814_v20 = vpop.f32.mrf.mxu1 }
 0x513   :  { %v1617_v3 = vadd.f32 %v2814_v20, %v1493_v63  ;;  %v2370_v20 = vunpack.c.h.bf16 %v2961_v40 }
 0x514   :  { %v1600_v27 = vpop.f32.mrf.mxu1 }
 0x515   :  { %v1615_v7 = vadd.f32 %v1600_v27, %v1485_v2 }
 0x516   :  { %v2815_v28 = vpop.f32.mrf.mxu1 }
 0x517   :  { %v1618_v11 = vadd.f32 %v2815_v28, %v1496_v6 }
 0x518   :  { %v1603_v29 = vpop.f32.mrf.mxu1 }
 0x519   :  { %v1616_v1 = vadd.f32 %v1603_v29, %v1488_v10 }
 0x51a   :  { %v2828_v30 = vpop.f32.mrf.mxu1 }
 0x51b   :  { %v1737_v8 = vadd.f32 %v2828_v30, %v1617_v3 }
 0x51c   :  { %v1720_v31 = vpop.f32.mrf.mxu1 }
 0x51d   :  { %v1735_v12 = vadd.f32 %v1720_v31, %v1615_v7  ;;  %v2361_v31 = vpop.permute.xlu1 %2360 }
 0x51e   :  { %v2829_v32 = vpop.f32.mrf.mxu1 }
 0x51f   :  { %v1738_v15 = vadd.f32 %v2829_v32, %v1618_v11 }
 0x520   :  { %v1723_v33 = vpop.f32.mrf.mxu1 }
 0x521   :  { %v1736_v24 = vadd.f32 %v1723_v33, %v1616_v1  ;;  %v2368_v33 = vunpack.c.h.bf16 %v2962_v52 }
 0x522   :  { %v2842_v34 = vpop.f32.mrf.mxu1 }
 0x523   :  { %v1857_v13 = vadd.f32 %v2842_v34, %v1737_v8 }
 0x524   :  { %v1840_v35 = vpop.f32.mrf.mxu1 }
 0x525   :  { %v1855_v16 = vadd.f32 %v1840_v35, %v1735_v12 }
 0x526   :  { %v2843_v57 = vpop.f32.mrf.mxu1 }
 0x527   :  { %v1858_v19 = vadd.f32 %v2843_v57, %v1738_v15 }
 0x528   :  { %v1843_v58 = vpop.f32.mrf.mxu1 }
 0x529   :  { %v1856_v22 = vadd.f32 %v1843_v58, %v1736_v24 }
 0x52a   :  { %v2856_v48 = vpop.f32.mrf.mxu1 }
 0x52b   :  { %v1977_v23 = vadd.f32 %v2856_v48, %v1857_v13 }
 0x52c   :  { %v1960_v59 = vpop.f32.mrf.mxu1 }
 0x52d   :  { %v1975_v4 = vadd.f32 %v1960_v59, %v1855_v16 }
 0x52e   :  { %v2857_v60 = vpop.f32.mrf.mxu1 }
 0x52f   :  { %v1978_v36 = vadd.f32 %v2857_v60, %v1858_v19 }
 0x530   :  { %v1963_v61 = vpop.f32.mrf.mxu1 }
 0x531   :  { %v1976_v42 = vadd.f32 %v1963_v61, %v1856_v22 }
 0x532   :  { %v2870_v62 = vpop.f32.mrf.mxu1 }
 0x533   :  { %v2097_v21 = vadd.f32 %v2870_v62, %v1977_v23 }
 0x534   :  { %v2080_v49 = vpop.f32.mrf.mxu1 }
 0x535   :  { %v2095_v38 = vadd.f32 %v2080_v49, %v1975_v4 }
 0x536   :  { %v2871_v0 = vpop.f32.mrf.mxu1 }
 0x537   :  { %v2098_v43 = vadd.f32 %v2871_v0, %v1978_v36 }
 0x538   :  { %v2083_v5 = vpop.f32.mrf.mxu1 }
 0x539   :  { %v2096_v46 = vadd.f32 %v2083_v5, %v1976_v42 }
 0x53a   :  { %v2884_v9 = vpop.f32.mrf.mxu1 }
 0x53b   :  { %v2217_v37 = vadd.f32 %v2884_v9, %v2097_v21 }
 0x53c   :  { %v2200_v14 = vpop.f32.mrf.mxu1 }
 0x53d   :  { %v2215_v44 = vadd.f32 %v2200_v14, %v2095_v38 }
 0x53e   :  { %v2885_v18 = vpop.f32.mrf.mxu1 }
 0x53f   :  { %v2218_v54 = vadd.f32 %v2885_v18, %v2098_v43 }
 0x540   :  { %v2203_v25 = vpop.f32.mrf.mxu1 }
 0x541   :  { %v2216_v27 = vadd.f32 %v2203_v25, %v2096_v46 }
 0x542   :  { %v2898_v39 = vpop.f32.mrf.mxu1 }
 0x543   :  { %v2337_v45 = vadd.f32 %v2898_v39, %v2217_v37 }
 0x544   :  { %v2320_v51 = vpop.f32.mrf.mxu1 }
 0x545   :  { %v2365_v55 = vadd.f32 %v2356_v50, %v2337_v45  ;;  %v2335_v47 = vadd.f32 %v2320_v51, %v2215_v44 }
 0x546   :  { %v2899_v56 = vpop.f32.mrf.mxu1 }
 0x547   :  { %v2373_v28 = vadd.f32 %v2369_v41, %v2365_v55  ;;  %v2363_v29 = vadd.f32 %v2346_v17, %v2335_v47  ;;  %v2338_v30 = vadd.f32 %v2899_v56, %v2218_v54 }
 0x548   :  { %v2323_v32 = vpop.f32.mrf.mxu1 }
 0x549   :  { %v2377_v34 = vmax.f32 %v2373_v28, 0.0  ;;  %v2371_v35 = vadd.f32 %v2367_v53, %v2363_v29  ;;  %v2366_v57 = vadd.f32 %v2361_v31, %v2338_v30  ;;  %v2336_v58 = vadd.f32 %v2323_v32, %v2216_v27 }
 0x54b   :  { %v2520_v48 = vpack.c.bf16 %v2377_v34, %v2377_v34  ;;  %v2375_v59 = vmax.f32 %v2371_v35, 0.0  ;;  %v2374_v60 = vadd.f32 %v2370_v20, %v2366_v57  ;;  %v2364_v61 = vadd.f32 %v2351_v26, %v2336_v58 }
 0x54d   :  { %2398 = vst.msk [vmem:[%s3425_s6 + $0x8] sm:$0xf] %vm2395_vm3, %v2520_v48  ;;  %v2518_v62 = vpack.c.bf16 %v2375_v59, %v2375_v59  ;;  %v2378_v49 = vmax.f32 %v2374_v60, 0.0  ;;  %v2372_v63 = vadd.f32 %v2368_v33, %v2364_v61 }
 0x54f   :  { %2396 = vst.msk [vmem:[%s3425_s6] sm:$0xf] %vm2395_vm3, %v2518_v62  ;;  %v2521_v0 = vpack.c.bf16 %v2378_v49, %v2378_v49  ;;  %v2376_v2 = vmax.f32 %v2372_v63, 0.0 }
 0x551   :  { %2399 = vst.msk [vmem:[%s3425_s6 + $0xc] sm:$0xf] %vm2395_vm3, %v2521_v0  ;;  %v2519_v3 = vpack.c.bf16 %v2376_v2, %v2376_v2 }
 0x553   :  { %2397 = vst.msk [vmem:[%s3425_s6 + $0x4] sm:$0xf] %vm2395_vm3, %v2519_v3 }

// kernel: resnet_forward.21
= control target key start
LH: loop header
LB: loop body
LE: loop exit
PB: predicated region body
PF: predicated region fallthrough
CT: control target
= control target key end

     0   :  { %v640_v1 = vmov 0   ;;  %vm283_vm0 = vcmask 261120   ;;  %vm466_vm1 = vcmask 11264   ;;  %s811_s1 = inlined_call_operand.vmem [shape: bf16[288,2], index: 1, kind: input, shape index: {}]   ;;  %s812_s0 = inlined_call_operand.vmem [shape: bf16[64,288], index: 0, kind: input, shape index: {}]   ;;  %s813_s2 = inlined_call_operand.vmem [shape: f32[64,1], index: 2, kind: input, shape index: {}]   ;;  %s814_s3 = inlined_call_operand.vmem [shape: bf16[64,2], index: 3, kind: output, shape index: {}]  }
   0x1   :  { %v606_v0 = vld [vmem:[%s811_s1 + $0x78] sm:$0xff]   ;;  %604 = vset.pattern.permute.xlu0 %v640_v1  ;;  %605 = vset.pattern.permute.xlu1 %v640_v1  ;;  %v608_v3 = vld [vmem:[%s811_s1 + $0x70] sm:$0xff]   ;;  %v610_v5 = vld [vmem:[%s811_s1 + $0x68] sm:$0xff]  }
   0x2   :  { %v607_v2 = vld [vmem:[%s811_s1 + $0x38] sm:$0xff]   ;;  %529 = vmatprep.subr.bf16.mxu0 %v606_v0  ;;  %587 = vmatprep.subr.bf16.mxu1 %v606_v0  ;;  %v609_v4 = vld [vmem:[%s811_s1 + $0x30] sm:$0xff]   ;;  %v611_v6 = vld [vmem:[%s811_s1 + $0x28] sm:$0xff]  }
   0x3   :  { %530 = vmatpush3.bf16.msra.mxu0 %v607_v2  ;;  %595 = vmatpush3.bf16.msra.mxu1 %v607_v2  ;;  %v612_v7 = vld [vmem:[%s811_s1 + $0x60] sm:$0xff]   ;;  %v614_v9 = vld [vmem:[%s811_s1 + $0x58] sm:$0xff]   ;;  %v616_v11 = vld [vmem:[%s811_s1 + $0x50] sm:$0xff]  }
   0x4   :  { %531 = vmatprep.subr.bf16.mxu0 %v608_v3  ;;  %588 = vmatprep.subr.bf16.mxu1 %v608_v3  ;;  %v613_v8 = vld [vmem:[%s811_s1 + $0x20] sm:$0xff]   ;;  %v615_v10 = vld [vmem:[%s811_s1 + $0x18] sm:$0xff]   ;;  %v617_v14 = vld [vmem:[%s811_s1 + $0x10] sm:$0xff]  }
   0x5   :  { %v624_v12 = vld [vmem:[%s812_s0 + $0x4] ss:$12 sps:$4 sm:$0xff]   ;;  %v627_v13 = vld [vmem:[%s812_s0 + $0x4c] ss:$12 sps:$4 sm:$0xff]   ;;  %v625_v23 = vld [vmem:[%s812_s0 + $0x48] ss:$12 sps:$4 sm:$0xff]  }
   0x6   :  { %v618_v15 = vld [vmem:[%s811_s1 + $0x48] sm:$0xff]   ;;  %328 = vmatprep.mubr.bf16.mxu0 %v624_v12  ;;  %352 = vmatprep.mubr.bf16.mxu1 %v627_v13  ;;  %v620_v17 = vld [vmem:[%s811_s1 + $0x40] sm:$0xff]   ;;  %v69_v20 = vld [vmem:[%s813_s2 + $0x10] sm:$0xff] }
   0x7   :  { %532 = vmatpush3.bf16.msra.mxu0 %v609_v4  ;;  %596 = vmatpush3.bf16.msra.mxu1 %v609_v4  ;;  %v619_v16 = vld [vmem:[%s811_s1 + $0x8] sm:$0xff]   ;;  %v621_v18 = vld [vmem:[%s811_s1] sm:$0xff]   ;;  %v70_v25 = vld [vmem:[%s813_s2 + $0x18] sm:$0xff] }
   0x8   :  { %533 = vmatprep.subr.bf16.mxu0 %v610_v5  ;;  %589 = vmatprep.subr.bf16.mxu1 %v610_v5  ;;  %v67_v19 = vld [vmem:[%s813_s2] sm:$0xff]  ;;  %v628_v21 = vld [vmem:[%s811_s1 + $0x88] sm:$0xff]   ;;  %v73_v33 = vld [vmem:[%s813_s2 + $0x30] sm:$0xff] }
   0x9   :  { %v622_v22 = vld [vmem:[%s812_s0] ss:$12 sps:$4 sm:$0xff]   ;;  %77 = vperm.xlu0 %604, %v67_v19   ;;  %87 = vperm.xlu1 %605, %v69_v20   ;;  %v630_v26 = vld [vmem:[%s812_s0 + $0x1c] ss:$12 sps:$4 sm:$0xff]   ;;  %v633_v31 = vld [vmem:[%s812_s0 + $0x18] ss:$12 sps:$4 sm:$0xff]  }
   0xa   :  { %v68_v24 = vld [vmem:[%s813_s2 + $0x8] sm:$0xff]  ;;  %v629_v27 = vld [vmem:[%s811_s1 + $0x80] sm:$0xff]   ;;  %v74_v34 = vld [vmem:[%s813_s2 + $0x38] sm:$0xff] }
   0xb   :  { %534 = vmatpush3.bf16.msra.mxu0 %v611_v6  ;;  %597 = vmatpush3.bf16.msra.mxu1 %v611_v6  ;;  %v632_v28 = vld [vmem:[%s812_s0 + $0x8] ss:$12 sps:$4 sm:$0xff]   ;;  %v71_v29 = vld [vmem:[%s813_s2 + $0x20] sm:$0xff]  ;;  %v638_v37 = vld [vmem:[%s812_s0 + $0x30] ss:$12 sps:$4 sm:$0xff]  }
   0xc   :  { %535 = vmatprep.subr.bf16.mxu0 %v612_v7  ;;  %590 = vmatprep.subr.bf16.mxu1 %v612_v7  ;;  %v72_v30 = vld [vmem:[%s813_s2 + $0x28] sm:$0xff]  ;;  %v635_v35 = vld [vmem:[%s812_s0 + $0x34] ss:$12 sps:$4 sm:$0xff]   ;;  %v637_v36 = vld [vmem:[%s812_s0 + $0x38] ss:$12 sps:$4 sm:$0xff]  }
   0xd   :  { %82 = vperm.xlu0 %604, %v68_v24   ;;  %92 = vperm.xlu1 %605, %v70_v25   ;;  %v634_v32 = vld [vmem:[%s812_s0 + $0x20] ss:$12 sps:$4 sm:$0xff]   ;;  %v639_v38 = vld [vmem:[%s812_s0 + $0x50] ss:$12 sps:$4 sm:$0xff]  }
   0xf   :  { %536 = vmatpush3.bf16.msra.mxu0 %v613_v8  ;;  %598 = vmatpush3.bf16.msra.mxu1 %v613_v8 }
  0x10   :  { %537 = vmatprep.subr.bf16.mxu0 %v614_v9  ;;  %591 = vmatprep.subr.bf16.mxu1 %v614_v9 }
  0x11   :  { %97 = vperm.xlu0 %604, %v71_v29   ;;  %102 = vperm.xlu1 %605, %v72_v30  }
  0x13   :  { %538 = vmatpush3.bf16.msra.mxu0 %v615_v10  ;;  %599 = vmatpush3.bf16.msra.mxu1 %v615_v10 }
  0x14   :  { %539 = vmatprep.subr.bf16.mxu0 %v616_v11  ;;  %592 = vmatprep.subr.bf16.mxu1 %v616_v11 }
  0x15   :  { %107 = vperm.xlu0 %604, %v73_v33   ;;  %112 = vperm.xlu1 %605, %v74_v34  }
  0x17   :  { %540 = vmatpush3.bf16.msra.mxu0 %v617_v14  ;;  %600 = vmatpush3.bf16.msra.mxu1 %v617_v14 }
  0x18   :  { %541 = vmatprep.subr.bf16.mxu0 %v618_v15  ;;  %593 = vmatprep.subr.bf16.mxu1 %v618_v15 }
  0x1b   :  { %542 = vmatpush3.bf16.msra.mxu0 %v619_v16  ;;  %601 = vmatpush3.bf16.msra.mxu1 %v619_v16 }
  0x1c   :  { %543 = vmatprep.subr.bf16.mxu0 %v620_v17  ;;  %594 = vmatprep.subr.bf16.mxu1 %v620_v17 }
  0x1f   :  { %544 = vmatpush3.bf16.msra.mxu0 %v621_v18  ;;  %602 = vmatpush3.bf16.msra.mxu1 %v621_v18 }
  0x20   :  { %575 = vmatprep.subr.bf16.mxu1 %v628_v21 }
  0x22   :  { %329 = vmatmul.mubr.bf16.vlgmr.msra.gmra.mxu0 %v622_v22  ;;  %353 = vmatmul.mubr.bf16.vlgmr.msra.gmra.mxu1 %v625_v23 }
  0x23   :  { %576 = vmatpush3.bf16.msra.mxu1 %v628_v21  ;;  %336 = vmatprep.mubr.bf16.mxu0 %v630_v26 }
  0x24   :  { %577 = vmatprep.subr.bf16.mxu1 %v629_v27  ;;  %579 = vmatprep.mubr.msk.bf16.mxu1 %vm283_vm0, %v632_v28 }
  0x27   :  { %578 = vmatpush3.bf16.msra.mxu1 %v629_v27 }
  0x2a   :  { %337 = vmatmul.mubr.bf16.gmra.mxu0 %v633_v31  ;;  %580 = vmatmul.mubr.msk.bf16.vlgmr.msra.gmra.mxu1 %vm283_vm0, %v634_v32 }
  0x2b   :  { %344 = vmatprep.mubr.bf16.mxu0 %v635_v35  ;;  %583 = vmatprep.mubr.msk.bf16.mxu1 %vm283_vm0, %v637_v36 }
  0x32   :  { %345 = vmatmul.mubr.bf16.gmra.mxu0 %v638_v37  ;;  %584 = vmatmul.mubr.msk.bf16.gmra.mxu1 %vm283_vm0, %v639_v38 }
  0x84   :  { %v78_v39 = vpop.permute.xlu0 %77  ;;  %v88_v40 = vpop.permute.xlu1 %87 }
  0x88   :  { %v83_v41 = vpop.permute.xlu0 %82  ;;  %v93_v46 = vpop.permute.xlu1 %92 }
  0x8c   :  { %v98_v49 = vpop.permute.xlu0 %97  ;;  %v103_v55 = vpop.permute.xlu1 %102 }
  0x90   :  { %v108_v61 = vpop.permute.xlu0 %107  ;;  %v113_v9 = vpop.permute.xlu1 %112 }
  0xe2   :  { %v545_v42 = vpop.f32.mrf.mxu0  ;;  %v563_v43 = vpop.f32.mrf.mxu1 }
  0xe4   :  { %v546_v44 = vpop.f32.mrf.mxu0  ;;  %v564_v45 = vpop.f32.mrf.mxu1 }
  0xe5   :  { %v547_v50 = vadd.f32 %v546_v44, %v545_v42  ;;  %v565_v58 = vadd.f32 %v564_v45, %v563_v43 }
  0xe6   :  { %v548_v47 = vpop.f32.mrf.mxu0  ;;  %v566_v48 = vpop.f32.mrf.mxu1 }
  0xe7   :  { %v331_v57 = vadd.f32 %v547_v50, %v78_v39  ;;  %v355_v5 = vadd.f32 %v565_v58, %v108_v61 }
  0xe8   :  { %v549_v51 = vpop.f32.mrf.mxu0  ;;  %v567_v52 = vpop.f32.mrf.mxu1 }
  0xe9   :  { %v550_v56 = vadd.f32 %v549_v51, %v548_v47  ;;  %v568_v6 = vadd.f32 %v567_v52, %v566_v48 }
  0xea   :  { %v551_v53 = vpop.f32.mrf.mxu0  ;;  %v581_v54 = vpop.f32.mrf.mxu1 }
  0xeb   :  { %v334_v4 = vadd.f32 %v550_v56, %v83_v41  ;;  %v358_v20 = vadd.f32 %v568_v6, %v113_v9 }
  0xec   :  { %v552_v59 = vpop.f32.mrf.mxu0  ;;  %v395_v60 = vpop.f32.mrf.mxu1 }
  0xed   :  { %v553_v62 = vadd.f32 %v552_v59, %v551_v53  ;;  %v396_v63 = vadd.f32 %v395_v60, %v331_v57 }
  0xee   :  { %v554_v0 = vpop.f32.mrf.mxu0  ;;  %v582_v1 = vpop.f32.mrf.mxu1 }
  0xef   :  { %v339_v2 = vadd.f32 %v553_v62, %v88_v40  ;;  %v426_v3 = vmax.f32 %v396_v63, 0.0 }
  0xf0   :  { %v555_v7 = vpop.f32.mrf.mxu0  ;;  %v398_v8 = vpop.f32.mrf.mxu1 }
  0xf1   :  { %v404_v10 = vadd.f32 %v581_v54, %v339_v2  ;;  %v521_v11 = vpack.c.bf16 %v426_v3, %v426_v3  ;;  %v556_v12 = vadd.f32 %v555_v7, %v554_v0  ;;  %v399_v13 = vadd.f32 %v398_v8, %v334_v4 }
  0xf2   :  { %v557_v14 = vpop.f32.mrf.mxu0  ;;  %v585_v15 = vpop.f32.mrf.mxu1 }
  0xf3   :  { %v428_v16 = vmax.f32 %v404_v10, 0.0  ;;  %467 = vst.msk [vmem:[%s814_s3] sm:$0xf] %vm466_vm1, %v521_v11  ;;  %v342_v17 = vadd.f32 %v556_v12, %v93_v46  ;;  %v427_v18 = vmax.f32 %v399_v13, 0.0  ;;  %v420_v19 = vadd.f32 %v585_v15, %v355_v5 }
  0xf4   :  { %v558_v21 = vpop.f32.mrf.mxu0  ;;  %v411_v22 = vpop.f32.mrf.mxu1 }
  0xf5   :  { %v523_v23 = vpack.c.bf16 %v428_v16, %v428_v16  ;;  %v407_v24 = vadd.f32 %v582_v1, %v342_v17  ;;  %v522_v25 = vpack.c.bf16 %v427_v18, %v427_v18  ;;  %v432_v26 = vmax.f32 %v420_v19, 0.0 }
  0xf6   :  { %v559_v27 = vadd.f32 %v558_v21, %v557_v14  ;;  %v560_v28 = vpop.f32.mrf.mxu0  ;;  %v586_v29 = vpop.f32.mrf.mxu1 }
  0xf7   :  { %469 = vst.msk [vmem:[%s814_s3 + $0x8] sm:$0xf] %vm466_vm1, %v523_v23  ;;  %v429_v30 = vmax.f32 %v407_v24, 0.0  ;;  %468 = vst.msk [vmem:[%s814_s3 + $0x4] sm:$0xf] %vm466_vm1, %v522_v25  ;;  %v527_v31 = vpack.c.bf16 %v432_v26, %v432_v26  ;;  %v423_v32 = vadd.f32 %v586_v29, %v358_v20 }
  0xf8   :  { %v347_v33 = vadd.f32 %v559_v27, %v98_v49  ;;  %v561_v34 = vpop.f32.mrf.mxu0  ;;  %v414_v42 = vpop.f32.mrf.mxu1 }
  0xf9   :  { %v524_v35 = vpack.c.bf16 %v429_v30, %v429_v30  ;;  %473 = vst.msk [vmem:[%s814_s3 + $0x18] sm:$0xf] %vm466_vm1, %v527_v31  ;;  %v433_v36 = vmax.f32 %v423_v32, 0.0  ;;  %v562_v37 = vadd.f32 %v561_v34, %v560_v28 }
  0xfa   :  { %v412_v38 = vadd.f32 %v411_v22, %v347_v33 }
  0xfb   :  { %470 = vst.msk [vmem:[%s814_s3 + $0xc] sm:$0xf] %vm466_vm1, %v524_v35  ;;  %v528_v39 = vpack.c.bf16 %v433_v36, %v433_v36  ;;  %v350_v40 = vadd.f32 %v562_v37, %v103_v55 }
  0xfc   :  { %v430_v41 = vmax.f32 %v412_v38, 0.0 }
  0xfd   :  { %474 = vst.msk [vmem:[%s814_s3 + $0x1c] sm:$0xf] %vm466_vm1, %v528_v39  ;;  %v415_v43 = vadd.f32 %v414_v42, %v350_v40 }
  0xfe   :  { %v525_v44 = vpack.c.bf16 %v430_v41, %v430_v41 }
  0xff   :  { %v431_v45 = vmax.f32 %v415_v43, 0.0 }
 0x100   :  { %471 = vst.msk [vmem:[%s814_s3 + $0x10] sm:$0xf] %vm466_vm1, %v525_v44 }
 0x101   :  { %v526_v46 = vpack.c.bf16 %v431_v45, %v431_v45 }
 0x103   :  { %472 = vst.msk [vmem:[%s814_s3 + $0x14] sm:$0xf] %vm466_vm1, %v526_v46 }

// kernel: resnet_forward.22
= control target key start
LH: loop header
LB: loop body
LE: loop exit
PB: predicated region body
PF: predicated region fallthrough
CT: control target
= control target key end

     0   :  { %vm74_vm0 = vcmask 1040384   ;;  %vm61_vm1 = vcmask 15360   ;;  %vm337_vm2 = vcmask 261120   ;;  %vm215_vm3 = vcmask 523264   ;;  %s734_s5 = inlined_call_operand.vmem [shape: bf16[9,2,2], index: 5, kind: input, shape index: {}]   ;;  %s735_s0 = inlined_call_operand.vmem [shape: bf16[64,2], index: 0, kind: input, shape index: {}]   ;;  %s736_s4 = inlined_call_operand.vmem [shape: bf16[32,2], index: 4, kind: input, shape index: {}]   ;;  %s737_s3 = inlined_call_operand.vmem [shape: bf16[64,32], index: 3, kind: input, shape index: {}]   ;;  %s738_s1 = inlined_call_operand.vmem [shape: bf16[9,64,64], index: 1, kind: input, shape index: {}]   ;;  %s739_s2 = inlined_call_operand.vmem [shape: f32[64,1], index: 2, kind: input, shape index: {}]   ;;  %s740_s6 = inlined_call_operand.vmem [shape: bf16[64,2], index: 6, kind: output, shape index: {}]  }
   0x1   :  { %v40_v0 = vld [vmem:[%s734_s5 + $0x4] sm:$0x1]  ;;  %v580_v3 = vld [vmem:[%s735_s0 + $0x8] sm:$0xff]   ;;  %v581_v4 = vld [vmem:[%s735_s0 + $0x10] sm:$0xff]   ;;  %v593_v13 = vmov 0   ;;  %vm463_vm4 = vcmask 11264  }
   0x2   :  { %575 = vmatprep.subr.msk.bf16.mxu0 %vm74_vm0, %v40_v0  ;;  %v76_v1 = vsel %vm74_vm0, %v40_v0, 0  ;;  %v579_v2 = vld [vmem:[%s735_s0] sm:$0xff]   ;;  %v582_v5 = vld [vmem:[%s735_s0 + $0x18] sm:$0xff]   ;;  %v583_v6 = vld [vmem:[%s736_s4 + $0x8] sm:$0xff]   ;;  %578 = vset.pattern.permute.xlu1 %v593_v13 }
   0x3   :  { %538 = vmatpush3.bf16.msra.mxu0 %v76_v1  ;;  %539 = vmatprep.mubr.msk.bf16.mxu0 %vm61_vm1, %v579_v2  ;;  %v584_v7 = vld [vmem:[%s736_s4] sm:$0xff]   ;;  %v586_v9 = vld [vmem:[%s737_s3 + $0x8] sm:$0xff]   ;;  %v589_v11 = vld [vmem:[%s737_s3 + $0x10] sm:$0xff]  }
   0x4   :  { %563 = vmatprep.subr.bf16.mxu0 %v583_v6  ;;  %v585_v8 = vld [vmem:[%s737_s3] sm:$0xff]   ;;  %v590_v12 = vld [vmem:[%s737_s3 + $0x18] sm:$0xff]   ;;  %577 = vset.pattern.permute.xlu0 %v593_v13  ;;  %v149_v14 = vld [vmem:[%s739_s2 + $0x10] sm:$0xff] }
   0x5   :  { %v587_v10 = vld [vmem:[%s738_s1 + $0x80] sm:$0xff]   ;;  %167 = vperm.xlu1 %578, %v149_v14   ;;  %v150_v16 = vld [vmem:[%s739_s2 + $0x18] sm:$0xff]  ;;  %v148_v17 = vld [vmem:[%s739_s2 + $0x8] sm:$0xff] }
   0x6   :  { %540 = vmatmul.mubr.msk.bf16.vlgmr.msra.gmra.mxu0 %vm61_vm1, %v580_v3  ;;  %555 = vmatprep.mubr.msk.bf16.mxu1 %vm215_vm3, %v587_v10  ;;  %v147_v15 = vld [vmem:[%s739_s2] sm:$0xff]  ;;  %v152_v18 = vld [vmem:[%s739_s2 + $0x28] sm:$0xff]  ;;  %v154_v20 = vld [vmem:[%s739_s2 + $0x38] sm:$0xff] }
   0x7   :  { %543 = vmatprep.mubr.msk.bf16.mxu0 %vm61_vm1, %v581_v4  ;;  %564 = vmatpush3.bf16.msra.mxu0 %v583_v6  ;;  %v151_v19 = vld [vmem:[%s739_s2 + $0x20] sm:$0xff]  ;;  %v153_v21 = vld [vmem:[%s739_s2 + $0x30] sm:$0xff]  ;;  %v588_v34 = vld [vmem:[%s738_s1 + $0x88] sm:$0xff]  }
   0x8   :  { %565 = vmatprep.subr.bf16.mxu0 %v584_v7  ;;  %157 = vperm.xlu0 %577, %v147_v15   ;;  %v591_v35 = vld [vmem:[%s738_s1 + $0x90] sm:$0xff]   ;;  %v592_v36 = vld [vmem:[%s738_s1 + $0x98] sm:$0xff]  }
   0x9   :  { %172 = vperm.xlu1 %578, %v150_v16  }
   0xb   :  { %566 = vmatpush3.bf16.msra.mxu0 %v584_v7 }
   0xc   :  { %162 = vperm.xlu0 %577, %v148_v17  }
   0xd   :  { %182 = vperm.xlu1 %578, %v152_v18  }
   0xe   :  { %544 = vmatmul.mubr.msk.bf16.gmra.mxu0 %vm61_vm1, %v582_v5 }
   0xf   :  { %567 = vmatprep.mubr.msk.bf16.mxu0 %vm337_vm2, %v585_v8 }
  0x10   :  { %177 = vperm.xlu0 %577, %v151_v19  }
  0x11   :  { %192 = vperm.xlu1 %578, %v154_v20  }
  0x14   :  { %187 = vperm.xlu0 %577, %v153_v21  }
  0x16   :  { %568 = vmatmul.mubr.msk.bf16.vlgmr.msra.gmra.mxu0 %vm337_vm2, %v586_v9 }
  0x17   :  { %571 = vmatprep.mubr.msk.bf16.mxu0 %vm337_vm2, %v589_v11 }
  0x1e   :  { %572 = vmatmul.mubr.msk.bf16.gmra.mxu0 %vm337_vm2, %v590_v12 }
  0x80   :  { %v168_v40 = vpop.permute.xlu1 %167 }
  0x83   :  { %v158_v38 = vpop.permute.xlu0 %157 }
  0x84   :  { %v173_v43 = vpop.permute.xlu1 %172 }
  0x87   :  { %v163_v41 = vpop.permute.xlu0 %162 }
  0x88   :  { %v183_v53 = vpop.permute.xlu1 %182 }
  0x8b   :  { %v178_v46 = vpop.permute.xlu0 %177 }
  0x8c   :  { %v193_v6 = vpop.permute.xlu1 %192 }
  0x8f   :  { %v188_v59 = vpop.permute.xlu0 %187 }
  0xc6   :  { %v541_v22 = vpop.f32.mrf.mxu0 }
  0xc8   :  { %v112_v23 = vpop.f32.mrf.mxu0 }
  0xca   :  { %v542_v24 = vpop.f32.mrf.mxu0 }
  0xcb   :  { %v144_v32 = vpack.c.bf16 %v542_v24, %v541_v22 }
  0xcc   :  { %v115_v25 = vpop.f32.mrf.mxu0 }
  0xcd   :  { %v143_v33 = vpack.c.bf16 %v115_v25, %v112_v23 }
  0xce   :  { %v545_v26 = vpop.f32.mrf.mxu0 }
  0xd0   :  { %v128_v27 = vpop.f32.mrf.mxu0 }
  0xd2   :  { %v546_v28 = vpop.f32.mrf.mxu0 }
  0xd3   :  { %v146_v29 = vpack.c.bf16 %v546_v28, %v545_v26 }
  0xd4   :  { %v131_v30 = vpop.f32.mrf.mxu0 }
  0xd5   :  { %v145_v31 = vpack.c.bf16 %v131_v30, %v128_v27  ;;  %547 = vmatprep.subr.bf16.mxu1 %v146_v29 }
  0xd6   :  { %548 = vmatpush3.bf16.msra.mxu1 %v146_v29  ;;  %v569_v37 = vpop.f32.mrf.mxu0 }
  0xd7   :  { %549 = vmatprep.subr.bf16.mxu1 %v145_v31 }
  0xd8   :  { %v384_v39 = vpop.f32.mrf.mxu0 }
  0xda   :  { %550 = vmatpush3.bf16.msra.mxu1 %v145_v31  ;;  %v570_v42 = vpop.f32.mrf.mxu0 }
  0xdb   :  { %551 = vmatprep.subr.bf16.mxu1 %v144_v32 }
  0xdc   :  { %v387_v45 = vpop.f32.mrf.mxu0 }
  0xde   :  { %552 = vmatpush3.bf16.msra.mxu1 %v144_v32  ;;  %v573_v52 = vpop.f32.mrf.mxu0 }
  0xdf   :  { %553 = vmatprep.subr.bf16.mxu1 %v143_v33 }
  0xe0   :  { %v400_v63 = vpop.f32.mrf.mxu0 }
  0xe2   :  { %554 = vmatpush3.bf16.msra.mxu1 %v143_v33  ;;  %v574_v11 = vpop.f32.mrf.mxu0 }
  0xe4   :  { %v403_v22 = vpop.f32.mrf.mxu0 }
  0xe5   :  { %556 = vmatmul.mubr.msk.bf16.vlgmr.msra.gmra.mxu1 %vm215_vm3, %v588_v34 }
  0xe6   :  { %559 = vmatprep.mubr.msk.bf16.mxu1 %vm215_vm3, %v591_v35 }
  0xed   :  { %560 = vmatmul.mubr.msk.bf16.gmra.mxu1 %vm215_vm3, %v592_v36 }
 0x1a5   :  { %v557_v44 = vpop.f32.mrf.mxu1 }
 0x1a6   :  { %v271_v47 = vadd.f32 %v557_v44, %v168_v40 }
 0x1a7   :  { %v262_v48 = vpop.f32.mrf.mxu1 }
 0x1a8   :  { %v417_v49 = vadd.f32 %v569_v37, %v271_v47  ;;  %v263_v50 = vadd.f32 %v262_v48, %v158_v38 }
 0x1a9   :  { %v558_v51 = vpop.f32.mrf.mxu1 }
 0x1aa   :  { %v425_v54 = vmax.f32 %v417_v49, 0.0  ;;  %v415_v55 = vadd.f32 %v384_v39, %v263_v50  ;;  %v274_v56 = vadd.f32 %v558_v51, %v173_v43 }
 0x1ab   :  { %v265_v57 = vpop.f32.mrf.mxu1 }
 0x1ac   :  { %v512_v58 = vpack.c.bf16 %v425_v54, %v425_v54  ;;  %v423_v60 = vmax.f32 %v415_v55, 0.0  ;;  %v418_v61 = vadd.f32 %v570_v42, %v274_v56  ;;  %v266_v62 = vadd.f32 %v265_v57, %v163_v41 }
 0x1ad   :  { %v561_v0 = vpop.f32.mrf.mxu1 }
 0x1ae   :  { %466 = vst.msk [vmem:[%s740_s6 + $0x8] sm:$0xf] %vm463_vm4, %v512_v58  ;;  %v510_v1 = vpack.c.bf16 %v423_v60, %v423_v60  ;;  %v426_v2 = vmax.f32 %v418_v61, 0.0  ;;  %v416_v3 = vadd.f32 %v387_v45, %v266_v62  ;;  %v287_v4 = vadd.f32 %v561_v0, %v188_v59 }
 0x1af   :  { %v278_v5 = vpop.f32.mrf.mxu1 }
 0x1b0   :  { %464 = vst.msk [vmem:[%s740_s6] sm:$0xf] %vm463_vm4, %v510_v1  ;;  %v513_v7 = vpack.c.bf16 %v426_v2, %v426_v2  ;;  %v424_v8 = vmax.f32 %v416_v3, 0.0  ;;  %v421_v9 = vadd.f32 %v573_v52, %v287_v4  ;;  %v279_v10 = vadd.f32 %v278_v5, %v178_v46 }
 0x1b1   :  { %v562_v12 = vpop.f32.mrf.mxu1 }
 0x1b2   :  { %467 = vst.msk [vmem:[%s740_s6 + $0xc] sm:$0xf] %vm463_vm4, %v513_v7  ;;  %v511_v13 = vpack.c.bf16 %v424_v8, %v424_v8  ;;  %v429_v14 = vmax.f32 %v421_v9, 0.0  ;;  %v419_v15 = vadd.f32 %v400_v63, %v279_v10  ;;  %v290_v16 = vadd.f32 %v562_v12, %v193_v6 }
 0x1b3   :  { %v281_v17 = vpop.f32.mrf.mxu1 }
 0x1b4   :  { %465 = vst.msk [vmem:[%s740_s6 + $0x4] sm:$0xf] %vm463_vm4, %v511_v13  ;;  %v516_v18 = vpack.c.bf16 %v429_v14, %v429_v14  ;;  %v427_v19 = vmax.f32 %v419_v15, 0.0  ;;  %v422_v20 = vadd.f32 %v574_v11, %v290_v16  ;;  %v282_v21 = vadd.f32 %v281_v17, %v183_v53 }
 0x1b6   :  { %470 = vst.msk [vmem:[%s740_s6 + $0x18] sm:$0xf] %vm463_vm4, %v516_v18  ;;  %v514_v23 = vpack.c.bf16 %v427_v19, %v427_v19  ;;  %v430_v24 = vmax.f32 %v422_v20, 0.0  ;;  %v420_v25 = vadd.f32 %v403_v22, %v282_v21 }
 0x1b8   :  { %468 = vst.msk [vmem:[%s740_s6 + $0x10] sm:$0xf] %vm463_vm4, %v514_v23  ;;  %v517_v26 = vpack.c.bf16 %v430_v24, %v430_v24  ;;  %v428_v27 = vmax.f32 %v420_v25, 0.0 }
 0x1ba   :  { %471 = vst.msk [vmem:[%s740_s6 + $0x1c] sm:$0xf] %vm463_vm4, %v517_v26  ;;  %v515_v28 = vpack.c.bf16 %v428_v27, %v428_v27 }
 0x1bc   :  { %469 = vst.msk [vmem:[%s740_s6 + $0x14] sm:$0xf] %vm463_vm4, %v515_v28 }

// kernel: resnet_forward.23
= control target key start
LH: loop header
LB: loop body
LE: loop exit
PB: predicated region body
PF: predicated region fallthrough
CT: control target
= control target key end

     0   :  { %vm74_vm0 = vcmask 1040384   ;;  %vm61_vm1 = vcmask 15360   ;;  %vm215_vm2 = vcmask 523264   ;;  %v759_v7 = vmov 0   ;;  %s950_s5 = inlined_call_operand.vmem [shape: bf16[9,2,2], index: 5, kind: input, shape index: {}]   ;;  %s951_s0 = inlined_call_operand.vmem [shape: bf16[64,2], index: 0, kind: input, shape index: {}]   ;;  %s952_s1 = inlined_call_operand.vmem [shape: bf16[9,64,64], index: 1, kind: input, shape index: {}]   ;;  %s953_s2 = inlined_call_operand.vmem [shape: f32[64,1], index: 2, kind: input, shape index: {}]   ;;  %s954_s4 = inlined_call_operand.vmem [shape: f32[64,1], index: 4, kind: input, shape index: {}]   ;;  %s955_s3 = inlined_call_operand.vmem [shape: bf16[9,64,64], index: 3, kind: input, shape index: {}]   ;;  %s956_s6 = inlined_call_operand.vmem [shape: bf16[64,2], index: 6, kind: output, shape index: {}]  }
   0x1   :  { %v32_v0 = vld [vmem:[%s950_s5 + $0x4] sm:$0x1]  ;;  %v806_v2 = vld [vmem:[%s951_s0 + $0x8] sm:$0xff]   ;;  %v811_v4 = vld [vmem:[%s951_s0 + $0x10] sm:$0xff]   ;;  %741 = vset.pattern.permute.xlu0 %v759_v7  ;;  %742 = vset.pattern.permute.xlu1 %v759_v7  ;;  %vm595_vm3 = vcmask 11264  }
   0x2   :  { %v801_v1 = vld [vmem:[%s951_s0] sm:$0xff]   ;;  %738 = vmatprep.subr.msk.bf16.mxu0 %vm74_vm0, %v32_v0  ;;  %v76_v3 = vsel %vm74_vm0, %v32_v0, 0  ;;  %v822_v5 = vld [vmem:[%s951_s0 + $0x18] sm:$0xff]   ;;  %v149_v9 = vld [vmem:[%s953_s2 + $0x10] sm:$0xff] }
   0x3   :  { %679 = vmatpush3.bf16.msra.mxu0 %v76_v3  ;;  %680 = vmatprep.mubr.msk.bf16.mxu0 %vm61_vm1, %v801_v1  ;;  %v747_v6 = vld [vmem:[%s952_s1 + $0x80] sm:$0xff]   ;;  %v148_v10 = vld [vmem:[%s953_s2 + $0x8] sm:$0xff]  ;;  %v150_v11 = vld [vmem:[%s953_s2 + $0x18] sm:$0xff] }
   0x4   :  { %739 = vmatprep.subr.msk.bf16.mxu0 %vm74_vm0, %v32_v0  ;;  %696 = vmatprep.mubr.msk.bf16.mxu1 %vm215_vm2, %v747_v6  ;;  %v147_v8 = vld [vmem:[%s953_s2] sm:$0xff]  ;;  %v152_v13 = vld [vmem:[%s953_s2 + $0x28] sm:$0xff]  ;;  %v153_v14 = vld [vmem:[%s953_s2 + $0x30] sm:$0xff] }
   0x5   :  { %157 = vperm.xlu0 %741, %v147_v8   ;;  %167 = vperm.xlu1 %742, %v149_v9   ;;  %v151_v12 = vld [vmem:[%s953_s2 + $0x20] sm:$0xff]  ;;  %v154_v15 = vld [vmem:[%s953_s2 + $0x38] sm:$0xff]  ;;  %v395_v17 = vld [vmem:[%s954_s4 + $0x8] sm:$0xff] }
   0x6   :  { %681 = vmatmul.mubr.msk.bf16.vlgmr.msra.gmra.mxu0 %vm61_vm1, %v806_v2  ;;  %v394_v16 = vld [vmem:[%s954_s4] sm:$0xff]  ;;  %v396_v18 = vld [vmem:[%s954_s4 + $0x10] sm:$0xff]  ;;  %v397_v19 = vld [vmem:[%s954_s4 + $0x18] sm:$0xff] }
   0x7   :  { %684 = vmatprep.mubr.msk.bf16.mxu0 %vm61_vm1, %v811_v4  ;;  %705 = vmatpush3.bf16.msra.mxu0 %v76_v3  ;;  %v398_v20 = vld [vmem:[%s954_s4 + $0x20] sm:$0xff]  ;;  %v399_v21 = vld [vmem:[%s954_s4 + $0x28] sm:$0xff]  ;;  %v400_v22 = vld [vmem:[%s954_s4 + $0x30] sm:$0xff] }
   0x8   :  { %v401_v23 = vld [vmem:[%s954_s4 + $0x38] sm:$0xff]  ;;  %v748_v36 = vld [vmem:[%s952_s1 + $0x88] sm:$0xff]   ;;  %v749_v37 = vld [vmem:[%s952_s1 + $0x90] sm:$0xff]  }
   0x9   :  { %162 = vperm.xlu0 %741, %v148_v10   ;;  %172 = vperm.xlu1 %742, %v150_v11   ;;  %v750_v38 = vld [vmem:[%s952_s1 + $0x98] sm:$0xff]  }
   0xd   :  { %177 = vperm.xlu0 %741, %v151_v12   ;;  %182 = vperm.xlu1 %742, %v152_v13  }
   0xe   :  { %685 = vmatmul.mubr.msk.bf16.gmra.mxu0 %vm61_vm1, %v822_v5 }
  0x11   :  { %187 = vperm.xlu0 %741, %v153_v14   ;;  %192 = vperm.xlu1 %742, %v154_v15   ;;  %v751_v15 = vld [vmem:[%s955_s3 + $0x80] sm:$0xff]  }
  0x15   :  { %404 = vperm.xlu0 %741, %v394_v16   ;;  %409 = vperm.xlu1 %742, %v395_v17   ;;  %v752_v16 = vld [vmem:[%s955_s3 + $0x90] sm:$0xff]  }
  0x19   :  { %414 = vperm.xlu0 %741, %v396_v18   ;;  %419 = vperm.xlu1 %742, %v397_v19  }
  0x1d   :  { %424 = vperm.xlu0 %741, %v398_v20   ;;  %429 = vperm.xlu1 %742, %v399_v21  }
  0x21   :  { %434 = vperm.xlu0 %741, %v400_v22   ;;  %439 = vperm.xlu1 %742, %v401_v23  }
  0x80   :  { %v168_v39 = vpop.permute.xlu1 %167  ;;  %v158_v40 = vpop.permute.xlu0 %157 }
  0x84   :  { %v173_v41 = vpop.permute.xlu1 %172  ;;  %v163_v43 = vpop.permute.xlu0 %162 }
  0x88   :  { %v183_v48 = vpop.permute.xlu1 %182  ;;  %v178_v51 = vpop.permute.xlu0 %177 }
  0x8c   :  { %v193_v60 = vpop.permute.xlu1 %192  ;;  %v188_v63 = vpop.permute.xlu0 %187 }
  0xc6   :  { %v682_v24 = vpop.f32.mrf.mxu0 }
  0xc8   :  { %v112_v25 = vpop.f32.mrf.mxu0 }
  0xca   :  { %v683_v26 = vpop.f32.mrf.mxu0 }
  0xcb   :  { %v144_v34 = vpack.c.bf16 %v683_v26, %v682_v24 }
  0xcc   :  { %v115_v27 = vpop.f32.mrf.mxu0 }
  0xcd   :  { %v143_v35 = vpack.c.bf16 %v115_v27, %v112_v25 }
  0xce   :  { %v686_v28 = vpop.f32.mrf.mxu0 }
  0xd0   :  { %v128_v29 = vpop.f32.mrf.mxu0 }
  0xd2   :  { %v687_v30 = vpop.f32.mrf.mxu0 }
  0xd3   :  { %v146_v31 = vpack.c.bf16 %v687_v30, %v686_v28  ;;  %v754_v30 = vld [vmem:[%s955_s3 + $0x98] sm:$0xff]  }
  0xd4   :  { %v131_v32 = vpop.f32.mrf.mxu0 }
  0xd5   :  { %v145_v33 = vpack.c.bf16 %v131_v32, %v128_v29  ;;  %688 = vmatprep.subr.bf16.mxu1 %v146_v31  ;;  %v753_v29 = vld [vmem:[%s955_s3 + $0x88] sm:$0xff]   ;;  %v410_v32 = vpop.permute.xlu1 %409 }
  0xd6   :  { %689 = vmatpush3.bf16.msra.mxu1 %v146_v31  ;;  %v405_v31 = vpop.permute.xlu0 %404 }
  0xd7   :  { %690 = vmatprep.subr.bf16.mxu1 %v145_v33 }
  0xda   :  { %691 = vmatpush3.bf16.msra.mxu1 %v145_v33  ;;  %v415_v33 = vpop.permute.xlu0 %414 }
  0xdb   :  { %692 = vmatprep.subr.bf16.mxu1 %v144_v34 }
  0xde   :  { %693 = vmatpush3.bf16.msra.mxu1 %v144_v34  ;;  %v420_v34 = vpop.permute.xlu1 %419 }
  0xdf   :  { %694 = vmatprep.subr.bf16.mxu1 %v143_v35 }
  0xe2   :  { %695 = vmatpush3.bf16.msra.mxu1 %v143_v35  ;;  %v425_v35 = vpop.permute.xlu0 %424 }
  0xe5   :  { %697 = vmatmul.mubr.msk.bf16.vlgmr.msra.gmra.mxu1 %vm215_vm2, %v748_v36  ;;  %v430_v36 = vpop.permute.xlu1 %429 }
  0xe6   :  { %700 = vmatprep.mubr.msk.bf16.mxu1 %vm215_vm2, %v749_v37  ;;  %v435_v37 = vpop.permute.xlu0 %434 }
  0xed   :  { %701 = vmatmul.mubr.msk.bf16.gmra.mxu1 %vm215_vm2, %v750_v38  ;;  %v541_v38 = vunpack.c.l.bf16 %v806_v2 }
  0xee   :  { %726 = vmatprep.mubr.msk.bf16.mxu1 %vm215_vm2, %v752_v16 }
 0x1a5   :  { %v698_v42 = vpop.f32.mrf.mxu1 }
 0x1a6   :  { %v271_v49 = vadd.f32 %v698_v42, %v168_v39  ;;  %v545_v39 = vunpack.c.l.bf16 %v822_v5  ;;  %v539_v42 = vunpack.c.l.bf16 %v801_v1 }
 0x1a7   :  { %v262_v44 = vpop.f32.mrf.mxu1 }
 0x1a8   :  { %v263_v46 = vadd.f32 %v262_v44, %v158_v40  ;;  %v295_v57 = vmax.f32 %v271_v49, 0.0 }
 0x1a9   :  { %v699_v45 = vpop.f32.mrf.mxu1 }
 0x1aa   :  { %v274_v47 = vadd.f32 %v699_v45, %v173_v41  ;;  %v293_v55 = vmax.f32 %v263_v46, 0.0  ;;  %v543_v45 = vunpack.c.l.bf16 %v811_v4 }
 0x1ab   :  { %v265_v50 = vpop.f32.mrf.mxu1 }
 0x1ac   :  { %v266_v52 = vadd.f32 %v265_v50, %v163_v43  ;;  %v296_v53 = vmax.f32 %v274_v47, 0.0 }
 0x1ad   :  { %v702_v54 = vpop.f32.mrf.mxu1 }
 0x1ae   :  { %v294_v56 = vmax.f32 %v266_v52, 0.0  ;;  %v302_v61 = vpack.c.bf16 %v296_v53, %v295_v57  ;;  %v287_v6 = vadd.f32 %v702_v54, %v188_v63  ;;  %v540_v52 = vunpack.c.h.bf16 %v801_v1  ;;  %v440_v57 = vpop.permute.xlu1 %439 }
 0x1af   :  { %v278_v58 = vpop.f32.mrf.mxu1  ;;  %v542_v54 = vunpack.c.h.bf16 %v806_v2 }
 0x1b0   :  { %v301_v59 = vpack.c.bf16 %v294_v56, %v293_v55  ;;  %v279_v0 = vadd.f32 %v278_v58, %v178_v51  ;;  %v299_v12 = vmax.f32 %v287_v6, 0.0  ;;  %v546_v56 = vunpack.c.h.bf16 %v822_v5 }
 0x1b1   :  { %v703_v62 = vpop.f32.mrf.mxu1  ;;  %v544_v6 = vunpack.c.h.bf16 %v811_v4 }
 0x1b2   :  { %v290_v3 = vadd.f32 %v703_v62, %v193_v60  ;;  %706 = vmatprep.mubr.msk.bf16.mxu0 %vm61_vm1, %v301_v59  ;;  %v297_v10 = vmax.f32 %v279_v0, 0.0 }
 0x1b3   :  { %v281_v7 = vpop.f32.mrf.mxu1  ;;  %707 = vmatmul.mubr.msk.bf16.vlgmr.msra.gmra.mxu0 %vm61_vm1, %v302_v61 }
 0x1b4   :  { %v282_v8 = vadd.f32 %v281_v7, %v183_v48  ;;  %v300_v9 = vmax.f32 %v290_v3, 0.0 }
 0x1b6   :  { %v298_v11 = vmax.f32 %v282_v8, 0.0  ;;  %v304_v14 = vpack.c.bf16 %v300_v9, %v299_v12 }
 0x1b8   :  { %v303_v13 = vpack.c.bf16 %v298_v11, %v297_v10 }
 0x1ba   :  { %710 = vmatprep.mubr.msk.bf16.mxu0 %vm61_vm1, %v303_v13 }
 0x1bb   :  { %711 = vmatmul.mubr.msk.bf16.gmra.mxu0 %vm61_vm1, %v304_v14 }
 0x1bc   :  { %722 = vmatprep.mubr.msk.bf16.mxu0 %vm215_vm2, %v751_v15 }
 0x273   :  { %v708_v17 = vpop.f32.mrf.mxu0 }
 0x275   :  { %v359_v18 = vpop.f32.mrf.mxu0 }
 0x277   :  { %v709_v19 = vpop.f32.mrf.mxu0 }
 0x278   :  { %v391_v27 = vpack.c.bf16 %v709_v19, %v708_v17 }
 0x279   :  { %v362_v20 = vpop.f32.mrf.mxu0 }
 0x27a   :  { %v390_v28 = vpack.c.bf16 %v362_v20, %v359_v18 }
 0x27b   :  { %v712_v21 = vpop.f32.mrf.mxu0 }
 0x27d   :  { %v375_v22 = vpop.f32.mrf.mxu0 }
 0x27f   :  { %v713_v23 = vpop.f32.mrf.mxu0 }
 0x280   :  { %v393_v24 = vpack.c.bf16 %v713_v23, %v712_v21 }
 0x281   :  { %v378_v25 = vpop.f32.mrf.mxu0 }
 0x282   :  { %v392_v26 = vpack.c.bf16 %v378_v25, %v375_v22  ;;  %714 = vmatprep.subr.bf16.mxu0 %v393_v24  ;;  %730 = vmatprep.subr.bf16.mxu1 %v393_v24 }
 0x283   :  { %715 = vmatpush3.bf16.msra.mxu0 %v393_v24  ;;  %734 = vmatpush3.bf16.msra.mxu1 %v393_v24 }
 0x284   :  { %716 = vmatprep.subr.bf16.mxu0 %v392_v26  ;;  %731 = vmatprep.subr.bf16.mxu1 %v392_v26 }
 0x287   :  { %717 = vmatpush3.bf16.msra.mxu0 %v392_v26  ;;  %735 = vmatpush3.bf16.msra.mxu1 %v392_v26 }
 0x288   :  { %718 = vmatprep.subr.bf16.mxu0 %v391_v27  ;;  %732 = vmatprep.subr.bf16.mxu1 %v391_v27 }
 0x28b   :  { %719 = vmatpush3.bf16.msra.mxu0 %v391_v27  ;;  %736 = vmatpush3.bf16.msra.mxu1 %v391_v27 }
 0x28c   :  { %720 = vmatprep.subr.bf16.mxu0 %v390_v28  ;;  %733 = vmatprep.subr.bf16.mxu1 %v390_v28 }
 0x28f   :  { %721 = vmatpush3.bf16.msra.mxu0 %v390_v28  ;;  %737 = vmatpush3.bf16.msra.mxu1 %v390_v28 }
 0x292   :  { %723 = vmatmul.mubr.msk.bf16.vlgmr.msra.gmra.mxu0 %vm215_vm2, %v753_v29  ;;  %727 = vmatmul.mubr.msk.bf16.vlgmr.msra.gmra.mxu1 %vm215_vm2, %v754_v30 }
 0x352   :  { %v724_v40 = vpop.f32.mrf.mxu0  ;;  %v728_v41 = vpop.f32.mrf.mxu1 }
 0x353   :  { %v517_v43 = vadd.f32 %v724_v40, %v415_v33  ;;  %v533_v44 = vadd.f32 %v728_v41, %v435_v37 }
 0x354   :  { %v508_v46 = vpop.f32.mrf.mxu0  ;;  %v524_v47 = vpop.f32.mrf.mxu1 }
 0x355   :  { %v549_v48 = vadd.f32 %v541_v38, %v517_v43  ;;  %v553_v49 = vadd.f32 %v545_v39, %v533_v44  ;;  %v509_v50 = vadd.f32 %v508_v46, %v405_v31  ;;  %v525_v51 = vadd.f32 %v524_v47, %v425_v35 }
 0x356   :  { %v725_v53 = vpop.f32.mrf.mxu0  ;;  %v729_v55 = vpop.f32.mrf.mxu1 }
 0x357   :  { %v557_v58 = vmax.f32 %v549_v48, 0.0  ;;  %v561_v59 = vmax.f32 %v553_v49, 0.0  ;;  %v547_v60 = vadd.f32 %v539_v42, %v509_v50  ;;  %v551_v61 = vadd.f32 %v543_v45, %v525_v51 }
 0x358   :  { %v520_v62 = vadd.f32 %v725_v53, %v420_v34  ;;  %v536_v63 = vadd.f32 %v729_v55, %v440_v57  ;;  %v511_v0 = vpop.f32.mrf.mxu0  ;;  %v527_v3 = vpop.f32.mrf.mxu1 }
 0x359   :  { %v646_v7 = vpack.c.bf16 %v557_v58, %v557_v58  ;;  %v650_v1 = vpack.c.bf16 %v561_v59, %v561_v59  ;;  %v555_v8 = vmax.f32 %v547_v60, 0.0  ;;  %v559_v9 = vmax.f32 %v551_v61, 0.0 }
 0x35a   :  { %v550_v2 = vadd.f32 %v542_v54, %v520_v62  ;;  %v554_v10 = vadd.f32 %v546_v56, %v536_v63  ;;  %v512_v11 = vadd.f32 %v511_v0, %v410_v32  ;;  %v528_v5 = vadd.f32 %v527_v3, %v430_v36 }
 0x35b   :  { %598 = vst.msk [vmem:[%s956_s6 + $0x8] sm:$0xf] %vm595_vm3, %v646_v7  ;;  %602 = vst.msk [vmem:[%s956_s6 + $0x18] sm:$0xf] %vm595_vm3, %v650_v1  ;;  %v644_v12 = vpack.c.bf16 %v555_v8, %v555_v8  ;;  %v648_v4 = vpack.c.bf16 %v559_v9, %v559_v9 }
 0x35c   :  { %v558_v13 = vmax.f32 %v550_v2, 0.0  ;;  %v562_v14 = vmax.f32 %v554_v10, 0.0  ;;  %v548_v15 = vadd.f32 %v540_v52, %v512_v11  ;;  %v552_v16 = vadd.f32 %v544_v6, %v528_v5 }
 0x35d   :  { %596 = vst.msk [vmem:[%s956_s6] sm:$0xf] %vm595_vm3, %v644_v12  ;;  %600 = vst.msk [vmem:[%s956_s6 + $0x10] sm:$0xf] %vm595_vm3, %v648_v4 }
 0x35e   :  { %v647_v17 = vpack.c.bf16 %v558_v13, %v558_v13  ;;  %v651_v18 = vpack.c.bf16 %v562_v14, %v562_v14  ;;  %v556_v19 = vmax.f32 %v548_v15, 0.0  ;;  %v560_v20 = vmax.f32 %v552_v16, 0.0 }
 0x360   :  { %599 = vst.msk [vmem:[%s956_s6 + $0xc] sm:$0xf] %vm595_vm3, %v647_v17  ;;  %603 = vst.msk [vmem:[%s956_s6 + $0x1c] sm:$0xf] %vm595_vm3, %v651_v18  ;;  %v645_v21 = vpack.c.bf16 %v556_v19, %v556_v19  ;;  %v649_v22 = vpack.c.bf16 %v560_v20, %v560_v20 }
 0x362   :  { %597 = vst.msk [vmem:[%s956_s6 + $0x4] sm:$0xf] %vm595_vm3, %v645_v21  ;;  %601 = vst.msk [vmem:[%s956_s6 + $0x14] sm:$0xf] %vm595_vm3, %v649_v22 }

</bundles_post_ra>
